<compile_context>
chip_gen: v5e
topology: v5e:2x2
jax: 0.10.0
libtpu: 0.0.40
codegen_flags: <defaults>
</compile_context>

<pallas_src>
import functools
import numpy as np
import jax
import jax.numpy as jnp
from jax.experimental import pallas as pl
from jax.experimental.pallas import tpu as pltpu

_MM_DTYPE = jnp.bfloat16      # matmul-operand dtype (accumulation is always f32)
_K = 3                        # adjacency subsets (self / inward / outward)


# ----------------------------- Graph (coco-17) -----------------------------
def _edge2mat(link, num_node):
    A = np.zeros((num_node, num_node), dtype=np.float32)
    for i, j in link:
        A[j, i] = 1.0
    return A


def _normalize_digraph(A):
    Dl = A.sum(0)
    Dn = np.zeros_like(A)
    for i in range(A.shape[0]):
        if Dl[i] > 0:
            Dn[i, i] = Dl[i] ** (-1)
    return A @ Dn


class Graph:
    """Spatial-partition graph for COCO-17 keypoints (self / inward / outward)."""

    def __init__(self, joint_format="coco"):
        assert joint_format == "coco"
        self.num_node = 17
        self_link = [(i, i) for i in range(self.num_node)]
        inward = [(15, 13), (13, 11), (16, 14), (14, 12), (11, 5), (12, 6),
                  (9, 7), (7, 5), (10, 8), (8, 6), (5, 0), (6, 0),
                  (1, 0), (2, 0), (3, 1), (4, 2)]
        outward = [(j, i) for (i, j) in inward]
        I = _edge2mat(self_link, self.num_node)
        In = _normalize_digraph(_edge2mat(inward, self.num_node))
        Out = _normalize_digraph(_edge2mat(outward, self.num_node))
        self.A = np.stack((I, In, Out)).astype(np.float32)  # (3, 17, 17)


# TODO(synk): part index groups approximate the original GPGait coco partition tables.
_PART_RANGES = {
    1: [(0, 17)],                                   # whole body
    2: [(0, 11), (11, 17)],                         # upper / lower
    3: [(0, 5), (5, 11), (11, 17)],                 # head / arms / legs
    4: [(0, 5), (5, 11), (11, 15), (15, 17)],       # head / arms / thighs+knees / feet
}


def _part_mask(part, V):
    m = np.zeros((V, V), dtype=np.float32)
    for lo, hi in _PART_RANGES[part]:
        m[lo:hi, lo:hi] = 1.0
    return m


# ----------------------------- weight expansion (glue, done once) -----------------------------
def _kron_eye_t(W, T):
    """kron(I_T, W): block-diagonal lift so a per-channel 1x1 conv acts on (t, c) lanes."""
    if W.ndim == 2:
        Cin, Cout = W.shape
        big = jnp.eye(T, dtype=W.dtype)[:, None, :, None] * W[None, :, None, :]
        return big.reshape(T * Cin, T * Cout)             # [tp*Cin+ci, t*Cout+co]
    K, Cin, Cout = W.shape
    big = jnp.eye(T, dtype=W.dtype)[None, :, None, :, None] * W[:, None, :, None, :]
    return big.reshape(K, T * Cin, T * Cout)


def _tcn_band_matrix(Wt, T):
    """Block-banded Toeplitz matrix: the (9,1) temporal conv becomes ONE (T*C, T*C) matmul.

    M[tp*C+ci, t*C+co] = Wt[tp - t + pad, ci, co]   (zero outside the 9-tap band)
    => z[v, t, co] = sum_dt sum_ci y[v, t+dt-pad, ci] * Wt[dt, ci, co]  (zero padded).
    """
    KT, C, _ = Wt.shape
    pad = (KT - 1) // 2
    dt = jnp.arange(T)[:, None] - jnp.arange(T)[None, :] + pad          # dt[tp, t]
    valid = ((dt >= 0) & (dt < KT)).astype(Wt.dtype)
    blocks = Wt[jnp.clip(dt, 0, KT - 1)] * valid[:, :, None, None]      # (T, T, C, C)
    return blocks.transpose(0, 2, 1, 3).reshape(T * C, T * C)


def _pad_joints(a, Vp):
    V = a.shape[-1]
    pad = [(0, 0)] * (a.ndim - 2) + [(0, Vp - V), (0, Vp - V)]
    return jnp.pad(a, pad)


# ----------------------------- parameters -----------------------------
def init_layer_params(key, in_c, out_c, K, V, kt=9):
    ks = jax.random.split(key, 8)

    def nrm(k, shape, s):
        return (s * jax.random.normal(k, shape)).astype(jnp.float32)

    p = {}
    p["PA"] = nrm(ks[0], (K, V, V), 1e-2)                         # adaptive adjacency
    p["W"] = nrm(ks[1], (K, in_c, out_c), 1.0 / np.sqrt(K * in_c))
    # BatchNorm2d folded to eval-mode scale/shift (running stats = (0, 1)).
    p["gcn_scale"] = (1.0 + nrm(ks[2], (1, out_c), 0.1)) / np.sqrt(1.0 + 1e-5)
    p["gcn_shift"] = nrm(ks[3], (1, out_c), 0.1)
    p["identity_res"] = bool(in_c == out_c)
    if not p["identity_res"]:
        p["res_W"] = nrm(ks[4], (in_c, out_c), 1.0 / np.sqrt(in_c))
        p["res_scale"] = (1.0 + nrm(ks[5], (1, out_c), 0.1)) / np.sqrt(1.0 + 1e-5)
        p["res_shift"] = jnp.zeros((1, out_c), jnp.float32)
    p["Wt"] = nrm(ks[6], (kt, out_c, out_c), 1.0 / np.sqrt(kt * out_c))  # (9,1) temporal conv
    p["tcn_scale"] = jnp.full((1, out_c), 1.0 / np.sqrt(1.0 + 1e-5), jnp.float32)
    p["tcn_shift"] = nrm(ks[7], (1, out_c), 0.1)
    return p


def init_newnet(key, in_c, share_num, first_c, joint_format="coco"):
    graph = Graph(joint_format)
    A = jnp.asarray(graph.A)
    K, V, _ = graph.A.shape
    keys = jax.random.split(key, 64)
    ki = iter(keys)
    params = {"A": A}
    # data_bn = BatchNorm1d(first_c * V), eval-mode affine; channel index = v * C + c (M == 1).
    params["data_bn_scale"] = ((1.0 + 0.05 * jax.random.normal(next(ki), (V, first_c)))
                               / np.sqrt(1.0 + 1e-5)).astype(jnp.float32)
    params["data_bn_shift"] = (0.05 * jax.random.normal(next(ki), (V, first_c))).astype(jnp.float32)

    share = [init_layer_params(next(ki), first_c, in_c[1], K, V)]
    for i in range(1, share_num):
        share.append(init_layer_params(next(ki), in_c[i], in_c[i + 1], K, V))
    params["layer_share"] = share

    def branch():
        return [init_layer_params(next(ki), in_c[i], in_c[i + 1], K, V)
                for i in range(share_num, len(in_c) - 1)]

    params["part_2"] = branch()
    if joint_format == "coco":
        params["part_2_2"] = branch()
        params["part_3_1"] = branch()
    params["backbone"] = branch()
    return params


# ----------------------------- plan: expanded operands, built ONCE -----------------------------
def _prepare_layer(p, A, part, mask, T, Vp):
    V = A.shape[-1]
    K, cin, cout = p["W"].shape
    TCout = T * cout
    m = _part_mask(part, V) if mask else np.ones((V, V), np.float32)
    A_eff = _pad_joints((A + p["PA"]) * jnp.asarray(m)[None], Vp)        # (K, Vp, Vp)
    # merged + transposed adjacency: acc_b = A_cat @ [h0_b ; h1_b ; h2_b]
    A_cat = jnp.concatenate([A_eff[k].T for k in range(K)], axis=1)      # (Vp, K*Vp)

    ops = {
        "Wbig": _kron_eye_t(p["W"], T).astype(_MM_DTYPE),                # (K, T*cin, T*cout)
        "Acat": A_cat.astype(_MM_DTYPE),                                 # (Vp, K*Vp)
        "Mt":   _tcn_band_matrix(p["Wt"], T).astype(_MM_DTYPE),          # (T*cout, T*cout)
    }

    def tile(v):
        return jnp.tile(v, (1, T))                                       # per-channel -> per-(t,c)

    rows = [tile(p["gcn_scale"]), tile(p["gcn_shift"]),
            tile(p["tcn_scale"]), tile(p["tcn_shift"])]
    if p["identity_res"]:
        rows += [jnp.ones((1, TCout), jnp.float32), jnp.zeros((1, TCout), jnp.float32)]
    else:
        rows += [tile(p["res_scale"]), tile(p["res_shift"])]
        ops["rW"] = _kron_eye_t(p["res_W"], T).astype(_MM_DTYPE)         # (T*cin, T*cout)
    rows += [jnp.zeros((1, TCout), jnp.float32)] * 2
    ops["aff"] = jnp.concatenate(rows, axis=0)                           # (8, T*cout), one operand

    cfg = {"cin": int(cin), "cout": int(cout), "identity_res": bool(p["identity_res"])}
    return cfg, ops


def prepare_newnet_plan(params, T, joint_format="coco", mask=True):
    A = params["A"]
    V = A.shape[-1]
    Vp = ((V + 7) // 8) * 8            # 17 -> 24: (B, Vp) <-> (B*Vp) is a free sublane view

    shared = [_prepare_layer(p, A, 1, mask, T, Vp) for p in params["layer_share"]]

    def branch(plist, part):
        layers = [_prepare_layer(p, A, part, mask, T, Vp) for p in plist]
        return layers, tuple(_PART_RANGES[part])

    branches = [branch(params["part_2"], 2)]
    if joint_format == "coco":
        branches.append(branch(params["part_2_2"], 3))
        branches.append(branch(params["part_3_1"], 4))
    branches.append(branch(params["backbone"], 1))                        # global branch

    return {"T": int(T), "V": int(V), "Vp": int(Vp),
            "data_bn_scale": params["data_bn_scale"],
            "data_bn_shift": params["data_bn_shift"],
            "shared": shared, "branches": branches}


# ----------------------------- in-kernel building blocks -----------------------------
def _refs_per_layer(cfg):
    return 4 if cfg["identity_res"] else 5


def _layer_fwd(x, refs, cfg, B, Vp, T):
    """One Part_AGCN_TCN layer on the flattened (B*Vp, T*cin) activation slab."""
    cout = cfg["cout"]
    TCout = T * cout
    if cfg["identity_res"]:
        wb_ref, acat_ref, aff_ref, mt_ref = refs
        rw_ref = None
    else:
        wb_ref, acat_ref, aff_ref, mt_ref, rw_ref = refs

    aff = aff_ref[...]                                   # (8, TCout) f32 packed affines
    xm = x.astype(_MM_DTYPE)                             # one cast, reused by every dot

    # ---- adaptive graph conv: K channel matmuls on the whole (B*Vp, TC) slab ----
    hs = [jnp.dot(xm, wb_ref[k], preferred_element_type=jnp.float32) for k in range(_K)]

    # merged-K adjacency contraction: one (Vp, K*Vp) x (K*Vp, TCout) dot per sample
    A_cat = acat_ref[...]
    acc_rows = []
    for b in range(B):
        h_b = jnp.concatenate([h[b * Vp:(b + 1) * Vp] for h in hs],
                              axis=0).astype(_MM_DTYPE)  # (K*Vp, TCout)
        acc_rows.append(jnp.dot(A_cat, h_b, preferred_element_type=jnp.float32))
    acc = jnp.concatenate(acc_rows, axis=0)              # (B*Vp, TCout)

    if cfg["identity_res"]:
        res = x                                          # in_c == out_c: pure identity
    else:
        res = jnp.dot(xm, rw_ref[...], preferred_element_type=jnp.float32)
        res = res * aff[4:5, :] + aff[5:6, :]

    # eval-mode BN + residual + ReLU (f32 elementwise)
    y = jnp.maximum(acc * aff[0:1, :] + aff[1:2, :] + res, 0.0)

    # ---- (9,1) temporal conv: ONE block-banded (TC, TC) matmul ----
    z = jnp.dot(y.astype(_MM_DTYPE), mt_ref[...], preferred_element_type=jnp.float32)
    z = jnp.maximum(z * aff[2:3, :] + aff[3:4, :] + y, 0.0)
    return z                                             # (B*Vp, T*cout) f32


def _pool_time_max(z, T, cout):
    """Max over time on lane index (t, c): (R, T*cout) -> (R, cout)."""
    TC = T * cout
    if T > 1 and (T & (T - 1)) == 0:
        # log2(T) roll+max tree: XLU rolls instead of T-1 lane-slice maxima
        s = TC // 2
        while s >= cout:
            z = jnp.maximum(z, pltpu.roll(z, s, 1))
            s //= 2
        return z[:, :cout]
    xm = z[:, :cout]
    for t in range(1, T):
        xm = jnp.maximum(xm, z[:, t * cout:(t + 1) * cout])
    return xm


def _spp(z, groups, B, Vp, T, cout):
    """Fused set pooling (max over T) + semantic part pooling (max over joint groups)."""
    xm = _pool_time_max(z, T, cout)                      # (B*Vp, cout)
    xm3 = xm.reshape(B, Vp, cout)                        # free: Vp multiple of 8
    parts = [jnp.max(xm3[:, lo:hi, :], axis=1, keepdims=True) for lo, hi in groups]
    return jnp.concatenate(parts, axis=1)                # (B, P, cout), stays in registers


# ----------------------------- the single fused kernel -----------------------------
def _make_newnet_kernel(shared_cfgs, branch_cfgs, branch_groups, B, Vp, T):
    def kernel(*refs):
        x_ref, o_ref = refs[0], refs[-1]
        w_refs = refs[1:-1]

        idx = 0
        h = x_ref[...].reshape(B * Vp, T * shared_cfgs[0]["cin"])
        for cfg in shared_cfgs:                          # 3 shared layers, chained in VMEM
            n = _refs_per_layer(cfg)
            h = _layer_fwd(h, w_refs[idx:idx + n], cfg, B, Vp, T)
            idx += n
        x_share = h                                      # reused by all branches, never hits HBM

        pooled = []
        for cfgs, groups in zip(branch_cfgs, branch_groups):
            hb = x_share
            for cfg in cfgs:
                n = _refs_per_layer(cfg)
                hb = _layer_fwd(hb, w_refs[idx:idx + n], cfg, B, Vp, T)
                idx += n
            pooled.append(_spp(hb, groups, B, Vp, T, cfgs[-1]["cout"]))

        o_ref[...] = jnp.concatenate(pooled, axis=1)     # (B, P_total, cout): ONE dense store
    return kernel


def _const_spec(arr):
    nd = arr.ndim
    return pl.BlockSpec(arr.shape, lambda n, _nd=nd: (0,) * _nd)


def _layer_operands(layer_plan):
    cfg, ops = layer_plan
    names = ("Wbig", "Acat", "aff", "Mt") if cfg["identity_res"] \
        else ("Wbig", "Acat", "aff", "Mt", "rW")
    return [ops[nm] for nm in names]


_COMPILER_PARAMS = pltpu.CompilerParams(
    dimension_semantics=("parallel",),       # batch-block axis -> both v7x TensorCores
    vmem_limit_bytes=32 * 1024 * 1024,       # explicit budget; fits v7x 64 MiB with headroom
)


def newnet_fused_call(x, plan, B):
    """Single pallas_call for the full NewNet stack (post data_bn layout glue)."""
    Vp, T = plan["Vp"], plan["T"]
    NMp = x.shape[0]
    shared_cfgs = [cfg for cfg, _ in plan["shared"]]
    branch_cfgs = [[cfg for cfg, _ in layers] for layers, _ in plan["branches"]]
    branch_groups = [groups for _, groups in plan["branches"]]
    cout = branch_cfgs[0][-1]["cout"]
    P_total = sum(len(g) for g in branch_groups)
    TC_in = T * shared_cfgs[0]["cin"]

    operands = [x]
    in_specs = [pl.BlockSpec((B, Vp, TC_in), lambda n: (n, 0, 0))]
    for lp in plan["shared"]:
        for arr in _layer_operands(lp):
            operands.append(arr)
            in_specs.append(_const_spec(arr))
    for layers, _ in plan["branches"]:
        for lp in layers:
            for arr in _layer_operands(lp):
                operands.append(arr)
                in_specs.append(_const_spec(arr))

    return pl.pallas_call(
        _make_newnet_kernel(shared_cfgs, branch_cfgs, branch_groups, B, Vp, T),
        out_shape=jax.ShapeDtypeStruct((NMp, P_total, cout), jnp.float32),
        grid=(NMp // B,),
        in_specs=in_specs,
        out_specs=pl.BlockSpec((B, P_total, cout), lambda n: (n, 0, 0)),
        compiler_params=_COMPILER_PARAMS,
    )(*operands)


# ----------------------------- model forward -----------------------------
def _choose_block(nm, max_b=8):
    """Samples per grid step: cap at max_b, but keep >= 2 grid steps whenever nm >= 2
    so a v7x megacore can split the parallel batch axis across its 2 TensorCores."""
    if nm <= 1:
        return 1
    nblk = max(2, -(-nm // max_b))
    return -(-nm // nblk)


def newnet_forward(plan, x):
    # x: (N, C, T, V, M) exactly as in the PyTorch module.
    # TODO(synk): seqL-based per-sequence set pooling not implemented; assumes seqL=None
    #             (PackSequenceWrapper(torch.max) over the full time axis).
    N, C, T, V, M = x.shape
    assert T == plan["T"] and V == plan["V"]
    Vp = plan["Vp"]
    NM = N * M

    # (N,C,T,V,M) -> (N*M, V, T, C), matching the PyTorch permute/view chain
    xl = jnp.transpose(x, (0, 4, 3, 2, 1)).reshape(NM, V, T, C)
    # data_bn: eval-mode per-(v, c) affine.
    # TODO(synk): for M > 1 the BatchNorm1d channel mapping is person-major; not modeled here.
    xl = xl * plan["data_bn_scale"][None, :, None, :] + plan["data_bn_shift"][None, :, None, :]
    # joints padded 17 -> 24 (zeros; A columns for pad joints are zero so they never leak),
    # then lane-dense layout (NM, Vp, T*C).
    xl = jnp.pad(xl, ((0, 0), (0, Vp - V), (0, 0), (0, 0))).reshape(NM, Vp, T * C)

    B = _choose_block(NM)
    NMp = -(-NM // B) * B
    if NMp != NM:
        xl = jnp.pad(xl, ((0, NMp - NM), (0, 0), (0, 0)))

    x_parts = newnet_fused_call(xl, plan, B)[:NM]        # (NM, total_parts, C_out)
    return jnp.transpose(x_parts, (0, 2, 1))             # (NM, C_out, total_parts)


# ----------------------------- demo -----------------------------
if __name__ == "__main__":
    in_c = [4, 8, 8, 16, 16]     # channel schedule: 3 shared layers + 1 layer per branch
    first_c = 4
    share_num = 3
    N, T, V, M = 8, 8, 17, 1     # coco => 17 joints, single person; final T*C = 128 lanes

    key = jax.random.PRNGKey(0)
    kp, kx = jax.random.split(key)
    params = init_newnet(kp, in_c, share_num, first_c, "coco")
    plan = prepare_newnet_plan(params, T=T, joint_format="coco", mask=True)
    x = jax.random.normal(kx, (N, first_c, T, V, M), jnp.float32)

    fwd = jax.jit(functools.partial(newnet_forward, plan))
    out = jax.block_until_ready(fwd(x))

    expected_parts = 2 + 3 + 4 + 1
    assert out.shape == (N * M, in_c[-1], expected_parts), out.shape
    assert bool(jnp.all(jnp.isfinite(out)))
    print("KERNEL_OK")
</pallas_src>

<mosaic_0001>
module attributes {stable_mosaic.version = 11 : i64} {
  func.func @kernel(%arg0: i32, %arg1: memref<4x24x32xf32, #tpu.memory_space<vmem>>, %arg2: memref<3x32x64xbf16, #tpu.memory_space<vmem>>, %arg3: memref<24x72xbf16, #tpu.memory_space<vmem>>, %arg4: memref<8x64xf32, #tpu.memory_space<vmem>>, %arg5: memref<64x64xbf16, #tpu.memory_space<vmem>>, %arg6: memref<32x64xbf16, #tpu.memory_space<vmem>>, %arg7: memref<3x64x64xbf16, #tpu.memory_space<vmem>>, %arg8: memref<24x72xbf16, #tpu.memory_space<vmem>>, %arg9: memref<8x64xf32, #tpu.memory_space<vmem>>, %arg10: memref<64x64xbf16, #tpu.memory_space<vmem>>, %arg11: memref<3x64x128xbf16, #tpu.memory_space<vmem>>, %arg12: memref<24x72xbf16, #tpu.memory_space<vmem>>, %arg13: memref<8x128xf32, #tpu.memory_space<vmem>>, %arg14: memref<128x128xbf16, #tpu.memory_space<vmem>>, %arg15: memref<64x128xbf16, #tpu.memory_space<vmem>>, %arg16: memref<3x128x128xbf16, #tpu.memory_space<vmem>>, %arg17: memref<24x72xbf16, #tpu.memory_space<vmem>>, %arg18: memref<8x128xf32, #tpu.memory_space<vmem>>, %arg19: memref<128x128xbf16, #tpu.memory_space<vmem>>, %arg20: memref<3x128x128xbf16, #tpu.memory_space<vmem>>, %arg21: memref<24x72xbf16, #tpu.memory_space<vmem>>, %arg22: memref<8x128xf32, #tpu.memory_space<vmem>>, %arg23: memref<128x128xbf16, #tpu.memory_space<vmem>>, %arg24: memref<3x128x128xbf16, #tpu.memory_space<vmem>>, %arg25: memref<24x72xbf16, #tpu.memory_space<vmem>>, %arg26: memref<8x128xf32, #tpu.memory_space<vmem>>, %arg27: memref<128x128xbf16, #tpu.memory_space<vmem>>, %arg28: memref<3x128x128xbf16, #tpu.memory_space<vmem>>, %arg29: memref<24x72xbf16, #tpu.memory_space<vmem>>, %arg30: memref<8x128xf32, #tpu.memory_space<vmem>>, %arg31: memref<128x128xbf16, #tpu.memory_space<vmem>>, %arg32: memref<4x10x16xf32, #tpu.memory_space<vmem>>) attributes {dimension_semantics = [#tpu.dimension_semantics<parallel>], iteration_bounds = array<i64: 2>, scalar_prefetch = 0 : i64, scratch_operands = 0 : i64, tpu.core_type = #tpu.core_type<tc>, window_params = [{transform_indices = @transform_0, window_bounds = array<i64: 4, 24, 32>}, {pipeline_mode = #tpu.pipeline_mode<synchronous>, transform_indices = @transform_1, window_bounds = array<i64: 3, 32, 64>}, {pipeline_mode = #tpu.pipeline_mode<synchronous>, transform_indices = @transform_2, window_bounds = array<i64: 24, 72>}, {pipeline_mode = #tpu.pipeline_mode<synchronous>, transform_indices = @transform_3, window_bounds = array<i64: 8, 64>}, {pipeline_mode = #tpu.pipeline_mode<synchronous>, transform_indices = @transform_4, window_bounds = array<i64: 64, 64>}, {pipeline_mode = #tpu.pipeline_mode<synchronous>, transform_indices = @transform_5, window_bounds = array<i64: 32, 64>}, {pipeline_mode = #tpu.pipeline_mode<synchronous>, transform_indices = @transform_6, window_bounds = array<i64: 3, 64, 64>}, {pipeline_mode = #tpu.pipeline_mode<synchronous>, transform_indices = @transform_7, window_bounds = array<i64: 24, 72>}, {pipeline_mode = #tpu.pipeline_mode<synchronous>, transform_indices = @transform_8, window_bounds = array<i64: 8, 64>}, {pipeline_mode = #tpu.pipeline_mode<synchronous>, transform_indices = @transform_9, window_bounds = array<i64: 64, 64>}, {pipeline_mode = #tpu.pipeline_mode<synchronous>, transform_indices = @transform_10, window_bounds = array<i64: 3, 64, 128>}, {pipeline_mode = #tpu.pipeline_mode<synchronous>, transform_indices = @transform_11, window_bounds = array<i64: 24, 72>}, {pipeline_mode = #tpu.pipeline_mode<synchronous>, transform_indices = @transform_12, window_bounds = array<i64: 8, 128>}, {pipeline_mode = #tpu.pipeline_mode<synchronous>, transform_indices = @transform_13, window_bounds = array<i64: 128, 128>}, {pipeline_mode = #tpu.pipeline_mode<synchronous>, transform_indices = @transform_14, window_bounds = array<i64: 64, 128>}, {pipeline_mode = #tpu.pipeline_mode<synchronous>, transform_indices = @transform_15, window_bounds = array<i64: 3, 128, 128>}, {pipeline_mode = #tpu.pipeline_mode<synchronous>, transform_indices = @transform_16, window_bounds = array<i64: 24, 72>}, {pipeline_mode = #tpu.pipeline_mode<synchronous>, transform_indices = @transform_17, window_bounds = array<i64: 8, 128>}, {pipeline_mode = #tpu.pipeline_mode<synchronous>, transform_indices = @transform_18, window_bounds = array<i64: 128, 128>}, {pipeline_mode = #tpu.pipeline_mode<synchronous>, transform_indices = @transform_19, window_bounds = array<i64: 3, 128, 128>}, {pipeline_mode = #tpu.pipeline_mode<synchronous>, transform_indices = @transform_20, window_bounds = array<i64: 24, 72>}, {pipeline_mode = #tpu.pipeline_mode<synchronous>, transform_indices = @transform_21, window_bounds = array<i64: 8, 128>}, {pipeline_mode = #tpu.pipeline_mode<synchronous>, transform_indices = @transform_22, window_bounds = array<i64: 128, 128>}, {pipeline_mode = #tpu.pipeline_mode<synchronous>, transform_indices = @transform_23, window_bounds = array<i64: 3, 128, 128>}, {pipeline_mode = #tpu.pipeline_mode<synchronous>, transform_indices = @transform_24, window_bounds = array<i64: 24, 72>}, {pipeline_mode = #tpu.pipeline_mode<synchronous>, transform_indices = @transform_25, window_bounds = array<i64: 8, 128>}, {pipeline_mode = #tpu.pipeline_mode<synchronous>, transform_indices = @transform_26, window_bounds = array<i64: 128, 128>}, {pipeline_mode = #tpu.pipeline_mode<synchronous>, transform_indices = @transform_27, window_bounds = array<i64: 3, 128, 128>}, {pipeline_mode = #tpu.pipeline_mode<synchronous>, transform_indices = @transform_28, window_bounds = array<i64: 24, 72>}, {pipeline_mode = #tpu.pipeline_mode<synchronous>, transform_indices = @transform_29, window_bounds = array<i64: 8, 128>}, {pipeline_mode = #tpu.pipeline_mode<synchronous>, transform_indices = @transform_30, window_bounds = array<i64: 128, 128>}, {transform_indices = @transform_31, window_bounds = array<i64: 4, 10, 16>}]} {
    %c0 = arith.constant 0 : index
    %c0_0 = arith.constant 0 : index
    %c0_1 = arith.constant 0 : index
    %0 = vector.load %arg1[%c0, %c0_0, %c0_1] : memref<4x24x32xf32, #tpu.memory_space<vmem>>, vector<4x24x32xf32>
    %1 = vector.shape_cast %0 : vector<4x24x32xf32> to vector<96x32xf32>
    %c0_2 = arith.constant 0 : index
    %c0_3 = arith.constant 0 : index
    %2 = vector.load %arg4[%c0_2, %c0_3] : memref<8x64xf32, #tpu.memory_space<vmem>>, vector<8x64xf32>
    %3 = arith.truncf %1 : vector<96x32xf32> to vector<96x32xbf16>
    %c0_4 = arith.constant 0 : index
    %c0_5 = arith.constant 0 : index
    %c0_6 = arith.constant 0 : index
    %4 = vector.load %arg2[%c0_4, %c0_5, %c0_6] : memref<3x32x64xbf16, #tpu.memory_space<vmem>>, vector<1x32x64xbf16>
    %5 = vector.shape_cast %4 : vector<1x32x64xbf16> to vector<32x64xbf16>
    %cst = arith.constant dense<0.000000e+00> : vector<96x64xf32>
    %6 = tpu.matmul %3, %5, %cst {dimension_numbers = #tpu.dot_dimension_numbers<[1], [0], [0], [1], [0, 0, 1, 1], [], []>} : vector<96x32xbf16>, vector<32x64xbf16>, vector<96x64xf32> -> vector<96x64xf32>
    %c1 = arith.constant 1 : index
    %c0_7 = arith.constant 0 : index
    %c0_8 = arith.constant 0 : index
    %7 = vector.load %arg2[%c1, %c0_7, %c0_8] : memref<3x32x64xbf16, #tpu.memory_space<vmem>>, vector<1x32x64xbf16>
    %8 = vector.shape_cast %7 : vector<1x32x64xbf16> to vector<32x64xbf16>
    %cst_9 = arith.constant dense<0.000000e+00> : vector<96x64xf32>
    %9 = tpu.matmul %3, %8, %cst_9 {dimension_numbers = #tpu.dot_dimension_numbers<[1], [0], [0], [1], [0, 0, 1, 1], [], []>} : vector<96x32xbf16>, vector<32x64xbf16>, vector<96x64xf32> -> vector<96x64xf32>
    %c2 = arith.constant 2 : index
    %c0_10 = arith.constant 0 : index
    %c0_11 = arith.constant 0 : index
    %10 = vector.load %arg2[%c2, %c0_10, %c0_11] : memref<3x32x64xbf16, #tpu.memory_space<vmem>>, vector<1x32x64xbf16>
    %11 = vector.shape_cast %10 : vector<1x32x64xbf16> to vector<32x64xbf16>
    %cst_12 = arith.constant dense<0.000000e+00> : vector<96x64xf32>
    %12 = tpu.matmul %3, %11, %cst_12 {dimension_numbers = #tpu.dot_dimension_numbers<[1], [0], [0], [1], [0, 0, 1, 1], [], []>} : vector<96x32xbf16>, vector<32x64xbf16>, vector<96x64xf32> -> vector<96x64xf32>
    %c0_13 = arith.constant 0 : index
    %c0_14 = arith.constant 0 : index
    %13 = vector.load %arg3[%c0_13, %c0_14] : memref<24x72xbf16, #tpu.memory_space<vmem>>, vector<24x72xbf16>
    %14 = vector.extract_strided_slice %6 {offsets = [0, 0], sizes = [24, 64], strides = [1, 1]} : vector<96x64xf32> to vector<24x64xf32>
    %15 = vector.extract_strided_slice %9 {offsets = [0, 0], sizes = [24, 64], strides = [1, 1]} : vector<96x64xf32> to vector<24x64xf32>
    %16 = vector.extract_strided_slice %12 {offsets = [0, 0], sizes = [24, 64], strides = [1, 1]} : vector<96x64xf32> to vector<24x64xf32>
    %17 = tpu.concatenate %14, %15, %16 in 0 : vector<24x64xf32>, vector<24x64xf32>, vector<24x64xf32> -> vector<72x64xf32>
    %18 = arith.truncf %17 : vector<72x64xf32> to vector<72x64xbf16>
    %cst_15 = arith.constant dense<0.000000e+00> : vector<24x64xf32>
    %19 = tpu.matmul %13, %18, %cst_15 {dimension_numbers = #tpu.dot_dimension_numbers<[1], [0], [0], [1], [0, 0, 1, 1], [], []>} : vector<24x72xbf16>, vector<72x64xbf16>, vector<24x64xf32> -> vector<24x64xf32>
    %20 = vector.extract_strided_slice %6 {offsets = [24, 0], sizes = [24, 64], strides = [1, 1]} : vector<96x64xf32> to vector<24x64xf32>
    %21 = vector.extract_strided_slice %9 {offsets = [24, 0], sizes = [24, 64], strides = [1, 1]} : vector<96x64xf32> to vector<24x64xf32>
    %22 = vector.extract_strided_slice %12 {offsets = [24, 0], sizes = [24, 64], strides = [1, 1]} : vector<96x64xf32> to vector<24x64xf32>
    %23 = tpu.concatenate %20, %21, %22 in 0 : vector<24x64xf32>, vector<24x64xf32>, vector<24x64xf32> -> vector<72x64xf32>
    %24 = arith.truncf %23 : vector<72x64xf32> to vector<72x64xbf16>
    %cst_16 = arith.constant dense<0.000000e+00> : vector<24x64xf32>
    %25 = tpu.matmul %13, %24, %cst_16 {dimension_numbers = #tpu.dot_dimension_numbers<[1], [0], [0], [1], [0, 0, 1, 1], [], []>} : vector<24x72xbf16>, vector<72x64xbf16>, vector<24x64xf32> -> vector<24x64xf32>
    %26 = vector.extract_strided_slice %6 {offsets = [48, 0], sizes = [24, 64], strides = [1, 1]} : vector<96x64xf32> to vector<24x64xf32>
    %27 = vector.extract_strided_slice %9 {offsets = [48, 0], sizes = [24, 64], strides = [1, 1]} : vector<96x64xf32> to vector<24x64xf32>
    %28 = vector.extract_strided_slice %12 {offsets = [48, 0], sizes = [24, 64], strides = [1, 1]} : vector<96x64xf32> to vector<24x64xf32>
    %29 = tpu.concatenate %26, %27, %28 in 0 : vector<24x64xf32>, vector<24x64xf32>, vector<24x64xf32> -> vector<72x64xf32>
    %30 = arith.truncf %29 : vector<72x64xf32> to vector<72x64xbf16>
    %cst_17 = arith.constant dense<0.000000e+00> : vector<24x64xf32>
    %31 = tpu.matmul %13, %30, %cst_17 {dimension_numbers = #tpu.dot_dimension_numbers<[1], [0], [0], [1], [0, 0, 1, 1], [], []>} : vector<24x72xbf16>, vector<72x64xbf16>, vector<24x64xf32> -> vector<24x64xf32>
    %32 = vector.extract_strided_slice %6 {offsets = [72, 0], sizes = [24, 64], strides = [1, 1]} : vector<96x64xf32> to vector<24x64xf32>
    %33 = vector.extract_strided_slice %9 {offsets = [72, 0], sizes = [24, 64], strides = [1, 1]} : vector<96x64xf32> to vector<24x64xf32>
    %34 = vector.extract_strided_slice %12 {offsets = [72, 0], sizes = [24, 64], strides = [1, 1]} : vector<96x64xf32> to vector<24x64xf32>
    %35 = tpu.concatenate %32, %33, %34 in 0 : vector<24x64xf32>, vector<24x64xf32>, vector<24x64xf32> -> vector<72x64xf32>
    %36 = arith.truncf %35 : vector<72x64xf32> to vector<72x64xbf16>
    %cst_18 = arith.constant dense<0.000000e+00> : vector<24x64xf32>
    %37 = tpu.matmul %13, %36, %cst_18 {dimension_numbers = #tpu.dot_dimension_numbers<[1], [0], [0], [1], [0, 0, 1, 1], [], []>} : vector<24x72xbf16>, vector<72x64xbf16>, vector<24x64xf32> -> vector<24x64xf32>
    %38 = tpu.concatenate %19, %25, %31, %37 in 0 : vector<24x64xf32>, vector<24x64xf32>, vector<24x64xf32>, vector<24x64xf32> -> vector<96x64xf32>
    %c0_19 = arith.constant 0 : index
    %c0_20 = arith.constant 0 : index
    %39 = vector.load %arg6[%c0_19, %c0_20] : memref<32x64xbf16, #tpu.memory_space<vmem>>, vector<32x64xbf16>
    %cst_21 = arith.constant dense<0.000000e+00> : vector<96x64xf32>
    %40 = tpu.matmul %3, %39, %cst_21 {dimension_numbers = #tpu.dot_dimension_numbers<[1], [0], [0], [1], [0, 0, 1, 1], [], []>} : vector<96x32xbf16>, vector<32x64xbf16>, vector<96x64xf32> -> vector<96x64xf32>
    %41 = vector.extract_strided_slice %2 {offsets = [4, 0], sizes = [1, 64], strides = [1, 1]} : vector<8x64xf32> to vector<1x64xf32>
    %42 = vector.broadcast %41 : vector<1x64xf32> to vector<96x64xf32>
    %43 = arith.mulf %40, %42 : vector<96x64xf32>
    %44 = vector.extract_strided_slice %2 {offsets = [5, 0], sizes = [1, 64], strides = [1, 1]} : vector<8x64xf32> to vector<1x64xf32>
    %45 = vector.broadcast %44 : vector<1x64xf32> to vector<96x64xf32>
    %46 = arith.addf %43, %45 : vector<96x64xf32>
    %47 = vector.extract_strided_slice %2 {offsets = [0, 0], sizes = [1, 64], strides = [1, 1]} : vector<8x64xf32> to vector<1x64xf32>
    %48 = vector.broadcast %47 : vector<1x64xf32> to vector<96x64xf32>
    %49 = arith.mulf %38, %48 : vector<96x64xf32>
    %50 = vector.extract_strided_slice %2 {offsets = [1, 0], sizes = [1, 64], strides = [1, 1]} : vector<8x64xf32> to vector<1x64xf32>
    %51 = vector.broadcast %50 : vector<1x64xf32> to vector<96x64xf32>
    %52 = arith.addf %49, %51 : vector<96x64xf32>
    %53 = arith.addf %52, %46 : vector<96x64xf32>
    %cst_22 = arith.constant 0.000000e+00 : f32
    %54 = vector.broadcast %cst_22 : f32 to vector<96x64xf32>
    %55 = arith.maximumf %53, %54 : vector<96x64xf32>
    %56 = arith.truncf %55 : vector<96x64xf32> to vector<96x64xbf16>
    %c0_23 = arith.constant 0 : index
    %c0_24 = arith.constant 0 : index
    %57 = vector.load %arg5[%c0_23, %c0_24] : memref<64x64xbf16, #tpu.memory_space<vmem>>, vector<64x64xbf16>
    %cst_25 = arith.constant dense<0.000000e+00> : vector<96x64xf32>
    %58 = tpu.matmul %56, %57, %cst_25 {dimension_numbers = #tpu.dot_dimension_numbers<[1], [0], [0], [1], [0, 0, 1, 1], [], []>} : vector<96x64xbf16>, vector<64x64xbf16>, vector<96x64xf32> -> vector<96x64xf32>
    %59 = vector.extract_strided_slice %2 {offsets = [2, 0], sizes = [1, 64], strides = [1, 1]} : vector<8x64xf32> to vector<1x64xf32>
    %60 = vector.broadcast %59 : vector<1x64xf32> to vector<96x64xf32>
    %61 = arith.mulf %58, %60 : vector<96x64xf32>
    %62 = vector.extract_strided_slice %2 {offsets = [3, 0], sizes = [1, 64], strides = [1, 1]} : vector<8x64xf32> to vector<1x64xf32>
    %63 = vector.broadcast %62 : vector<1x64xf32> to vector<96x64xf32>
    %64 = arith.addf %61, %63 : vector<96x64xf32>
    %65 = arith.addf %64, %55 : vector<96x64xf32>
    %cst_26 = arith.constant 0.000000e+00 : f32
    %66 = vector.broadcast %cst_26 : f32 to vector<96x64xf32>
    %67 = arith.maximumf %65, %66 : vector<96x64xf32>
    %c0_27 = arith.constant 0 : index
    %c0_28 = arith.constant 0 : index
    %68 = vector.load %arg9[%c0_27, %c0_28] : memref<8x64xf32, #tpu.memory_space<vmem>>, vector<8x64xf32>
    %69 = arith.truncf %67 : vector<96x64xf32> to vector<96x64xbf16>
    %c0_29 = arith.constant 0 : index
    %c0_30 = arith.constant 0 : index
    %c0_31 = arith.constant 0 : index
    %70 = vector.load %arg7[%c0_29, %c0_30, %c0_31] : memref<3x64x64xbf16, #tpu.memory_space<vmem>>, vector<1x64x64xbf16>
    %71 = vector.shape_cast %70 : vector<1x64x64xbf16> to vector<64x64xbf16>
    %cst_32 = arith.constant dense<0.000000e+00> : vector<96x64xf32>
    %72 = tpu.matmul %69, %71, %cst_32 {dimension_numbers = #tpu.dot_dimension_numbers<[1], [0], [0], [1], [0, 0, 1, 1], [], []>} : vector<96x64xbf16>, vector<64x64xbf16>, vector<96x64xf32> -> vector<96x64xf32>
    %c1_33 = arith.constant 1 : index
    %c0_34 = arith.constant 0 : index
    %c0_35 = arith.constant 0 : index
    %73 = vector.load %arg7[%c1_33, %c0_34, %c0_35] : memref<3x64x64xbf16, #tpu.memory_space<vmem>>, vector<1x64x64xbf16>
    %74 = vector.shape_cast %73 : vector<1x64x64xbf16> to vector<64x64xbf16>
    %cst_36 = arith.constant dense<0.000000e+00> : vector<96x64xf32>
    %75 = tpu.matmul %69, %74, %cst_36 {dimension_numbers = #tpu.dot_dimension_numbers<[1], [0], [0], [1], [0, 0, 1, 1], [], []>} : vector<96x64xbf16>, vector<64x64xbf16>, vector<96x64xf32> -> vector<96x64xf32>
    %c2_37 = arith.constant 2 : index
    %c0_38 = arith.constant 0 : index
    %c0_39 = arith.constant 0 : index
    %76 = vector.load %arg7[%c2_37, %c0_38, %c0_39] : memref<3x64x64xbf16, #tpu.memory_space<vmem>>, vector<1x64x64xbf16>
    %77 = vector.shape_cast %76 : vector<1x64x64xbf16> to vector<64x64xbf16>
    %cst_40 = arith.constant dense<0.000000e+00> : vector<96x64xf32>
    %78 = tpu.matmul %69, %77, %cst_40 {dimension_numbers = #tpu.dot_dimension_numbers<[1], [0], [0], [1], [0, 0, 1, 1], [], []>} : vector<96x64xbf16>, vector<64x64xbf16>, vector<96x64xf32> -> vector<96x64xf32>
    %c0_41 = arith.constant 0 : index
    %c0_42 = arith.constant 0 : index
    %79 = vector.load %arg8[%c0_41, %c0_42] : memref<24x72xbf16, #tpu.memory_space<vmem>>, vector<24x72xbf16>
    %80 = vector.extract_strided_slice %72 {offsets = [0, 0], sizes = [24, 64], strides = [1, 1]} : vector<96x64xf32> to vector<24x64xf32>
    %81 = vector.extract_strided_slice %75 {offsets = [0, 0], sizes = [24, 64], strides = [1, 1]} : vector<96x64xf32> to vector<24x64xf32>
    %82 = vector.extract_strided_slice %78 {offsets = [0, 0], sizes = [24, 64], strides = [1, 1]} : vector<96x64xf32> to vector<24x64xf32>
    %83 = tpu.concatenate %80, %81, %82 in 0 : vector<24x64xf32>, vector<24x64xf32>, vector<24x64xf32> -> vector<72x64xf32>
    %84 = arith.truncf %83 : vector<72x64xf32> to vector<72x64xbf16>
    %cst_43 = arith.constant dense<0.000000e+00> : vector<24x64xf32>
    %85 = tpu.matmul %79, %84, %cst_43 {dimension_numbers = #tpu.dot_dimension_numbers<[1], [0], [0], [1], [0, 0, 1, 1], [], []>} : vector<24x72xbf16>, vector<72x64xbf16>, vector<24x64xf32> -> vector<24x64xf32>
    %86 = vector.extract_strided_slice %72 {offsets = [24, 0], sizes = [24, 64], strides = [1, 1]} : vector<96x64xf32> to vector<24x64xf32>
    %87 = vector.extract_strided_slice %75 {offsets = [24, 0], sizes = [24, 64], strides = [1, 1]} : vector<96x64xf32> to vector<24x64xf32>
    %88 = vector.extract_strided_slice %78 {offsets = [24, 0], sizes = [24, 64], strides = [1, 1]} : vector<96x64xf32> to vector<24x64xf32>
    %89 = tpu.concatenate %86, %87, %88 in 0 : vector<24x64xf32>, vector<24x64xf32>, vector<24x64xf32> -> vector<72x64xf32>
    %90 = arith.truncf %89 : vector<72x64xf32> to vector<72x64xbf16>
    %cst_44 = arith.constant dense<0.000000e+00> : vector<24x64xf32>
    %91 = tpu.matmul %79, %90, %cst_44 {dimension_numbers = #tpu.dot_dimension_numbers<[1], [0], [0], [1], [0, 0, 1, 1], [], []>} : vector<24x72xbf16>, vector<72x64xbf16>, vector<24x64xf32> -> vector<24x64xf32>
    %92 = vector.extract_strided_slice %72 {offsets = [48, 0], sizes = [24, 64], strides = [1, 1]} : vector<96x64xf32> to vector<24x64xf32>
    %93 = vector.extract_strided_slice %75 {offsets = [48, 0], sizes = [24, 64], strides = [1, 1]} : vector<96x64xf32> to vector<24x64xf32>
    %94 = vector.extract_strided_slice %78 {offsets = [48, 0], sizes = [24, 64], strides = [1, 1]} : vector<96x64xf32> to vector<24x64xf32>
    %95 = tpu.concatenate %92, %93, %94 in 0 : vector<24x64xf32>, vector<24x64xf32>, vector<24x64xf32> -> vector<72x64xf32>
    %96 = arith.truncf %95 : vector<72x64xf32> to vector<72x64xbf16>
    %cst_45 = arith.constant dense<0.000000e+00> : vector<24x64xf32>
    %97 = tpu.matmul %79, %96, %cst_45 {dimension_numbers = #tpu.dot_dimension_numbers<[1], [0], [0], [1], [0, 0, 1, 1], [], []>} : vector<24x72xbf16>, vector<72x64xbf16>, vector<24x64xf32> -> vector<24x64xf32>
    %98 = vector.extract_strided_slice %72 {offsets = [72, 0], sizes = [24, 64], strides = [1, 1]} : vector<96x64xf32> to vector<24x64xf32>
    %99 = vector.extract_strided_slice %75 {offsets = [72, 0], sizes = [24, 64], strides = [1, 1]} : vector<96x64xf32> to vector<24x64xf32>
    %100 = vector.extract_strided_slice %78 {offsets = [72, 0], sizes = [24, 64], strides = [1, 1]} : vector<96x64xf32> to vector<24x64xf32>
    %101 = tpu.concatenate %98, %99, %100 in 0 : vector<24x64xf32>, vector<24x64xf32>, vector<24x64xf32> -> vector<72x64xf32>
    %102 = arith.truncf %101 : vector<72x64xf32> to vector<72x64xbf16>
    %cst_46 = arith.constant dense<0.000000e+00> : vector<24x64xf32>
    %103 = tpu.matmul %79, %102, %cst_46 {dimension_numbers = #tpu.dot_dimension_numbers<[1], [0], [0], [1], [0, 0, 1, 1], [], []>} : vector<24x72xbf16>, vector<72x64xbf16>, vector<24x64xf32> -> vector<24x64xf32>
    %104 = tpu.concatenate %85, %91, %97, %103 in 0 : vector<24x64xf32>, vector<24x64xf32>, vector<24x64xf32>, vector<24x64xf32> -> vector<96x64xf32>
    %105 = vector.extract_strided_slice %68 {offsets = [0, 0], sizes = [1, 64], strides = [1, 1]} : vector<8x64xf32> to vector<1x64xf32>
    %106 = vector.broadcast %105 : vector<1x64xf32> to vector<96x64xf32>
    %107 = arith.mulf %104, %106 : vector<96x64xf32>
    %108 = vector.extract_strided_slice %68 {offsets = [1, 0], sizes = [1, 64], strides = [1, 1]} : vector<8x64xf32> to vector<1x64xf32>
    %109 = vector.broadcast %108 : vector<1x64xf32> to vector<96x64xf32>
    %110 = arith.addf %107, %109 : vector<96x64xf32>
    %111 = arith.addf %110, %67 : vector<96x64xf32>
    %cst_47 = arith.constant 0.000000e+00 : f32
    %112 = vector.broadcast %cst_47 : f32 to vector<96x64xf32>
    %113 = arith.maximumf %111, %112 : vector<96x64xf32>
    %114 = arith.truncf %113 : vector<96x64xf32> to vector<96x64xbf16>
    %c0_48 = arith.constant 0 : index
    %c0_49 = arith.constant 0 : index
    %115 = vector.load %arg10[%c0_48, %c0_49] : memref<64x64xbf16, #tpu.memory_space<vmem>>, vector<64x64xbf16>
    %cst_50 = arith.constant dense<0.000000e+00> : vector<96x64xf32>
    %116 = tpu.matmul %114, %115, %cst_50 {dimension_numbers = #tpu.dot_dimension_numbers<[1], [0], [0], [1], [0, 0, 1, 1], [], []>} : vector<96x64xbf16>, vector<64x64xbf16>, vector<96x64xf32> -> vector<96x64xf32>
    %117 = vector.extract_strided_slice %68 {offsets = [2, 0], sizes = [1, 64], strides = [1, 1]} : vector<8x64xf32> to vector<1x64xf32>
    %118 = vector.broadcast %117 : vector<1x64xf32> to vector<96x64xf32>
    %119 = arith.mulf %116, %118 : vector<96x64xf32>
    %120 = vector.extract_strided_slice %68 {offsets = [3, 0], sizes = [1, 64], strides = [1, 1]} : vector<8x64xf32> to vector<1x64xf32>
    %121 = vector.broadcast %120 : vector<1x64xf32> to vector<96x64xf32>
    %122 = arith.addf %119, %121 : vector<96x64xf32>
    %123 = arith.addf %122, %113 : vector<96x64xf32>
    %cst_51 = arith.constant 0.000000e+00 : f32
    %124 = vector.broadcast %cst_51 : f32 to vector<96x64xf32>
    %125 = arith.maximumf %123, %124 : vector<96x64xf32>
    %c0_52 = arith.constant 0 : index
    %c0_53 = arith.constant 0 : index
    %126 = vector.load %arg13[%c0_52, %c0_53] : memref<8x128xf32, #tpu.memory_space<vmem>>, vector<8x128xf32>
    %127 = arith.truncf %125 : vector<96x64xf32> to vector<96x64xbf16>
    %c0_54 = arith.constant 0 : index
    %c0_55 = arith.constant 0 : index
    %c0_56 = arith.constant 0 : index
    %128 = vector.load %arg11[%c0_54, %c0_55, %c0_56] : memref<3x64x128xbf16, #tpu.memory_space<vmem>>, vector<1x64x128xbf16>
    %129 = vector.shape_cast %128 : vector<1x64x128xbf16> to vector<64x128xbf16>
    %cst_57 = arith.constant dense<0.000000e+00> : vector<96x128xf32>
    %130 = tpu.matmul %127, %129, %cst_57 {dimension_numbers = #tpu.dot_dimension_numbers<[1], [0], [0], [1], [0, 0, 1, 1], [], []>} : vector<96x64xbf16>, vector<64x128xbf16>, vector<96x128xf32> -> vector<96x128xf32>
    %c1_58 = arith.constant 1 : index
    %c0_59 = arith.constant 0 : index
    %c0_60 = arith.constant 0 : index
    %131 = vector.load %arg11[%c1_58, %c0_59, %c0_60] : memref<3x64x128xbf16, #tpu.memory_space<vmem>>, vector<1x64x128xbf16>
    %132 = vector.shape_cast %131 : vector<1x64x128xbf16> to vector<64x128xbf16>
    %cst_61 = arith.constant dense<0.000000e+00> : vector<96x128xf32>
    %133 = tpu.matmul %127, %132, %cst_61 {dimension_numbers = #tpu.dot_dimension_numbers<[1], [0], [0], [1], [0, 0, 1, 1], [], []>} : vector<96x64xbf16>, vector<64x128xbf16>, vector<96x128xf32> -> vector<96x128xf32>
    %c2_62 = arith.constant 2 : index
    %c0_63 = arith.constant 0 : index
    %c0_64 = arith.constant 0 : index
    %134 = vector.load %arg11[%c2_62, %c0_63, %c0_64] : memref<3x64x128xbf16, #tpu.memory_space<vmem>>, vector<1x64x128xbf16>
    %135 = vector.shape_cast %134 : vector<1x64x128xbf16> to vector<64x128xbf16>
    %cst_65 = arith.constant dense<0.000000e+00> : vector<96x128xf32>
    %136 = tpu.matmul %127, %135, %cst_65 {dimension_numbers = #tpu.dot_dimension_numbers<[1], [0], [0], [1], [0, 0, 1, 1], [], []>} : vector<96x64xbf16>, vector<64x128xbf16>, vector<96x128xf32> -> vector<96x128xf32>
    %c0_66 = arith.constant 0 : index
    %c0_67 = arith.constant 0 : index
    %137 = vector.load %arg12[%c0_66, %c0_67] : memref<24x72xbf16, #tpu.memory_space<vmem>>, vector<24x72xbf16>
    %138 = vector.extract_strided_slice %130 {offsets = [0, 0], sizes = [24, 128], strides = [1, 1]} : vector<96x128xf32> to vector<24x128xf32>
    %139 = vector.extract_strided_slice %133 {offsets = [0, 0], sizes = [24, 128], strides = [1, 1]} : vector<96x128xf32> to vector<24x128xf32>
    %140 = vector.extract_strided_slice %136 {offsets = [0, 0], sizes = [24, 128], strides = [1, 1]} : vector<96x128xf32> to vector<24x128xf32>
    %141 = tpu.concatenate %138, %139, %140 in 0 : vector<24x128xf32>, vector<24x128xf32>, vector<24x128xf32> -> vector<72x128xf32>
    %142 = arith.truncf %141 : vector<72x128xf32> to vector<72x128xbf16>
    %cst_68 = arith.constant dense<0.000000e+00> : vector<24x128xf32>
    %143 = tpu.matmul %137, %142, %cst_68 {dimension_numbers = #tpu.dot_dimension_numbers<[1], [0], [0], [1], [0, 0, 1, 1], [], []>} : vector<24x72xbf16>, vector<72x128xbf16>, vector<24x128xf32> -> vector<24x128xf32>
    %144 = vector.extract_strided_slice %130 {offsets = [24, 0], sizes = [24, 128], strides = [1, 1]} : vector<96x128xf32> to vector<24x128xf32>
    %145 = vector.extract_strided_slice %133 {offsets = [24, 0], sizes = [24, 128], strides = [1, 1]} : vector<96x128xf32> to vector<24x128xf32>
    %146 = vector.extract_strided_slice %136 {offsets = [24, 0], sizes = [24, 128], strides = [1, 1]} : vector<96x128xf32> to vector<24x128xf32>
    %147 = tpu.concatenate %144, %145, %146 in 0 : vector<24x128xf32>, vector<24x128xf32>, vector<24x128xf32> -> vector<72x128xf32>
    %148 = arith.truncf %147 : vector<72x128xf32> to vector<72x128xbf16>
    %cst_69 = arith.constant dense<0.000000e+00> : vector<24x128xf32>
    %149 = tpu.matmul %137, %148, %cst_69 {dimension_numbers = #tpu.dot_dimension_numbers<[1], [0], [0], [1], [0, 0, 1, 1], [], []>} : vector<24x72xbf16>, vector<72x128xbf16>, vector<24x128xf32> -> vector<24x128xf32>
    %150 = vector.extract_strided_slice %130 {offsets = [48, 0], sizes = [24, 128], strides = [1, 1]} : vector<96x128xf32> to vector<24x128xf32>
    %151 = vector.extract_strided_slice %133 {offsets = [48, 0], sizes = [24, 128], strides = [1, 1]} : vector<96x128xf32> to vector<24x128xf32>
    %152 = vector.extract_strided_slice %136 {offsets = [48, 0], sizes = [24, 128], strides = [1, 1]} : vector<96x128xf32> to vector<24x128xf32>
    %153 = tpu.concatenate %150, %151, %152 in 0 : vector<24x128xf32>, vector<24x128xf32>, vector<24x128xf32> -> vector<72x128xf32>
    %154 = arith.truncf %153 : vector<72x128xf32> to vector<72x128xbf16>
    %cst_70 = arith.constant dense<0.000000e+00> : vector<24x128xf32>
    %155 = tpu.matmul %137, %154, %cst_70 {dimension_numbers = #tpu.dot_dimension_numbers<[1], [0], [0], [1], [0, 0, 1, 1], [], []>} : vector<24x72xbf16>, vector<72x128xbf16>, vector<24x128xf32> -> vector<24x128xf32>
    %156 = vector.extract_strided_slice %130 {offsets = [72, 0], sizes = [24, 128], strides = [1, 1]} : vector<96x128xf32> to vector<24x128xf32>
    %157 = vector.extract_strided_slice %133 {offsets = [72, 0], sizes = [24, 128], strides = [1, 1]} : vector<96x128xf32> to vector<24x128xf32>
    %158 = vector.extract_strided_slice %136 {offsets = [72, 0], sizes = [24, 128], strides = [1, 1]} : vector<96x128xf32> to vector<24x128xf32>
    %159 = tpu.concatenate %156, %157, %158 in 0 : vector<24x128xf32>, vector<24x128xf32>, vector<24x128xf32> -> vector<72x128xf32>
    %160 = arith.truncf %159 : vector<72x128xf32> to vector<72x128xbf16>
    %cst_71 = arith.constant dense<0.000000e+00> : vector<24x128xf32>
    %161 = tpu.matmul %137, %160, %cst_71 {dimension_numbers = #tpu.dot_dimension_numbers<[1], [0], [0], [1], [0, 0, 1, 1], [], []>} : vector<24x72xbf16>, vector<72x128xbf16>, vector<24x128xf32> -> vector<24x128xf32>
    %162 = tpu.concatenate %143, %149, %155, %161 in 0 : vector<24x128xf32>, vector<24x128xf32>, vector<24x128xf32>, vector<24x128xf32> -> vector<96x128xf32>
    %c0_72 = arith.constant 0 : index
    %c0_73 = arith.constant 0 : index
    %163 = vector.load %arg15[%c0_72, %c0_73] : memref<64x128xbf16, #tpu.memory_space<vmem>>, vector<64x128xbf16>
    %cst_74 = arith.constant dense<0.000000e+00> : vector<96x128xf32>
    %164 = tpu.matmul %127, %163, %cst_74 {dimension_numbers = #tpu.dot_dimension_numbers<[1], [0], [0], [1], [0, 0, 1, 1], [], []>} : vector<96x64xbf16>, vector<64x128xbf16>, vector<96x128xf32> -> vector<96x128xf32>
    %165 = vector.extract_strided_slice %126 {offsets = [4, 0], sizes = [1, 128], strides = [1, 1]} : vector<8x128xf32> to vector<1x128xf32>
    %166 = vector.broadcast %165 : vector<1x128xf32> to vector<96x128xf32>
    %167 = arith.mulf %164, %166 : vector<96x128xf32>
    %168 = vector.extract_strided_slice %126 {offsets = [5, 0], sizes = [1, 128], strides = [1, 1]} : vector<8x128xf32> to vector<1x128xf32>
    %169 = vector.broadcast %168 : vector<1x128xf32> to vector<96x128xf32>
    %170 = arith.addf %167, %169 : vector<96x128xf32>
    %171 = vector.extract_strided_slice %126 {offsets = [0, 0], sizes = [1, 128], strides = [1, 1]} : vector<8x128xf32> to vector<1x128xf32>
    %172 = vector.broadcast %171 : vector<1x128xf32> to vector<96x128xf32>
    %173 = arith.mulf %162, %172 : vector<96x128xf32>
    %174 = vector.extract_strided_slice %126 {offsets = [1, 0], sizes = [1, 128], strides = [1, 1]} : vector<8x128xf32> to vector<1x128xf32>
    %175 = vector.broadcast %174 : vector<1x128xf32> to vector<96x128xf32>
    %176 = arith.addf %173, %175 : vector<96x128xf32>
    %177 = arith.addf %176, %170 : vector<96x128xf32>
    %cst_75 = arith.constant 0.000000e+00 : f32
    %178 = vector.broadcast %cst_75 : f32 to vector<96x128xf32>
    %179 = arith.maximumf %177, %178 : vector<96x128xf32>
    %180 = arith.truncf %179 : vector<96x128xf32> to vector<96x128xbf16>
    %c0_76 = arith.constant 0 : index
    %c0_77 = arith.constant 0 : index
    %181 = vector.load %arg14[%c0_76, %c0_77] : memref<128x128xbf16, #tpu.memory_space<vmem>>, vector<128x128xbf16>
    %cst_78 = arith.constant dense<0.000000e+00> : vector<96x128xf32>
    %182 = tpu.matmul %180, %181, %cst_78 {dimension_numbers = #tpu.dot_dimension_numbers<[1], [0], [0], [1], [0, 0, 1, 1], [], []>} : vector<96x128xbf16>, vector<128x128xbf16>, vector<96x128xf32> -> vector<96x128xf32>
    %183 = vector.extract_strided_slice %126 {offsets = [2, 0], sizes = [1, 128], strides = [1, 1]} : vector<8x128xf32> to vector<1x128xf32>
    %184 = vector.broadcast %183 : vector<1x128xf32> to vector<96x128xf32>
    %185 = arith.mulf %182, %184 : vector<96x128xf32>
    %186 = vector.extract_strided_slice %126 {offsets = [3, 0], sizes = [1, 128], strides = [1, 1]} : vector<8x128xf32> to vector<1x128xf32>
    %187 = vector.broadcast %186 : vector<1x128xf32> to vector<96x128xf32>
    %188 = arith.addf %185, %187 : vector<96x128xf32>
    %189 = arith.addf %188, %179 : vector<96x128xf32>
    %cst_79 = arith.constant 0.000000e+00 : f32
    %190 = vector.broadcast %cst_79 : f32 to vector<96x128xf32>
    %191 = arith.maximumf %189, %190 : vector<96x128xf32>
    %c0_80 = arith.constant 0 : index
    %c0_81 = arith.constant 0 : index
    %192 = vector.load %arg18[%c0_80, %c0_81] : memref<8x128xf32, #tpu.memory_space<vmem>>, vector<8x128xf32>
    %193 = arith.truncf %191 : vector<96x128xf32> to vector<96x128xbf16>
    %c0_82 = arith.constant 0 : index
    %c0_83 = arith.constant 0 : index
    %c0_84 = arith.constant 0 : index
    %194 = vector.load %arg16[%c0_82, %c0_83, %c0_84] : memref<3x128x128xbf16, #tpu.memory_space<vmem>>, vector<1x128x128xbf16>
    %195 = vector.shape_cast %194 : vector<1x128x128xbf16> to vector<128x128xbf16>
    %cst_85 = arith.constant dense<0.000000e+00> : vector<96x128xf32>
    %196 = tpu.matmul %193, %195, %cst_85 {dimension_numbers = #tpu.dot_dimension_numbers<[1], [0], [0], [1], [0, 0, 1, 1], [], []>} : vector<96x128xbf16>, vector<128x128xbf16>, vector<96x128xf32> -> vector<96x128xf32>
    %c1_86 = arith.constant 1 : index
    %c0_87 = arith.constant 0 : index
    %c0_88 = arith.constant 0 : index
    %197 = vector.load %arg16[%c1_86, %c0_87, %c0_88] : memref<3x128x128xbf16, #tpu.memory_space<vmem>>, vector<1x128x128xbf16>
    %198 = vector.shape_cast %197 : vector<1x128x128xbf16> to vector<128x128xbf16>
    %cst_89 = arith.constant dense<0.000000e+00> : vector<96x128xf32>
    %199 = tpu.matmul %193, %198, %cst_89 {dimension_numbers = #tpu.dot_dimension_numbers<[1], [0], [0], [1], [0, 0, 1, 1], [], []>} : vector<96x128xbf16>, vector<128x128xbf16>, vector<96x128xf32> -> vector<96x128xf32>
    %c2_90 = arith.constant 2 : index
    %c0_91 = arith.constant 0 : index
    %c0_92 = arith.constant 0 : index
    %200 = vector.load %arg16[%c2_90, %c0_91, %c0_92] : memref<3x128x128xbf16, #tpu.memory_space<vmem>>, vector<1x128x128xbf16>
    %201 = vector.shape_cast %200 : vector<1x128x128xbf16> to vector<128x128xbf16>
    %cst_93 = arith.constant dense<0.000000e+00> : vector<96x128xf32>
    %202 = tpu.matmul %193, %201, %cst_93 {dimension_numbers = #tpu.dot_dimension_numbers<[1], [0], [0], [1], [0, 0, 1, 1], [], []>} : vector<96x128xbf16>, vector<128x128xbf16>, vector<96x128xf32> -> vector<96x128xf32>
    %c0_94 = arith.constant 0 : index
    %c0_95 = arith.constant 0 : index
    %203 = vector.load %arg17[%c0_94, %c0_95] : memref<24x72xbf16, #tpu.memory_space<vmem>>, vector<24x72xbf16>
    %204 = vector.extract_strided_slice %196 {offsets = [0, 0], sizes = [24, 128], strides = [1, 1]} : vector<96x128xf32> to vector<24x128xf32>
    %205 = vector.extract_strided_slice %199 {offsets = [0, 0], sizes = [24, 128], strides = [1, 1]} : vector<96x128xf32> to vector<24x128xf32>
    %206 = vector.extract_strided_slice %202 {offsets = [0, 0], sizes = [24, 128], strides = [1, 1]} : vector<96x128xf32> to vector<24x128xf32>
    %207 = tpu.concatenate %204, %205, %206 in 0 : vector<24x128xf32>, vector<24x128xf32>, vector<24x128xf32> -> vector<72x128xf32>
    %208 = arith.truncf %207 : vector<72x128xf32> to vector<72x128xbf16>
    %cst_96 = arith.constant dense<0.000000e+00> : vector<24x128xf32>
    %209 = tpu.matmul %203, %208, %cst_96 {dimension_numbers = #tpu.dot_dimension_numbers<[1], [0], [0], [1], [0, 0, 1, 1], [], []>} : vector<24x72xbf16>, vector<72x128xbf16>, vector<24x128xf32> -> vector<24x128xf32>
    %210 = vector.extract_strided_slice %196 {offsets = [24, 0], sizes = [24, 128], strides = [1, 1]} : vector<96x128xf32> to vector<24x128xf32>
    %211 = vector.extract_strided_slice %199 {offsets = [24, 0], sizes = [24, 128], strides = [1, 1]} : vector<96x128xf32> to vector<24x128xf32>
    %212 = vector.extract_strided_slice %202 {offsets = [24, 0], sizes = [24, 128], strides = [1, 1]} : vector<96x128xf32> to vector<24x128xf32>
    %213 = tpu.concatenate %210, %211, %212 in 0 : vector<24x128xf32>, vector<24x128xf32>, vector<24x128xf32> -> vector<72x128xf32>
    %214 = arith.truncf %213 : vector<72x128xf32> to vector<72x128xbf16>
    %cst_97 = arith.constant dense<0.000000e+00> : vector<24x128xf32>
    %215 = tpu.matmul %203, %214, %cst_97 {dimension_numbers = #tpu.dot_dimension_numbers<[1], [0], [0], [1], [0, 0, 1, 1], [], []>} : vector<24x72xbf16>, vector<72x128xbf16>, vector<24x128xf32> -> vector<24x128xf32>
    %216 = vector.extract_strided_slice %196 {offsets = [48, 0], sizes = [24, 128], strides = [1, 1]} : vector<96x128xf32> to vector<24x128xf32>
    %217 = vector.extract_strided_slice %199 {offsets = [48, 0], sizes = [24, 128], strides = [1, 1]} : vector<96x128xf32> to vector<24x128xf32>
    %218 = vector.extract_strided_slice %202 {offsets = [48, 0], sizes = [24, 128], strides = [1, 1]} : vector<96x128xf32> to vector<24x128xf32>
    %219 = tpu.concatenate %216, %217, %218 in 0 : vector<24x128xf32>, vector<24x128xf32>, vector<24x128xf32> -> vector<72x128xf32>
    %220 = arith.truncf %219 : vector<72x128xf32> to vector<72x128xbf16>
    %cst_98 = arith.constant dense<0.000000e+00> : vector<24x128xf32>
    %221 = tpu.matmul %203, %220, %cst_98 {dimension_numbers = #tpu.dot_dimension_numbers<[1], [0], [0], [1], [0, 0, 1, 1], [], []>} : vector<24x72xbf16>, vector<72x128xbf16>, vector<24x128xf32> -> vector<24x128xf32>
    %222 = vector.extract_strided_slice %196 {offsets = [72, 0], sizes = [24, 128], strides = [1, 1]} : vector<96x128xf32> to vector<24x128xf32>
    %223 = vector.extract_strided_slice %199 {offsets = [72, 0], sizes = [24, 128], strides = [1, 1]} : vector<96x128xf32> to vector<24x128xf32>
    %224 = vector.extract_strided_slice %202 {offsets = [72, 0], sizes = [24, 128], strides = [1, 1]} : vector<96x128xf32> to vector<24x128xf32>
    %225 = tpu.concatenate %222, %223, %224 in 0 : vector<24x128xf32>, vector<24x128xf32>, vector<24x128xf32> -> vector<72x128xf32>
    %226 = arith.truncf %225 : vector<72x128xf32> to vector<72x128xbf16>
    %cst_99 = arith.constant dense<0.000000e+00> : vector<24x128xf32>
    %227 = tpu.matmul %203, %226, %cst_99 {dimension_numbers = #tpu.dot_dimension_numbers<[1], [0], [0], [1], [0, 0, 1, 1], [], []>} : vector<24x72xbf16>, vector<72x128xbf16>, vector<24x128xf32> -> vector<24x128xf32>
    %228 = tpu.concatenate %209, %215, %221, %227 in 0 : vector<24x128xf32>, vector<24x128xf32>, vector<24x128xf32>, vector<24x128xf32> -> vector<96x128xf32>
    %229 = vector.extract_strided_slice %192 {offsets = [0, 0], sizes = [1, 128], strides = [1, 1]} : vector<8x128xf32> to vector<1x128xf32>
    %230 = vector.broadcast %229 : vector<1x128xf32> to vector<96x128xf32>
    %231 = arith.mulf %228, %230 : vector<96x128xf32>
    %232 = vector.extract_strided_slice %192 {offsets = [1, 0], sizes = [1, 128], strides = [1, 1]} : vector<8x128xf32> to vector<1x128xf32>
    %233 = vector.broadcast %232 : vector<1x128xf32> to vector<96x128xf32>
    %234 = arith.addf %231, %233 : vector<96x128xf32>
    %235 = arith.addf %234, %191 : vector<96x128xf32>
    %cst_100 = arith.constant 0.000000e+00 : f32
    %236 = vector.broadcast %cst_100 : f32 to vector<96x128xf32>
    %237 = arith.maximumf %235, %236 : vector<96x128xf32>
    %238 = arith.truncf %237 : vector<96x128xf32> to vector<96x128xbf16>
    %c0_101 = arith.constant 0 : index
    %c0_102 = arith.constant 0 : index
    %239 = vector.load %arg19[%c0_101, %c0_102] : memref<128x128xbf16, #tpu.memory_space<vmem>>, vector<128x128xbf16>
    %cst_103 = arith.constant dense<0.000000e+00> : vector<96x128xf32>
    %240 = tpu.matmul %238, %239, %cst_103 {dimension_numbers = #tpu.dot_dimension_numbers<[1], [0], [0], [1], [0, 0, 1, 1], [], []>} : vector<96x128xbf16>, vector<128x128xbf16>, vector<96x128xf32> -> vector<96x128xf32>
    %241 = vector.extract_strided_slice %192 {offsets = [2, 0], sizes = [1, 128], strides = [1, 1]} : vector<8x128xf32> to vector<1x128xf32>
    %242 = vector.broadcast %241 : vector<1x128xf32> to vector<96x128xf32>
    %243 = arith.mulf %240, %242 : vector<96x128xf32>
    %244 = vector.extract_strided_slice %192 {offsets = [3, 0], sizes = [1, 128], strides = [1, 1]} : vector<8x128xf32> to vector<1x128xf32>
    %245 = vector.broadcast %244 : vector<1x128xf32> to vector<96x128xf32>
    %246 = arith.addf %243, %245 : vector<96x128xf32>
    %247 = arith.addf %246, %237 : vector<96x128xf32>
    %cst_104 = arith.constant 0.000000e+00 : f32
    %248 = vector.broadcast %cst_104 : f32 to vector<96x128xf32>
    %249 = arith.maximumf %247, %248 : vector<96x128xf32>
    %c64_i32 = arith.constant 64 : i32
    %250 = tpu.dynamic_rotate %249 by %c64_i32 dim 1 : vector<96x128xf32>, i32 -> vector<96x128xf32>
    %251 = arith.maximumf %249, %250 : vector<96x128xf32>
    %c32_i32 = arith.constant 32 : i32
    %252 = tpu.dynamic_rotate %251 by %c32_i32 dim 1 : vector<96x128xf32>, i32 -> vector<96x128xf32>
    %253 = arith.maximumf %251, %252 : vector<96x128xf32>
    %c16_i32 = arith.constant 16 : i32
    %254 = tpu.dynamic_rotate %253 by %c16_i32 dim 1 : vector<96x128xf32>, i32 -> vector<96x128xf32>
    %255 = arith.maximumf %253, %254 : vector<96x128xf32>
    %256 = vector.extract_strided_slice %255 {offsets = [0, 0], sizes = [96, 16], strides = [1, 1]} : vector<96x128xf32> to vector<96x16xf32>
    %257 = vector.shape_cast %256 : vector<96x16xf32> to vector<4x24x16xf32>
    %258 = vector.extract_strided_slice %257 {offsets = [0, 0, 0], sizes = [4, 11, 16], strides = [1, 1, 1]} : vector<4x24x16xf32> to vector<4x11x16xf32>
    %cst_105 = arith.constant dense<0xFF800000> : vector<4x16xf32>
    %259 = vector.multi_reduction <maximumf>, %258, %cst_105 [1] : vector<4x11x16xf32> to vector<4x16xf32>
    %260 = vector.shape_cast %259 : vector<4x16xf32> to vector<4x1x16xf32>
    %261 = vector.extract_strided_slice %257 {offsets = [0, 11, 0], sizes = [4, 6, 16], strides = [1, 1, 1]} : vector<4x24x16xf32> to vector<4x6x16xf32>
    %cst_106 = arith.constant dense<0xFF800000> : vector<4x16xf32>
    %262 = vector.multi_reduction <maximumf>, %261, %cst_106 [1] : vector<4x6x16xf32> to vector<4x16xf32>
    %263 = vector.shape_cast %262 : vector<4x16xf32> to vector<4x1x16xf32>
    %264 = tpu.concatenate %260, %263 in 1 : vector<4x1x16xf32>, vector<4x1x16xf32> -> vector<4x2x16xf32>
    %c0_107 = arith.constant 0 : index
    %c0_108 = arith.constant 0 : index
    %265 = vector.load %arg22[%c0_107, %c0_108] : memref<8x128xf32, #tpu.memory_space<vmem>>, vector<8x128xf32>
    %266 = arith.truncf %191 : vector<96x128xf32> to vector<96x128xbf16>
    %c0_109 = arith.constant 0 : index
    %c0_110 = arith.constant 0 : index
    %c0_111 = arith.constant 0 : index
    %267 = vector.load %arg20[%c0_109, %c0_110, %c0_111] : memref<3x128x128xbf16, #tpu.memory_space<vmem>>, vector<1x128x128xbf16>
    %268 = vector.shape_cast %267 : vector<1x128x128xbf16> to vector<128x128xbf16>
    %cst_112 = arith.constant dense<0.000000e+00> : vector<96x128xf32>
    %269 = tpu.matmul %266, %268, %cst_112 {dimension_numbers = #tpu.dot_dimension_numbers<[1], [0], [0], [1], [0, 0, 1, 1], [], []>} : vector<96x128xbf16>, vector<128x128xbf16>, vector<96x128xf32> -> vector<96x128xf32>
    %c1_113 = arith.constant 1 : index
    %c0_114 = arith.constant 0 : index
    %c0_115 = arith.constant 0 : index
    %270 = vector.load %arg20[%c1_113, %c0_114, %c0_115] : memref<3x128x128xbf16, #tpu.memory_space<vmem>>, vector<1x128x128xbf16>
    %271 = vector.shape_cast %270 : vector<1x128x128xbf16> to vector<128x128xbf16>
    %cst_116 = arith.constant dense<0.000000e+00> : vector<96x128xf32>
    %272 = tpu.matmul %266, %271, %cst_116 {dimension_numbers = #tpu.dot_dimension_numbers<[1], [0], [0], [1], [0, 0, 1, 1], [], []>} : vector<96x128xbf16>, vector<128x128xbf16>, vector<96x128xf32> -> vector<96x128xf32>
    %c2_117 = arith.constant 2 : index
    %c0_118 = arith.constant 0 : index
    %c0_119 = arith.constant 0 : index
    %273 = vector.load %arg20[%c2_117, %c0_118, %c0_119] : memref<3x128x128xbf16, #tpu.memory_space<vmem>>, vector<1x128x128xbf16>
    %274 = vector.shape_cast %273 : vector<1x128x128xbf16> to vector<128x128xbf16>
    %cst_120 = arith.constant dense<0.000000e+00> : vector<96x128xf32>
    %275 = tpu.matmul %266, %274, %cst_120 {dimension_numbers = #tpu.dot_dimension_numbers<[1], [0], [0], [1], [0, 0, 1, 1], [], []>} : vector<96x128xbf16>, vector<128x128xbf16>, vector<96x128xf32> -> vector<96x128xf32>
    %c0_121 = arith.constant 0 : index
    %c0_122 = arith.constant 0 : index
    %276 = vector.load %arg21[%c0_121, %c0_122] : memref<24x72xbf16, #tpu.memory_space<vmem>>, vector<24x72xbf16>
    %277 = vector.extract_strided_slice %269 {offsets = [0, 0], sizes = [24, 128], strides = [1, 1]} : vector<96x128xf32> to vector<24x128xf32>
    %278 = vector.extract_strided_slice %272 {offsets = [0, 0], sizes = [24, 128], strides = [1, 1]} : vector<96x128xf32> to vector<24x128xf32>
    %279 = vector.extract_strided_slice %275 {offsets = [0, 0], sizes = [24, 128], strides = [1, 1]} : vector<96x128xf32> to vector<24x128xf32>
    %280 = tpu.concatenate %277, %278, %279 in 0 : vector<24x128xf32>, vector<24x128xf32>, vector<24x128xf32> -> vector<72x128xf32>
    %281 = arith.truncf %280 : vector<72x128xf32> to vector<72x128xbf16>
    %cst_123 = arith.constant dense<0.000000e+00> : vector<24x128xf32>
    %282 = tpu.matmul %276, %281, %cst_123 {dimension_numbers = #tpu.dot_dimension_numbers<[1], [0], [0], [1], [0, 0, 1, 1], [], []>} : vector<24x72xbf16>, vector<72x128xbf16>, vector<24x128xf32> -> vector<24x128xf32>
    %283 = vector.extract_strided_slice %269 {offsets = [24, 0], sizes = [24, 128], strides = [1, 1]} : vector<96x128xf32> to vector<24x128xf32>
    %284 = vector.extract_strided_slice %272 {offsets = [24, 0], sizes = [24, 128], strides = [1, 1]} : vector<96x128xf32> to vector<24x128xf32>
    %285 = vector.extract_strided_slice %275 {offsets = [24, 0], sizes = [24, 128], strides = [1, 1]} : vector<96x128xf32> to vector<24x128xf32>
    %286 = tpu.concatenate %283, %284, %285 in 0 : vector<24x128xf32>, vector<24x128xf32>, vector<24x128xf32> -> vector<72x128xf32>
    %287 = arith.truncf %286 : vector<72x128xf32> to vector<72x128xbf16>
    %cst_124 = arith.constant dense<0.000000e+00> : vector<24x128xf32>
    %288 = tpu.matmul %276, %287, %cst_124 {dimension_numbers = #tpu.dot_dimension_numbers<[1], [0], [0], [1], [0, 0, 1, 1], [], []>} : vector<24x72xbf16>, vector<72x128xbf16>, vector<24x128xf32> -> vector<24x128xf32>
    %289 = vector.extract_strided_slice %269 {offsets = [48, 0], sizes = [24, 128], strides = [1, 1]} : vector<96x128xf32> to vector<24x128xf32>
    %290 = vector.extract_strided_slice %272 {offsets = [48, 0], sizes = [24, 128], strides = [1, 1]} : vector<96x128xf32> to vector<24x128xf32>
    %291 = vector.extract_strided_slice %275 {offsets = [48, 0], sizes = [24, 128], strides = [1, 1]} : vector<96x128xf32> to vector<24x128xf32>
    %292 = tpu.concatenate %289, %290, %291 in 0 : vector<24x128xf32>, vector<24x128xf32>, vector<24x128xf32> -> vector<72x128xf32>
    %293 = arith.truncf %292 : vector<72x128xf32> to vector<72x128xbf16>
    %cst_125 = arith.constant dense<0.000000e+00> : vector<24x128xf32>
    %294 = tpu.matmul %276, %293, %cst_125 {dimension_numbers = #tpu.dot_dimension_numbers<[1], [0], [0], [1], [0, 0, 1, 1], [], []>} : vector<24x72xbf16>, vector<72x128xbf16>, vector<24x128xf32> -> vector<24x128xf32>
    %295 = vector.extract_strided_slice %269 {offsets = [72, 0], sizes = [24, 128], strides = [1, 1]} : vector<96x128xf32> to vector<24x128xf32>
    %296 = vector.extract_strided_slice %272 {offsets = [72, 0], sizes = [24, 128], strides = [1, 1]} : vector<96x128xf32> to vector<24x128xf32>
    %297 = vector.extract_strided_slice %275 {offsets = [72, 0], sizes = [24, 128], strides = [1, 1]} : vector<96x128xf32> to vector<24x128xf32>
    %298 = tpu.concatenate %295, %296, %297 in 0 : vector<24x128xf32>, vector<24x128xf32>, vector<24x128xf32> -> vector<72x128xf32>
    %299 = arith.truncf %298 : vector<72x128xf32> to vector<72x128xbf16>
    %cst_126 = arith.constant dense<0.000000e+00> : vector<24x128xf32>
    %300 = tpu.matmul %276, %299, %cst_126 {dimension_numbers = #tpu.dot_dimension_numbers<[1], [0], [0], [1], [0, 0, 1, 1], [], []>} : vector<24x72xbf16>, vector<72x128xbf16>, vector<24x128xf32> -> vector<24x128xf32>
    %301 = tpu.concatenate %282, %288, %294, %300 in 0 : vector<24x128xf32>, vector<24x128xf32>, vector<24x128xf32>, vector<24x128xf32> -> vector<96x128xf32>
    %302 = vector.extract_strided_slice %265 {offsets = [0, 0], sizes = [1, 128], strides = [1, 1]} : vector<8x128xf32> to vector<1x128xf32>
    %303 = vector.broadcast %302 : vector<1x128xf32> to vector<96x128xf32>
    %304 = arith.mulf %301, %303 : vector<96x128xf32>
    %305 = vector.extract_strided_slice %265 {offsets = [1, 0], sizes = [1, 128], strides = [1, 1]} : vector<8x128xf32> to vector<1x128xf32>
    %306 = vector.broadcast %305 : vector<1x128xf32> to vector<96x128xf32>
    %307 = arith.addf %304, %306 : vector<96x128xf32>
    %308 = arith.addf %307, %191 : vector<96x128xf32>
    %cst_127 = arith.constant 0.000000e+00 : f32
    %309 = vector.broadcast %cst_127 : f32 to vector<96x128xf32>
    %310 = arith.maximumf %308, %309 : vector<96x128xf32>
    %311 = arith.truncf %310 : vector<96x128xf32> to vector<96x128xbf16>
    %c0_128 = arith.constant 0 : index
    %c0_129 = arith.constant 0 : index
    %312 = vector.load %arg23[%c0_128, %c0_129] : memref<128x128xbf16, #tpu.memory_space<vmem>>, vector<128x128xbf16>
    %cst_130 = arith.constant dense<0.000000e+00> : vector<96x128xf32>
    %313 = tpu.matmul %311, %312, %cst_130 {dimension_numbers = #tpu.dot_dimension_numbers<[1], [0], [0], [1], [0, 0, 1, 1], [], []>} : vector<96x128xbf16>, vector<128x128xbf16>, vector<96x128xf32> -> vector<96x128xf32>
    %314 = vector.extract_strided_slice %265 {offsets = [2, 0], sizes = [1, 128], strides = [1, 1]} : vector<8x128xf32> to vector<1x128xf32>
    %315 = vector.broadcast %314 : vector<1x128xf32> to vector<96x128xf32>
    %316 = arith.mulf %313, %315 : vector<96x128xf32>
    %317 = vector.extract_strided_slice %265 {offsets = [3, 0], sizes = [1, 128], strides = [1, 1]} : vector<8x128xf32> to vector<1x128xf32>
    %318 = vector.broadcast %317 : vector<1x128xf32> to vector<96x128xf32>
    %319 = arith.addf %316, %318 : vector<96x128xf32>
    %320 = arith.addf %319, %310 : vector<96x128xf32>
    %cst_131 = arith.constant 0.000000e+00 : f32
    %321 = vector.broadcast %cst_131 : f32 to vector<96x128xf32>
    %322 = arith.maximumf %320, %321 : vector<96x128xf32>
    %c64_i32_132 = arith.constant 64 : i32
    %323 = tpu.dynamic_rotate %322 by %c64_i32_132 dim 1 : vector<96x128xf32>, i32 -> vector<96x128xf32>
    %324 = arith.maximumf %322, %323 : vector<96x128xf32>
    %c32_i32_133 = arith.constant 32 : i32
    %325 = tpu.dynamic_rotate %324 by %c32_i32_133 dim 1 : vector<96x128xf32>, i32 -> vector<96x128xf32>
    %326 = arith.maximumf %324, %325 : vector<96x128xf32>
    %c16_i32_134 = arith.constant 16 : i32
    %327 = tpu.dynamic_rotate %326 by %c16_i32_134 dim 1 : vector<96x128xf32>, i32 -> vector<96x128xf32>
    %328 = arith.maximumf %326, %327 : vector<96x128xf32>
    %329 = vector.extract_strided_slice %328 {offsets = [0, 0], sizes = [96, 16], strides = [1, 1]} : vector<96x128xf32> to vector<96x16xf32>
    %330 = vector.shape_cast %329 : vector<96x16xf32> to vector<4x24x16xf32>
    %331 = vector.extract_strided_slice %330 {offsets = [0, 0, 0], sizes = [4, 5, 16], strides = [1, 1, 1]} : vector<4x24x16xf32> to vector<4x5x16xf32>
    %cst_135 = arith.constant dense<0xFF800000> : vector<4x16xf32>
    %332 = vector.multi_reduction <maximumf>, %331, %cst_135 [1] : vector<4x5x16xf32> to vector<4x16xf32>
    %333 = vector.shape_cast %332 : vector<4x16xf32> to vector<4x1x16xf32>
    %334 = vector.extract_strided_slice %330 {offsets = [0, 5, 0], sizes = [4, 6, 16], strides = [1, 1, 1]} : vector<4x24x16xf32> to vector<4x6x16xf32>
    %cst_136 = arith.constant dense<0xFF800000> : vector<4x16xf32>
    %335 = vector.multi_reduction <maximumf>, %334, %cst_136 [1] : vector<4x6x16xf32> to vector<4x16xf32>
    %336 = vector.shape_cast %335 : vector<4x16xf32> to vector<4x1x16xf32>
    %337 = vector.extract_strided_slice %330 {offsets = [0, 11, 0], sizes = [4, 6, 16], strides = [1, 1, 1]} : vector<4x24x16xf32> to vector<4x6x16xf32>
    %cst_137 = arith.constant dense<0xFF800000> : vector<4x16xf32>
    %338 = vector.multi_reduction <maximumf>, %337, %cst_137 [1] : vector<4x6x16xf32> to vector<4x16xf32>
    %339 = vector.shape_cast %338 : vector<4x16xf32> to vector<4x1x16xf32>
    %340 = tpu.concatenate %333, %336, %339 in 1 : vector<4x1x16xf32>, vector<4x1x16xf32>, vector<4x1x16xf32> -> vector<4x3x16xf32>
    %c0_138 = arith.constant 0 : index
    %c0_139 = arith.constant 0 : index
    %341 = vector.load %arg26[%c0_138, %c0_139] : memref<8x128xf32, #tpu.memory_space<vmem>>, vector<8x128xf32>
    %342 = arith.truncf %191 : vector<96x128xf32> to vector<96x128xbf16>
    %c0_140 = arith.constant 0 : index
    %c0_141 = arith.constant 0 : index
    %c0_142 = arith.constant 0 : index
    %343 = vector.load %arg24[%c0_140, %c0_141, %c0_142] : memref<3x128x128xbf16, #tpu.memory_space<vmem>>, vector<1x128x128xbf16>
    %344 = vector.shape_cast %343 : vector<1x128x128xbf16> to vector<128x128xbf16>
    %cst_143 = arith.constant dense<0.000000e+00> : vector<96x128xf32>
    %345 = tpu.matmul %342, %344, %cst_143 {dimension_numbers = #tpu.dot_dimension_numbers<[1], [0], [0], [1], [0, 0, 1, 1], [], []>} : vector<96x128xbf16>, vector<128x128xbf16>, vector<96x128xf32> -> vector<96x128xf32>
    %c1_144 = arith.constant 1 : index
    %c0_145 = arith.constant 0 : index
    %c0_146 = arith.constant 0 : index
    %346 = vector.load %arg24[%c1_144, %c0_145, %c0_146] : memref<3x128x128xbf16, #tpu.memory_space<vmem>>, vector<1x128x128xbf16>
    %347 = vector.shape_cast %346 : vector<1x128x128xbf16> to vector<128x128xbf16>
    %cst_147 = arith.constant dense<0.000000e+00> : vector<96x128xf32>
    %348 = tpu.matmul %342, %347, %cst_147 {dimension_numbers = #tpu.dot_dimension_numbers<[1], [0], [0], [1], [0, 0, 1, 1], [], []>} : vector<96x128xbf16>, vector<128x128xbf16>, vector<96x128xf32> -> vector<96x128xf32>
    %c2_148 = arith.constant 2 : index
    %c0_149 = arith.constant 0 : index
    %c0_150 = arith.constant 0 : index
    %349 = vector.load %arg24[%c2_148, %c0_149, %c0_150] : memref<3x128x128xbf16, #tpu.memory_space<vmem>>, vector<1x128x128xbf16>
    %350 = vector.shape_cast %349 : vector<1x128x128xbf16> to vector<128x128xbf16>
    %cst_151 = arith.constant dense<0.000000e+00> : vector<96x128xf32>
    %351 = tpu.matmul %342, %350, %cst_151 {dimension_numbers = #tpu.dot_dimension_numbers<[1], [0], [0], [1], [0, 0, 1, 1], [], []>} : vector<96x128xbf16>, vector<128x128xbf16>, vector<96x128xf32> -> vector<96x128xf32>
    %c0_152 = arith.constant 0 : index
    %c0_153 = arith.constant 0 : index
    %352 = vector.load %arg25[%c0_152, %c0_153] : memref<24x72xbf16, #tpu.memory_space<vmem>>, vector<24x72xbf16>
    %353 = vector.extract_strided_slice %345 {offsets = [0, 0], sizes = [24, 128], strides = [1, 1]} : vector<96x128xf32> to vector<24x128xf32>
    %354 = vector.extract_strided_slice %348 {offsets = [0, 0], sizes = [24, 128], strides = [1, 1]} : vector<96x128xf32> to vector<24x128xf32>
    %355 = vector.extract_strided_slice %351 {offsets = [0, 0], sizes = [24, 128], strides = [1, 1]} : vector<96x128xf32> to vector<24x128xf32>
    %356 = tpu.concatenate %353, %354, %355 in 0 : vector<24x128xf32>, vector<24x128xf32>, vector<24x128xf32> -> vector<72x128xf32>
    %357 = arith.truncf %356 : vector<72x128xf32> to vector<72x128xbf16>
    %cst_154 = arith.constant dense<0.000000e+00> : vector<24x128xf32>
    %358 = tpu.matmul %352, %357, %cst_154 {dimension_numbers = #tpu.dot_dimension_numbers<[1], [0], [0], [1], [0, 0, 1, 1], [], []>} : vector<24x72xbf16>, vector<72x128xbf16>, vector<24x128xf32> -> vector<24x128xf32>
    %359 = vector.extract_strided_slice %345 {offsets = [24, 0], sizes = [24, 128], strides = [1, 1]} : vector<96x128xf32> to vector<24x128xf32>
    %360 = vector.extract_strided_slice %348 {offsets = [24, 0], sizes = [24, 128], strides = [1, 1]} : vector<96x128xf32> to vector<24x128xf32>
    %361 = vector.extract_strided_slice %351 {offsets = [24, 0], sizes = [24, 128], strides = [1, 1]} : vector<96x128xf32> to vector<24x128xf32>
    %362 = tpu.concatenate %359, %360, %361 in 0 : vector<24x128xf32>, vector<24x128xf32>, vector<24x128xf32> -> vector<72x128xf32>
    %363 = arith.truncf %362 : vector<72x128xf32> to vector<72x128xbf16>
    %cst_155 = arith.constant dense<0.000000e+00> : vector<24x128xf32>
    %364 = tpu.matmul %352, %363, %cst_155 {dimension_numbers = #tpu.dot_dimension_numbers<[1], [0], [0], [1], [0, 0, 1, 1], [], []>} : vector<24x72xbf16>, vector<72x128xbf16>, vector<24x128xf32> -> vector<24x128xf32>
    %365 = vector.extract_strided_slice %345 {offsets = [48, 0], sizes = [24, 128], strides = [1, 1]} : vector<96x128xf32> to vector<24x128xf32>
    %366 = vector.extract_strided_slice %348 {offsets = [48, 0], sizes = [24, 128], strides = [1, 1]} : vector<96x128xf32> to vector<24x128xf32>
    %367 = vector.extract_strided_slice %351 {offsets = [48, 0], sizes = [24, 128], strides = [1, 1]} : vector<96x128xf32> to vector<24x128xf32>
    %368 = tpu.concatenate %365, %366, %367 in 0 : vector<24x128xf32>, vector<24x128xf32>, vector<24x128xf32> -> vector<72x128xf32>
    %369 = arith.truncf %368 : vector<72x128xf32> to vector<72x128xbf16>
    %cst_156 = arith.constant dense<0.000000e+00> : vector<24x128xf32>
    %370 = tpu.matmul %352, %369, %cst_156 {dimension_numbers = #tpu.dot_dimension_numbers<[1], [0], [0], [1], [0, 0, 1, 1], [], []>} : vector<24x72xbf16>, vector<72x128xbf16>, vector<24x128xf32> -> vector<24x128xf32>
    %371 = vector.extract_strided_slice %345 {offsets = [72, 0], sizes = [24, 128], strides = [1, 1]} : vector<96x128xf32> to vector<24x128xf32>
    %372 = vector.extract_strided_slice %348 {offsets = [72, 0], sizes = [24, 128], strides = [1, 1]} : vector<96x128xf32> to vector<24x128xf32>
    %373 = vector.extract_strided_slice %351 {offsets = [72, 0], sizes = [24, 128], strides = [1, 1]} : vector<96x128xf32> to vector<24x128xf32>
    %374 = tpu.concatenate %371, %372, %373 in 0 : vector<24x128xf32>, vector<24x128xf32>, vector<24x128xf32> -> vector<72x128xf32>
    %375 = arith.truncf %374 : vector<72x128xf32> to vector<72x128xbf16>
    %cst_157 = arith.constant dense<0.000000e+00> : vector<24x128xf32>
    %376 = tpu.matmul %352, %375, %cst_157 {dimension_numbers = #tpu.dot_dimension_numbers<[1], [0], [0], [1], [0, 0, 1, 1], [], []>} : vector<24x72xbf16>, vector<72x128xbf16>, vector<24x128xf32> -> vector<24x128xf32>
    %377 = tpu.concatenate %358, %364, %370, %376 in 0 : vector<24x128xf32>, vector<24x128xf32>, vector<24x128xf32>, vector<24x128xf32> -> vector<96x128xf32>
    %378 = vector.extract_strided_slice %341 {offsets = [0, 0], sizes = [1, 128], strides = [1, 1]} : vector<8x128xf32> to vector<1x128xf32>
    %379 = vector.broadcast %378 : vector<1x128xf32> to vector<96x128xf32>
    %380 = arith.mulf %377, %379 : vector<96x128xf32>
    %381 = vector.extract_strided_slice %341 {offsets = [1, 0], sizes = [1, 128], strides = [1, 1]} : vector<8x128xf32> to vector<1x128xf32>
    %382 = vector.broadcast %381 : vector<1x128xf32> to vector<96x128xf32>
    %383 = arith.addf %380, %382 : vector<96x128xf32>
    %384 = arith.addf %383, %191 : vector<96x128xf32>
    %cst_158 = arith.constant 0.000000e+00 : f32
    %385 = vector.broadcast %cst_158 : f32 to vector<96x128xf32>
    %386 = arith.maximumf %384, %385 : vector<96x128xf32>
    %387 = arith.truncf %386 : vector<96x128xf32> to vector<96x128xbf16>
    %c0_159 = arith.constant 0 : index
    %c0_160 = arith.constant 0 : index
    %388 = vector.load %arg27[%c0_159, %c0_160] : memref<128x128xbf16, #tpu.memory_space<vmem>>, vector<128x128xbf16>
    %cst_161 = arith.constant dense<0.000000e+00> : vector<96x128xf32>
    %389 = tpu.matmul %387, %388, %cst_161 {dimension_numbers = #tpu.dot_dimension_numbers<[1], [0], [0], [1], [0, 0, 1, 1], [], []>} : vector<96x128xbf16>, vector<128x128xbf16>, vector<96x128xf32> -> vector<96x128xf32>
    %390 = vector.extract_strided_slice %341 {offsets = [2, 0], sizes = [1, 128], strides = [1, 1]} : vector<8x128xf32> to vector<1x128xf32>
    %391 = vector.broadcast %390 : vector<1x128xf32> to vector<96x128xf32>
    %392 = arith.mulf %389, %391 : vector<96x128xf32>
    %393 = vector.extract_strided_slice %341 {offsets = [3, 0], sizes = [1, 128], strides = [1, 1]} : vector<8x128xf32> to vector<1x128xf32>
    %394 = vector.broadcast %393 : vector<1x128xf32> to vector<96x128xf32>
    %395 = arith.addf %392, %394 : vector<96x128xf32>
    %396 = arith.addf %395, %386 : vector<96x128xf32>
    %cst_162 = arith.constant 0.000000e+00 : f32
    %397 = vector.broadcast %cst_162 : f32 to vector<96x128xf32>
    %398 = arith.maximumf %396, %397 : vector<96x128xf32>
    %c64_i32_163 = arith.constant 64 : i32
    %399 = tpu.dynamic_rotate %398 by %c64_i32_163 dim 1 : vector<96x128xf32>, i32 -> vector<96x128xf32>
    %400 = arith.maximumf %398, %399 : vector<96x128xf32>
    %c32_i32_164 = arith.constant 32 : i32
    %401 = tpu.dynamic_rotate %400 by %c32_i32_164 dim 1 : vector<96x128xf32>, i32 -> vector<96x128xf32>
    %402 = arith.maximumf %400, %401 : vector<96x128xf32>
    %c16_i32_165 = arith.constant 16 : i32
    %403 = tpu.dynamic_rotate %402 by %c16_i32_165 dim 1 : vector<96x128xf32>, i32 -> vector<96x128xf32>
    %404 = arith.maximumf %402, %403 : vector<96x128xf32>
    %405 = vector.extract_strided_slice %404 {offsets = [0, 0], sizes = [96, 16], strides = [1, 1]} : vector<96x128xf32> to vector<96x16xf32>
    %406 = vector.shape_cast %405 : vector<96x16xf32> to vector<4x24x16xf32>
    %407 = vector.extract_strided_slice %406 {offsets = [0, 0, 0], sizes = [4, 5, 16], strides = [1, 1, 1]} : vector<4x24x16xf32> to vector<4x5x16xf32>
    %cst_166 = arith.constant dense<0xFF800000> : vector<4x16xf32>
    %408 = vector.multi_reduction <maximumf>, %407, %cst_166 [1] : vector<4x5x16xf32> to vector<4x16xf32>
    %409 = vector.shape_cast %408 : vector<4x16xf32> to vector<4x1x16xf32>
    %410 = vector.extract_strided_slice %406 {offsets = [0, 5, 0], sizes = [4, 6, 16], strides = [1, 1, 1]} : vector<4x24x16xf32> to vector<4x6x16xf32>
    %cst_167 = arith.constant dense<0xFF800000> : vector<4x16xf32>
    %411 = vector.multi_reduction <maximumf>, %410, %cst_167 [1] : vector<4x6x16xf32> to vector<4x16xf32>
    %412 = vector.shape_cast %411 : vector<4x16xf32> to vector<4x1x16xf32>
    %413 = vector.extract_strided_slice %406 {offsets = [0, 11, 0], sizes = [4, 4, 16], strides = [1, 1, 1]} : vector<4x24x16xf32> to vector<4x4x16xf32>
    %cst_168 = arith.constant dense<0xFF800000> : vector<4x16xf32>
    %414 = vector.multi_reduction <maximumf>, %413, %cst_168 [1] : vector<4x4x16xf32> to vector<4x16xf32>
    %415 = vector.shape_cast %414 : vector<4x16xf32> to vector<4x1x16xf32>
    %416 = vector.extract_strided_slice %406 {offsets = [0, 15, 0], sizes = [4, 2, 16], strides = [1, 1, 1]} : vector<4x24x16xf32> to vector<4x2x16xf32>
    %cst_169 = arith.constant dense<0xFF800000> : vector<4x16xf32>
    %417 = vector.multi_reduction <maximumf>, %416, %cst_169 [1] : vector<4x2x16xf32> to vector<4x16xf32>
    %418 = vector.shape_cast %417 : vector<4x16xf32> to vector<4x1x16xf32>
    %419 = tpu.concatenate %409, %412, %415, %418 in 1 : vector<4x1x16xf32>, vector<4x1x16xf32>, vector<4x1x16xf32>, vector<4x1x16xf32> -> vector<4x4x16xf32>
    %c0_170 = arith.constant 0 : index
    %c0_171 = arith.constant 0 : index
    %420 = vector.load %arg30[%c0_170, %c0_171] : memref<8x128xf32, #tpu.memory_space<vmem>>, vector<8x128xf32>
    %421 = arith.truncf %191 : vector<96x128xf32> to vector<96x128xbf16>
    %c0_172 = arith.constant 0 : index
    %c0_173 = arith.constant 0 : index
    %c0_174 = arith.constant 0 : index
    %422 = vector.load %arg28[%c0_172, %c0_173, %c0_174] : memref<3x128x128xbf16, #tpu.memory_space<vmem>>, vector<1x128x128xbf16>
    %423 = vector.shape_cast %422 : vector<1x128x128xbf16> to vector<128x128xbf16>
    %cst_175 = arith.constant dense<0.000000e+00> : vector<96x128xf32>
    %424 = tpu.matmul %421, %423, %cst_175 {dimension_numbers = #tpu.dot_dimension_numbers<[1], [0], [0], [1], [0, 0, 1, 1], [], []>} : vector<96x128xbf16>, vector<128x128xbf16>, vector<96x128xf32> -> vector<96x128xf32>
    %c1_176 = arith.constant 1 : index
    %c0_177 = arith.constant 0 : index
    %c0_178 = arith.constant 0 : index
    %425 = vector.load %arg28[%c1_176, %c0_177, %c0_178] : memref<3x128x128xbf16, #tpu.memory_space<vmem>>, vector<1x128x128xbf16>
    %426 = vector.shape_cast %425 : vector<1x128x128xbf16> to vector<128x128xbf16>
    %cst_179 = arith.constant dense<0.000000e+00> : vector<96x128xf32>
    %427 = tpu.matmul %421, %426, %cst_179 {dimension_numbers = #tpu.dot_dimension_numbers<[1], [0], [0], [1], [0, 0, 1, 1], [], []>} : vector<96x128xbf16>, vector<128x128xbf16>, vector<96x128xf32> -> vector<96x128xf32>
    %c2_180 = arith.constant 2 : index
    %c0_181 = arith.constant 0 : index
    %c0_182 = arith.constant 0 : index
    %428 = vector.load %arg28[%c2_180, %c0_181, %c0_182] : memref<3x128x128xbf16, #tpu.memory_space<vmem>>, vector<1x128x128xbf16>
    %429 = vector.shape_cast %428 : vector<1x128x128xbf16> to vector<128x128xbf16>
    %cst_183 = arith.constant dense<0.000000e+00> : vector<96x128xf32>
    %430 = tpu.matmul %421, %429, %cst_183 {dimension_numbers = #tpu.dot_dimension_numbers<[1], [0], [0], [1], [0, 0, 1, 1], [], []>} : vector<96x128xbf16>, vector<128x128xbf16>, vector<96x128xf32> -> vector<96x128xf32>
    %c0_184 = arith.constant 0 : index
    %c0_185 = arith.constant 0 : index
    %431 = vector.load %arg29[%c0_184, %c0_185] : memref<24x72xbf16, #tpu.memory_space<vmem>>, vector<24x72xbf16>
    %432 = vector.extract_strided_slice %424 {offsets = [0, 0], sizes = [24, 128], strides = [1, 1]} : vector<96x128xf32> to vector<24x128xf32>
    %433 = vector.extract_strided_slice %427 {offsets = [0, 0], sizes = [24, 128], strides = [1, 1]} : vector<96x128xf32> to vector<24x128xf32>
    %434 = vector.extract_strided_slice %430 {offsets = [0, 0], sizes = [24, 128], strides = [1, 1]} : vector<96x128xf32> to vector<24x128xf32>
    %435 = tpu.concatenate %432, %433, %434 in 0 : vector<24x128xf32>, vector<24x128xf32>, vector<24x128xf32> -> vector<72x128xf32>
    %436 = arith.truncf %435 : vector<72x128xf32> to vector<72x128xbf16>
    %cst_186 = arith.constant dense<0.000000e+00> : vector<24x128xf32>
    %437 = tpu.matmul %431, %436, %cst_186 {dimension_numbers = #tpu.dot_dimension_numbers<[1], [0], [0], [1], [0, 0, 1, 1], [], []>} : vector<24x72xbf16>, vector<72x128xbf16>, vector<24x128xf32> -> vector<24x128xf32>
    %438 = vector.extract_strided_slice %424 {offsets = [24, 0], sizes = [24, 128], strides = [1, 1]} : vector<96x128xf32> to vector<24x128xf32>
    %439 = vector.extract_strided_slice %427 {offsets = [24, 0], sizes = [24, 128], strides = [1, 1]} : vector<96x128xf32> to vector<24x128xf32>
    %440 = vector.extract_strided_slice %430 {offsets = [24, 0], sizes = [24, 128], strides = [1, 1]} : vector<96x128xf32> to vector<24x128xf32>
    %441 = tpu.concatenate %438, %439, %440 in 0 : vector<24x128xf32>, vector<24x128xf32>, vector<24x128xf32> -> vector<72x128xf32>
    %442 = arith.truncf %441 : vector<72x128xf32> to vector<72x128xbf16>
    %cst_187 = arith.constant dense<0.000000e+00> : vector<24x128xf32>
    %443 = tpu.matmul %431, %442, %cst_187 {dimension_numbers = #tpu.dot_dimension_numbers<[1], [0], [0], [1], [0, 0, 1, 1], [], []>} : vector<24x72xbf16>, vector<72x128xbf16>, vector<24x128xf32> -> vector<24x128xf32>
    %444 = vector.extract_strided_slice %424 {offsets = [48, 0], sizes = [24, 128], strides = [1, 1]} : vector<96x128xf32> to vector<24x128xf32>
    %445 = vector.extract_strided_slice %427 {offsets = [48, 0], sizes = [24, 128], strides = [1, 1]} : vector<96x128xf32> to vector<24x128xf32>
    %446 = vector.extract_strided_slice %430 {offsets = [48, 0], sizes = [24, 128], strides = [1, 1]} : vector<96x128xf32> to vector<24x128xf32>
    %447 = tpu.concatenate %444, %445, %446 in 0 : vector<24x128xf32>, vector<24x128xf32>, vector<24x128xf32> -> vector<72x128xf32>
    %448 = arith.truncf %447 : vector<72x128xf32> to vector<72x128xbf16>
    %cst_188 = arith.constant dense<0.000000e+00> : vector<24x128xf32>
    %449 = tpu.matmul %431, %448, %cst_188 {dimension_numbers = #tpu.dot_dimension_numbers<[1], [0], [0], [1], [0, 0, 1, 1], [], []>} : vector<24x72xbf16>, vector<72x128xbf16>, vector<24x128xf32> -> vector<24x128xf32>
    %450 = vector.extract_strided_slice %424 {offsets = [72, 0], sizes = [24, 128], strides = [1, 1]} : vector<96x128xf32> to vector<24x128xf32>
    %451 = vector.extract_strided_slice %427 {offsets = [72, 0], sizes = [24, 128], strides = [1, 1]} : vector<96x128xf32> to vector<24x128xf32>
    %452 = vector.extract_strided_slice %430 {offsets = [72, 0], sizes = [24, 128], strides = [1, 1]} : vector<96x128xf32> to vector<24x128xf32>
    %453 = tpu.concatenate %450, %451, %452 in 0 : vector<24x128xf32>, vector<24x128xf32>, vector<24x128xf32> -> vector<72x128xf32>
    %454 = arith.truncf %453 : vector<72x128xf32> to vector<72x128xbf16>
    %cst_189 = arith.constant dense<0.000000e+00> : vector<24x128xf32>
    %455 = tpu.matmul %431, %454, %cst_189 {dimension_numbers = #tpu.dot_dimension_numbers<[1], [0], [0], [1], [0, 0, 1, 1], [], []>} : vector<24x72xbf16>, vector<72x128xbf16>, vector<24x128xf32> -> vector<24x128xf32>
    %456 = tpu.concatenate %437, %443, %449, %455 in 0 : vector<24x128xf32>, vector<24x128xf32>, vector<24x128xf32>, vector<24x128xf32> -> vector<96x128xf32>
    %457 = vector.extract_strided_slice %420 {offsets = [0, 0], sizes = [1, 128], strides = [1, 1]} : vector<8x128xf32> to vector<1x128xf32>
    %458 = vector.broadcast %457 : vector<1x128xf32> to vector<96x128xf32>
    %459 = arith.mulf %456, %458 : vector<96x128xf32>
    %460 = vector.extract_strided_slice %420 {offsets = [1, 0], sizes = [1, 128], strides = [1, 1]} : vector<8x128xf32> to vector<1x128xf32>
    %461 = vector.broadcast %460 : vector<1x128xf32> to vector<96x128xf32>
    %462 = arith.addf %459, %461 : vector<96x128xf32>
    %463 = arith.addf %462, %191 : vector<96x128xf32>
    %cst_190 = arith.constant 0.000000e+00 : f32
    %464 = vector.broadcast %cst_190 : f32 to vector<96x128xf32>
    %465 = arith.maximumf %463, %464 : vector<96x128xf32>
    %466 = arith.truncf %465 : vector<96x128xf32> to vector<96x128xbf16>
    %c0_191 = arith.constant 0 : index
    %c0_192 = arith.constant 0 : index
    %467 = vector.load %arg31[%c0_191, %c0_192] : memref<128x128xbf16, #tpu.memory_space<vmem>>, vector<128x128xbf16>
    %cst_193 = arith.constant dense<0.000000e+00> : vector<96x128xf32>
    %468 = tpu.matmul %466, %467, %cst_193 {dimension_numbers = #tpu.dot_dimension_numbers<[1], [0], [0], [1], [0, 0, 1, 1], [], []>} : vector<96x128xbf16>, vector<128x128xbf16>, vector<96x128xf32> -> vector<96x128xf32>
    %469 = vector.extract_strided_slice %420 {offsets = [2, 0], sizes = [1, 128], strides = [1, 1]} : vector<8x128xf32> to vector<1x128xf32>
    %470 = vector.broadcast %469 : vector<1x128xf32> to vector<96x128xf32>
    %471 = arith.mulf %468, %470 : vector<96x128xf32>
    %472 = vector.extract_strided_slice %420 {offsets = [3, 0], sizes = [1, 128], strides = [1, 1]} : vector<8x128xf32> to vector<1x128xf32>
    %473 = vector.broadcast %472 : vector<1x128xf32> to vector<96x128xf32>
    %474 = arith.addf %471, %473 : vector<96x128xf32>
    %475 = arith.addf %474, %465 : vector<96x128xf32>
    %cst_194 = arith.constant 0.000000e+00 : f32
    %476 = vector.broadcast %cst_194 : f32 to vector<96x128xf32>
    %477 = arith.maximumf %475, %476 : vector<96x128xf32>
    %c64_i32_195 = arith.constant 64 : i32
    %478 = tpu.dynamic_rotate %477 by %c64_i32_195 dim 1 : vector<96x128xf32>, i32 -> vector<96x128xf32>
    %479 = arith.maximumf %477, %478 : vector<96x128xf32>
    %c32_i32_196 = arith.constant 32 : i32
    %480 = tpu.dynamic_rotate %479 by %c32_i32_196 dim 1 : vector<96x128xf32>, i32 -> vector<96x128xf32>
    %481 = arith.maximumf %479, %480 : vector<96x128xf32>
    %c16_i32_197 = arith.constant 16 : i32
    %482 = tpu.dynamic_rotate %481 by %c16_i32_197 dim 1 : vector<96x128xf32>, i32 -> vector<96x128xf32>
    %483 = arith.maximumf %481, %482 : vector<96x128xf32>
    %484 = vector.extract_strided_slice %483 {offsets = [0, 0], sizes = [96, 16], strides = [1, 1]} : vector<96x128xf32> to vector<96x16xf32>
    %485 = vector.shape_cast %484 : vector<96x16xf32> to vector<4x24x16xf32>
    %486 = vector.extract_strided_slice %485 {offsets = [0, 0, 0], sizes = [4, 17, 16], strides = [1, 1, 1]} : vector<4x24x16xf32> to vector<4x17x16xf32>
    %cst_198 = arith.constant dense<0xFF800000> : vector<4x16xf32>
    %487 = vector.multi_reduction <maximumf>, %486, %cst_198 [1] : vector<4x17x16xf32> to vector<4x16xf32>
    %488 = vector.shape_cast %487 : vector<4x16xf32> to vector<4x1x16xf32>
    %489 = tpu.concatenate %264, %340, %419, %488 in 1 : vector<4x2x16xf32>, vector<4x3x16xf32>, vector<4x4x16xf32>, vector<4x1x16xf32> -> vector<4x10x16xf32>
    %c0_199 = arith.constant 0 : index
    %c0_200 = arith.constant 0 : index
    %c0_201 = arith.constant 0 : index
    %490 = vector.load %arg32[%c0_199, %c0_200, %c0_201] : memref<4x10x16xf32, #tpu.memory_space<vmem>>, vector<4x10x16xf32>
    tpu.vector_store %arg32[%c0_199, %c0_200, %c0_201], %489 {strides = array<i32>} : memref<4x10x16xf32, #tpu.memory_space<vmem>>, vector<4x10x16xf32>,
    return
  }
  func.func @transform_0(%arg0: i32) -> (i32, i32, i32) {
    %c0_i32 = arith.constant 0 : i32
    %c0_i32_0 = arith.constant 0 : i32
    %c0_i32_1 = arith.constant 0 : i32
    return %arg0, %c0_i32, %c0_i32_0 : i32, i32, i32
  }
  func.func @transform_1(%arg0: i32) -> (i32, i32, i32) {
    %c0_i32 = arith.constant 0 : i32
    %c0_i32_0 = arith.constant 0 : i32
    %c0_i32_1 = arith.constant 0 : i32
    %c0_i32_2 = arith.constant 0 : i32
    return %c0_i32, %c0_i32_0, %c0_i32_1 : i32, i32, i32
  }
  func.func @transform_2(%arg0: i32) -> (i32, i32) {
    %c0_i32 = arith.constant 0 : i32
    %c0_i32_0 = arith.constant 0 : i32
    %c0_i32_1 = arith.constant 0 : i32
    return %c0_i32, %c0_i32_0 : i32, i32
  }
  func.func @transform_3(%arg0: i32) -> (i32, i32) {
    %c0_i32 = arith.constant 0 : i32
    %c0_i32_0 = arith.constant 0 : i32
    %c0_i32_1 = arith.constant 0 : i32
    return %c0_i32, %c0_i32_0 : i32, i32
  }
  func.func @transform_4(%arg0: i32) -> (i32, i32) {
    %c0_i32 = arith.constant 0 : i32
    %c0_i32_0 = arith.constant 0 : i32
    %c0_i32_1 = arith.constant 0 : i32
    return %c0_i32, %c0_i32_0 : i32, i32
  }
  func.func @transform_5(%arg0: i32) -> (i32, i32) {
    %c0_i32 = arith.constant 0 : i32
    %c0_i32_0 = arith.constant 0 : i32
    %c0_i32_1 = arith.constant 0 : i32
    return %c0_i32, %c0_i32_0 : i32, i32
  }
  func.func @transform_6(%arg0: i32) -> (i32, i32, i32) {
    %c0_i32 = arith.constant 0 : i32
    %c0_i32_0 = arith.constant 0 : i32
    %c0_i32_1 = arith.constant 0 : i32
    %c0_i32_2 = arith.constant 0 : i32
    return %c0_i32, %c0_i32_0, %c0_i32_1 : i32, i32, i32
  }
  func.func @transform_7(%arg0: i32) -> (i32, i32) {
    %c0_i32 = arith.constant 0 : i32
    %c0_i32_0 = arith.constant 0 : i32
    %c0_i32_1 = arith.constant 0 : i32
    return %c0_i32, %c0_i32_0 : i32, i32
  }
  func.func @transform_8(%arg0: i32) -> (i32, i32) {
    %c0_i32 = arith.constant 0 : i32
    %c0_i32_0 = arith.constant 0 : i32
    %c0_i32_1 = arith.constant 0 : i32
    return %c0_i32, %c0_i32_0 : i32, i32
  }
  func.func @transform_9(%arg0: i32) -> (i32, i32) {
    %c0_i32 = arith.constant 0 : i32
    %c0_i32_0 = arith.constant 0 : i32
    %c0_i32_1 = arith.constant 0 : i32
    return %c0_i32, %c0_i32_0 : i32, i32
  }
  func.func @transform_10(%arg0: i32) -> (i32, i32, i32) {
    %c0_i32 = arith.constant 0 : i32
    %c0_i32_0 = arith.constant 0 : i32
    %c0_i32_1 = arith.constant 0 : i32
    %c0_i32_2 = arith.constant 0 : i32
    return %c0_i32, %c0_i32_0, %c0_i32_1 : i32, i32, i32
  }
  func.func @transform_11(%arg0: i32) -> (i32, i32) {
    %c0_i32 = arith.constant 0 : i32
    %c0_i32_0 = arith.constant 0 : i32
    %c0_i32_1 = arith.constant 0 : i32
    return %c0_i32, %c0_i32_0 : i32, i32
  }
  func.func @transform_12(%arg0: i32) -> (i32, i32) {
    %c0_i32 = arith.constant 0 : i32
    %c0_i32_0 = arith.constant 0 : i32
    %c0_i32_1 = arith.constant 0 : i32
    return %c0_i32, %c0_i32_0 : i32, i32
  }
  func.func @transform_13(%arg0: i32) -> (i32, i32) {
    %c0_i32 = arith.constant 0 : i32
    %c0_i32_0 = arith.constant 0 : i32
    %c0_i32_1 = arith.constant 0 : i32
    return %c0_i32, %c0_i32_0 : i32, i32
  }
  func.func @transform_14(%arg0: i32) -> (i32, i32) {
    %c0_i32 = arith.constant 0 : i32
    %c0_i32_0 = arith.constant 0 : i32
    %c0_i32_1 = arith.constant 0 : i32
    return %c0_i32, %c0_i32_0 : i32, i32
  }
  func.func @transform_15(%arg0: i32) -> (i32, i32, i32) {
    %c0_i32 = arith.constant 0 : i32
    %c0_i32_0 = arith.constant 0 : i32
    %c0_i32_1 = arith.constant 0 : i32
    %c0_i32_2 = arith.constant 0 : i32
    return %c0_i32, %c0_i32_0, %c0_i32_1 : i32, i32, i32
  }
  func.func @transform_16(%arg0: i32) -> (i32, i32) {
    %c0_i32 = arith.constant 0 : i32
    %c0_i32_0 = arith.constant 0 : i32
    %c0_i32_1 = arith.constant 0 : i32
    return %c0_i32, %c0_i32_0 : i32, i32
  }
  func.func @transform_17(%arg0: i32) -> (i32, i32) {
    %c0_i32 = arith.constant 0 : i32
    %c0_i32_0 = arith.constant 0 : i32
    %c0_i32_1 = arith.constant 0 : i32
    return %c0_i32, %c0_i32_0 : i32, i32
  }
  func.func @transform_18(%arg0: i32) -> (i32, i32) {
    %c0_i32 = arith.constant 0 : i32
    %c0_i32_0 = arith.constant 0 : i32
    %c0_i32_1 = arith.constant 0 : i32
    return %c0_i32, %c0_i32_0 : i32, i32
  }
  func.func @transform_19(%arg0: i32) -> (i32, i32, i32) {
    %c0_i32 = arith.constant 0 : i32
    %c0_i32_0 = arith.constant 0 : i32
    %c0_i32_1 = arith.constant 0 : i32
    %c0_i32_2 = arith.constant 0 : i32
    return %c0_i32, %c0_i32_0, %c0_i32_1 : i32, i32, i32
  }
  func.func @transform_20(%arg0: i32) -> (i32, i32) {
    %c0_i32 = arith.constant 0 : i32
    %c0_i32_0 = arith.constant 0 : i32
    %c0_i32_1 = arith.constant 0 : i32
    return %c0_i32, %c0_i32_0 : i32, i32
  }
  func.func @transform_21(%arg0: i32) -> (i32, i32) {
    %c0_i32 = arith.constant 0 : i32
    %c0_i32_0 = arith.constant 0 : i32
    %c0_i32_1 = arith.constant 0 : i32
    return %c0_i32, %c0_i32_0 : i32, i32
  }
  func.func @transform_22(%arg0: i32) -> (i32, i32) {
    %c0_i32 = arith.constant 0 : i32
    %c0_i32_0 = arith.constant 0 : i32
    %c0_i32_1 = arith.constant 0 : i32
    return %c0_i32, %c0_i32_0 : i32, i32
  }
  func.func @transform_23(%arg0: i32) -> (i32, i32, i32) {
    %c0_i32 = arith.constant 0 : i32
    %c0_i32_0 = arith.constant 0 : i32
    %c0_i32_1 = arith.constant 0 : i32
    %c0_i32_2 = arith.constant 0 : i32
    return %c0_i32, %c0_i32_0, %c0_i32_1 : i32, i32, i32
  }
  func.func @transform_24(%arg0: i32) -> (i32, i32) {
    %c0_i32 = arith.constant 0 : i32
    %c0_i32_0 = arith.constant 0 : i32
    %c0_i32_1 = arith.constant 0 : i32
    return %c0_i32, %c0_i32_0 : i32, i32
  }
  func.func @transform_25(%arg0: i32) -> (i32, i32) {
    %c0_i32 = arith.constant 0 : i32
    %c0_i32_0 = arith.constant 0 : i32
    %c0_i32_1 = arith.constant 0 : i32
    return %c0_i32, %c0_i32_0 : i32, i32
  }
  func.func @transform_26(%arg0: i32) -> (i32, i32) {
    %c0_i32 = arith.constant 0 : i32
    %c0_i32_0 = arith.constant 0 : i32
    %c0_i32_1 = arith.constant 0 : i32
    return %c0_i32, %c0_i32_0 : i32, i32
  }
  func.func @transform_27(%arg0: i32) -> (i32, i32, i32) {
    %c0_i32 = arith.constant 0 : i32
    %c0_i32_0 = arith.constant 0 : i32
    %c0_i32_1 = arith.constant 0 : i32
    %c0_i32_2 = arith.constant 0 : i32
    return %c0_i32, %c0_i32_0, %c0_i32_1 : i32, i32, i32
  }
  func.func @transform_28(%arg0: i32) -> (i32, i32) {
    %c0_i32 = arith.constant 0 : i32
    %c0_i32_0 = arith.constant 0 : i32
    %c0_i32_1 = arith.constant 0 : i32
    return %c0_i32, %c0_i32_0 : i32, i32
  }
  func.func @transform_29(%arg0: i32) -> (i32, i32) {
    %c0_i32 = arith.constant 0 : i32
    %c0_i32_0 = arith.constant 0 : i32
    %c0_i32_1 = arith.constant 0 : i32
    return %c0_i32, %c0_i32_0 : i32, i32
  }
  func.func @transform_30(%arg0: i32) -> (i32, i32) {
    %c0_i32 = arith.constant 0 : i32
    %c0_i32_0 = arith.constant 0 : i32
    %c0_i32_1 = arith.constant 0 : i32
    return %c0_i32, %c0_i32_0 : i32, i32
  }
  func.func @transform_31(%arg0: i32) -> (i32, i32, i32) {
    %c0_i32 = arith.constant 0 : i32
    %c0_i32_0 = arith.constant 0 : i32
    %c0_i32_1 = arith.constant 0 : i32
    return %arg0, %c0_i32, %c0_i32_0 : i32, i32, i32
  }
}

</mosaic_0001>

<bundles_post_ra>
// kernel: newnet_forward.1
= control target key start
LH: loop header
LB: loop body
LE: loop exit
PB: predicated region body
PF: predicated region fallthrough
CT: control target
= control target key end

     0   :  { %s7627_s6 = smov 1   ;;  %s7628_s10 = smov 2   ;;  %s10799_s0 = inlined_call_operand.smem [shape: u32[32], index: -1, kind: input, shape index: {}] }
   0x1   :  { %s7669_s5 = sld [smem:[%s10799_s0]]   ;;  %s7629_s14 = smov 3  }
   0x2   :  { %s7674_s9 = sld [smem:[%s10799_s0 + %s7627_s6]]   ;;  %s7630_s18 = smov 4  }
   0x3   :  { %s7679_s13 = sld [smem:[%s10799_s0 + %s7628_s10]]   ;;  %s7631_s22 = smov 5  }
   0x4   :  { %s7684_s17 = sld [smem:[%s10799_s0 + %s7629_s14]]   ;;  %s7632_s26 = smov 6  }
   0x5   :  { %s7689_s21 = sld [smem:[%s10799_s0 + %s7630_s18]]   ;;  %s7633_s30 = smov 7  }
   0x6   :  { %s7694_s25 = sld [smem:[%s10799_s0 + %s7631_s22]]   ;;  %s7634_s4 = smov 8  }
   0x7   :  { %s7699_s29 = sld [smem:[%s10799_s0 + %s7632_s26]]   ;;  %s7635_s10 = smov 9  }
   0x8   :  { %s7704_s3 = sld [smem:[%s10799_s0 + %s7633_s30]]   ;;  %s7636_s15 = smov 10  }
   0x9   :  { %s7709_s8 = sld [smem:[%s10799_s0 + %s7634_s4]]   ;;  %s7637_s20 = smov 11  }
   0xa   :  { %s7714_s14 = sld [smem:[%s10799_s0 + %s7635_s10]]   ;;  %s7638_s26 = smov 12  }
   0xb   :  { %s7719_s19 = sld [smem:[%s10799_s0 + %s7636_s15]]   ;;  %s7639_s1 = smov 13  }
   0xc   :  { %s7724_s24 = sld [smem:[%s10799_s0 + %s7637_s20]]   ;;  %s7640_s7 = smov 14  }
   0xd   :  { %s7729_s30 = sld [smem:[%s10799_s0 + %s7638_s26]]   ;;  %s7641_s15 = smov 15  }
   0xe   :  { %10860 = sst [smem:[#allocation2_spill]] %s7704_s3  ;;  %s7642_s22 = smov 16  }
   0xf   :  { %s7734_s6 = sld [smem:[%s10799_s0 + %s7639_s1]]   ;;  %s7643_s28 = smov 17  }
  0x10   :  { %s7739_s12 = sld [smem:[%s10799_s0 + %s7640_s7]]   ;;  %s7644_s7 = smov 18  }
  0x11   :  { %s7744_s20 = sld [smem:[%s10799_s0 + %s7641_s15]]   ;;  %s7645_s15 = smov 19  }
  0x12   :  { %s7749_s27 = sld [smem:[%s10799_s0 + %s7642_s22]]   ;;  %s7646_s22 = smov 20  }
  0x13   :  { %10861 = sst [smem:[#allocation3_spill]] %s7729_s30 }
  0x14   :  { %s7754_s4 = sld [smem:[%s10799_s0 + %s7643_s28]]   ;;  %s7647_s28 = smov 21  }
  0x15   :  { %s7759_s30 = sld [smem:[%s10799_s0 + %s7644_s7]]   ;;  %s7648_s7 = smov 22  }
  0x17   :  { %10862 = sst [smem:[#allocation4_spill]] %s7744_s20 }
  0x18   :  { %10863 = sst [smem:[#allocation5_spill]] %s7749_s27 }
  0x19   :  { %s7764_s20 = sld [smem:[%s10799_s0 + %s7645_s15]]   ;;  %s7649_s15 = smov 23  }
  0x1a   :  { %10864 = sst [smem:[#allocation6_spill]] %s7754_s4 }
  0x1b   :  { %10865 = sst [smem:[#allocation7_spill]] %s7759_s30 }
  0x1c   :  { %s7769_s27 = sld [smem:[%s10799_s0 + %s7646_s22]]   ;;  %s7650_s22 = smov 24  }
  0x1d   :  { %s7774_s4 = sld [smem:[%s10799_s0 + %s7647_s28]]   ;;  %s7651_s28 = smov 25  }
  0x1e   :  { %s7779_s30 = sld [smem:[%s10799_s0 + %s7648_s7]]   ;;  %s7652_s7 = smov 26  }
  0x1f   :  { %10866 = sst [smem:[#allocation8_spill]] %s7764_s20 }
  0x20   :  { %s7784_s20 = sld [smem:[%s10799_s0 + %s7649_s15]]   ;;  %s7653_s15 = smov 27  }
  0x22   :  { %10867 = sst [smem:[#allocation9_spill]] %s7769_s27 }
  0x23   :  { %10868 = sst [smem:[#allocation10_spill]] %s7774_s4 }
  0x24   :  { %10869 = sst [smem:[#allocation11_spill]] %s7779_s30 }
  0x25   :  { %s7789_s27 = sld [smem:[%s10799_s0 + %s7650_s22]]   ;;  %s7654_s22 = smov 28  }
  0x26   :  { %10870 = sst [smem:[#allocation12_spill]] %s7784_s20 }
  0x27   :  { %s7794_s4 = sld [smem:[%s10799_s0 + %s7651_s28]]   ;;  %s7655_s28 = smov 29  }
  0x28   :  { %s7799_s30 = sld [smem:[%s10799_s0 + %s7652_s7]]   ;;  %s7656_s7 = smov 30  }
  0x29   :  { %s7804_s20 = sld [smem:[%s10799_s0 + %s7653_s15]]   ;;  %s7657_s15 = smov 31  }
  0x2b   :  { %10871 = sst [smem:[#allocation13_spill]] %s7789_s27 }
  0x2c   :  { %s7809_s27 = sld [smem:[%s10799_s0 + %s7654_s22]]   ;;  %s7826_s22 = smov 0  }
  0x2d   :  { %10872 = sst [smem:[#allocation14_spill]] %s7794_s4 }
  0x2e   :  { %10873 = sst [smem:[#allocation15_spill]] %s7799_s30 }
  0x2f   :  { %10874 = sst [smem:[#allocation16_spill]] %s7804_s20 }
  0x30   :  { %s7814_s4 = sld [smem:[%s10799_s0 + %s7655_s28]]  }
  0x31   :  { %s7819_s30 = sld [smem:[%s10799_s0 + %s7656_s7]]  }
  0x32   :  { %s7824_s20 = sld [smem:[%s10799_s0 + %s7657_s15]]  }
  0x33 LB: > { %s10875_s3 = sld [smem:[#allocation2_spill]]  ;;  %s6316_s23 = sadd.s32 4294967295, %s7625_s22   ;;  %s7625_s22 = sphi %s7826_s22, %s73_s22  }
  0x34   : > { %p6320_p0 = scmp.ge.s32.totalorder %s7625_s22, 1  ;;  %p871_p1 = scmp.lt.s32.totalorder %s7625_s22, 3 }
  0x36   : > { %p872_p2 = pnand %p6320_p0, %p871_p1 }
  0x38   : > { %875 = sbr.rel (%p872_p2) target bundleno = 3286 (0xcd6), region = 144 }
  0x3d   : > { %v7380_v0 = vld [vmem:[%s7674_s9 + $0x8] sm:$0xff]  ;;  %v7382_v1 = vld [vmem:[%s7674_s9 + $0x18] sm:$0xff]  ;;  %s6321_s0 = sshll.u32 %s6316_s23, 2  ;;  %v7379_v3 = vld [vmem:[%s7674_s9] sm:$0xff]  ;;  %vm1003_vm0 = vcmask 261120   ;;  %vm1196_vm1 = vcmask 1043456  }
  0x3e   : > { %v7384_v2 = vld [vmem:[%s7674_s9 + $0x28] sm:$0xff]  ;;  %p954_p3 = scmp.lt.s32.totalorder %s6321_s0, 7  ;;  %1028 = vmatpush.bf16.msra.mxu0 %v7380_v0  ;;  %1084 = vmatpush.bf16.msra.mxu1 %v7382_v1  ;;  %v7381_v4 = vld [vmem:[%s7674_s9 + $0x10] sm:$0xff]  ;;  %v7383_v5 = vld [vmem:[%s7674_s9 + $0x20] sm:$0xff]  ;;  %vm1189_vm2 = vcmask 588800   ;;  %vm1465_vm3 = vcmask 523264  }
  0x3f   : > { %1140 = vmatpush.bf16.msra.mxu2 %v7384_v2  ;;  %v7909_v55 = vld [vmem:[%s7679_s13] sm:$0xff]  ;;  %s10876_s1 = sld [smem:[#allocation3_spill]]  ;;  %s10835_s23 = smov 64   ;;  %vm3592_vm4 = vcmask 122880   ;;  %vm3552_vm5 = vcmask 130048   ;;  %vm3554_vm6 = vcmask 124928  }
  0x40   : > { %s10935_s0 = smov (!%p954_p3, %s6321_s0), 7  ;;  %s10877_s2 = sld [smem:[#allocation4_spill]]  ;;  %vm3590_vm7 = vcmask 130051   ;;  %vm3628_vm8 = vcmask 1040384   ;;  %vm4383_vm9 = vcmask 126976   ;;  %vm4412_vm10 = vcmask 130053  }
  0x41   : > { %s7576_s26 = smul.u32 24, %s10935_s0  ;;  %s10878_s7 = sld [smem:[#allocation8_spill]]  ;;  %vm4489_vm11 = vcmask 1041408   ;;  %vm5308_vm12 = vcmask 129027   ;;  %vm5337_vm13 = vcmask 130055   ;;  %vm5382_vm14 = vcmask 1042432  }
  0x42   : > { %1029 = vmatpush.bf16.msra.mxu0 %v7379_v3  ;;  %1085 = vmatpush.bf16.msra.mxu1 %v7381_v4  ;;  %s10880_s10 = sld [smem:[#allocation12_spill]]  ;;  %vm6209_vm15 = vcmask 1044480  }
  0x43   : > { %1141 = vmatpush.bf16.msra.mxu2 %v7383_v5  ;;  %s7844_s28 = scalar_lea.vmem %s7669_s5, %s7576_s26  ;;  %s10883_s11 = sld [smem:[#allocation5_spill]] }
  0x44   : > { %v968_v6 = vld [vmem:[%s7844_s28] sm:$0xff]  ;;  %v969_v7 = vld [vmem:[%s7844_s28 + $0x8] sm:$0xff]  ;;  %v970_v9 = vld [vmem:[%s7844_s28 + $0x10] sm:$0xff]  ;;  %s10884_s15 = sld [smem:[#allocation7_spill]] }
  0x45   : > { %v7848_v8 = vpack.c.bf16 %v969_v7, %v968_v6  ;;  %v971_v10 = vld [vmem:[%s7844_s28 + $0x18] sm:$0xff]  ;;  %v972_v12 = vld [vmem:[%s7844_s28 + $0x20] sm:$0xff]  ;;  %v973_v13 = vld [vmem:[%s7844_s28 + $0x28] sm:$0xff]  ;;  %s10885_s16 = sld [smem:[#allocation6_spill]] }
  0x46   : > { %v7858_v11 = vpack.c.bf16 %v971_v10, %v970_v9  ;;  %v7868_v14 = vpack.c.bf16 %v973_v13, %v972_v12  ;;  %v974_v15 = vld [vmem:[%s7844_s28 + $0x30] sm:$0xff]  ;;  %v975_v16 = vld [vmem:[%s7844_s28 + $0x38] sm:$0xff]  ;;  %v976_v18 = vld [vmem:[%s7844_s28 + $0x40] sm:$0xff]  ;;  %s10886_s18 = sld [smem:[#allocation9_spill]] }
  0x47   : > { %6334 = vmatmul.msk.bf16.vlgmr.msra.gmra.mxu0 %vm1003_vm0, %v7848_v8  ;;  %6352 = vmatmul.msk.bf16.vlgmr.msra.gmra.mxu1 %vm1003_vm0, %v7848_v8  ;;  %v7878_v17 = vpack.c.bf16 %v975_v16, %v974_v15  ;;  %v977_v19 = vld [vmem:[%s7844_s28 + $0x48] sm:$0xff]  ;;  %v978_v21 = vld [vmem:[%s7844_s28 + $0x50] sm:$0xff]  ;;  %v979_v22 = vld [vmem:[%s7844_s28 + $0x58] sm:$0xff]  ;;  %s10887_s26 = sld [smem:[#allocation11_spill]] }
  0x48   : > { %6370 = vmatmul.msk.bf16.vlgmr.msra.gmra.mxu2 %vm1003_vm0, %v7848_v8  ;;  %v7888_v20 = vpack.c.bf16 %v977_v19, %v976_v18  ;;  %v7898_v23 = vpack.c.bf16 %v979_v22, %v978_v21  ;;  %v1175_v6 = vld [vmem:[%s7679_s13 + $0x8] sm:$0xf]  ;;  %v7386_v19 = vld [vmem:[%s7694_s25] sm:$0xff]  ;;  %s10888_s28 = sld [smem:[#allocation10_spill]] }
  0x49   : > { %v1186_v7 = vunpack.c.l.b16 %v1175_v6  ;;  %v7387_v15 = vld [vmem:[%s7694_s25 + $0x8] sm:$0xff] }
  0x4b   : > { %v1188_v12 = vpack.c.b16 %v1186_v7, %v1186_v7 }
  0x57   : > { %6335 = vmatmul.msk.bf16.gmra.mxu0 %vm1003_vm0, %v7858_v11  ;;  %6353 = vmatmul.msk.bf16.gmra.mxu1 %vm1003_vm0, %v7858_v11 }
  0x58   : > { %6371 = vmatmul.msk.bf16.gmra.mxu2 %vm1003_vm0, %v7858_v11 }
  0x67   : > { %6336 = vmatmul.msk.bf16.gmra.mxu0 %vm1003_vm0, %v7868_v14  ;;  %6354 = vmatmul.msk.bf16.gmra.mxu1 %vm1003_vm0, %v7868_v14 }
  0x68   : > { %6372 = vmatmul.msk.bf16.gmra.mxu2 %vm1003_vm0, %v7868_v14 }
  0x77   : > { %6337 = vmatmul.msk.bf16.gmra.mxu0 %vm1003_vm0, %v7878_v17  ;;  %6355 = vmatmul.msk.bf16.gmra.mxu1 %vm1003_vm0, %v7878_v17 }
  0x78   : > { %6373 = vmatmul.msk.bf16.gmra.mxu2 %vm1003_vm0, %v7878_v17 }
  0x87   : > { %6338 = vmatmul.msk.bf16.gmra.mxu0 %vm1003_vm0, %v7888_v20  ;;  %6356 = vmatmul.msk.bf16.gmra.mxu1 %vm1003_vm0, %v7888_v20 }
  0x88   : > { %6374 = vmatmul.msk.bf16.gmra.mxu2 %vm1003_vm0, %v7888_v20 }
  0x97   : > { %6339 = vmatmul.msk.bf16.gmra.mxu0 %vm1003_vm0, %v7898_v23  ;;  %6357 = vmatmul.msk.bf16.gmra.mxu1 %vm1003_vm0, %v7898_v23 }
  0x98   : > { %6375 = vmatmul.msk.bf16.gmra.mxu2 %vm1003_vm0, %v7898_v23 }
  0xc4   : > { %v1031_v24 = vpop.f32.mrf.mxu0  ;;  %v1087_v25 = vpop.f32.mrf.mxu1 }
  0xcb   : > { %v1143_v26 = vpop.f32.mrf.mxu2 }
  0xcc   : > { %v1033_v27 = vpop.f32.mrf.mxu0  ;;  %v1089_v28 = vpop.f32.mrf.mxu1 }
  0xcd   : > { %v1176_v44 = vpack.c.bf16 %v1033_v27, %v1031_v24 }
  0xd3   : > { %v1145_v29 = vpop.f32.mrf.mxu2 }
  0xd4   : > { %v1036_v30 = vpop.f32.mrf.mxu0  ;;  %v1092_v31 = vpop.f32.mrf.mxu1  ;;  %v1179_v37 = vpack.c.bf16 %v1145_v29, %v1143_v26 }
  0xd5   : > { %v1178_v39 = vpack.c.bf16 %v1092_v31, %v1089_v28  ;;  %v1177_v42 = vpack.c.bf16 %v1087_v25, %v1036_v30 }
  0xdb   : > { %v1148_v32 = vpop.f32.mrf.mxu2 }
  0xdc   : > { %v1180_v33 = vpack.c.bf16 %v1148_v32, %v1148_v32  ;;  %v1094_v34 = vpop.f32.mrf.mxu1  ;;  %v1038_v35 = vpop.f32.mrf.mxu0  ;;  %v7391_v32 = vld [vmem:[%s7689_s21 + $0x18] sm:$0xff] }
  0xde   : > { %v1198_v36 = vsel %vm1196_vm1, %v1180_v33, 0  ;;  %v7390_v33 = vld [vmem:[%s7689_s21 + $0x10] sm:$0xff] }
  0xdf   : > { %1203 = vmatpush.bf16.msrb.mxu0 %v1198_v36 }
  0xe3   : > { %v1150_v38 = vpop.f32.mrf.mxu2  ;;  %1204 = vmatpush.bf16.msrb.mxu0 %v1179_v37 }
  0xe4   : > { %v1097_v40 = vpop.f32.mrf.mxu1  ;;  %v1041_v41 = vpop.f32.mrf.mxu0 }
  0xe5   : > { %v1218_v59 = vpack.c.bf16 %v1041_v41, %v1038_v35  ;;  %v7388_v35 = vld [vmem:[%s7689_s21] sm:$0xff] }
  0xe7   : > { %1205 = vmatpush.bf16.msrb.mxu0 %v1178_v39 }
  0xeb   : > { %v1153_v43 = vpop.f32.mrf.mxu2  ;;  %1206 = vmatpush.bf16.msrb.mxu0 %v1177_v42 }
  0xec   : > { %v1099_v45 = vpop.f32.mrf.mxu1  ;;  %v1043_v46 = vpop.f32.mrf.mxu0  ;;  %v1221_v50 = vpack.c.bf16 %v1153_v43, %v1150_v38 }
  0xed   : > { %v1220_v54 = vpack.c.bf16 %v1099_v45, %v1097_v40  ;;  %v1219_v56 = vpack.c.bf16 %v1094_v34, %v1043_v46 }
  0xef   : > { %1207 = vmatpush.bf16.msrb.mxu0 %v1176_v44 }
  0xf2   : > { %6380 = vmatmul.msk.bf16.vlgmr.msrb.gmra.mxu0 %vm1189_vm2, %v7909_v55 }
  0xf3   : > { %v1155_v47 = vpop.f32.mrf.mxu2 }
  0xf4   : > { %v1222_v48 = vpack.c.bf16 %v1155_v47, %v1155_v47  ;;  %v1102_v51 = vpop.f32.mrf.mxu1  ;;  %v1046_v53 = vpop.f32.mrf.mxu0 }
  0xf6   : > { %v1224_v49 = vsel %vm1196_vm1, %v1222_v48, 0 }
  0xf7   : > { %1229 = vmatpush.bf16.msra.mxu3 %v1224_v49 }
  0xfb   : > { %v1158_v52 = vpop.f32.mrf.mxu2  ;;  %1230 = vmatpush.bf16.msra.mxu3 %v1221_v50 }
  0xfc   : > { %v1104_v58 = vpop.f32.mrf.mxu1  ;;  %v1048_v60 = vpop.f32.mrf.mxu0 }
  0xfd   : > { %v1244_v16 = vpack.c.bf16 %v1048_v60, %v1046_v53 }
  0xff   : > { %1231 = vmatpush.bf16.msra.mxu3 %v1220_v54 }
 0x102   : > { %6381 = vmatmul.msk.bf16.gmra.mxu0 %vm1189_vm2, %v1188_v12 }
 0x103   : > { %v1160_v57 = vpop.f32.mrf.mxu2  ;;  %1232 = vmatpush.bf16.msra.mxu3 %v1219_v56 }
 0x104   : > { %v1107_v63 = vpop.f32.mrf.mxu1  ;;  %v1051_v1 = vpop.f32.mrf.mxu0  ;;  %v1247_v2 = vpack.c.bf16 %v1160_v57, %v1158_v52 }
 0x105   : > { %v1246_v4 = vpack.c.bf16 %v1107_v63, %v1104_v58  ;;  %v1245_v9 = vpack.c.bf16 %v1102_v51, %v1051_v1 }
 0x107   : > { %1233 = vmatpush.bf16.msra.mxu3 %v1218_v59 }
 0x10a   : > { %6382 = vmatmul.msk.bf16.vlgmr.msra.gmra.mxu3 %vm1189_vm2, %v7909_v55 }
 0x10b   : > { %v1163_v61 = vpop.f32.mrf.mxu2 }
 0x10c   : > { %v1248_v62 = vpack.c.bf16 %v1163_v61, %v1163_v61  ;;  %v1109_v5 = vpop.f32.mrf.mxu1  ;;  %v1053_v10 = vpop.f32.mrf.mxu0 }
 0x10e   : > { %v1250_v0 = vsel %vm1196_vm1, %v1248_v62, 0 }
 0x10f   : > { %1255 = vmatpush.bf16.msrb.mxu1 %v1250_v0  ;;  %7566 = vmatpush.bf16.msrb.mxu3 %v1250_v0 }
 0x113   : > { %v1165_v3 = vpop.f32.mrf.mxu2  ;;  %1256 = vmatpush.bf16.msrb.mxu1 %v1247_v2  ;;  %7567 = vmatpush.bf16.msrb.mxu3 %v1247_v2 }
 0x114   : > { %v1112_v18 = vpop.f32.mrf.mxu1  ;;  %v1056_v22 = vpop.f32.mrf.mxu0 }
 0x115   : > { %v1270_v31 = vpack.c.bf16 %v1056_v22, %v1053_v10 }
 0x117   : > { %1257 = vmatpush.bf16.msrb.mxu1 %v1246_v4  ;;  %7568 = vmatpush.bf16.msrb.mxu3 %v1246_v4 }
 0x11a   : > { %6383 = vmatmul.msk.bf16.gmra.mxu3 %vm1189_vm2, %v1188_v12 }
 0x11b   : > { %v1168_v13 = vpop.f32.mrf.mxu2  ;;  %1258 = vmatpush.bf16.msrb.mxu1 %v1245_v9  ;;  %7569 = vmatpush.bf16.msrb.mxu3 %v1245_v9 }
 0x11c   : > { %v1114_v26 = vpop.f32.mrf.mxu1  ;;  %v1273_v27 = vpack.c.bf16 %v1168_v13, %v1165_v3  ;;  %v1058_v29 = vpop.f32.mrf.mxu0 }
 0x11d   : > { %v1272_v28 = vpack.c.bf16 %v1114_v26, %v1112_v18  ;;  %v1271_v30 = vpack.c.bf16 %v1109_v5, %v1058_v29 }
 0x11f   : > { %1259 = vmatpush.bf16.msrb.mxu1 %v1244_v16  ;;  %7570 = vmatpush.bf16.msrb.mxu3 %v1244_v16 }
 0x122   : > { %6384 = vmatmul.msk.bf16.vlgmr.msrb.gmra.mxu1 %vm1189_vm2, %v7909_v55 }
 0x123   : > { %1318 = vmatpush.bf16.msra.mxu1 %v7387_v15  ;;  %v1170_v21 = vpop.f32.mrf.mxu2 }
 0x124   : > { %v1274_v24 = vpack.c.bf16 %v1170_v21, %v1170_v21 }
 0x126   : > { %v1276_v25 = vsel %vm1196_vm1, %v1274_v24, 0 }
 0x127   : > { %1319 = vmatpush.bf16.msra.mxu1 %v7386_v19  ;;  %1281 = vmatpush.bf16.msra.mxu0 %v1276_v25 }
 0x128   : > { %7571 = vmatpush.bf16.msrb.mxu2 %v1276_v25 }
 0x12a   : > { %6385 = vmatmul.msk.bf16.vlgmr.msrb.gmra.mxu3 %vm1189_vm2, %v1188_v12 }
 0x12b   : > { %1282 = vmatpush.bf16.msra.mxu0 %v1273_v27 }
 0x12c   : > { %7572 = vmatpush.bf16.msrb.mxu2 %v1273_v27 }
 0x12f   : > { %1283 = vmatpush.bf16.msra.mxu0 %v1272_v28 }
 0x130   : > { %7573 = vmatpush.bf16.msrb.mxu2 %v1272_v28 }
 0x132   : > { %6396 = vmatmul.msk.bf16.vlgmr.msra.gmra.mxu1 %vm1003_vm0, %v7848_v8 }
 0x133   : > { %1284 = vmatpush.bf16.msra.mxu0 %v1271_v30 }
 0x134   : > { %7574 = vmatpush.bf16.msrb.mxu2 %v1271_v30 }
 0x137   : > { %1285 = vmatpush.bf16.msra.mxu0 %v1270_v31 }
 0x138   : > { %7575 = vmatpush.bf16.msrb.mxu2 %v1270_v31 }
 0x13a   : > { %6386 = vmatmul.msk.bf16.vlgmr.msra.gmra.mxu0 %vm1189_vm2, %v7909_v55 }
 0x13b   : > { %6387 = vmatmul.msk.bf16.vlgmr.msrb.gmra.mxu2 %vm1189_vm2, %v1188_v12 }
 0x13c   : > { %1488 = vmatpush.bf16.msra.mxu2 %v7391_v32 }
 0x140   : > { %1489 = vmatpush.bf16.msra.mxu2 %v7390_v33 }
 0x142   : > { %6397 = vmatmul.msk.bf16.gmra.mxu1 %vm1003_vm0, %v7858_v11  ;;  %v7389_v11 = vld [vmem:[%s7689_s21 + $0x8] sm:$0xff] }
 0x144   : > { %1490 = vmatpush.bf16.msra.mxu2 %v7389_v11 }
 0x148   : > { %1491 = vmatpush.bf16.msra.mxu2 %v7388_v35 }
 0x152   : > { %6398 = vmatmul.msk.bf16.gmra.mxu1 %vm1003_vm0, %v7868_v14 }
 0x162   : > { %6399 = vmatmul.msk.bf16.gmra.mxu1 %vm1003_vm0, %v7878_v17 }
 0x16f   : > { %v1209_v8 = vpop.f32.mrf.mxu0 }
 0x172   : > { %6400 = vmatmul.msk.bf16.gmra.mxu1 %vm1003_vm0, %v7888_v20 }
 0x177   : > { %v1211_v34 = vpop.f32.mrf.mxu0 }
 0x17f   : > { %v1214_v36 = vpop.f32.mrf.mxu0 }
 0x182   : > { %6401 = vmatmul.msk.bf16.gmra.mxu1 %vm1003_vm0, %v7898_v23  ;;  %v7949_v23 = vld [vmem:[%s7684_s17] sm:$0xff]  ;;  %vm6219_vm0 = vcmask 123904  }
 0x183   : > { %v7952_v39 = vperm.slane %v7949_v23, 4  ;;  %v7955_v41 = vperm.slane %v7949_v23, 0  ;;  %v7960_v45 = vperm.slane %v7949_v23, 5  ;;  %v7963_v46 = vperm.slane %v7949_v23, 1 }
 0x185   : > { %v1378_v43 = vmul.f32 %v7955_v41, %v1209_v8  ;;  %v1379_v48 = vmul.f32 %v7955_v41, %v1211_v34  ;;  %v1380_v61 = vmul.f32 %v7955_v41, %v1214_v36 }
 0x187   : > { %v1216_v20 = vpop.f32.mrf.mxu0  ;;  %v1391_v47 = vadd.f32 %v7963_v46, %v1378_v43  ;;  %v1392_v53 = vadd.f32 %v7963_v46, %v1379_v48  ;;  %v1393_v0 = vadd.f32 %v7963_v46, %v1380_v61 }
 0x18d   : > { %v1235_v17 = vpop.f32.mrf.mxu3 }
 0x18e   : > { %v1381_v63 = vmul.f32 %v7955_v41, %v1235_v17 }
 0x190   : > { %v1394_v3 = vadd.f32 %v7963_v46, %v1381_v63 }
 0x195   : > { %v1237_v38 = vpop.f32.mrf.mxu3 }
 0x196   : > { %v1382_v18 = vmul.f32 %v7955_v41, %v1237_v38 }
 0x198   : > { %v1395_v24 = vadd.f32 %v7963_v46, %v1382_v18 }
 0x19d   : > { %v1240_v42 = vpop.f32.mrf.mxu3 }
 0x19e   : > { %v1383_v19 = vmul.f32 %v7955_v41, %v1240_v42 }
 0x19f   : > { %v7944_v14 = vpop.f32.mrf.mxu1 }
 0x1a0   : > { %v1396_v25 = vadd.f32 %v7963_v46, %v1383_v19  ;;  %v1384_v11 = vmul.f32 %v7955_v41, %v7944_v14 }
 0x1a2   : > { %v1397_v38 = vadd.f32 %v7963_v46, %v1384_v11  ;;  %v7398_v11 = vld [vmem:[%s7699_s29 + $0x30] sm:$0xff] }
 0x1a5   : > { %v1242_v52 = vpop.f32.mrf.mxu3 }
 0x1a7   : > { %v7946_v37 = vpop.f32.mrf.mxu1 }
 0x1a8   : > { %v1385_v35 = vmul.f32 %v7955_v41, %v7946_v37 }
 0x1aa   : > { %v1398_v42 = vadd.f32 %v7963_v46, %v1385_v35  ;;  %v7402_v35 = vld [vmem:[%s7699_s29 + $0x50] sm:$0xff] }
 0x1ad   : > { %v1266_v16 = vpop.f32.mrf.mxu3 }
 0x1ae   : > { %v1386_v52 = vmul.f32 %v7955_v41, %v1266_v16 }
 0x1af   : > { %v1321_v40 = vpop.f32.mrf.mxu1 }
 0x1b0   : > { %v1352_v44 = vmul.f32 %v7952_v39, %v1321_v40 }
 0x1b2   : > { %v1365_v49 = vadd.f32 %v7960_v45, %v1352_v44 }
 0x1b4   : > { %v7970_v54 = vadd.f32 %v1391_v47, %v1365_v49 }
 0x1b5   : > { %v1268_v29 = vpop.f32.mrf.mxu3 }
 0x1b6   : > { %v1415_v57 = vmax.f32 %v7970_v54, 0.0 }
 0x1b7   : > { %v1323_v50 = vpop.f32.mrf.mxu1 }
 0x1b8   : > { %v1353_v51 = vmul.f32 %v7952_v39, %v1323_v50 }
 0x1ba   : > { %v1366_v55 = vadd.f32 %v7960_v45, %v1353_v51 }
 0x1bc   : > { %v7973_v56 = vadd.f32 %v1392_v53, %v1366_v55  ;;  %v1287_v53 = vpop.f32.mrf.mxu0 }
 0x1be   : > { %v1416_v58 = vmax.f32 %v7973_v56, 0.0  ;;  %v1292_v17 = vpop.f32.mrf.mxu2 }
 0x1bf   : > { %v1326_v59 = vpop.f32.mrf.mxu1 }
 0x1c0   : > { %v1427_v60 = vpack.c.bf16 %v1416_v58, %v1415_v57  ;;  %v1354_v62 = vmul.f32 %v7952_v39, %v1326_v59  ;;  %v1399_v59 = vadd.f32 %v7963_v46, %v1386_v52 }
 0x1c2   : > { %6418 = vmatmul.msk.bf16.vlgmr.msra.gmra.mxu2 %vm1465_vm3, %v1427_v60  ;;  %v1367_v1 = vadd.f32 %v7960_v45, %v1354_v62  ;;  %v1387_v60 = vmul.f32 %v7955_v41, %v1287_v53 }
 0x1c4   : > { %v7989_v5 = vadd.f32 %v1393_v0, %v1367_v1  ;;  %v1400_v63 = vadd.f32 %v7963_v46, %v1387_v60 }
 0x1c6   : > { %v1417_v9 = vmax.f32 %v7989_v5, 0.0  ;;  %v1294_v48 = vpop.f32.mrf.mxu2 }
 0x1c7   : > { %v1328_v2 = vpop.f32.mrf.mxu1 }
 0x1c8   : > { %v1355_v4 = vmul.f32 %v7952_v39, %v1328_v2 }
 0x1ca   : > { %v1368_v6 = vadd.f32 %v7960_v45, %v1355_v4  ;;  %v1289_v4 = vpop.f32.mrf.mxu0 }
 0x1cb   : > { %v1388_v16 = vmul.f32 %v7955_v41, %v1289_v4 }
 0x1cc   : > { %v7992_v7 = vadd.f32 %v1394_v3, %v1368_v6 }
 0x1cd   : > { %v1401_v19 = vadd.f32 %v7963_v46, %v1388_v16 }
 0x1ce   : > { %v1418_v10 = vmax.f32 %v7992_v7, 0.0 }
 0x1cf   : > { %v1331_v12 = vpop.f32.mrf.mxu1 }
 0x1d0   : > { %v1428_v13 = vpack.c.bf16 %v1418_v10, %v1417_v9  ;;  %v1356_v15 = vmul.f32 %v7952_v39, %v1331_v12 }
 0x1d2   : > { %6419 = vmatmul.msk.bf16.gmra.mxu2 %vm1465_vm3, %v1428_v13  ;;  %v1369_v21 = vadd.f32 %v7960_v45, %v1356_v15 }
 0x1d4   : > { %v8008_v27 = vadd.f32 %v1395_v24, %v1369_v21  ;;  %v1389_v21 = vmul.f32 %v7955_v41, %v1292_v17  ;;  %v7397_v17 = vld [vmem:[%s7699_s29 + $0x28] sm:$0xff] }
 0x1d6   : > { %v1419_v31 = vmax.f32 %v8008_v27, 0.0 }
 0x1d7   : > { %v1333_v22 = vpop.f32.mrf.mxu1 }
 0x1d8   : > { %v1357_v26 = vmul.f32 %v7952_v39, %v1333_v22 }
 0x1da   : > { %v1370_v28 = vadd.f32 %v7960_v45, %v1357_v26 }
 0x1dc   : > { %v8011_v30 = vadd.f32 %v1396_v25, %v1370_v28  ;;  %v1402_v25 = vadd.f32 %v7963_v46, %v1389_v21  ;;  %v7403_v46 = vld [vmem:[%s7699_s29 + $0x58] sm:$0xff] }
 0x1dd   : > { %1778 = vmatpush.bf16.msrb.mxu1 %v7403_v46 }
 0x1de   : > { %v1420_v8 = vmax.f32 %v8011_v30, 0.0 }
 0x1df   : > { %v1336_v32 = vpop.f32.mrf.mxu1 }
 0x1e0   : > { %v1429_v33 = vpack.c.bf16 %v1420_v8, %v1419_v31  ;;  %v1358_v34 = vmul.f32 %v7952_v39, %v1336_v32 }
 0x1e1   : > { %1779 = vmatpush.bf16.msrb.mxu1 %v7402_v35 }
 0x1e2   : > { %6420 = vmatmul.msk.bf16.gmra.mxu2 %vm1465_vm3, %v1429_v33  ;;  %v1371_v36 = vadd.f32 %v7960_v45, %v1358_v34  ;;  %v7399_v34 = vld [vmem:[%s7699_s29 + $0x38] sm:$0xff] }
 0x1e3   : > { %1706 = vmatpush.bf16.msrb.mxu0 %v7399_v34 }
 0x1e4   : > { %v8029_v43 = vadd.f32 %v1397_v38, %v1371_v36  ;;  %v7393_v36 = vld [vmem:[%s7699_s29 + $0x8] sm:$0xff]  ;;  %v7392_v38 = vld [vmem:[%s7699_s29] sm:$0xff] }
 0x1e6   : > { %v1421_v14 = vmax.f32 %v8029_v43, 0.0 }
 0x1e7   : > { %v1338_v20 = vpop.f32.mrf.mxu1  ;;  %1707 = vmatpush.bf16.msrb.mxu0 %v7398_v11 }
 0x1e8   : > { %v1359_v40 = vmul.f32 %v7952_v39, %v1338_v20  ;;  %v7401_v20 = vld [vmem:[%s7699_s29 + $0x48] sm:$0xff] }
 0x1e9   : > { %1780 = vmatpush.bf16.msrb.mxu1 %v7401_v20 }
 0x1ea   : > { %v1372_v44 = vadd.f32 %v7960_v45, %v1359_v40  ;;  %v7396_v40 = vld [vmem:[%s7699_s29 + $0x20] sm:$0xff] }
 0x1eb   : > { %1708 = vmatpush.bf16.msrb.mxu0 %v7397_v17 }
 0x1ec   : > { %v8032_v47 = vadd.f32 %v1398_v42, %v1372_v44  ;;  %v7400_v42 = vld [vmem:[%s7699_s29 + $0x40] sm:$0xff]  ;;  %v8092_v44 = vperm.slane %v7949_v23, 2 }
 0x1ed   : > { %1781 = vmatpush.bf16.msrb.mxu1 %v7400_v42 }
 0x1ee   : > { %v1422_v37 = vmax.f32 %v8032_v47, 0.0 }
 0x1ef   : > { %v1341_v49 = vpop.f32.mrf.mxu1  ;;  %1709 = vmatpush.bf16.msrb.mxu0 %v7396_v40 }
 0x1f0   : > { %v1360_v50 = vmul.f32 %v7952_v39, %v1341_v49  ;;  %v1430_v51 = vpack.c.bf16 %v1422_v37, %v1421_v14 }
 0x1f2   : > { %6421 = vmatmul.msk.bf16.gmra.mxu2 %vm1465_vm3, %v1430_v51  ;;  %v1373_v55 = vadd.f32 %v7960_v45, %v1360_v50  ;;  %v8096_v50 = vperm.slane %v7949_v23, 3 }
 0x1f4   : > { %v8046_v62 = vadd.f32 %v1399_v59, %v1373_v55 }
 0x1f6   : > { %v1423_v2 = vmax.f32 %v8046_v62, 0.0 }
 0x1f7   : > { %v1343_v61 = vpop.f32.mrf.mxu1 }
 0x1f8   : > { %v1361_v0 = vmul.f32 %v7952_v39, %v1343_v61 }
 0x1fa   : > { %v1374_v1 = vadd.f32 %v7960_v45, %v1361_v0 }
 0x1fc   : > { %v8052_v3 = vadd.f32 %v1400_v63, %v1374_v1 }
 0x1fe   : > { %v1424_v6 = vmax.f32 %v8052_v3, 0.0 }
 0x1ff   : > { %v1346_v12 = vpop.f32.mrf.mxu1 }
 0x200   : > { %v1362_v13 = vmul.f32 %v7952_v39, %v1346_v12  ;;  %v1431_v15 = vpack.c.bf16 %v1424_v6, %v1423_v2 }
 0x202   : > { %6422 = vmatmul.msk.bf16.gmra.mxu2 %vm1465_vm3, %v1431_v15  ;;  %v1375_v18 = vadd.f32 %v7960_v45, %v1362_v13 }
 0x204   : > { %v8065_v24 = vadd.f32 %v1401_v19, %v1375_v18 }
 0x206   : > { %v1425_v29 = vmax.f32 %v8065_v24, 0.0 }
 0x207   : > { %v1348_v22 = vpop.f32.mrf.mxu1 }
 0x208   : > { %v1363_v26 = vmul.f32 %v7952_v39, %v1348_v22  ;;  %v7395_v39 = vld [vmem:[%s7699_s29 + $0x18] sm:$0xff] }
 0x209   : > { %1634 = vmatpush.bf16.msra.mxu3 %v7395_v39 }
 0x20a   : > { %v1376_v28 = vadd.f32 %v7960_v45, %v1363_v26  ;;  %v7394_v45 = vld [vmem:[%s7699_s29 + $0x10] sm:$0xff] }
 0x20c   : > { %v8071_v32 = vadd.f32 %v1402_v25, %v1376_v28 }
 0x20d   : > { %1635 = vmatpush.bf16.msra.mxu3 %v7394_v45 }
 0x20e   : > { %v1426_v33 = vmax.f32 %v8071_v32, 0.0 }
 0x210   : > { %v1432_v41 = vpack.c.bf16 %v1426_v33, %v1425_v29 }
 0x211   : > { %1636 = vmatpush.bf16.msra.mxu3 %v7393_v36 }
 0x212   : > { %6423 = vmatmul.msk.bf16.gmra.mxu2 %vm1465_vm3, %v1432_v41 }
 0x215   : > { %1637 = vmatpush.bf16.msra.mxu3 %v7392_v38 }
 0x245   : > { %v1493_v48 = vpop.f32.mrf.mxu2 }
 0x246   : > { %v1524_v49 = vmul.f32 %v8092_v44, %v1493_v48 }
 0x248   : > { %v1537_v51 = vadd.f32 %v8096_v50, %v1524_v49 }
 0x24a   : > { %v8102_v55 = vadd.f32 %v1537_v51, %v1415_v57 }
 0x24c   : > { %v1561_v61 = vmax.f32 %v8102_v55, 0.0 }
 0x24d   : > { %v1495_v52 = vpop.f32.mrf.mxu2 }
 0x24e   : > { %v1525_v53 = vmul.f32 %v8092_v44, %v1495_v52 }
 0x250   : > { %v1538_v59 = vadd.f32 %v8096_v50, %v1525_v53 }
 0x252   : > { %v8107_v60 = vadd.f32 %v1538_v59, %v1416_v58 }
 0x254   : > { %v1562_v23 = vmax.f32 %v8107_v60, 0.0 }
 0x255   : > { %v1498_v63 = vpop.f32.mrf.mxu2 }
 0x256   : > { %v1574_v0 = vpack.c.bf16 %v1562_v23, %v1561_v61  ;;  %v1526_v54 = vmul.f32 %v8092_v44, %v1498_v63 }
 0x258   : > { %6440 = vmatmul.msk.bf16.vlgmr.msra.gmra.mxu3 %vm1465_vm3, %v1574_v0  ;;  %6470 = vmatmul.msk.bf16.vlgmr.msrb.gmra.mxu0 %vm1465_vm3, %v1574_v0  ;;  %v1539_v56 = vadd.f32 %v8096_v50, %v1526_v54 }
 0x259   : > { %6500 = vmatmul.msk.bf16.vlgmr.msrb.gmra.mxu1 %vm1465_vm3, %v1574_v0 }
 0x25a   : > { %v8123_v1 = vadd.f32 %v1539_v56, %v1417_v9 }
 0x25c   : > { %v1563_v13 = vmax.f32 %v8123_v1, 0.0 }
 0x25d   : > { %v1500_v57 = vpop.f32.mrf.mxu2 }
 0x25e   : > { %v1527_v58 = vmul.f32 %v8092_v44, %v1500_v57 }
 0x260   : > { %v1540_v4 = vadd.f32 %v8096_v50, %v1527_v58 }
 0x262   : > { %v8128_v12 = vadd.f32 %v1540_v4, %v1418_v10 }
 0x264   : > { %v1564_v15 = vmax.f32 %v8128_v12, 0.0 }
 0x265   : > { %v1503_v16 = vpop.f32.mrf.mxu2 }
 0x266   : > { %v1575_v18 = vpack.c.bf16 %v1564_v15, %v1563_v13  ;;  %v1528_v5 = vmul.f32 %v8092_v44, %v1503_v16 }
 0x268   : > { %6441 = vmatmul.msk.bf16.gmra.mxu3 %vm1465_vm3, %v1575_v18  ;;  %6471 = vmatmul.msk.bf16.gmra.mxu0 %vm1465_vm3, %v1575_v18  ;;  %v1541_v7 = vadd.f32 %v8096_v50, %v1528_v5 }
 0x269   : > { %6501 = vmatmul.msk.bf16.gmra.mxu1 %vm1465_vm3, %v1575_v18 }
 0x26a   : > { %v8144_v19 = vadd.f32 %v1541_v7, %v1419_v31 }
 0x26c   : > { %v1565_v25 = vmax.f32 %v8144_v19, 0.0 }
 0x26d   : > { %v1505_v9 = vpop.f32.mrf.mxu2 }
 0x26e   : > { %v1529_v10 = vmul.f32 %v8092_v44, %v1505_v9 }
 0x270   : > { %v1542_v21 = vadd.f32 %v8096_v50, %v1529_v10 }
 0x272   : > { %v8149_v22 = vadd.f32 %v1542_v21, %v1420_v8 }
 0x274   : > { %v1566_v26 = vmax.f32 %v8149_v22, 0.0 }
 0x275   : > { %v1508_v28 = vpop.f32.mrf.mxu2 }
 0x276   : > { %v1576_v41 = vpack.c.bf16 %v1566_v26, %v1565_v25  ;;  %v1530_v27 = vmul.f32 %v8092_v44, %v1508_v28 }
 0x278   : > { %6442 = vmatmul.msk.bf16.gmra.mxu3 %vm1465_vm3, %v1576_v41  ;;  %6472 = vmatmul.msk.bf16.gmra.mxu0 %vm1465_vm3, %v1576_v41  ;;  %v1543_v30 = vadd.f32 %v8096_v50, %v1530_v27  ;;  %v8225_v27 = vld [vmem:[%s10875_s3] sm:$0xff] }
 0x279   : > { %6502 = vmatmul.msk.bf16.gmra.mxu1 %vm1465_vm3, %v1576_v41 }
 0x27a   : > { %v8165_v46 = vadd.f32 %v1543_v30, %v1421_v14 }
 0x27c   : > { %v1567_v45 = vmax.f32 %v8165_v46, 0.0 }
 0x27d   : > { %v1510_v31 = vpop.f32.mrf.mxu2 }
 0x27e   : > { %v1531_v8 = vmul.f32 %v8092_v44, %v1510_v31 }
 0x280   : > { %v1544_v39 = vadd.f32 %v8096_v50, %v1531_v8 }
 0x282   : > { %v8170_v34 = vadd.f32 %v1544_v39, %v1422_v37 }
 0x284   : > { %v1568_v11 = vmax.f32 %v8170_v34, 0.0 }
 0x285   : > { %v1513_v35 = vpop.f32.mrf.mxu2 }
 0x286   : > { %v1577_v36 = vpack.c.bf16 %v1568_v11, %v1567_v45  ;;  %v1532_v43 = vmul.f32 %v8092_v44, %v1513_v35 }
 0x288   : > { %6443 = vmatmul.msk.bf16.gmra.mxu3 %vm1465_vm3, %v1577_v36  ;;  %6473 = vmatmul.msk.bf16.gmra.mxu0 %vm1465_vm3, %v1577_v36  ;;  %v1545_v47 = vadd.f32 %v8096_v50, %v1532_v43 }
 0x289   : > { %6503 = vmatmul.msk.bf16.gmra.mxu1 %vm1465_vm3, %v1577_v36  ;;  %v1815_v36 = vld [vmem:[%s10875_s3 + $0x8] sm:$0xf] }
 0x28a   : > { %v8186_v17 = vadd.f32 %v1545_v47, %v1423_v2 }
 0x28c   : > { %v1569_v40 = vmax.f32 %v8186_v17, 0.0 }
 0x28d   : > { %v1515_v14 = vpop.f32.mrf.mxu2 }
 0x28e   : > { %v1533_v37 = vmul.f32 %v8092_v44, %v1515_v14 }
 0x290   : > { %v1546_v20 = vadd.f32 %v8096_v50, %v1533_v37  ;;  %v1826_v37 = vunpack.c.l.b16 %v1815_v36  ;;  %v7407_v36 = vld [vmem:[%s7714_s14 + $0x10] sm:$0xff] }
 0x292   : > { %v8191_v38 = vadd.f32 %v1546_v20, %v1424_v6 }
 0x294   : > { %v1570_v42 = vmax.f32 %v8191_v38, 0.0 }
 0x295   : > { %v1518_v48 = vpop.f32.mrf.mxu2 }
 0x296   : > { %v1578_v49 = vpack.c.bf16 %v1570_v42, %v1569_v40  ;;  %v1534_v62 = vmul.f32 %v8092_v44, %v1518_v48 }
 0x298   : > { %6444 = vmatmul.msk.bf16.gmra.mxu3 %vm1465_vm3, %v1578_v49  ;;  %6474 = vmatmul.msk.bf16.gmra.mxu0 %vm1465_vm3, %v1578_v49  ;;  %v1547_v2 = vadd.f32 %v8096_v50, %v1534_v62 }
 0x299   : > { %6504 = vmatmul.msk.bf16.gmra.mxu1 %vm1465_vm3, %v1578_v49  ;;  %v1828_v49 = vpack.c.b16 %v1826_v37, %v1826_v37 }
 0x29a   : > { %v8207_v51 = vadd.f32 %v1547_v2, %v1425_v29 }
 0x29c   : > { %v1571_v59 = vmax.f32 %v8207_v51, 0.0 }
 0x29d   : > { %v1520_v3 = vpop.f32.mrf.mxu2 }
 0x29e   : > { %v1535_v6 = vmul.f32 %v8092_v44, %v1520_v3 }
 0x2a0   : > { %v1548_v52 = vadd.f32 %v8096_v50, %v1535_v6 }
 0x2a2   : > { %v8212_v53 = vadd.f32 %v1548_v52, %v1426_v33 }
 0x2a4   : > { %v1572_v63 = vmax.f32 %v8212_v53, 0.0  ;;  %v7416_v53 = vld [vmem:[%s7719_s19 + $0x38] sm:$0xff] }
 0x2a6   : > { %v1579_v0 = vpack.c.bf16 %v1572_v63, %v1571_v59 }
 0x2a8   : > { %6445 = vmatmul.msk.bf16.gmra.mxu3 %vm1465_vm3, %v1579_v0  ;;  %6475 = vmatmul.msk.bf16.gmra.mxu0 %vm1465_vm3, %v1579_v0 }
 0x2a9   : > { %6505 = vmatmul.msk.bf16.gmra.mxu1 %vm1465_vm3, %v1579_v0 }
 0x2d5   : > { %v1711_v24 = vpop.f32.mrf.mxu0 }
 0x2d6   : > { %v1783_v29 = vpop.f32.mrf.mxu1 }
 0x2db   : > { %v1639_v32 = vpop.f32.mrf.mxu3 }
 0x2dd   : > { %v1713_v33 = vpop.f32.mrf.mxu0 }
 0x2de   : > { %v1785_v44 = vpop.f32.mrf.mxu1 }
 0x2df   : > { %v1819_v16 = vpack.c.bf16 %v1785_v44, %v1783_v29 }
 0x2e3   : > { %v1641_v50 = vpop.f32.mrf.mxu3 }
 0x2e4   : > { %v1816_v41 = vpack.c.bf16 %v1641_v50, %v1639_v32 }
 0x2e5   : > { %v1716_v54 = vpop.f32.mrf.mxu0 }
 0x2e6   : > { %v1788_v56 = vpop.f32.mrf.mxu1  ;;  %v1818_v7 = vpack.c.bf16 %v1716_v54, %v1713_v33 }
 0x2e7   : > { %v1820_v57 = vpack.c.bf16 %v1788_v56, %v1788_v56 }
 0x2e9   : > { %v1836_v58 = vsel %vm1196_vm1, %v1820_v57, 0 }
 0x2ea   : > { %1841 = vmatpush.bf16.msrb.mxu2 %v1836_v58 }
 0x2eb   : > { %v1644_v4 = vpop.f32.mrf.mxu3 }
 0x2ec   : > { %v1817_v10 = vpack.c.bf16 %v1711_v24, %v1644_v4 }
 0x2ed   : > { %v1718_v18 = vpop.f32.mrf.mxu0 }
 0x2ee   : > { %v1790_v5 = vpop.f32.mrf.mxu1  ;;  %1842 = vmatpush.bf16.msrb.mxu2 %v1819_v16 }
 0x2f2   : > { %1843 = vmatpush.bf16.msrb.mxu2 %v1818_v7 }
 0x2f3   : > { %v1646_v9 = vpop.f32.mrf.mxu3 }
 0x2f5   : > { %v1721_v21 = vpop.f32.mrf.mxu0 }
 0x2f6   : > { %v1793_v28 = vpop.f32.mrf.mxu1  ;;  %1844 = vmatpush.bf16.msrb.mxu2 %v1817_v10 }
 0x2f7   : > { %v1859_v47 = vpack.c.bf16 %v1793_v28, %v1790_v5 }
 0x2fa   : > { %1845 = vmatpush.bf16.msrb.mxu2 %v1816_v41 }
 0x2fb   : > { %v1649_v30 = vpop.f32.mrf.mxu3 }
 0x2fc   : > { %v1856_v52 = vpack.c.bf16 %v1649_v30, %v1646_v9 }
 0x2fd   : > { %6510 = vmatmul.msk.bf16.vlgmr.msrb.gmra.mxu2 %vm1189_vm2, %v8225_v27  ;;  %v1723_v31 = vpop.f32.mrf.mxu0 }
 0x2fe   : > { %v1795_v8 = vpop.f32.mrf.mxu1  ;;  %v1858_v48 = vpack.c.bf16 %v1723_v31, %v1721_v21 }
 0x2ff   : > { %v1860_v39 = vpack.c.bf16 %v1795_v8, %v1795_v8 }
 0x301   : > { %v1862_v35 = vsel %vm1196_vm1, %v1860_v39, 0 }
 0x302   : > { %1867 = vmatpush.bf16.msrb.mxu3 %v1862_v35  ;;  %v7408_v35 = vld [vmem:[%s7714_s14 + $0x18] sm:$0xff] }
 0x303   : > { %v1651_v43 = vpop.f32.mrf.mxu3 }
 0x304   : > { %v1857_v2 = vpack.c.bf16 %v1718_v18, %v1651_v43  ;;  %v7406_v43 = vld [vmem:[%s7714_s14 + $0x8] sm:$0xff] }
 0x305   : > { %v1726_v14 = vpop.f32.mrf.mxu0 }
 0x306   : > { %v1798_v20 = vpop.f32.mrf.mxu1  ;;  %1868 = vmatpush.bf16.msrb.mxu3 %v1859_v47  ;;  %v7405_v47 = vld [vmem:[%s7714_s14] sm:$0xff] }
 0x30a   : > { %1869 = vmatpush.bf16.msrb.mxu3 %v1858_v48 }
 0x30b   : > { %v1654_v62 = vpop.f32.mrf.mxu3 }
 0x30d   : > { %6511 = vmatmul.msk.bf16.gmra.mxu2 %vm1189_vm2, %v1828_v49  ;;  %v1728_v3 = vpop.f32.mrf.mxu0 }
 0x30e   : > { %v1800_v6 = vpop.f32.mrf.mxu1  ;;  %1870 = vmatpush.bf16.msrb.mxu3 %v1857_v2 }
 0x30f   : > { %v1885_v50 = vpack.c.bf16 %v1800_v6, %v1798_v20 }
 0x312   : > { %1871 = vmatpush.bf16.msrb.mxu3 %v1856_v52 }
 0x313   : > { %v1656_v0 = vpop.f32.mrf.mxu3 }
 0x314   : > { %v1882_v18 = vpack.c.bf16 %v1656_v0, %v1654_v62 }
 0x315   : > { %6512 = vmatmul.msk.bf16.vlgmr.msrb.gmra.mxu3 %vm1189_vm2, %v8225_v27  ;;  %v1731_v29 = vpop.f32.mrf.mxu0 }
 0x316   : > { %v1803_v24 = vpop.f32.mrf.mxu1  ;;  %v1884_v56 = vpack.c.bf16 %v1731_v29, %v1728_v3  ;;  %2044 = vmatpush.bf16.msra.mxu3 %v7408_v35 }
 0x317   : > { %v1886_v32 = vpack.c.bf16 %v1803_v24, %v1803_v24 }
 0x319   : > { %v1888_v33 = vsel %vm1196_vm1, %v1886_v32, 0 }
 0x31a   : > { %1893 = vmatpush.bf16.msra.mxu0 %v1888_v33  ;;  %2045 = vmatpush.bf16.msra.mxu3 %v7407_v36 }
 0x31b   : > { %v1659_v44 = vpop.f32.mrf.mxu3 }
 0x31c   : > { %v1883_v58 = vpack.c.bf16 %v1726_v14, %v1659_v44  ;;  %v8248_v14 = vld [vmem:[%s7709_s8] sm:$0xff] }
 0x31d   : > { %v1733_v57 = vpop.f32.mrf.mxu0  ;;  %v8251_v37 = vperm.slane %v8248_v14, 0 }
 0x31e   : > { %v1805_v54 = vpop.f32.mrf.mxu1  ;;  %1894 = vmatpush.bf16.msra.mxu0 %v1885_v50  ;;  %2046 = vmatpush.bf16.msra.mxu3 %v7406_v43 }
 0x322   : > { %1895 = vmatpush.bf16.msra.mxu0 %v1884_v56  ;;  %2047 = vmatpush.bf16.msra.mxu3 %v7405_v47 }
 0x323   : > { %v1661_v4 = vpop.f32.mrf.mxu3 }
 0x325   : > { %6513 = vmatmul.msk.bf16.gmra.mxu3 %vm1189_vm2, %v1828_v49  ;;  %v1736_v5 = vpop.f32.mrf.mxu0 }
 0x326   : > { %v1808_v16 = vpop.f32.mrf.mxu1  ;;  %1896 = vmatpush.bf16.msra.mxu0 %v1883_v58 }
 0x327   : > { %v1911_v28 = vpack.c.bf16 %v1808_v16, %v1805_v54 }
 0x32a   : > { %1897 = vmatpush.bf16.msra.mxu0 %v1882_v18 }
 0x32b   : > { %v1664_v9 = vpop.f32.mrf.mxu3 }
 0x32c   : > { %v1908_v39 = vpack.c.bf16 %v1664_v9, %v1661_v4 }
 0x32d   : > { %6514 = vmatmul.msk.bf16.vlgmr.msra.gmra.mxu0 %vm1189_vm2, %v8225_v27  ;;  %v1738_v41 = vpop.f32.mrf.mxu0 }
 0x32e   : > { %v1810_v7 = vpop.f32.mrf.mxu1  ;;  %v1910_v30 = vpack.c.bf16 %v1738_v41, %v1736_v5 }
 0x32f   : > { %v1912_v10 = vpack.c.bf16 %v1810_v7, %v1810_v7 }
 0x331   : > { %v1914_v21 = vsel %vm1196_vm1, %v1912_v10, 0 }
 0x332   : > { %1919 = vmatpush.bf16.msra.mxu2 %v1914_v21 }
 0x333   : > { %v1666_v31 = vpop.f32.mrf.mxu3 }
 0x334   : > { %v1909_v8 = vpack.c.bf16 %v1733_v57, %v1666_v31 }
 0x336   : > { %1920 = vmatpush.bf16.msra.mxu2 %v1911_v28 }
 0x33a   : > { %1921 = vmatpush.bf16.msra.mxu2 %v1910_v30 }
 0x33d   : > { %6515 = vmatmul.msk.bf16.gmra.mxu0 %vm1189_vm2, %v1828_v49 }
 0x33e   : > { %1922 = vmatpush.bf16.msra.mxu2 %v1909_v8 }
 0x342   : > { %1923 = vmatpush.bf16.msra.mxu2 %v1908_v39 }
 0x345   : > { %6516 = vmatmul.msk.bf16.vlgmr.msra.gmra.mxu2 %vm1189_vm2, %v8225_v27  ;;  %v8255_v27 = vperm.slane %v8248_v14, 1 }
 0x346   : > { %2262 = vmatpush.bf16.msrb.mxu2 %v7416_v53 }
 0x355   : > { %6517 = vmatmul.msk.bf16.gmra.mxu2 %vm1189_vm2, %v1828_v49 }
 0x380   : > { %v1847_v20 = vpop.f32.mrf.mxu2 }
 0x381   : > { %v1935_v48 = vmul.f32 %v8251_v37, %v1847_v20 }
 0x383   : > { %v1948_v49 = vadd.f32 %v8255_v27, %v1935_v48 }
 0x385   : > { %v8261_v3 = vadd.f32 %v1948_v49, %v1561_v61 }
 0x387   : > { %v1972_v0 = vmax.f32 %v8261_v3, 0.0 }
 0x388   : > { %v1849_v62 = vpop.f32.mrf.mxu2 }
 0x389   : > { %v1936_v2 = vmul.f32 %v8251_v37, %v1849_v62 }
 0x38b   : > { %v1949_v6 = vadd.f32 %v8255_v27, %v1936_v2 }
 0x38d   : > { %v8266_v52 = vadd.f32 %v1949_v6, %v1562_v23 }
 0x38f   : > { %v1973_v24 = vmax.f32 %v8266_v52, 0.0 }
 0x390   : > { %v1852_v29 = vpop.f32.mrf.mxu2 }
 0x391   : > { %v1984_v32 = vpack.c.bf16 %v1973_v24, %v1972_v0  ;;  %v1937_v55 = vmul.f32 %v8251_v37, %v1852_v29 }
 0x393   : > { %6534 = vmatmul.msk.bf16.vlgmr.msra.gmra.mxu3 %vm1465_vm3, %v1984_v32  ;;  %v1950_v61 = vadd.f32 %v8255_v27, %v1937_v55 }
 0x395   : > { %v8280_v44 = vadd.f32 %v1950_v61, %v1563_v13 }
 0x397   : > { %v1974_v56 = vmax.f32 %v8280_v44, 0.0 }
 0x398   : > { %v1854_v33 = vpop.f32.mrf.mxu2  ;;  %v1873_v60 = vpop.f32.mrf.mxu3 }
 0x399   : > { %v1938_v23 = vmul.f32 %v8251_v37, %v1873_v60 }
 0x39b   : > { %v1951_v50 = vadd.f32 %v8255_v27, %v1938_v23  ;;  %v7419_v23 = vld [vmem:[%s7719_s19 + $0x50] sm:$0xff] }
 0x39d   : > { %v8285_v54 = vadd.f32 %v1951_v50, %v1564_v15  ;;  %v7410_v50 = vld [vmem:[%s7719_s19 + $0x8] sm:$0xff] }
 0x39f   : > { %v1975_v57 = vmax.f32 %v8285_v54, 0.0 }
 0x3a0   : > { %v1875_v58 = vpop.f32.mrf.mxu3 }
 0x3a1   : > { %v1985_v4 = vpack.c.bf16 %v1975_v57, %v1974_v56  ;;  %v1939_v1 = vmul.f32 %v8251_v37, %v1875_v58  ;;  %v7414_v58 = vld [vmem:[%s7719_s19 + $0x28] sm:$0xff] }
 0x3a3   : > { %6535 = vmatmul.msk.bf16.gmra.mxu3 %vm1465_vm3, %v1985_v4  ;;  %v1952_v13 = vadd.f32 %v8255_v27, %v1939_v1  ;;  %v7418_v4 = vld [vmem:[%s7719_s19 + $0x48] sm:$0xff]  ;;  %v7409_v1 = vld [vmem:[%s7719_s19] sm:$0xff] }
 0x3a5   : > { %v8299_v18 = vadd.f32 %v1952_v13, %v1565_v25  ;;  %v7413_v13 = vld [vmem:[%s7719_s19 + $0x20] sm:$0xff] }
 0x3a7   : > { %v1976_v9 = vmax.f32 %v8299_v18, 0.0 }
 0x3a8   : > { %v1878_v16 = vpop.f32.mrf.mxu3 }
 0x3a9   : > { %v1940_v12 = vmul.f32 %v8251_v37, %v1878_v16  ;;  %v7417_v16 = vld [vmem:[%s7719_s19 + $0x40] sm:$0xff] }
 0x3aa   : > { %v1899_v15 = vpop.f32.mrf.mxu0 }
 0x3ab   : > { %v1953_v5 = vadd.f32 %v8255_v27, %v1940_v12  ;;  %v1941_v19 = vmul.f32 %v8251_v37, %v1899_v15  ;;  %v8383_v12 = vperm.slane %v8248_v14, 2 }
 0x3ad   : > { %v8304_v7 = vadd.f32 %v1953_v5, %v1566_v26  ;;  %v1954_v26 = vadd.f32 %v8255_v27, %v1941_v19 }
 0x3af   : > { %v1977_v10 = vmax.f32 %v8304_v7, 0.0  ;;  %v8323_v8 = vadd.f32 %v1954_v26, %v1567_v45 }
 0x3b0   : > { %v1880_v21 = vpop.f32.mrf.mxu3 }
 0x3b1   : > { %v1986_v28 = vpack.c.bf16 %v1977_v10, %v1976_v9  ;;  %v1978_v35 = vmax.f32 %v8323_v8, 0.0  ;;  %v8387_v21 = vperm.slane %v8248_v14, 3 }
 0x3b2   : > { %v1901_v41 = vpop.f32.mrf.mxu0 }
 0x3b3   : > { %v1942_v25 = vmul.f32 %v8251_v37, %v1901_v41  ;;  %6536 = vmatmul.msk.bf16.gmra.mxu3 %vm1465_vm3, %v1986_v28 }
 0x3b5   : > { %v1955_v22 = vadd.f32 %v8255_v27, %v1942_v25 }
 0x3b7   : > { %v8319_v30 = vadd.f32 %v1955_v22, %v1568_v11 }
 0x3b9   : > { %v1979_v39 = vmax.f32 %v8319_v30, 0.0 }
 0x3ba   : > { %v1904_v31 = vpop.f32.mrf.mxu0 }
 0x3bb   : > { %v1987_v36 = vpack.c.bf16 %v1979_v39, %v1978_v35  ;;  %v1943_v47 = vmul.f32 %v8251_v37, %v1904_v31 }
 0x3bd   : > { %v1956_v34 = vadd.f32 %v8255_v27, %v1943_v47 }
 0x3bf   : > { %v8337_v45 = vadd.f32 %v1956_v34, %v1569_v40 }
 0x3c1   : > { %v1980_v49 = vmax.f32 %v8337_v45, 0.0 }
 0x3c2   : > { %v1906_v43 = vpop.f32.mrf.mxu0 }
 0x3c3   : > { %6537 = vmatmul.msk.bf16.gmra.mxu3 %vm1465_vm3, %v1987_v36 }
 0x3c8   : > { %v1925_v11 = vpop.f32.mrf.mxu2 }
 0x3c9   : > { %v1944_v46 = vmul.f32 %v8251_v37, %v1925_v11 }
 0x3cb   : > { %v1957_v20 = vadd.f32 %v8255_v27, %v1944_v46 }
 0x3cd   : > { %v8342_v48 = vadd.f32 %v1957_v20, %v1570_v42 }
 0x3cf   : > { %v1981_v62 = vmax.f32 %v8342_v48, 0.0 }
 0x3d0   : > { %v1927_v2 = vpop.f32.mrf.mxu2 }
 0x3d1   : > { %v1988_v17 = vpack.c.bf16 %v1981_v62, %v1980_v49  ;;  %v1945_v40 = vmul.f32 %v8251_v37, %v1927_v2 }
 0x3d3   : > { %6538 = vmatmul.msk.bf16.gmra.mxu3 %vm1465_vm3, %v1988_v17  ;;  %v1958_v38 = vadd.f32 %v8255_v27, %v1945_v40 }
 0x3d5   : > { %v8356_v29 = vadd.f32 %v1958_v38, %v1571_v59  ;;  %v7420_v59 = vld [vmem:[%s7719_s19 + $0x58] sm:$0xff] }
 0x3d6   : > { %2334 = vmatpush.bf16.msra.mxu1 %v7420_v59 }
 0x3d7   : > { %v1982_v61 = vmax.f32 %v8356_v29, 0.0 }
 0x3d8   : > { %v1930_v42 = vpop.f32.mrf.mxu2 }
 0x3d9   : > { %v1946_v6 = vmul.f32 %v8251_v37, %v1930_v42  ;;  %v7412_v37 = vld [vmem:[%s7719_s19 + $0x18] sm:$0xff] }
 0x3da   : > { %2190 = vmatpush.bf16.msrb.mxu0 %v7412_v37  ;;  %2335 = vmatpush.bf16.msra.mxu1 %v7419_v23 }
 0x3db   : > { %v1959_v32 = vadd.f32 %v8255_v27, %v1946_v6  ;;  %v7415_v27 = vld [vmem:[%s7719_s19 + $0x30] sm:$0xff] }
 0x3dc   : > { %2263 = vmatpush.bf16.msrb.mxu2 %v7415_v27 }
 0x3dd   : > { %v8361_v55 = vadd.f32 %v1959_v32, %v1572_v63  ;;  %v7411_v63 = vld [vmem:[%s7719_s19 + $0x10] sm:$0xff] }
 0x3de   : > { %2191 = vmatpush.bf16.msrb.mxu0 %v7411_v63  ;;  %2336 = vmatpush.bf16.msra.mxu1 %v7418_v4 }
 0x3df   : > { %v1983_v33 = vmax.f32 %v8361_v55, 0.0 }
 0x3e0   : > { %v1932_v60 = vpop.f32.mrf.mxu2  ;;  %2264 = vmatpush.bf16.msrb.mxu2 %v7414_v58 }
 0x3e1   : > { %v1989_v51 = vpack.c.bf16 %v1983_v33, %v1982_v61 }
 0x3e2   : > { %2192 = vmatpush.bf16.msrb.mxu0 %v7410_v50  ;;  %2337 = vmatpush.bf16.msra.mxu1 %v7417_v16 }
 0x3e3   : > { %6539 = vmatmul.msk.bf16.gmra.mxu3 %vm1465_vm3, %v1989_v51 }
 0x3e4   : > { %2265 = vmatpush.bf16.msrb.mxu2 %v7413_v13 }
 0x3e6   : > { %2193 = vmatpush.bf16.msrb.mxu0 %v7409_v1 }
 0x416   : > { %v2049_v15 = vpop.f32.mrf.mxu3 }
 0x417   : > { %v2080_v5 = vmul.f32 %v8383_v12, %v2049_v15 }
 0x419   : > { %v2093_v28 = vadd.f32 %v8387_v21, %v2080_v5 }
 0x41b   : > { %v2105_v25 = vadd.f32 %v2093_v28, %v1972_v0 }
 0x41d   : > { %v2117_v31 = vmax.f32 %v2105_v25, 0.0 }
 0x41e   : > { %v2051_v41 = vpop.f32.mrf.mxu3 }
 0x41f   : > { %v2081_v19 = vmul.f32 %v8383_v12, %v2051_v41 }
 0x421   : > { %v2094_v22 = vadd.f32 %v8387_v21, %v2081_v19 }
 0x423   : > { %v2106_v26 = vadd.f32 %v2094_v22, %v1973_v24 }
 0x425   : > { %v2118_v36 = vmax.f32 %v2106_v26, 0.0 }
 0x426   : > { %v2054_v43 = vpop.f32.mrf.mxu3 }
 0x427   : > { %v8396_v47 = vpack.c.bf16 %v2118_v36, %v2117_v31  ;;  %v2082_v14 = vmul.f32 %v8383_v12, %v2054_v43 }
 0x429   : > { %6556 = vmatmul.msk.bf16.vlgmr.msrb.gmra.mxu0 %vm1465_vm3, %v8396_v47  ;;  %6586 = vmatmul.msk.bf16.vlgmr.msrb.gmra.mxu2 %vm1465_vm3, %v8396_v47  ;;  %v2095_v3 = vadd.f32 %v8387_v21, %v2082_v14 }
 0x42a   : > { %6616 = vmatmul.msk.bf16.vlgmr.msra.gmra.mxu1 %vm1465_vm3, %v8396_v47 }
 0x42b   : > { %v2107_v24 = vadd.f32 %v2095_v3, %v1974_v56 }
 0x42d   : > { %v2119_v46 = vmax.f32 %v2107_v24, 0.0 }
 0x42e   : > { %v2056_v52 = vpop.f32.mrf.mxu3 }
 0x42f   : > { %v2083_v0 = vmul.f32 %v8383_v12, %v2056_v52 }
 0x431   : > { %v2096_v34 = vadd.f32 %v8387_v21, %v2083_v0 }
 0x433   : > { %v2108_v11 = vadd.f32 %v2096_v34, %v1975_v57 }
 0x435   : > { %v2120_v20 = vmax.f32 %v2108_v11, 0.0 }
 0x436   : > { %v2059_v2 = vpop.f32.mrf.mxu3 }
 0x437   : > { %v8412_v17 = vpack.c.bf16 %v2120_v20, %v2119_v46  ;;  %v2084_v40 = vmul.f32 %v8383_v12, %v2059_v2 }
 0x439   : > { %6557 = vmatmul.msk.bf16.gmra.mxu0 %vm1465_vm3, %v8412_v17  ;;  %6587 = vmatmul.msk.bf16.gmra.mxu2 %vm1465_vm3, %v8412_v17  ;;  %v2097_v44 = vadd.f32 %v8387_v21, %v2084_v40 }
 0x43a   : > { %6617 = vmatmul.msk.bf16.gmra.mxu1 %vm1465_vm3, %v8412_v17 }
 0x43b   : > { %v2109_v57 = vadd.f32 %v2097_v44, %v1976_v9 }
 0x43d   : > { %v2121_v6 = vmax.f32 %v2109_v57, 0.0 }
 0x43e   : > { %v2061_v54 = vpop.f32.mrf.mxu3 }
 0x43f   : > { %v2085_v56 = vmul.f32 %v8383_v12, %v2061_v54  ;;  %v8486_v54 = vld [vmem:[%s7724_s24] sm:$0xff] }
 0x441   : > { %v2098_v38 = vadd.f32 %v8387_v21, %v2085_v56 }
 0x443   : > { %v2110_v42 = vadd.f32 %v2098_v38, %v1977_v10 }
 0x445   : > { %v2122_v32 = vmax.f32 %v2110_v42, 0.0 }
 0x446   : > { %v2064_v60 = vpop.f32.mrf.mxu3 }
 0x447   : > { %v8428_v51 = vpack.c.bf16 %v2122_v32, %v2121_v6  ;;  %v2086_v59 = vmul.f32 %v8383_v12, %v2064_v60  ;;  %v2371_v60 = vld [vmem:[%s7724_s24 + $0x8] sm:$0xf] }
 0x449   : > { %6558 = vmatmul.msk.bf16.gmra.mxu0 %vm1465_vm3, %v8428_v51  ;;  %6588 = vmatmul.msk.bf16.gmra.mxu2 %vm1465_vm3, %v8428_v51  ;;  %v2099_v18 = vadd.f32 %v8387_v21, %v2086_v59 }
 0x44a   : > { %6618 = vmatmul.msk.bf16.gmra.mxu1 %vm1465_vm3, %v8428_v51 }
 0x44b   : > { %v2111_v10 = vadd.f32 %v2099_v18, %v1978_v35 }
 0x44d   : > { %v2123_v63 = vmax.f32 %v2111_v10, 0.0 }
 0x44e   : > { %v2066_v7 = vpop.f32.mrf.mxu3 }
 0x44f   : > { %v2087_v9 = vmul.f32 %v8383_v12, %v2066_v7  ;;  %v2382_v7 = vunpack.c.l.b16 %v2371_v60 }
 0x451   : > { %v2100_v37 = vadd.f32 %v8387_v21, %v2087_v9 }
 0x453   : > { %v2112_v53 = vadd.f32 %v2100_v37, %v1979_v39  ;;  %v2384_v37 = vpack.c.b16 %v2382_v7, %v2382_v7 }
 0x455   : > { %v2124_v27 = vmax.f32 %v2112_v53, 0.0 }
 0x456   : > { %v2069_v23 = vpop.f32.mrf.mxu3 }
 0x457   : > { %v8444_v50 = vpack.c.bf16 %v2124_v27, %v2123_v63  ;;  %v2088_v58 = vmul.f32 %v8383_v12, %v2069_v23  ;;  %v7425_v27 = vld [vmem:[%s7739_s12 + $0x18] sm:$0xff] }
 0x459   : > { %6559 = vmatmul.msk.bf16.gmra.mxu0 %vm1465_vm3, %v8444_v50  ;;  %6589 = vmatmul.msk.bf16.gmra.mxu2 %vm1465_vm3, %v8444_v50  ;;  %v2101_v8 = vadd.f32 %v8387_v21, %v2088_v58 }
 0x45a   : > { %6619 = vmatmul.msk.bf16.gmra.mxu1 %vm1465_vm3, %v8444_v50 }
 0x45b   : > { %v2113_v35 = vadd.f32 %v2101_v8, %v1980_v49 }
 0x45d   : > { %v2125_v13 = vmax.f32 %v2113_v35, 0.0 }
 0x45e   : > { %v2071_v30 = vpop.f32.mrf.mxu3 }
 0x45f   : > { %v2089_v39 = vmul.f32 %v8383_v12, %v2071_v30  ;;  %v7424_v30 = vld [vmem:[%s7739_s12 + $0x10] sm:$0xff] }
 0x461   : > { %v2102_v4 = vadd.f32 %v8387_v21, %v2089_v39 }
 0x463   : > { %v2114_v1 = vadd.f32 %v2102_v4, %v1981_v62  ;;  %v7423_v4 = vld [vmem:[%s7739_s12 + $0x8] sm:$0xff] }
 0x465   : > { %v2126_v16 = vmax.f32 %v2114_v1, 0.0 }
 0x466   : > { %v2074_v15 = vpop.f32.mrf.mxu3 }
 0x467   : > { %v8460_v5 = vpack.c.bf16 %v2126_v16, %v2125_v13  ;;  %v2090_v28 = vmul.f32 %v8383_v12, %v2074_v15  ;;  %v7422_v15 = vld [vmem:[%s7739_s12] sm:$0xff] }
 0x469   : > { %6560 = vmatmul.msk.bf16.gmra.mxu0 %vm1465_vm3, %v8460_v5  ;;  %6590 = vmatmul.msk.bf16.gmra.mxu2 %vm1465_vm3, %v8460_v5  ;;  %v2103_v45 = vadd.f32 %v8387_v21, %v2090_v28 }
 0x46a   : > { %6620 = vmatmul.msk.bf16.gmra.mxu1 %vm1465_vm3, %v8460_v5 }
 0x46b   : > { %v2115_v62 = vadd.f32 %v2103_v45, %v1982_v61 }
 0x46d   : > { %v2127_v25 = vmax.f32 %v2115_v62, 0.0 }
 0x46e   : > { %v2076_v48 = vpop.f32.mrf.mxu3 }
 0x46f   : > { %v2091_v49 = vmul.f32 %v8383_v12, %v2076_v48 }
 0x471   : > { %v2104_v41 = vadd.f32 %v8387_v21, %v2091_v49 }
 0x473   : > { %v2116_v19 = vadd.f32 %v2104_v41, %v1983_v33 }
 0x475   : > { %v2128_v22 = vmax.f32 %v2116_v19, 0.0 }
 0x477   : > { %v8476_v26 = vpack.c.bf16 %v2128_v22, %v2127_v25 }
 0x479   : > { %6561 = vmatmul.msk.bf16.gmra.mxu0 %vm1465_vm3, %v8476_v26  ;;  %6591 = vmatmul.msk.bf16.gmra.mxu2 %vm1465_vm3, %v8476_v26 }
 0x47a   : > { %6621 = vmatmul.msk.bf16.gmra.mxu1 %vm1465_vm3, %v8476_v26 }
 0x4a6   : > { %v2195_v29 = vpop.f32.mrf.mxu0 }
 0x4a7   : > { %v2339_v61 = vpop.f32.mrf.mxu1 }
 0x4ac   : > { %v2267_v12 = vpop.f32.mrf.mxu2 }
 0x4ae   : > { %v2197_v21 = vpop.f32.mrf.mxu0 }
 0x4af   : > { %v2341_v31 = vpop.f32.mrf.mxu1  ;;  %v2372_v40 = vpack.c.bf16 %v2197_v21, %v2195_v29 }
 0x4b0   : > { %v2375_v52 = vpack.c.bf16 %v2341_v31, %v2339_v61 }
 0x4b4   : > { %v2269_v55 = vpop.f32.mrf.mxu2 }
 0x4b6   : > { %v2200_v33 = vpop.f32.mrf.mxu0 }
 0x4b7   : > { %v2344_v36 = vpop.f32.mrf.mxu1  ;;  %v2373_v46 = vpack.c.bf16 %v2267_v12, %v2200_v33 }
 0x4b8   : > { %v2376_v43 = vpack.c.bf16 %v2344_v36, %v2344_v36 }
 0x4ba   : > { %v2392_v14 = vsel %vm1196_vm1, %v2376_v43, 0 }
 0x4bb   : > { %2397 = vmatpush.bf16.msrb.mxu3 %v2392_v14 }
 0x4bc   : > { %v2272_v3 = vpop.f32.mrf.mxu2 }
 0x4bd   : > { %v2374_v34 = vpack.c.bf16 %v2272_v3, %v2269_v55  ;;  %v7431_v3 = vld [vmem:[%s7734_s6 + $0x28] sm:$0xff] }
 0x4be   : > { %v2202_v0 = vpop.f32.mrf.mxu0 }
 0x4bf   : > { %v2346_v24 = vpop.f32.mrf.mxu1  ;;  %2398 = vmatpush.bf16.msrb.mxu3 %v2375_v52  ;;  %v7430_v52 = vld [vmem:[%s7734_s6 + $0x20] sm:$0xff] }
 0x4c3   : > { %2399 = vmatpush.bf16.msrb.mxu3 %v2374_v34 }
 0x4c4   : > { %v2274_v11 = vpop.f32.mrf.mxu2 }
 0x4c6   : > { %v2205_v20 = vpop.f32.mrf.mxu0 }
 0x4c7   : > { %v2349_v2 = vpop.f32.mrf.mxu1  ;;  %2400 = vmatpush.bf16.msrb.mxu3 %v2373_v46  ;;  %v2412_v23 = vpack.c.bf16 %v2205_v20, %v2202_v0 }
 0x4c8   : > { %v2415_v32 = vpack.c.bf16 %v2349_v2, %v2346_v24  ;;  %v7428_v24 = vld [vmem:[%s7734_s6 + $0x10] sm:$0xff] }
 0x4cb   : > { %2401 = vmatpush.bf16.msrb.mxu3 %v2372_v40 }
 0x4cc   : > { %v2277_v44 = vpop.f32.mrf.mxu2 }
 0x4ce   : > { %v2207_v56 = vpop.f32.mrf.mxu0  ;;  %6626 = vmatmul.msk.bf16.vlgmr.msrb.gmra.mxu3 %vm1189_vm2, %v8486_v54 }
 0x4cf   : > { %v2351_v57 = vpop.f32.mrf.mxu1  ;;  %v2413_v53 = vpack.c.bf16 %v2274_v11, %v2207_v56  ;;  %v7427_v11 = vld [vmem:[%s7734_s6 + $0x8] sm:$0xff] }
 0x4d0   : > { %v2416_v38 = vpack.c.bf16 %v2351_v57, %v2351_v57 }
 0x4d2   : > { %v2418_v42 = vsel %vm1196_vm1, %v2416_v38, 0 }
 0x4d3   : > { %2423 = vmatpush.bf16.msra.mxu0 %v2418_v42 }
 0x4d4   : > { %v2279_v6 = vpop.f32.mrf.mxu2 }
 0x4d5   : > { %v2414_v9 = vpack.c.bf16 %v2279_v6, %v2277_v44  ;;  %v8529_v44 = vld [vmem:[%s10876_s1] sm:$0xff]  ;;  %s10824_s1 = smov 32  }
 0x4d6   : > { %v2210_v18 = vpop.f32.mrf.mxu0  ;;  %v8535_v57 = vperm.slane %v8529_v44, 0  ;;  %v8540_v6 = vperm.slane %v8529_v44, 5 }
 0x4d7   : > { %v2354_v59 = vpop.f32.mrf.mxu1  ;;  %2424 = vmatpush.bf16.msra.mxu0 %v2415_v32  ;;  %v8543_v32 = vperm.slane %v8529_v44, 1 }
 0x4db   : > { %2425 = vmatpush.bf16.msra.mxu0 %v2414_v9 }
 0x4dc   : > { %v2282_v10 = vpop.f32.mrf.mxu2 }
 0x4de   : > { %6627 = vmatmul.msk.bf16.gmra.mxu3 %vm1189_vm2, %v2384_v37  ;;  %v2212_v58 = vpop.f32.mrf.mxu0 }
 0x4df   : > { %v2356_v63 = vpop.f32.mrf.mxu1  ;;  %2426 = vmatpush.bf16.msra.mxu0 %v2413_v53  ;;  %v2438_v25 = vpack.c.bf16 %v2212_v58, %v2210_v18 }
 0x4e0   : > { %v2441_v28 = vpack.c.bf16 %v2356_v63, %v2354_v59 }
 0x4e3   : > { %2427 = vmatpush.bf16.msra.mxu0 %v2412_v23 }
 0x4e4   : > { %v2284_v8 = vpop.f32.mrf.mxu2 }
 0x4e6   : > { %6628 = vmatmul.msk.bf16.vlgmr.msra.gmra.mxu0 %vm1189_vm2, %v8486_v54  ;;  %v2215_v13 = vpop.f32.mrf.mxu0 }
 0x4e7   : > { %2526 = vmatpush.bf16.msrb.mxu0 %v7425_v27  ;;  %v2359_v39 = vpop.f32.mrf.mxu1  ;;  %v2439_v62 = vpack.c.bf16 %v2282_v10, %v2215_v13 }
 0x4e8   : > { %v2442_v35 = vpack.c.bf16 %v2359_v39, %v2359_v39 }
 0x4ea   : > { %v2444_v1 = vsel %vm1196_vm1, %v2442_v35, 0 }
 0x4eb   : > { %2527 = vmatpush.bf16.msrb.mxu0 %v7424_v30  ;;  %2449 = vmatpush.bf16.msra.mxu2 %v2444_v1 }
 0x4ec   : > { %v2287_v16 = vpop.f32.mrf.mxu2 }
 0x4ed   : > { %v2440_v48 = vpack.c.bf16 %v2287_v16, %v2284_v8 }
 0x4ee   : > { %v2217_v41 = vpop.f32.mrf.mxu0 }
 0x4ef   : > { %2528 = vmatpush.bf16.msrb.mxu0 %v7423_v4  ;;  %v2361_v45 = vpop.f32.mrf.mxu1  ;;  %2450 = vmatpush.bf16.msra.mxu2 %v2441_v28 }
 0x4f3   : > { %2529 = vmatpush.bf16.msrb.mxu0 %v7422_v15  ;;  %2451 = vmatpush.bf16.msra.mxu2 %v2440_v48 }
 0x4f4   : > { %v2289_v49 = vpop.f32.mrf.mxu2 }
 0x4f6   : > { %6629 = vmatmul.msk.bf16.gmra.mxu0 %vm1189_vm2, %v2384_v37  ;;  %v2220_v61 = vpop.f32.mrf.mxu0 }
 0x4f7   : > { %v2364_v19 = vpop.f32.mrf.mxu1  ;;  %2452 = vmatpush.bf16.msra.mxu2 %v2439_v62  ;;  %v2464_v14 = vpack.c.bf16 %v2220_v61, %v2217_v41 }
 0x4f8   : > { %v2467_v31 = vpack.c.bf16 %v2364_v19, %v2361_v45 }
 0x4fb   : > { %2453 = vmatpush.bf16.msra.mxu2 %v2438_v25 }
 0x4fc   : > { %v2292_v22 = vpop.f32.mrf.mxu2 }
 0x4fe   : > { %6630 = vmatmul.msk.bf16.vlgmr.msra.gmra.mxu2 %vm1189_vm2, %v8486_v54  ;;  %v2222_v36 = vpop.f32.mrf.mxu0 }
 0x4ff   : > { %v2366_v29 = vpop.f32.mrf.mxu1  ;;  %v2465_v43 = vpack.c.bf16 %v2289_v49, %v2222_v36 }
 0x500   : > { %v2468_v12 = vpack.c.bf16 %v2366_v29, %v2366_v29 }
 0x502   : > { %v2470_v21 = vsel %vm1196_vm1, %v2468_v12, 0 }
 0x503   : > { %2475 = vmatpush.bf16.msra.mxu3 %v2470_v21 }
 0x504   : > { %v2294_v55 = vpop.f32.mrf.mxu2 }
 0x505   : > { %v2466_v33 = vpack.c.bf16 %v2294_v55, %v2292_v22 }
 0x506   : > { %6650 = vmatmul.msk.bf16.vlgmr.msrb.gmra.mxu0 %vm1465_vm3, %v8396_v47  ;;  %v7433_v47 = vld [vmem:[%s7734_s6 + $0x38] sm:$0xff] }
 0x507   : > { %2476 = vmatpush.bf16.msra.mxu3 %v2467_v31  ;;  %2707 = vmatpush.bf16.msrb.mxu1 %v7433_v47 }
 0x50b   : > { %2477 = vmatpush.bf16.msra.mxu3 %v2466_v33 }
 0x50e   : > { %6631 = vmatmul.msk.bf16.gmra.mxu2 %vm1189_vm2, %v2384_v37 }
 0x50f   : > { %2478 = vmatpush.bf16.msra.mxu3 %v2465_v43 }
 0x513   : > { %2479 = vmatpush.bf16.msra.mxu3 %v2464_v14 }
 0x516   : > { %6651 = vmatmul.msk.bf16.gmra.mxu0 %vm1465_vm3, %v8412_v17  ;;  %6632 = vmatmul.msk.bf16.vlgmr.msra.gmra.mxu3 %vm1189_vm2, %v8486_v54  ;;  %v7432_v17 = vld [vmem:[%s7734_s6 + $0x30] sm:$0xff]  ;;  %v8532_v54 = vperm.slane %v8529_v44, 4 }
 0x517   : > { %2708 = vmatpush.bf16.msrb.mxu1 %v7432_v17 }
 0x51b   : > { %2709 = vmatpush.bf16.msrb.mxu1 %v7431_v3 }
 0x51f   : > { %2710 = vmatpush.bf16.msrb.mxu1 %v7430_v52 }
 0x526   : > { %6652 = vmatmul.msk.bf16.gmra.mxu0 %vm1465_vm3, %v8428_v51  ;;  %6633 = vmatmul.msk.bf16.gmra.mxu3 %vm1189_vm2, %v2384_v37 }
 0x536   : > { %6653 = vmatmul.msk.bf16.gmra.mxu0 %vm1465_vm3, %v8444_v50  ;;  %v7429_v50 = vld [vmem:[%s7734_s6 + $0x18] sm:$0xff] }
 0x537   : > { %2711 = vmatpush.bf16.msrb.mxu1 %v7429_v50 }
 0x53b   : > { %2712 = vmatpush.bf16.msrb.mxu1 %v7428_v24 }
 0x53f   : > { %2713 = vmatpush.bf16.msrb.mxu1 %v7427_v11 }
 0x546   : > { %6654 = vmatmul.msk.bf16.gmra.mxu0 %vm1465_vm3, %v8460_v5 }
 0x551   : > { %v2403_v51 = vpop.f32.mrf.mxu3 }
 0x552   : > { %v2588_v38 = vmul.f32 %v8535_v57, %v2403_v51 }
 0x554   : > { %v2601_v60 = vadd.f32 %v8543_v32, %v2588_v38 }
 0x556   : > { %6655 = vmatmul.msk.bf16.gmra.mxu0 %vm1465_vm3, %v8476_v26  ;;  %v7426_v26 = vld [vmem:[%s7734_s6] sm:$0xff] }
 0x557   : > { %2714 = vmatpush.bf16.msrb.mxu1 %v7426_v26 }
 0x559   : > { %v2405_v34 = vpop.f32.mrf.mxu3 }
 0x55a   : > { %v2589_v59 = vmul.f32 %v8535_v57, %v2405_v34 }
 0x55c   : > { %v2602_v10 = vadd.f32 %v8543_v32, %v2589_v59 }
 0x561   : > { %v2408_v20 = vpop.f32.mrf.mxu3 }
 0x562   : > { %v2590_v39 = vmul.f32 %v8535_v57, %v2408_v20 }
 0x563   : > { %v2429_v0 = vpop.f32.mrf.mxu0 }
 0x564   : > { %v2591_v1 = vmul.f32 %v8535_v57, %v2429_v0  ;;  %v2603_v13 = vadd.f32 %v8543_v32, %v2590_v39  ;;  %v7449_v39 = vld [vmem:[%s10877_s2 + $0x78] sm:$0xff] }
 0x565   : > { %2971 = vmatpush.bf16.msrb.mxu3 %v7449_v39  ;;  %v7434_v39 = vld [vmem:[%s10877_s2] sm:$0xff] }
 0x566   : > { %v2604_v45 = vadd.f32 %v8543_v32, %v2591_v1  ;;  %v7440_v1 = vld [vmem:[%s10877_s2 + $0x30] sm:$0xff] }
 0x569   : > { %v2410_v40 = vpop.f32.mrf.mxu3 }
 0x56b   : > { %v2431_v5 = vpop.f32.mrf.mxu0 }
 0x56c   : > { %v2592_v21 = vmul.f32 %v8535_v57, %v2431_v5 }
 0x56e   : > { %v2605_v14 = vadd.f32 %v8543_v32, %v2592_v21 }
 0x573   : > { %v2434_v46 = vpop.f32.mrf.mxu0 }
 0x574   : > { %v2593_v55 = vmul.f32 %v8535_v57, %v2434_v46 }
 0x576   : > { %v2606_v17 = vadd.f32 %v8543_v32, %v2593_v55 }
 0x57b   : > { %v2436_v2 = vpop.f32.mrf.mxu0 }
 0x581   : > { %v2455_v63 = vpop.f32.mrf.mxu2 }
 0x582   : > { %v2594_v11 = vmul.f32 %v8535_v57, %v2455_v63 }
 0x583   : > { %v2531_v56 = vpop.f32.mrf.mxu0 }
 0x584   : > { %v2562_v42 = vmul.f32 %v8532_v54, %v2531_v56  ;;  %v2607_v46 = vadd.f32 %v8543_v32, %v2594_v11 }
 0x586   : > { %v2575_v18 = vadd.f32 %v8540_v6, %v2562_v42 }
 0x588   : > { %v8550_v37 = vadd.f32 %v2601_v60, %v2575_v18 }
 0x589   : > { %v2457_v4 = vpop.f32.mrf.mxu2 }
 0x58a   : > { %v2625_v23 = vmax.f32 %v8550_v37, 0.0  ;;  %v2595_v20 = vmul.f32 %v8535_v57, %v2457_v4 }
 0x58b   : > { %v2533_v7 = vpop.f32.mrf.mxu0 }
 0x58c   : > { %v2563_v9 = vmul.f32 %v8532_v54, %v2533_v7  ;;  %v2608_v42 = vadd.f32 %v8543_v32, %v2595_v20 }
 0x58e   : > { %v2576_v53 = vadd.f32 %v8540_v6, %v2563_v9 }
 0x590   : > { %v8553_v27 = vadd.f32 %v2602_v10, %v2576_v53 }
 0x591   : > { %v2460_v41 = vpop.f32.mrf.mxu2 }
 0x592   : > { %v2626_v58 = vmax.f32 %v8553_v27, 0.0  ;;  %v2596_v63 = vmul.f32 %v8535_v57, %v2460_v41 }
 0x593   : > { %v2536_v8 = vpop.f32.mrf.mxu0 }
 0x594   : > { %v2637_v30 = vpack.c.bf16 %v2626_v58, %v2625_v23  ;;  %v2564_v35 = vmul.f32 %v8532_v54, %v2536_v8 }
 0x596   : > { %2715 = vmatmul.bf16.vlgmr.msrb.gmra.mxu1 %v2637_v30  ;;  %v2577_v16 = vadd.f32 %v8540_v6, %v2564_v35  ;;  %v7441_v30 = vld [vmem:[%s10877_s2 + $0x38] sm:$0xff] }
 0x597   : > { %v7457_v35 = vld [vmem:[%s10877_s2 + $0xb8] sm:$0xff]  ;;  %2867 = vmatpush.bf16.msrb.mxu2 %v7441_v30  ;;  %v7451_v30 = vld [vmem:[%s10877_s2 + $0x88] sm:$0xff] }
 0x598   : > { %v8568_v48 = vadd.f32 %v2603_v13, %v2577_v16  ;;  %v7448_v13 = vld [vmem:[%s10877_s2 + $0x70] sm:$0xff]  ;;  %3075 = vmatpush.bf16.msra.mxu0 %v7457_v35  ;;  %v7442_v35 = vld [vmem:[%s10877_s2 + $0x40] sm:$0xff] }
 0x599   : > { %v2481_v19 = vpop.f32.mrf.mxu3  ;;  %v2462_v31 = vpop.f32.mrf.mxu2  ;;  %v7456_v16 = vld [vmem:[%s10877_s2 + $0xb0] sm:$0xff]  ;;  %2972 = vmatpush.bf16.msrb.mxu3 %v7448_v13 }
 0x59a   : > { %v2627_v25 = vmax.f32 %v8568_v48, 0.0  ;;  %v2597_v4 = vmul.f32 %v8535_v57, %v2481_v19  ;;  %v7447_v19 = vld [vmem:[%s10877_s2 + $0x68] sm:$0xff] }
 0x59b   : > { %v2538_v15 = vpop.f32.mrf.mxu0  ;;  %2868 = vmatpush.bf16.msrb.mxu2 %v7440_v1  ;;  %v8679_v1 = vperm.slane %v8529_v44, 2 }
 0x59c   : > { %v2565_v28 = vmul.f32 %v8532_v54, %v2538_v15  ;;  %v2609_v15 = vadd.f32 %v8543_v32, %v2596_v63  ;;  %3076 = vmatpush.bf16.msra.mxu0 %v7456_v16  ;;  %v7435_v63 = vld [vmem:[%s10877_s2 + $0x8] sm:$0xff] }
 0x59d   : > { %2973 = vmatpush.bf16.msrb.mxu3 %v7447_v19 }
 0x59e   : > { %v2578_v49 = vadd.f32 %v8540_v6, %v2565_v28 }
 0x5a0   : > { %v8571_v62 = vadd.f32 %v2604_v45, %v2578_v49  ;;  %v2610_v49 = vadd.f32 %v8543_v32, %v2597_v4  ;;  %v7450_v4 = vld [vmem:[%s10877_s2 + $0x80] sm:$0xff] }
 0x5a1   : > { %v8583_v36 = vpop.f32.mrf.mxu3 }
 0x5a2   : > { %v2628_v22 = vmax.f32 %v8571_v62, 0.0 }
 0x5a3   : > { %v2541_v29 = vpop.f32.mrf.mxu0 }
 0x5a4   : > { %v2638_v61 = vpack.c.bf16 %v2628_v22, %v2627_v25  ;;  %v2566_v12 = vmul.f32 %v8532_v54, %v2541_v29  ;;  %v7439_v29 = vld [vmem:[%s10877_s2 + $0x28] sm:$0xff] }
 0x5a5   : > { %2869 = vmatpush.bf16.msrb.mxu2 %v7439_v29 }
 0x5a6   : > { %2720 = vmatmul.bf16.gmra.mxu1 %v2638_v61  ;;  %v2579_v33 = vadd.f32 %v8540_v6, %v2566_v12  ;;  %v7455_v61 = vld [vmem:[%s10877_s2 + $0xa8] sm:$0xff] }
 0x5a7   : > { %3077 = vmatpush.bf16.msra.mxu0 %v7455_v61 }
 0x5a8   : > { %v8588_v3 = vadd.f32 %v2605_v14, %v2579_v33 }
 0x5a9   : > { %v2486_v24 = vpop.f32.mrf.mxu3 }
 0x5aa   : > { %v2629_v0 = vmax.f32 %v8588_v3, 0.0  ;;  %v7490_v3 = vld [vmem:[%s10878_s7 + $0xb8] sm:$0xff] }
 0x5ab   : > { %v2543_v43 = vpop.f32.mrf.mxu0 }
 0x5ac   : > { %v2567_v47 = vmul.f32 %v8532_v54, %v2543_v43 }
 0x5ae   : > { %v2580_v51 = vadd.f32 %v8540_v6, %v2567_v47 }
 0x5b0   : > { %v8591_v52 = vadd.f32 %v2606_v17, %v2580_v51  ;;  %v2598_v17 = vmul.f32 %v8535_v57, %v8583_v36  ;;  %v2599_v51 = vmul.f32 %v8535_v57, %v2486_v24 }
 0x5b1   : > { %v2488_v40 = vpop.f32.mrf.mxu3 }
 0x5b2   : > { %v2630_v50 = vmax.f32 %v8591_v52, 0.0  ;;  %v2611_v11 = vadd.f32 %v8543_v32, %v2598_v17  ;;  %v7446_v40 = vld [vmem:[%s10877_s2 + $0x60] sm:$0xff] }
 0x5b3   : > { %v2546_v5 = vpop.f32.mrf.mxu0  ;;  %2974 = vmatpush.bf16.msrb.mxu3 %v7446_v40 }
 0x5b4   : > { %v2639_v34 = vpack.c.bf16 %v2630_v50, %v2629_v0  ;;  %v2568_v26 = vmul.f32 %v8532_v54, %v2546_v5 }
 0x5b6   : > { %2725 = vmatmul.bf16.gmra.mxu1 %v2639_v34  ;;  %v2581_v2 = vadd.f32 %v8540_v6, %v2568_v26  ;;  %v2612_v26 = vadd.f32 %v8543_v32, %v2599_v51 }
 0x5b8   : > { %v8606_v60 = vadd.f32 %v2607_v46, %v2581_v2 }
 0x5ba   : > { %v2631_v7 = vmax.f32 %v8606_v60, 0.0 }
 0x5bb   : > { %v2548_v56 = vpop.f32.mrf.mxu0 }
 0x5bc   : > { %v2569_v38 = vmul.f32 %v8532_v54, %v2548_v56  ;;  %v7454_v56 = vld [vmem:[%s10877_s2 + $0xa0] sm:$0xff] }
 0x5bd   : > { %3078 = vmatpush.bf16.msra.mxu0 %v7454_v56 }
 0x5be   : > { %v2582_v59 = vadd.f32 %v8540_v6, %v2569_v38  ;;  %v7445_v38 = vld [vmem:[%s10877_s2 + $0x58] sm:$0xff] }
 0x5bf   : > { %2975 = vmatpush.bf16.msrb.mxu3 %v7445_v38 }
 0x5c0   : > { %v8609_v18 = vadd.f32 %v2608_v42, %v2582_v59  ;;  %v7453_v42 = vld [vmem:[%s10877_s2 + $0x98] sm:$0xff]  ;;  %v7436_v59 = vld [vmem:[%s10877_s2 + $0x10] sm:$0xff] }
 0x5c1   : > { %3079 = vmatpush.bf16.msra.mxu0 %v7453_v42 }
 0x5c2   : > { %v2632_v9 = vmax.f32 %v8609_v18, 0.0  ;;  %v7486_v18 = vld [vmem:[%s10878_s7 + $0x98] sm:$0xff] }
 0x5c3   : > { %v2551_v10 = vpop.f32.mrf.mxu0 }
 0x5c4   : > { %v2640_v53 = vpack.c.bf16 %v2632_v9, %v2631_v7  ;;  %v2570_v8 = vmul.f32 %v8532_v54, %v2551_v10  ;;  %v7444_v10 = vld [vmem:[%s10877_s2 + $0x50] sm:$0xff] }
 0x5c5   : > { %2976 = vmatpush.bf16.msrb.mxu3 %v7444_v10  ;;  %v7488_v10 = vld [vmem:[%s10878_s7 + $0xa8] sm:$0xff] }
 0x5c6   : > { %2730 = vmatmul.bf16.gmra.mxu1 %v2640_v53  ;;  %v2583_v28 = vadd.f32 %v8540_v6, %v2570_v8  ;;  %v7452_v53 = vld [vmem:[%s10877_s2 + $0x90] sm:$0xff]  ;;  %v7443_v8 = vld [vmem:[%s10877_s2 + $0x48] sm:$0xff] }
 0x5c7   : > { %3080 = vmatpush.bf16.msra.mxu0 %v7452_v53 }
 0x5c8   : > { %v8633_v12 = vadd.f32 %v2609_v15, %v2583_v28  ;;  %v8683_v15 = vperm.slane %v8529_v44, 3 }
 0x5c9   : > { %2977 = vmatpush.bf16.msrb.mxu3 %v7443_v8 }
 0x5ca   : > { %v2633_v55 = vmax.f32 %v8633_v12, 0.0 }
 0x5cb   : > { %v2553_v45 = vpop.f32.mrf.mxu0  ;;  %3081 = vmatpush.bf16.msra.mxu0 %v7451_v30  ;;  %v7487_v30 = vld [vmem:[%s10878_s7 + $0xa0] sm:$0xff] }
 0x5cc   : > { %v2571_v41 = vmul.f32 %v8532_v54, %v2553_v45 }
 0x5cd   : > { %2978 = vmatpush.bf16.msrb.mxu3 %v7442_v35 }
 0x5ce   : > { %v2584_v21 = vadd.f32 %v8540_v6, %v2571_v41 }
 0x5cf   : > { %3082 = vmatpush.bf16.msra.mxu0 %v7450_v4 }
 0x5d0   : > { %v8636_v31 = vadd.f32 %v2610_v49, %v2584_v21 }
 0x5d2   : > { %v2634_v33 = vmax.f32 %v8636_v31, 0.0 }
 0x5d3   : > { %v2556_v43 = vpop.f32.mrf.mxu0  ;;  %3906 = vmatpush.bf16.msrb.mxu0 %v7490_v3 }
 0x5d4   : > { %v2641_v14 = vpack.c.bf16 %v2634_v33, %v2633_v55  ;;  %v2572_v47 = vmul.f32 %v8532_v54, %v2556_v43 }
 0x5d6   : > { %2735 = vmatmul.bf16.gmra.mxu1 %v2641_v14  ;;  %v2585_v5 = vadd.f32 %v8540_v6, %v2572_v47 }
 0x5d8   : > { %v8652_v20 = vadd.f32 %v2611_v11, %v2585_v5 }
 0x5da   : > { %v2635_v57 = vmax.f32 %v8652_v20, 0.0 }
 0x5db   : > { %v2558_v34 = vpop.f32.mrf.mxu0 }
 0x5dc   : > { %v2573_v46 = vmul.f32 %v8532_v54, %v2558_v34  ;;  %v7438_v54 = vld [vmem:[%s10877_s2 + $0x20] sm:$0xff] }
 0x5dd   : > { %2870 = vmatpush.bf16.msrb.mxu2 %v7438_v54 }
 0x5de   : > { %v2586_v2 = vadd.f32 %v8540_v6, %v2573_v46  ;;  %v7437_v6 = vld [vmem:[%s10877_s2 + $0x18] sm:$0xff]  ;;  %s10913_s2 = smov 64  }
 0x5e0   : > { %v8655_v36 = vadd.f32 %v2612_v26, %v2586_v2 }
 0x5e1   : > { %2871 = vmatpush.bf16.msrb.mxu2 %v7437_v6 }
 0x5e2   : > { %v2636_v24 = vmax.f32 %v8655_v36, 0.0  ;;  %v7507_v36 = vld [vmem:[%s10880_s10 + $0x38] sm:$0xff] }
 0x5e4   : > { %v2642_v32 = vpack.c.bf16 %v2636_v24, %v2635_v57 }
 0x5e5   : > { %2872 = vmatpush.bf16.msrb.mxu2 %v7436_v59 }
 0x5e6   : > { %2740 = vmatmul.bf16.gmra.mxu1 %v2642_v32 }
 0x5e9   : > { %2873 = vmatpush.bf16.msrb.mxu2 %v7435_v63 }
 0x5ed   : > { %2874 = vmatpush.bf16.msrb.mxu2 %v7434_v39 }
 0x613   : > { %v2716_v13 = vpop.f32.mrf.mxu1 }
 0x614   : > { %v2747_v16 = vmul.f32 %v8679_v1, %v2716_v13 }
 0x616   : > { %v2760_v28 = vadd.f32 %v8683_v15, %v2747_v16  ;;  %v7484_v16 = vld [vmem:[%s10878_s7 + $0x88] sm:$0xff] }
 0x618   : > { %v2772_v41 = vadd.f32 %v2760_v28, %v2625_v23 }
 0x61a   : > { %v8692_v61 = vmax.f32 %v2772_v41, 0.0  ;;  %v7483_v41 = vld [vmem:[%s10878_s7 + $0x80] sm:$0xff] }
 0x61b   : > { %v2718_v45 = vpop.f32.mrf.mxu1 }
 0x61c   : > { %v2748_v49 = vmul.f32 %v8679_v1, %v2718_v45 }
 0x61e   : > { %v2761_v29 = vadd.f32 %v8683_v15, %v2748_v49 }
 0x620   : > { %v2773_v19 = vadd.f32 %v2761_v29, %v2626_v58 }
 0x622   : > { %v8694_v21 = vmax.f32 %v2773_v19, 0.0 }
 0x623   : > { %v2721_v43 = vpop.f32.mrf.mxu1 }
 0x624   : > { %v8698_v44 = vpack.c.bf16 %v8694_v21, %v8692_v61  ;;  %v2749_v14 = vmul.f32 %v8679_v1, %v2721_v43 }
 0x626   : > { %2875 = vmatmul.bf16.vlgmr.msrb.gmra.mxu2 %v8698_v44  ;;  %2979 = vmatmul.bf16.vlgmr.msrb.gmra.mxu3 %v8698_v44  ;;  %v2762_v37 = vadd.f32 %v8683_v15, %v2749_v14 }
 0x627   : > { %3083 = vmatmul.bf16.vlgmr.msra.gmra.mxu0 %v8698_v44 }
 0x628   : > { %v2774_v58 = vadd.f32 %v2762_v37, %v2627_v25 }
 0x62a   : > { %v8711_v51 = vmax.f32 %v2774_v58, 0.0 }
 0x62b   : > { %v2723_v27 = vpop.f32.mrf.mxu1 }
 0x62c   : > { %v2750_v23 = vmul.f32 %v8679_v1, %v2723_v27 }
 0x62e   : > { %v2763_v47 = vadd.f32 %v8683_v15, %v2750_v23 }
 0x630   : > { %v2775_v17 = vadd.f32 %v2763_v47, %v2628_v22 }
 0x632   : > { %v8713_v5 = vmax.f32 %v2775_v17, 0.0 }
 0x633   : > { %v2726_v34 = vpop.f32.mrf.mxu1 }
 0x634   : > { %v8717_v11 = vpack.c.bf16 %v8713_v5, %v8711_v51  ;;  %v2751_v26 = vmul.f32 %v8679_v1, %v2726_v34  ;;  %v7505_v34 = vld [vmem:[%s10880_s10 + $0x28] sm:$0xff] }
 0x636   : > { %2880 = vmatmul.bf16.gmra.mxu2 %v8717_v11  ;;  %2984 = vmatmul.bf16.gmra.mxu3 %v8717_v11  ;;  %v2764_v48 = vadd.f32 %v8683_v15, %v2751_v26 }
 0x637   : > { %3088 = vmatmul.bf16.gmra.mxu0 %v8717_v11 }
 0x638   : > { %v2776_v22 = vadd.f32 %v2764_v48, %v2629_v0  ;;  %v7489_v0 = vld [vmem:[%s10878_s7 + $0xb0] sm:$0xff] }
 0x639   : > { %3907 = vmatpush.bf16.msrb.mxu0 %v7489_v0 }
 0x63a   : > { %v8730_v32 = vmax.f32 %v2776_v22, 0.0 }
 0x63b   : > { %v2728_v62 = vpop.f32.mrf.mxu1 }
 0x63c   : > { %v2752_v25 = vmul.f32 %v8679_v1, %v2728_v62  ;;  %v7504_v62 = vld [vmem:[%s10880_s10 + $0x20] sm:$0xff] }
 0x63d   : > { %3908 = vmatpush.bf16.msrb.mxu0 %v7488_v10 }
 0x63e   : > { %v2765_v46 = vadd.f32 %v8683_v15, %v2752_v25 }
 0x640   : > { %v2777_v2 = vadd.f32 %v2765_v46, %v2630_v50  ;;  %v7503_v46 = vld [vmem:[%s10880_s10 + $0x18] sm:$0xff] }
 0x641   : > { %3909 = vmatpush.bf16.msrb.mxu0 %v7487_v30 }
 0x642   : > { %v8732_v54 = vmax.f32 %v2777_v2, 0.0 }
 0x643   : > { %v2731_v40 = vpop.f32.mrf.mxu1 }
 0x644   : > { %v8736_v56 = vpack.c.bf16 %v8732_v54, %v8730_v32  ;;  %v2753_v6 = vmul.f32 %v8679_v1, %v2731_v40 }
 0x645   : > { %3910 = vmatpush.bf16.msrb.mxu0 %v7486_v18 }
 0x646   : > { %2885 = vmatmul.bf16.gmra.mxu2 %v8736_v56  ;;  %2989 = vmatmul.bf16.gmra.mxu3 %v8736_v56  ;;  %v2766_v52 = vadd.f32 %v8683_v15, %v2753_v6 }
 0x647   : > { %3093 = vmatmul.bf16.gmra.mxu0 %v8736_v56 }
 0x648   : > { %v2778_v42 = vadd.f32 %v2766_v52, %v2631_v7  ;;  %v7485_v7 = vld [vmem:[%s10878_s7 + $0x90] sm:$0xff] }
 0x649   : > { %3911 = vmatpush.bf16.msrb.mxu0 %v7485_v7  ;;  %v7502_v52 = vld [vmem:[%s10880_s10 + $0x10] sm:$0xff] }
 0x64a   : > { %v8752_v63 = vmax.f32 %v2778_v42, 0.0 }
 0x64b   : > { %v2733_v50 = vpop.f32.mrf.mxu1 }
 0x64c   : > { %v2754_v38 = vmul.f32 %v8679_v1, %v2733_v50 }
 0x64d   : > { %3912 = vmatpush.bf16.msrb.mxu0 %v7484_v16  ;;  %v3116_v16 = vld [vmem:[%s10883_s11 + $0x8] sm:$0xf] }
 0x64e   : > { %v2767_v59 = vadd.f32 %v8683_v15, %v2754_v38  ;;  %v7501_v38 = vld [vmem:[%s10880_s10 + $0x8] sm:$0xff] }
 0x650   : > { %v2779_v53 = vadd.f32 %v2767_v59, %v2632_v9 }
 0x651   : > { %3913 = vmatpush.bf16.msrb.mxu0 %v7483_v41  ;;  %v3127_v41 = vunpack.c.l.b16 %v3116_v16 }
 0x652   : > { %v8754_v8 = vmax.f32 %v2779_v53, 0.0  ;;  %v7500_v53 = vld [vmem:[%s10880_s10] sm:$0xff] }
 0x653   : > { %v2736_v39 = vpop.f32.mrf.mxu1 }
 0x654   : > { %v8759_v35 = vpack.c.bf16 %v8754_v8, %v8752_v63  ;;  %v2755_v60 = vmul.f32 %v8679_v1, %v2736_v39 }
 0x655   : > { %4559 = vmatpush.bf16.msra.mxu0 %v7507_v36 }
 0x656   : > { %2890 = vmatmul.bf16.gmra.mxu2 %v8759_v35  ;;  %2994 = vmatmul.bf16.gmra.mxu3 %v8759_v35  ;;  %v2768_v9 = vadd.f32 %v8683_v15, %v2755_v60  ;;  %v8821_v60 = vld [vmem:[%s10883_s11] sm:$0xff] }
 0x657   : > { %3098 = vmatmul.bf16.gmra.mxu0 %v8759_v35 }
 0x658   : > { %v2780_v28 = vadd.f32 %v2768_v9, %v2633_v55 }
 0x65a   : > { %v8776_v29 = vmax.f32 %v2780_v28, 0.0 }
 0x65b   : > { %v2738_v4 = vpop.f32.mrf.mxu1 }
 0x65c   : > { %v2756_v13 = vmul.f32 %v8679_v1, %v2738_v4 }
 0x65e   : > { %v2769_v45 = vadd.f32 %v8683_v15, %v2756_v13 }
 0x660   : > { %v2781_v49 = vadd.f32 %v2769_v45, %v2634_v33 }
 0x662   : > { %v8778_v19 = vmax.f32 %v2781_v49, 0.0 }
 0x663   : > { %v2741_v43 = vpop.f32.mrf.mxu1 }
 0x664   : > { %10879 = vst [vmem:[#allocation17_spill] sm:$0xff] %v8778_v19  ;;  %v8782_v14 = vpack.c.bf16 %v8778_v19, %v8776_v29  ;;  %v2757_v12 = vmul.f32 %v8679_v1, %v2741_v43 }
 0x666   : > { %2895 = vmatmul.bf16.gmra.mxu2 %v8782_v14  ;;  %2999 = vmatmul.bf16.gmra.mxu3 %v8782_v14  ;;  %v2770_v31 = vadd.f32 %v8683_v15, %v2757_v12 }
 0x667   : > { %3103 = vmatmul.bf16.gmra.mxu0 %v8782_v14 }
 0x668   : > { %v2782_v37 = vadd.f32 %v2770_v31, %v2635_v57  ;;  %v8828_v31 = vpack.c.b16 %v3127_v41, %v3127_v41 }
 0x66a   : > { %v8795_v58 = vmax.f32 %v2782_v37, 0.0 }
 0x66b   : > { %v2743_v55 = vpop.f32.mrf.mxu1 }
 0x66c   : > { %v2758_v33 = vmul.f32 %v8679_v1, %v2743_v55  ;;  %10881 = vst [vmem:[#allocation18_spill] sm:$0xff] %v8795_v58  ;;  %v7506_v1 = vld [vmem:[%s10880_s10 + $0x30] sm:$0xff] }
 0x66d   : > { %4560 = vmatpush.bf16.msra.mxu0 %v7506_v1 }
 0x66e   : > { %v2771_v27 = vadd.f32 %v8683_v15, %v2758_v33 }
 0x670   : > { %v2783_v23 = vadd.f32 %v2771_v27, %v2636_v24 }
 0x671   : > { %4561 = vmatpush.bf16.msra.mxu0 %v7505_v34  ;;  %v7464_v34 = vld [vmem:[%s10884_s15 + $0x28] sm:$0xff] }
 0x672   : > { %v8797_v47 = vmax.f32 %v2783_v23, 0.0  ;;  %v7466_v23 = vld [vmem:[%s10884_s15 + $0x38] sm:$0xff] }
 0x674   : > { %10882 = vst [vmem:[#allocation19_spill] sm:$0xff] %v8797_v47  ;;  %v8801_v17 = vpack.c.bf16 %v8797_v47, %v8795_v58 }
 0x675   : > { %4562 = vmatpush.bf16.msra.mxu0 %v7504_v62 }
 0x676   : > { %2900 = vmatmul.bf16.gmra.mxu2 %v8801_v17  ;;  %3004 = vmatmul.bf16.gmra.mxu3 %v8801_v17 }
 0x677   : > { %3108 = vmatmul.bf16.gmra.mxu0 %v8801_v17 }
 0x679   : > { %4563 = vmatpush.bf16.msra.mxu0 %v7503_v46 }
 0x67d   : > { %4564 = vmatpush.bf16.msra.mxu0 %v7502_v52 }
 0x681   : > { %4565 = vmatpush.bf16.msra.mxu0 %v7501_v38  ;;  %v7474_v38 = vld [vmem:[%s10878_s7 + $0x38] sm:$0xff] }
 0x685   : > { %4566 = vmatpush.bf16.msra.mxu0 %v7500_v53  ;;  %v7473_v53 = vld [vmem:[%s10878_s7 + $0x30] sm:$0xff] }
 0x687   : > { %3914 = vmatmul.bf16.vlgmr.msrb.gmra.mxu0 %v8698_v44 }
 0x697   : > { %3919 = vmatmul.bf16.gmra.mxu0 %v8717_v11 }
 0x6a4   : > { %v3084_v20 = vpop.f32.mrf.mxu0 }
 0x6a7   : > { %3924 = vmatmul.bf16.gmra.mxu0 %v8736_v56 }
 0x6a9   : > { %v2876_v57 = vpop.f32.mrf.mxu2  ;;  %v2980_v24 = vpop.f32.mrf.mxu3 }
 0x6ac   : > { %v3086_v15 = vpop.f32.mrf.mxu0 }
 0x6ad   : > { %v3120_v3 = vpack.c.bf16 %v3086_v15, %v3084_v20 }
 0x6b1   : > { %v2878_v26 = vpop.f32.mrf.mxu2  ;;  %v2982_v48 = vpop.f32.mrf.mxu3 }
 0x6b2   : > { %v3117_v39 = vpack.c.bf16 %v2878_v26, %v2876_v57 }
 0x6b4   : > { %v3089_v25 = vpop.f32.mrf.mxu0 }
 0x6b5   : > { %v3121_v22 = vpack.c.bf16 %v3089_v25, %v3089_v25  ;;  %v7463_v25 = vld [vmem:[%s10884_s15 + $0x20] sm:$0xff] }
 0x6b7   : > { %v3137_v2 = vsel %vm1196_vm1, %v3121_v22, 0  ;;  %3929 = vmatmul.bf16.gmra.mxu0 %v8759_v35 }
 0x6b8   : > { %3142 = vmatpush.bf16.msra.mxu1 %v3137_v2  ;;  %v7462_v2 = vld [vmem:[%s10884_s15 + $0x18] sm:$0xff] }
 0x6b9   : > { %v2881_v40 = vpop.f32.mrf.mxu2  ;;  %v2985_v6 = vpop.f32.mrf.mxu3 }
 0x6ba   : > { %v3119_v50 = vpack.c.bf16 %v2985_v6, %v2982_v48  ;;  %v3118_v10 = vpack.c.bf16 %v2980_v24, %v2881_v40  ;;  %v7465_v24 = vld [vmem:[%s10884_s15 + $0x30] sm:$0xff] }
 0x6bc   : > { %v3091_v0 = vpop.f32.mrf.mxu0  ;;  %3143 = vmatpush.bf16.msra.mxu1 %v3120_v3  ;;  %v7461_v3 = vld [vmem:[%s10884_s15 + $0x10] sm:$0xff] }
 0x6c0   : > { %3144 = vmatpush.bf16.msra.mxu1 %v3119_v50 }
 0x6c1   : > { %v2883_v42 = vpop.f32.mrf.mxu2  ;;  %v2987_v59 = vpop.f32.mrf.mxu3 }
 0x6c4   : > { %v3094_v30 = vpop.f32.mrf.mxu0  ;;  %3145 = vmatpush.bf16.msra.mxu1 %v3118_v10 }
 0x6c5   : > { %v3160_v49 = vpack.c.bf16 %v3094_v30, %v3091_v0  ;;  %v7459_v30 = vld [vmem:[%s10884_s15] sm:$0xff] }
 0x6c7   : > { %3934 = vmatmul.bf16.gmra.mxu0 %v8782_v14 }
 0x6c8   : > { %3146 = vmatpush.bf16.msra.mxu1 %v3117_v39 }
 0x6c9   : > { %v2886_v18 = vpop.f32.mrf.mxu2  ;;  %v2990_v7 = vpop.f32.mrf.mxu3 }
 0x6ca   : > { %v3157_v20 = vpack.c.bf16 %v2886_v18, %v2883_v42  ;;  %v7460_v42 = vld [vmem:[%s10884_s15 + $0x8] sm:$0xff] }
 0x6cb   : > { %6820 = vmatmul.msk.bf16.vlgmr.msra.gmra.mxu1 %vm1189_vm2, %v8821_v60 }
 0x6cc   : > { %v3096_v9 = vpop.f32.mrf.mxu0 }
 0x6cd   : > { %v3161_v4 = vpack.c.bf16 %v3096_v9, %v3096_v9  ;;  %v7472_v9 = vld [vmem:[%s10878_s7 + $0x28] sm:$0xff] }
 0x6cf   : > { %v3163_v13 = vsel %vm1196_vm1, %v3161_v4, 0 }
 0x6d0   : > { %3168 = vmatpush.bf16.msra.mxu2 %v3163_v13  ;;  %v7471_v13 = vld [vmem:[%s10878_s7 + $0x20] sm:$0xff] }
 0x6d1   : > { %v2888_v28 = vpop.f32.mrf.mxu2  ;;  %v2992_v45 = vpop.f32.mrf.mxu3 }
 0x6d2   : > { %v3159_v12 = vpack.c.bf16 %v2992_v45, %v2990_v7  ;;  %v3158_v37 = vpack.c.bf16 %v2987_v59, %v2888_v28 }
 0x6d4   : > { %v3099_v43 = vpop.f32.mrf.mxu0  ;;  %3169 = vmatpush.bf16.msra.mxu2 %v3160_v49  ;;  %v7470_v49 = vld [vmem:[%s10878_s7 + $0x18] sm:$0xff] }
 0x6d7   : > { %3939 = vmatmul.bf16.gmra.mxu0 %v8801_v17 }
 0x6d8   : > { %3170 = vmatpush.bf16.msra.mxu2 %v3159_v12  ;;  %v7469_v12 = vld [vmem:[%s10878_s7 + $0x10] sm:$0xff] }
 0x6d9   : > { %v2891_v55 = vpop.f32.mrf.mxu2  ;;  %v2995_v33 = vpop.f32.mrf.mxu3 }
 0x6db   : > { %6821 = vmatmul.msk.bf16.gmra.mxu1 %vm1189_vm2, %v8828_v31 }
 0x6dc   : > { %v3101_v27 = vpop.f32.mrf.mxu0  ;;  %3171 = vmatpush.bf16.msra.mxu2 %v3158_v37  ;;  %v7468_v37 = vld [vmem:[%s10878_s7 + $0x8] sm:$0xff] }
 0x6dd   : > { %v3186_v22 = vpack.c.bf16 %v3101_v27, %v3099_v43  ;;  %v7482_v27 = vld [vmem:[%s10878_s7 + $0x78] sm:$0xff] }
 0x6e0   : > { %3172 = vmatpush.bf16.msra.mxu2 %v3157_v20  ;;  %v7467_v20 = vld [vmem:[%s10878_s7] sm:$0xff] }
 0x6e1   : > { %v2893_v36 = vpop.f32.mrf.mxu2  ;;  %v2997_v57 = vpop.f32.mrf.mxu3 }
 0x6e2   : > { %v3183_v59 = vpack.c.bf16 %v2893_v36, %v2891_v55  ;;  %v7481_v36 = vld [vmem:[%s10878_s7 + $0x70] sm:$0xff] }
 0x6e3   : > { %6822 = vmatmul.msk.bf16.vlgmr.msra.gmra.mxu2 %vm1189_vm2, %v8821_v60 }
 0x6e4   : > { %3355 = vmatpush.bf16.msrb.mxu2 %v7466_v23  ;;  %v3104_v1 = vpop.f32.mrf.mxu0 }
 0x6e5   : > { %v3187_v15 = vpack.c.bf16 %v3104_v1, %v3104_v1  ;;  %v7480_v1 = vld [vmem:[%s10878_s7 + $0x68] sm:$0xff] }
 0x6e7   : > { %v3189_v26 = vsel %vm1196_vm1, %v3187_v15, 0  ;;  %4567 = vmatmul.bf16.vlgmr.msra.gmra.mxu0 %v8698_v44 }
 0x6e8   : > { %3356 = vmatpush.bf16.msrb.mxu2 %v7465_v24  ;;  %3194 = vmatpush.bf16.msra.mxu3 %v3189_v26 }
 0x6e9   : > { %v2896_v48 = vpop.f32.mrf.mxu2  ;;  %v3000_v62 = vpop.f32.mrf.mxu3 }
 0x6ea   : > { %v3185_v40 = vpack.c.bf16 %v3000_v62, %v2997_v57  ;;  %v3184_v52 = vpack.c.bf16 %v2995_v33, %v2896_v48  ;;  %v7478_v48 = vld [vmem:[%s10878_s7 + $0x58] sm:$0xff]  ;;  %v7477_v62 = vld [vmem:[%s10878_s7 + $0x50] sm:$0xff] }
 0x6ec   : > { %3357 = vmatpush.bf16.msrb.mxu2 %v7464_v34  ;;  %v3106_v46 = vpop.f32.mrf.mxu0  ;;  %3195 = vmatpush.bf16.msra.mxu3 %v3186_v22  ;;  %v7479_v34 = vld [vmem:[%s10878_s7 + $0x60] sm:$0xff]  ;;  %v7476_v22 = vld [vmem:[%s10878_s7 + $0x48] sm:$0xff] }
 0x6f0   : > { %3358 = vmatpush.bf16.msrb.mxu2 %v7463_v25  ;;  %3196 = vmatpush.bf16.msra.mxu3 %v3185_v40 }
 0x6f1   : > { %v3002_v6 = vpop.f32.mrf.mxu3  ;;  %v2898_v0 = vpop.f32.mrf.mxu2 }
 0x6f3   : > { %6823 = vmatmul.msk.bf16.gmra.mxu2 %vm1189_vm2, %v8828_v31 }
 0x6f4   : > { %3359 = vmatpush.bf16.msrb.mxu2 %v7462_v2  ;;  %v3109_v50 = vpop.f32.mrf.mxu0  ;;  %3197 = vmatpush.bf16.msra.mxu3 %v3184_v52 }
 0x6f5   : > { %v3212_v16 = vpack.c.bf16 %v3109_v50, %v3106_v46  ;;  %v7475_v46 = vld [vmem:[%s10878_s7 + $0x40] sm:$0xff] }
 0x6f6   : > { %v8884_v50 = vld [vmem:[%s10885_s16] sm:$0xff]  ;;  %s10833_s16 = smov 16  }
 0x6f7   : > { %4572 = vmatmul.bf16.gmra.mxu0 %v8717_v11 }
 0x6f8   : > { %3360 = vmatpush.bf16.msrb.mxu2 %v7461_v3  ;;  %3198 = vmatpush.bf16.msra.mxu3 %v3183_v59  ;;  %v8888_v59 = vperm.slane %v8884_v50, 0 }
 0x6f9   : > { %v3005_v10 = vpop.f32.mrf.mxu3  ;;  %v2901_v18 = vpop.f32.mrf.mxu2 }
 0x6fa   : > { %v3209_v23 = vpack.c.bf16 %v2901_v18, %v2898_v0 }
 0x6fb   : > { %6824 = vmatmul.msk.bf16.vlgmr.msra.gmra.mxu3 %vm1189_vm2, %v8821_v60 }
 0x6fc   : > { %3698 = vmatpush.bf16.msrb.mxu3 %v7474_v38  ;;  %3361 = vmatpush.bf16.msrb.mxu2 %v7460_v42  ;;  %v3111_v39 = vpop.f32.mrf.mxu0 }
 0x6fd   : > { %v3213_v7 = vpack.c.bf16 %v3111_v39, %v3111_v39  ;;  %v8892_v39 = vperm.slane %v8884_v50, 1 }
 0x6ff   : > { %v3215_v4 = vsel %vm1196_vm1, %v3213_v7, 0 }
 0x700   : > { %3699 = vmatpush.bf16.msrb.mxu3 %v7473_v53  ;;  %3362 = vmatpush.bf16.msrb.mxu2 %v7459_v30 }
 0x701   : > { %3220 = vmatpush.bf16.msrb.mxu1 %v3215_v4  ;;  %v3007_v28 = vpop.f32.mrf.mxu3  ;;  %v2903_v43 = vpop.f32.mrf.mxu2 }
 0x702   : > { %v3211_v41 = vpack.c.bf16 %v3007_v28, %v3005_v10  ;;  %v3210_v55 = vpack.c.bf16 %v3002_v6, %v2903_v43 }
 0x704   : > { %3700 = vmatpush.bf16.msrb.mxu3 %v7472_v9  ;;  %v3915_v45 = vpop.f32.mrf.mxu0 }
 0x705   : > { %3221 = vmatpush.bf16.msrb.mxu1 %v3212_v16 }
 0x707   : > { %4577 = vmatmul.bf16.gmra.mxu0 %v8736_v56 }
 0x708   : > { %3701 = vmatpush.bf16.msrb.mxu3 %v7471_v13 }
 0x709   : > { %3222 = vmatpush.bf16.msrb.mxu1 %v3211_v41 }
 0x70b   : > { %6825 = vmatmul.msk.bf16.gmra.mxu3 %vm1189_vm2, %v8828_v31 }
 0x70c   : > { %3702 = vmatpush.bf16.msrb.mxu3 %v7470_v49  ;;  %v3917_v33 = vpop.f32.mrf.mxu0 }
 0x70d   : > { %3223 = vmatpush.bf16.msrb.mxu1 %v3210_v55  ;;  %v3951_v26 = vpack.c.bf16 %v3917_v33, %v3915_v45 }
 0x710   : > { %3703 = vmatpush.bf16.msrb.mxu3 %v7469_v12 }
 0x711   : > { %3224 = vmatpush.bf16.msrb.mxu1 %v3209_v23 }
 0x714   : > { %3704 = vmatpush.bf16.msrb.mxu3 %v7468_v37  ;;  %6826 = vmatmul.msk.bf16.vlgmr.msrb.gmra.mxu1 %vm1189_vm2, %v8821_v60  ;;  %v3920_v57 = vpop.f32.mrf.mxu0 }
 0x715   : > { %3802 = vmatpush.bf16.msra.mxu1 %v7482_v27  ;;  %v3952_v24 = vpack.c.bf16 %v3920_v57, %v3920_v57 }
 0x717   : > { %v3968_v15 = vsel %vm1196_vm1, %v3952_v24, 0  ;;  %4582 = vmatmul.bf16.gmra.mxu0 %v8759_v35 }
 0x718   : > { %3705 = vmatpush.bf16.msrb.mxu3 %v7467_v20  ;;  %3973 = vmatpush.bf16.msra.mxu2 %v3968_v15 }
 0x719   : > { %3803 = vmatpush.bf16.msra.mxu1 %v7481_v36 }
 0x71b   : > { %3706 = vmatmul.bf16.vlgmr.msrb.gmra.mxu3 %v8698_v44 }
 0x71c   : > { %v3922_v60 = vpop.f32.mrf.mxu0  ;;  %3974 = vmatpush.bf16.msra.mxu2 %v3951_v26 }
 0x71d   : > { %3804 = vmatpush.bf16.msra.mxu1 %v7480_v1 }
 0x721   : > { %3805 = vmatpush.bf16.msra.mxu1 %v7479_v34 }
 0x724   : > { %6827 = vmatmul.msk.bf16.gmra.mxu1 %vm1189_vm2, %v8828_v31  ;;  %v3925_v25 = vpop.f32.mrf.mxu0 }
 0x725   : > { %3806 = vmatpush.bf16.msra.mxu1 %v7478_v48  ;;  %v3991_v3 = vpack.c.bf16 %v3925_v25, %v3922_v60 }
 0x727   : > { %4587 = vmatmul.bf16.gmra.mxu0 %v8782_v14 }
 0x729   : > { %3807 = vmatpush.bf16.msra.mxu1 %v7477_v62 }
 0x72b   : > { %3711 = vmatmul.bf16.gmra.mxu3 %v8717_v11 }
 0x72c   : > { %v3927_v2 = vpop.f32.mrf.mxu0 }
 0x72d   : > { %3808 = vmatpush.bf16.msra.mxu1 %v7476_v22  ;;  %v3992_v40 = vpack.c.bf16 %v3927_v2, %v3927_v2 }
 0x72f   : > { %v3994_v6 = vsel %vm1196_vm1, %v3992_v40, 0 }
 0x730   : > { %3999 = vmatpush.bf16.msra.mxu3 %v3994_v6 }
 0x731   : > { %3809 = vmatpush.bf16.msra.mxu1 %v7475_v46 }
 0x734   : > { %3810 = vmatmul.bf16.vlgmr.msra.gmra.mxu1 %v8698_v44  ;;  %v3930_v31 = vpop.f32.mrf.mxu0  ;;  %4000 = vmatpush.bf16.msra.mxu3 %v3991_v3 }
 0x737   : > { %4592 = vmatmul.bf16.gmra.mxu0 %v8801_v17 }
 0x73b   : > { %3716 = vmatmul.bf16.gmra.mxu3 %v8736_v56 }
 0x73c   : > { %v3932_v52 = vpop.f32.mrf.mxu0 }
 0x73d   : > { %v4017_v53 = vpack.c.bf16 %v3932_v52, %v3930_v31 }
 0x744   : > { %3815 = vmatmul.bf16.gmra.mxu1 %v8717_v11  ;;  %v3935_v0 = vpop.f32.mrf.mxu0 }
 0x745   : > { %v4018_v38 = vpack.c.bf16 %v3935_v0, %v3935_v0 }
 0x747   : > { %v4020_v42 = vsel %vm1196_vm1, %v4018_v38, 0 }
 0x748   : > { %v3148_v10 = vpop.f32.mrf.mxu1  ;;  %4025 = vmatpush.bf16.msrb.mxu1 %v4020_v42 }
 0x749   : > { %v3236_v30 = vmul.f32 %v8888_v59, %v3148_v10 }
 0x74b   : > { %3721 = vmatmul.bf16.gmra.mxu3 %v8759_v35  ;;  %v3249_v18 = vadd.f32 %v8892_v39, %v3236_v30 }
 0x74c   : > { %4026 = vmatpush.bf16.msrb.mxu1 %v4017_v53 }
 0x74d   : > { %v8898_v4 = vadd.f32 %v3249_v18, %v8692_v61 }
 0x74f   : > { %v3273_v28 = vmax.f32 %v8898_v4, 0.0 }
 0x750   : > { %v3150_v7 = vpop.f32.mrf.mxu1 }
 0x751   : > { %v3237_v9 = vmul.f32 %v8888_v59, %v3150_v7 }
 0x753   : > { %v3250_v13 = vadd.f32 %v8892_v39, %v3237_v9 }
 0x754   : > { %3820 = vmatmul.bf16.gmra.mxu1 %v8736_v56 }
 0x755   : > { %v8903_v16 = vadd.f32 %v3250_v13, %v8694_v21 }
 0x757   : > { %v3274_v45 = vmax.f32 %v8903_v16, 0.0 }
 0x758   : > { %v3153_v49 = vpop.f32.mrf.mxu1 }
 0x759   : > { %v3285_v41 = vpack.c.bf16 %v3274_v45, %v3273_v28  ;;  %v3238_v12 = vmul.f32 %v8888_v59, %v3153_v49 }
 0x75b   : > { %3363 = vmatmul.bf16.vlgmr.msrb.gmra.mxu2 %v3285_v41  ;;  %3726 = vmatmul.bf16.gmra.mxu3 %v8782_v14  ;;  %v3251_v55 = vadd.f32 %v8892_v39, %v3238_v12 }
 0x75d   : > { %v8917_v27 = vadd.f32 %v3251_v55, %v8711_v51 }
 0x75f   : > { %v3275_v36 = vmax.f32 %v8917_v27, 0.0 }
 0x760   : > { %v3155_v43 = vpop.f32.mrf.mxu1 }
 0x764   : > { %3825 = vmatmul.bf16.gmra.mxu1 %v8759_v35 }
 0x766   : > { %v3174_v33 = vpop.f32.mrf.mxu2 }
 0x767   : > { %v3239_v37 = vmul.f32 %v8888_v59, %v3174_v33 }
 0x769   : > { %v3252_v23 = vadd.f32 %v8892_v39, %v3239_v37 }
 0x76b   : > { %v8921_v20 = vadd.f32 %v3252_v23, %v8713_v5  ;;  %3731 = vmatmul.bf16.gmra.mxu3 %v8801_v17 }
 0x76d   : > { %v3276_v57 = vmax.f32 %v8921_v20, 0.0  ;;  %v7511_v20 = vld [vmem:[%s10880_s10 + $0x58] sm:$0xff] }
 0x76e   : > { %v3176_v24 = vpop.f32.mrf.mxu2 }
 0x76f   : > { %v3286_v1 = vpack.c.bf16 %v3276_v57, %v3275_v36  ;;  %v3240_v15 = vmul.f32 %v8888_v59, %v3176_v24 }
 0x771   : > { %3368 = vmatmul.bf16.gmra.mxu2 %v3286_v1  ;;  %v3253_v34 = vadd.f32 %v8892_v39, %v3240_v15 }
 0x773   : > { %v8935_v48 = vadd.f32 %v3253_v34, %v8730_v32 }
 0x774   : > { %3830 = vmatmul.bf16.gmra.mxu1 %v8782_v14 }
 0x775   : > { %v3277_v46 = vmax.f32 %v8935_v48, 0.0 }
 0x776   : > { %v3179_v26 = vpop.f32.mrf.mxu2 }
 0x777   : > { %v3241_v60 = vmul.f32 %v8888_v59, %v3179_v26 }
 0x779   : > { %v3254_v62 = vadd.f32 %v8892_v39, %v3241_v60 }
 0x77b   : > { %v8939_v25 = vadd.f32 %v3254_v62, %v8732_v54 }
 0x77d   : > { %v3278_v22 = vmax.f32 %v8939_v25, 0.0 }
 0x77e   : > { %v3200_v2 = vpop.f32.mrf.mxu3  ;;  %v3181_v40 = vpop.f32.mrf.mxu2 }
 0x77f   : > { %v3287_v6 = vpack.c.bf16 %v3278_v22, %v3277_v46  ;;  %v3242_v3 = vmul.f32 %v8888_v59, %v3200_v2 }
 0x781   : > { %3373 = vmatmul.bf16.gmra.mxu2 %v3287_v6  ;;  %v3255_v31 = vadd.f32 %v8892_v39, %v3242_v3 }
 0x783   : > { %v8952_v38 = vadd.f32 %v3255_v31, %v8752_v63 }
 0x784   : > { %3835 = vmatmul.bf16.gmra.mxu1 %v8801_v17 }
 0x785   : > { %v3279_v53 = vmax.f32 %v8952_v38, 0.0  ;;  %v7499_v38 = vld [vmem:[%s10887_s26 + $0x38] sm:$0xff] }
 0x786   : > { %v3202_v52 = vpop.f32.mrf.mxu3 }
 0x787   : > { %v3243_v0 = vmul.f32 %v8888_v59, %v3202_v52 }
 0x789   : > { %v3256_v42 = vadd.f32 %v8892_v39, %v3243_v0 }
 0x78b   : > { %v8956_v10 = vadd.f32 %v3256_v42, %v8754_v8  ;;  %v3937_v42 = vpop.f32.mrf.mxu0 }
 0x78d   : > { %v3280_v30 = vmax.f32 %v8956_v10, 0.0 }
 0x78e   : > { %v3205_v18 = vpop.f32.mrf.mxu3 }
 0x78f   : > { %v3288_v7 = vpack.c.bf16 %v3280_v30, %v3279_v53  ;;  %v3244_v13 = vmul.f32 %v8888_v59, %v3205_v18 }
 0x791   : > { %v3226_v9 = vpop.f32.mrf.mxu1  ;;  %3378 = vmatmul.bf16.gmra.mxu2 %v3288_v7  ;;  %v3257_v43 = vadd.f32 %v8892_v39, %v3244_v13 }
 0x792   : > { %v3245_v49 = vmul.f32 %v8888_v59, %v3226_v9 }
 0x793   : > { %v8972_v37 = vadd.f32 %v3257_v43, %v8776_v29  ;;  %v3940_v9 = vpop.f32.mrf.mxu0 }
 0x794   : > { %v3258_v41 = vadd.f32 %v8892_v39, %v3245_v49 }
 0x795   : > { %v3281_v24 = vmax.f32 %v8972_v37, 0.0 }
 0x796   : > { %v3207_v12 = vpop.f32.mrf.mxu3  ;;  %v8969_v55 = vadd.f32 %v3258_v41, %v8778_v19 }
 0x798   : > { %v3282_v23 = vmax.f32 %v8969_v55, 0.0  ;;  %v7494_v55 = vld [vmem:[%s10887_s26 + $0x10] sm:$0xff] }
 0x799   : > { %v3228_v33 = vpop.f32.mrf.mxu1 }
 0x79a   : > { %v3289_v15 = vpack.c.bf16 %v3282_v23, %v3281_v24  ;;  %v3246_v26 = vmul.f32 %v8888_v59, %v3228_v33 }
 0x79b   : > { %v3942_v43 = vpop.f32.mrf.mxu0 }
 0x79c   : > { %v3259_v2 = vadd.f32 %v8892_v39, %v3246_v26 }
 0x79e   : > { %v3707_v1 = vpop.f32.mrf.mxu3  ;;  %v8988_v31 = vadd.f32 %v3259_v2, %v8795_v58  ;;  %v4043_v2 = vpack.c.bf16 %v3940_v9, %v3937_v42  ;;  %v9009_v42 = vperm.slane %v8884_v50, 3 }
 0x7a0   : > { %v3283_v0 = vmax.f32 %v8988_v31, 0.0  ;;  %v7492_v31 = vld [vmem:[%s10887_s26] sm:$0xff] }
 0x7a1   : > { %v3231_v34 = vpop.f32.mrf.mxu1  ;;  %3383 = vmatmul.bf16.gmra.mxu2 %v3289_v15  ;;  %v4044_v15 = vpack.c.bf16 %v3942_v43, %v3942_v43 }
 0x7a2   : > { %v3247_v60 = vmul.f32 %v8888_v59, %v3231_v34 }
 0x7a4   : > { %v3260_v62 = vadd.f32 %v8892_v39, %v3247_v60  ;;  %v8997_v60 = vld [vmem:[%s10886_s18] sm:$0xff] }
 0x7a6   : > { %v8985_v40 = vadd.f32 %v3260_v62, %v8797_v47  ;;  %v3709_v6 = vpop.f32.mrf.mxu3  ;;  %v4046_v62 = vsel %vm1196_vm1, %v4044_v15, 0 }
 0x7a7   : > { %v3948_v26 = vpack.c.bf16 %v3709_v6, %v3707_v1  ;;  %v9006_v1 = vperm.slane %v8884_v50, 2 }
 0x7a8   : > { %v3284_v52 = vmax.f32 %v8985_v40, 0.0 }
 0x7a9   : > { %v3233_v3 = vpop.f32.mrf.mxu1 }
 0x7aa   : > { %v3290_v59 = vpack.c.bf16 %v3284_v52, %v3283_v0 }
 0x7ae   : > { %v3712_v39 = vpop.f32.mrf.mxu3 }
 0x7b1   : > { %v3811_v18 = vpop.f32.mrf.mxu1  ;;  %3388 = vmatmul.bf16.gmra.mxu2 %v3290_v59 }
 0x7b2   : > { %v3949_v12 = vpack.c.bf16 %v3811_v18, %v3712_v39 }
 0x7b6   : > { %v3714_v13 = vpop.f32.mrf.mxu3 }
 0x7b9   : > { %v3813_v7 = vpop.f32.mrf.mxu1 }
 0x7be   : > { %v3717_v33 = vpop.f32.mrf.mxu3 }
 0x7c1   : > { %v3816_v49 = vpop.f32.mrf.mxu1 }
 0x7c2   : > { %v3950_v41 = vpack.c.bf16 %v3816_v49, %v3813_v7  ;;  %v3947_v7 = vld [vmem:[%s10886_s18 + $0x8] sm:$0xf] }
 0x7c3   : > { %v3958_v18 = vunpack.c.l.b16 %v3947_v7 }
 0x7c4   : > { %3975 = vmatpush.bf16.msra.mxu2 %v3950_v41 }
 0x7c5   : > { %v9003_v43 = vpack.c.b16 %v3958_v18, %v3958_v18 }
 0x7c6   : > { %v3719_v3 = vpop.f32.mrf.mxu3 }
 0x7c8   : > { %3976 = vmatpush.bf16.msra.mxu2 %v3949_v12 }
 0x7c9   : > { %v3818_v34 = vpop.f32.mrf.mxu1 }
 0x7ca   : > { %v3989_v6 = vpack.c.bf16 %v3818_v34, %v3719_v3 }
 0x7cc   : > { %3977 = vmatpush.bf16.msra.mxu2 %v3948_v26  ;;  %v3988_v26 = vpack.c.bf16 %v3717_v33, %v3714_v13 }
 0x7ce   : > { %v3722_v41 = vpop.f32.mrf.mxu3 }
 0x7cf   : > { %6992 = vmatmul.msk.bf16.vlgmr.msra.gmra.mxu2 %vm1189_vm2, %v8997_v60 }
 0x7d0   : > { %4051 = vmatpush.bf16.msrb.mxu2 %v4046_v62 }
 0x7d1   : > { %v3821_v59 = vpop.f32.mrf.mxu1 }
 0x7d4   : > { %4052 = vmatpush.bf16.msrb.mxu2 %v4043_v2 }
 0x7d6   : > { %v3724_v34 = vpop.f32.mrf.mxu3 }
 0x7d9   : > { %v3823_v39 = vpop.f32.mrf.mxu1 }
 0x7da   : > { %v3990_v49 = vpack.c.bf16 %v3823_v39, %v3821_v59 }
 0x7dc   : > { %4001 = vmatpush.bf16.msra.mxu3 %v3990_v49 }
 0x7de   : > { %v3364_v9 = vpop.f32.mrf.mxu2  ;;  %v3727_v7 = vpop.f32.mrf.mxu3 }
 0x7df   : > { %6993 = vmatmul.msk.bf16.gmra.mxu2 %vm1189_vm2, %v9003_v43  ;;  %v3395_v12 = vmul.f32 %v9006_v1, %v3364_v9 }
 0x7e0   : > { %4002 = vmatpush.bf16.msra.mxu3 %v3989_v6 }
 0x7e1   : > { %v3826_v15 = vpop.f32.mrf.mxu1  ;;  %v3408_v62 = vadd.f32 %v9009_v42, %v3395_v12 }
 0x7e2   : > { %v4015_v6 = vpack.c.bf16 %v3826_v15, %v3727_v7 }
 0x7e3   : > { %v9017_v2 = vadd.f32 %v3408_v62, %v3273_v28  ;;  %v4014_v62 = vpack.c.bf16 %v3724_v34, %v3722_v41  ;;  %v7513_v41 = vld [vmem:[%s10880_s10 + $0x68] sm:$0xff] }
 0x7e4   : > { %4003 = vmatpush.bf16.msra.mxu3 %v3988_v26  ;;  %v7515_v26 = vld [vmem:[%s10880_s10 + $0x78] sm:$0xff] }
 0x7e5   : > { %v3432_v50 = vmax.f32 %v9017_v2, 0.0 }
 0x7e6   : > { %v3366_v3 = vpop.f32.mrf.mxu2 }
 0x7e7   : > { %6994 = vmatmul.msk.bf16.vlgmr.msra.gmra.mxu3 %vm1189_vm2, %v8997_v60  ;;  %v3396_v59 = vmul.f32 %v9006_v1, %v3366_v3  ;;  %3444 = vrot.lane.b32.xlu0 %v3432_v50, %s10835_s23 }
 0x7e8   : > { %4186 = vmatpush.bf16.msrb.mxu3 %v7499_v38 }
 0x7e9   : > { %v3828_v13 = vpop.f32.mrf.mxu1  ;;  %v3409_v33 = vadd.f32 %v9009_v42, %v3396_v59 }
 0x7eb   : > { %v9029_v4 = vadd.f32 %v3409_v33, %v3274_v45  ;;  %v3729_v45 = vpop.f32.mrf.mxu3 }
 0x7ed   : > { %v3433_v28 = vmax.f32 %v9029_v4, 0.0 }
 0x7ef   : > { %3446 = vrot.lane.b32.xlu0 %v3433_v28, %s10835_s23 }
 0x7f1   : > { %v3831_v18 = vpop.f32.mrf.mxu1 }
 0x7f2   : > { %v4016_v39 = vpack.c.bf16 %v3831_v18, %v3828_v13  ;;  %v7514_v13 = vld [vmem:[%s10880_s10 + $0x70] sm:$0xff] }
 0x7f3   : > { %v3732_v7 = vpop.f32.mrf.mxu3 }
 0x7f4   : > { %4027 = vmatpush.bf16.msrb.mxu1 %v4016_v39  ;;  %v3369_v49 = vpop.f32.mrf.mxu2 }
 0x7f5   : > { %v3397_v9 = vmul.f32 %v9006_v1, %v3369_v49  ;;  %v7512_v49 = vld [vmem:[%s10880_s10 + $0x60] sm:$0xff] }
 0x7f7   : > { %6995 = vmatmul.msk.bf16.gmra.mxu3 %vm1189_vm2, %v9003_v43  ;;  %v3410_v16 = vadd.f32 %v9009_v42, %v3397_v9 }
 0x7f8   : > { %4028 = vmatpush.bf16.msrb.mxu1 %v4015_v6 }
 0x7f9   : > { %v3833_v12 = vpop.f32.mrf.mxu1  ;;  %v9042_v3 = vadd.f32 %v3410_v16, %v3275_v36 }
 0x7fb   : > { %v3434_v15 = vmax.f32 %v9042_v3, 0.0 }
 0x7fc   : > { %4029 = vmatpush.bf16.msrb.mxu1 %v4014_v62  ;;  %v3371_v59 = vpop.f32.mrf.mxu2 }
 0x7fd   : > { %v3398_v33 = vmul.f32 %v9006_v1, %v3371_v59  ;;  %3448 = vrot.lane.b32.xlu1 %v3434_v15, %s10835_s23  ;;  %v3734_v59 = vpop.f32.mrf.mxu3 }
 0x7ff   : > { %6996 = vmatmul.msk.bf16.vlgmr.msrb.gmra.mxu1 %vm1189_vm2, %v8997_v60  ;;  %v3411_v27 = vadd.f32 %v9009_v42, %v3398_v33  ;;  %v7510_v33 = vld [vmem:[%s10880_s10 + $0x50] sm:$0xff] }
 0x800   : > { %4663 = vmatpush.bf16.msra.mxu1 %v7515_v26 }
 0x801   : > { %v3836_v36 = vpop.f32.mrf.mxu1  ;;  %v9056_v34 = vadd.f32 %v3411_v27, %v3276_v57  ;;  %v4041_v27 = vpack.c.bf16 %v3833_v12, %v3734_v59  ;;  %v7520_v59 = vld [vmem:[%s10880_s10 + $0xa0] sm:$0xff] }
 0x803   : > { %v3435_v18 = vmax.f32 %v9056_v34, 0.0 }
 0x804   : > { %4664 = vmatpush.bf16.msra.mxu1 %v7514_v13  ;;  %v3374_v39 = vpop.f32.mrf.mxu2 }
 0x805   : > { %v3399_v6 = vmul.f32 %v9006_v1, %v3374_v39  ;;  %3450 = vrot.lane.b32.xlu1 %v3435_v18, %s10835_s23  ;;  %v4040_v39 = vpack.c.bf16 %v3732_v7, %v3729_v45 }
 0x807   : > { %v3412_v9 = vadd.f32 %v9009_v42, %v3399_v6 }
 0x808   : > { %4665 = vmatpush.bf16.msra.mxu1 %v7513_v41 }
 0x809   : > { %v3838_v16 = vpop.f32.mrf.mxu1  ;;  %v9068_v26 = vadd.f32 %v3412_v9, %v3277_v46  ;;  %v7509_v46 = vld [vmem:[%s10880_s10 + $0x48] sm:$0xff]  ;;  %v7508_v9 = vld [vmem:[%s10880_s10 + $0x40] sm:$0xff] }
 0x80a   : > { %v4042_v57 = vpack.c.bf16 %v3838_v16, %v3836_v36  ;;  %v7523_v36 = vld [vmem:[%s10880_s10 + $0xb8] sm:$0xff]  ;;  %v7522_v16 = vld [vmem:[%s10880_s10 + $0xb0] sm:$0xff] }
 0x80b   : > { %v3436_v62 = vmax.f32 %v9068_v26, 0.0 }
 0x80c   : > { %4666 = vmatpush.bf16.msra.mxu1 %v7512_v49  ;;  %4053 = vmatpush.bf16.msrb.mxu2 %v4042_v57  ;;  %v3376_v13 = vpop.f32.mrf.mxu2 }
 0x80d   : > { %v3400_v41 = vmul.f32 %v9006_v1, %v3376_v13  ;;  %3452 = vrot.lane.b32.xlu2 %v3436_v62, %s10835_s23 }
 0x80f   : > { %6997 = vmatmul.msk.bf16.gmra.mxu1 %vm1189_vm2, %v9003_v43  ;;  %v3413_v48 = vadd.f32 %v9009_v42, %v3400_v41 }
 0x810   : > { %4667 = vmatpush.bf16.msra.mxu1 %v7511_v20  ;;  %4054 = vmatpush.bf16.msrb.mxu2 %v4041_v27 }
 0x811   : > { %v9083_v12 = vadd.f32 %v3413_v48, %v3278_v22  ;;  %v7521_v22 = vld [vmem:[%s10880_s10 + $0xa8] sm:$0xff]  ;;  %v7518_v48 = vld [vmem:[%s10880_s10 + $0x90] sm:$0xff] }
 0x813   : > { %v3437_v49 = vmax.f32 %v9083_v12, 0.0 }
 0x814   : > { %4668 = vmatpush.bf16.msra.mxu1 %v7510_v33  ;;  %4055 = vmatpush.bf16.msrb.mxu2 %v4040_v39  ;;  %v3379_v6 = vpop.f32.mrf.mxu2  ;;  %v7497_v39 = vld [vmem:[%s10887_s26 + $0x28] sm:$0xff] }
 0x815   : > { %v3401_v20 = vmul.f32 %v9006_v1, %v3379_v6  ;;  %3454 = vrot.lane.b32.xlu2 %v3437_v49, %s10835_s23 }
 0x817   : > { %6998 = vmatmul.msk.bf16.vlgmr.msrb.gmra.mxu2 %vm1189_vm2, %v8997_v60  ;;  %v3414_v25 = vadd.f32 %v9009_v42, %v3401_v20  ;;  %v7516_v20 = vld [vmem:[%s10880_s10 + $0x80] sm:$0xff] }
 0x818   : > { %4669 = vmatpush.bf16.msra.mxu1 %v7509_v46  ;;  %4767 = vmatpush.bf16.msra.mxu2 %v7523_v36  ;;  %v7498_v36 = vld [vmem:[%s10887_s26 + $0x30] sm:$0xff] }
 0x819   : > { %v9098_v45 = vadd.f32 %v3414_v25, %v3279_v53  ;;  %v7519_v53 = vld [vmem:[%s10880_s10 + $0x98] sm:$0xff]  ;;  %4187 = vmatpush.bf16.msrb.mxu3 %v7498_v36  ;;  %v7496_v25 = vld [vmem:[%s10887_s26 + $0x20] sm:$0xff] }
 0x81b   : > { %v3438_v7 = vmax.f32 %v9098_v45, 0.0 }
 0x81c   : > { %4670 = vmatpush.bf16.msra.mxu1 %v7508_v9  ;;  %4768 = vmatpush.bf16.msra.mxu2 %v7522_v16  ;;  %v3381_v57 = vpop.f32.mrf.mxu2 }
 0x81d   : > { %v3402_v13 = vmul.f32 %v9006_v1, %v3381_v57  ;;  %3456 = vrot.lane.b32.xlu0 %v3438_v7, %s10835_s23  ;;  %4188 = vmatpush.bf16.msrb.mxu3 %v7497_v39  ;;  %v7495_v57 = vld [vmem:[%s10887_s26 + $0x18] sm:$0xff] }
 0x81f   : > { %4671 = vmatmul.bf16.vlgmr.msra.gmra.mxu1 %v8698_v44  ;;  %v3415_v60 = vadd.f32 %v9009_v42, %v3402_v13 }
 0x820   : > { %4769 = vmatpush.bf16.msra.mxu2 %v7521_v22 }
 0x821   : > { %v9112_v33 = vadd.f32 %v3415_v60, %v3280_v30  ;;  %v7517_v30 = vld [vmem:[%s10880_s10 + $0x88] sm:$0xff]  ;;  %4189 = vmatpush.bf16.msrb.mxu3 %v7496_v25 }
 0x823   : > { %v3439_v27 = vmax.f32 %v9112_v33, 0.0 }
 0x824   : > { %4770 = vmatpush.bf16.msra.mxu2 %v7520_v59  ;;  %v3384_v41 = vpop.f32.mrf.mxu2 }
 0x825   : > { %v3403_v46 = vmul.f32 %v9006_v1, %v3384_v41  ;;  %3458 = vrot.lane.b32.xlu1 %v3439_v27, %s10835_s23  ;;  %4190 = vmatpush.bf16.msrb.mxu3 %v7495_v57 }
 0x827   : > { %6999 = vmatmul.msk.bf16.gmra.mxu2 %vm1189_vm2, %v9003_v43  ;;  %v3416_v10 = vadd.f32 %v9009_v42, %v3403_v46 }
 0x828   : > { %4771 = vmatpush.bf16.msra.mxu2 %v7519_v53  ;;  %v7493_v53 = vld [vmem:[%s10887_s26 + $0x8] sm:$0xff] }
 0x829   : > { %v9128_v6 = vadd.f32 %v3416_v10, %v3281_v24  ;;  %4191 = vmatpush.bf16.msrb.mxu3 %v7494_v55 }
 0x82b   : > { %v3440_v9 = vmax.f32 %v9128_v6, 0.0 }
 0x82c   : > { %4772 = vmatpush.bf16.msra.mxu2 %v7518_v48  ;;  %v3386_v16 = vpop.f32.mrf.mxu2 }
 0x82d   : > { %v3404_v43 = vmul.f32 %v9006_v1, %v3386_v16  ;;  %3460 = vrot.lane.b32.xlu2 %v3440_v9, %s10835_s23  ;;  %4192 = vmatpush.bf16.msrb.mxu3 %v7493_v53 }
 0x82f   : > { %4676 = vmatmul.bf16.gmra.mxu1 %v8717_v11  ;;  %v3417_v37 = vadd.f32 %v9009_v42, %v3404_v43 }
 0x830   : > { %4773 = vmatpush.bf16.msra.mxu2 %v7517_v30 }
 0x831   : > { %v9141_v24 = vadd.f32 %v3417_v37, %v3282_v23  ;;  %4193 = vmatpush.bf16.msrb.mxu3 %v7492_v31 }
 0x833   : > { %v3441_v22 = vmax.f32 %v9141_v24, 0.0 }
 0x834   : > { %4774 = vmatpush.bf16.msra.mxu2 %v7516_v20  ;;  %v3389_v59 = vpop.f32.mrf.mxu2 }
 0x835   : > { %v3405_v13 = vmul.f32 %v9006_v1, %v3389_v59  ;;  %3462 = vrot.lane.b32.xlu0 %v3441_v22, %s10835_s23 }
 0x837   : > { %4775 = vmatmul.bf16.vlgmr.msra.gmra.mxu2 %v8698_v44  ;;  %v3418_v60 = vadd.f32 %v9009_v42, %v3405_v13 }
 0x839   : > { %v9154_v23 = vadd.f32 %v3418_v60, %v3283_v0 }
 0x83b   : > { %v3442_v38 = vmax.f32 %v9154_v23, 0.0 }
 0x83c   : > { %v3391_v41 = vpop.f32.mrf.mxu2 }
 0x83d   : > { %v3406_v48 = vmul.f32 %v9006_v1, %v3391_v41  ;;  %3464 = vrot.lane.b32.xlu1 %v3442_v38, %s10835_s23  ;;  %v9175_v1 = vld [vmem:[%s10888_s28] sm:$0xff]  ;;  %s10889_s28 = sld [smem:[#allocation13_spill]] }
 0x83f   : > { %4681 = vmatmul.bf16.gmra.mxu1 %v8736_v56  ;;  %v3419_v46 = vadd.f32 %v9009_v42, %v3406_v48  ;;  %v9179_v42 = vperm.slane %v9175_v1, 0 }
 0x841   : > { %v9167_v0 = vadd.f32 %v3419_v46, %v3284_v52  ;;  %v9183_v52 = vperm.slane %v9175_v1, 1 }
 0x843   : > { %v3443_v36 = vmax.f32 %v9167_v0, 0.0 }
 0x845   : > { %3466 = vrot.lane.b32.xlu2 %v3443_v36, %s10835_s23 }
 0x847   : > { %4780 = vmatmul.bf16.gmra.mxu2 %v8717_v11 }
 0x84f   : > { %4686 = vmatmul.bf16.gmra.mxu1 %v8759_v35 }
 0x852   : > { %v3979_v10 = vpop.f32.mrf.mxu2 }
 0x853   : > { %v4067_v40 = vmul.f32 %v9179_v42, %v3979_v10 }
 0x855   : > { %v4080_v30 = vadd.f32 %v9183_v52, %v4067_v40 }
 0x857   : > { %4785 = vmatmul.bf16.gmra.mxu2 %v8736_v56  ;;  %v9193_v37 = vadd.f32 %v4080_v30, %v8692_v61 }
 0x859   : > { %v3445_v39 = vpop.permute.xlu0 %3444  ;;  %v10821_v2 = vmax.f32 %v9193_v37, 0.0 }
 0x85a   : > { %v3981_v16 = vpop.f32.mrf.mxu2  ;;  %v9189_v20 = vmax.f32 %v3432_v50, %v3445_v39 }
 0x85b   : > { %v4068_v43 = vmul.f32 %v9179_v42, %v3981_v16 }
 0x85c   : > { %3480 = vrot.lane.b32.xlu0 %v9189_v20, %s10824_s1 }
 0x85d   : > { %v4081_v25 = vadd.f32 %v9183_v52, %v4068_v43 }
 0x85f   : > { %v9199_v57 = vadd.f32 %v4081_v25, %v8694_v21  ;;  %4691 = vmatmul.bf16.gmra.mxu1 %v8782_v14 }
 0x861   : > { %v10820_v50 = vmax.f32 %v9199_v57, 0.0  ;;  %v3447_v59 = vpop.permute.xlu0 %3446 }
 0x862   : > { %v3984_v13 = vpop.f32.mrf.mxu2  ;;  %v9210_v55 = vmax.f32 %v3433_v28, %v3447_v59 }
 0x863   : > { %v4116_v60 = vpack.c.bf16 %v10820_v50, %v10821_v2  ;;  %v4069_v53 = vmul.f32 %v9179_v42, %v3984_v13  ;;  %v9402_v50 = vperm.slane %v9175_v1, 3 }
 0x864   : > { %3482 = vrot.lane.b32.xlu1 %v9210_v55, %s10824_s1 }
 0x865   : > { %4194 = vmatmul.bf16.vlgmr.msrb.gmra.mxu3 %v4116_v60  ;;  %v4082_v48 = vadd.f32 %v9183_v52, %v4069_v53 }
 0x867   : > { %4790 = vmatmul.bf16.gmra.mxu2 %v8759_v35  ;;  %v3453_v41 = vpop.permute.xlu2 %3452  ;;  %v9223_v28 = vadd.f32 %v4082_v48, %v8711_v51 }
 0x868   : > { %v9219_v10 = vmax.f32 %v3436_v62, %v3453_v41 }
 0x869   : > { %v10819_v26 = vmax.f32 %v9223_v28, 0.0 }
 0x86a   : > { %v4005_v46 = vpop.f32.mrf.mxu3  ;;  %v3986_v31 = vpop.f32.mrf.mxu2 }
 0x86b   : > { %v4070_v4 = vmul.f32 %v9179_v42, %v4005_v46 }
 0x86c   : > { %3488 = vrot.lane.b32.xlu1 %v9219_v10, %s10824_s1 }
 0x86d   : > { %v4083_v40 = vadd.f32 %v9183_v52, %v4070_v4 }
 0x86f   : > { %v9229_v30 = vadd.f32 %v4083_v40, %v8713_v5  ;;  %4696 = vmatmul.bf16.gmra.mxu1 %v8801_v17  ;;  %v3449_v39 = vpop.permute.xlu1 %3448  ;;  %v3455_v13 = vpop.permute.xlu2 %3454 }
 0x870   : > { %v9236_v16 = vmax.f32 %v3434_v15, %v3449_v39  ;;  %v9248_v3 = vmax.f32 %v3437_v49, %v3455_v13 }
 0x871   : > { %v10816_v62 = vmax.f32 %v9229_v30, 0.0 }
 0x872   : > { %v4007_v43 = vpop.f32.mrf.mxu3  ;;  %3484 = vrot.lane.b32.xlu2 %v9236_v16, %s10824_s1 }
 0x873   : > { %v4117_v25 = vpack.c.bf16 %v10816_v62, %v10819_v26  ;;  %v4071_v59 = vmul.f32 %v9179_v42, %v4007_v43 }
 0x875   : > { %4199 = vmatmul.bf16.gmra.mxu3 %v4117_v25  ;;  %v4084_v15 = vadd.f32 %v9183_v52, %v4071_v59 }
 0x877   : > { %4795 = vmatmul.bf16.gmra.mxu2 %v8782_v14  ;;  %v3451_v60 = vpop.permute.xlu1 %3450  ;;  %v9261_v12 = vadd.f32 %v4084_v15, %v8730_v32 }
 0x878   : > { %v9253_v53 = vmax.f32 %v3435_v18, %v3451_v60 }
 0x879   : > { %v10815_v18 = vmax.f32 %v9261_v12, 0.0 }
 0x87a   : > { %v4010_v41 = vpop.f32.mrf.mxu3  ;;  %3486 = vrot.lane.b32.xlu0 %v9253_v53, %s10824_s1  ;;  %3490 = vrot.lane.b32.xlu2 %v9248_v3, %s10824_s1 }
 0x87b   : > { %v4072_v48 = vmul.f32 %v9179_v42, %v4010_v41 }
 0x87c   : > { %v4031_v46 = vpop.f32.mrf.mxu1 }
 0x87d   : > { %v4085_v49 = vadd.f32 %v9183_v52, %v4072_v48  ;;  %v4073_v43 = vmul.f32 %v9179_v42, %v4031_v46 }
 0x87f   : > { %v9265_v31 = vadd.f32 %v4085_v49, %v8732_v54  ;;  %v4086_v60 = vadd.f32 %v9183_v52, %v4073_v43 }
 0x881   : > { %v10814_v34 = vmax.f32 %v9265_v31, 0.0  ;;  %v9288_v46 = vadd.f32 %v4086_v60, %v8752_v63 }
 0x882   : > { %v4012_v4 = vpop.f32.mrf.mxu3 }
 0x883   : > { %v4118_v40 = vpack.c.bf16 %v10814_v34, %v10815_v18 }
 0x884   : > { %v4033_v39 = vpop.f32.mrf.mxu1 }
 0x885   : > { %v4074_v25 = vmul.f32 %v9179_v42, %v4033_v39  ;;  %4204 = vmatmul.bf16.gmra.mxu3 %v4118_v40  ;;  %v10813_v40 = vmax.f32 %v9288_v46, 0.0 }
 0x887   : > { %v4087_v59 = vadd.f32 %v9183_v52, %v4074_v25  ;;  %4800 = vmatmul.bf16.gmra.mxu2 %v8801_v17  ;;  %v3461_v13 = vpop.permute.xlu2 %3460 }
 0x888   : > { %v9280_v15 = vmax.f32 %v3440_v9, %v3461_v13 }
 0x889   : > { %v9283_v41 = vadd.f32 %v4087_v59, %v8754_v8 }
 0x88a   : > { %3496 = vrot.lane.b32.xlu2 %v9280_v15, %s10824_s1 }
 0x88b   : > { %v10810_v49 = vmax.f32 %v9283_v41, 0.0 }
 0x88c   : > { %v4036_v48 = vpop.f32.mrf.mxu1 }
 0x88d   : > { %v4119_v9 = vpack.c.bf16 %v10810_v49, %v10813_v40  ;;  %v4075_v43 = vmul.f32 %v9179_v42, %v4036_v48 }
 0x88f   : > { %v3457_v4 = vpop.permute.xlu0 %3456  ;;  %v4088_v59 = vadd.f32 %v9183_v52, %v4075_v43 }
 0x890   : > { %v9294_v6 = vmax.f32 %v3438_v7, %v3457_v4 }
 0x891   : > { %v9312_v60 = vadd.f32 %v4088_v59, %v8776_v29 }
 0x892   : > { %3492 = vrot.lane.b32.xlu0 %v9294_v6, %s10824_s1 }
 0x894   : > { %v4038_v39 = vpop.f32.mrf.mxu1 }
 0x895   : > { %4209 = vmatmul.bf16.gmra.mxu3 %v4119_v9  ;;  %v10812_v39 = vmax.f32 %v9312_v60, 0.0 }
 0x897   : > { %v3459_v25 = vpop.permute.xlu1 %3458 }
 0x898   : > { %v9306_v45 = vmax.f32 %v3439_v27, %v3459_v25 }
 0x89a   : > { %v4057_v7 = vpop.f32.mrf.mxu2  ;;  %3494 = vrot.lane.b32.xlu1 %v9306_v45, %s10824_s1 }
 0x89b   : > { %v4076_v13 = vmul.f32 %v9179_v42, %v4057_v7 }
 0x89d   : > { %v4089_v4 = vadd.f32 %v9183_v52, %v4076_v13 }
 0x89f   : > { %v9316_v48 = vadd.f32 %v4089_v4, %v8778_v19  ;;  %v3467_v9 = vpop.permute.xlu2 %3466  ;;  %v4672_v4 = vpop.f32.mrf.mxu1 }
 0x8a0   : > { %v9322_v27 = vmax.f32 %v3443_v36, %v3467_v9 }
 0x8a1   : > { %v10811_v33 = vmax.f32 %v9316_v48, 0.0 }
 0x8a2   : > { %v4059_v43 = vpop.f32.mrf.mxu2  ;;  %3502 = vrot.lane.b32.xlu2 %v9322_v27, %s10824_s1 }
 0x8a3   : > { %v4120_v25 = vpack.c.bf16 %v10811_v33, %v10812_v39  ;;  %v4077_v59 = vmul.f32 %v9179_v42, %v4059_v43  ;;  %v4568_v33 = vpop.f32.mrf.mxu0 }
 0x8a5   : > { %4214 = vmatmul.bf16.gmra.mxu3 %v4120_v25  ;;  %v4090_v13 = vadd.f32 %v9183_v52, %v4077_v59 }
 0x8a7   : > { %v3463_v7 = vpop.permute.xlu0 %3462  ;;  %v9340_v49 = vadd.f32 %v4090_v13, %v8795_v58  ;;  %v4674_v13 = vpop.f32.mrf.mxu1 }
 0x8a8   : > { %v9334_v0 = vmax.f32 %v3441_v22, %v3463_v7 }
 0x8aa   : > { %v4062_v36 = vpop.f32.mrf.mxu2  ;;  %3498 = vrot.lane.b32.xlu0 %v9334_v0, %s10824_s1 }
 0x8ab   : > { %v4078_v9 = vmul.f32 %v9179_v42, %v4062_v36  ;;  %v10818_v42 = vmax.f32 %v9340_v49, 0.0 }
 0x8ad   : > { %v4091_v43 = vadd.f32 %v9183_v52, %v4078_v9  ;;  %v4570_v9 = vpop.f32.mrf.mxu0 }
 0x8af   : > { %v9344_v25 = vadd.f32 %v4091_v43, %v8797_v47  ;;  %v3465_v59 = vpop.permute.xlu1 %3464  ;;  %v4677_v43 = vpop.f32.mrf.mxu1 }
 0x8b0   : > { %v9349_v22 = vmax.f32 %v3442_v38, %v3465_v59 }
 0x8b1   : > { %v10817_v24 = vmax.f32 %v9344_v25, 0.0 }
 0x8b2   : > { %v4064_v7 = vpop.f32.mrf.mxu2  ;;  %3500 = vrot.lane.b32.xlu1 %v9349_v22, %s10824_s1  ;;  %s10890_s1 = sld [smem:[#allocation16_spill]] }
 0x8b3   : > { %v4121_v52 = vpack.c.bf16 %v10817_v24, %v10818_v42 }
 0x8b5   : > { %4219 = vmatmul.bf16.gmra.mxu3 %v4121_v52  ;;  %v4573_v23 = vpop.f32.mrf.mxu0 }
 0x8b7   : > { %v9358_v38 = vpop.f32.mrf.mxu1 }
 0x8ba   : > { %v4776_v36 = vpop.f32.mrf.mxu2 }
 0x8bd   : > { %v9364_v62 = vpop.f32.mrf.mxu0 }
 0x8c2   : > { %v4778_v39 = vpop.f32.mrf.mxu2 }
 0x8c3   : > { %v4812_v52 = vpack.c.bf16 %v4778_v39, %v4776_v36 }
 0x8c5   : > { %v4578_v36 = vpop.f32.mrf.mxu0 }
 0x8ca   : > { %v4781_v59 = vpop.f32.mrf.mxu2 }
 0x8cb   : > { %v4813_v40 = vpack.c.bf16 %v4781_v59, %v4781_v59 }
 0x8cc   : > { %v3485_v34 = vpop.permute.xlu2 %3484 }
 0x8cd   : > { %v4829_v7 = vsel %vm1196_vm1, %v4813_v40, 0  ;;  %v9362_v18 = vmax.f32 %v9236_v16, %v3485_v34  ;;  %v4682_v16 = vpop.f32.mrf.mxu1  ;;  %v4811_v34 = vpack.c.bf16 %v4677_v43, %v4674_v13  ;;  %v4809_v13 = vpack.c.bf16 %v4570_v9, %v4568_v33  ;;  %v4808_v9 = vld [vmem:[%s10889_s28 + $0x8] sm:$0xf] }
 0x8ce   : > { %4834 = vmatpush.bf16.msra.mxu3 %v4829_v7  ;;  %v3481_v24 = vpop.permute.xlu0 %3480  ;;  %v9395_v33 = vperm.slane %v9175_v1, 2 }
 0x8cf   : > { %v9367_v42 = vmax.f32 %v9189_v20, %v3481_v24  ;;  %3520 = vrot.lane.b32.xlu2 %v9362_v18, %s10833_s16  ;;  %v4810_v20 = vpack.c.bf16 %v4672_v4, %v4573_v23  ;;  %v4580_v23 = vpop.f32.mrf.mxu0 }
 0x8d1   : > { %3516 = vrot.lane.b32.xlu0 %v9367_v42, %s10833_s16 }
 0x8d2   : > { %v4783_v40 = vpop.f32.mrf.mxu2  ;;  %4835 = vmatpush.bf16.msra.mxu3 %v4812_v52 }
 0x8d4   : > { %v3491_v59 = vpop.permute.xlu2 %3490 }
 0x8d5   : > { %v9374_v7 = vmax.f32 %v9248_v3, %v3491_v59  ;;  %v4684_v43 = vpop.f32.mrf.mxu1  ;;  %v9384_v3 = vld [vmem:[%s10889_s28] sm:$0xff] }
 0x8d6   : > { %4836 = vmatpush.bf16.msra.mxu3 %v4811_v34  ;;  %v3483_v39 = vpop.permute.xlu1 %3482 }
 0x8d7   : > { %v9377_v24 = vmax.f32 %v9210_v55, %v3483_v39  ;;  %3526 = vrot.lane.b32.xlu2 %v9374_v7, %s10833_s16  ;;  %v9404_v47 = vpop.f32.mrf.mxu0 }
 0x8d9   : > { %3518 = vrot.lane.b32.xlu1 %v9377_v24, %s10833_s16 }
 0x8da   : > { %v4786_v52 = vpop.f32.mrf.mxu2  ;;  %4837 = vmatpush.bf16.msra.mxu3 %v4810_v20 }
 0x8dd   : > { %v9398_v20 = vpop.f32.mrf.mxu1 }
 0x8de   : > { %4838 = vmatpush.bf16.msra.mxu3 %v4809_v13  ;;  %v3489_v34 = vpop.permute.xlu1 %3488 }
 0x8df   : > { %v9387_v4 = vmax.f32 %v9219_v10, %v3489_v34  ;;  %v4852_v10 = vpack.c.bf16 %v4786_v52, %v4783_v40  ;;  %v4819_v34 = vunpack.c.l.b16 %v4808_v9  ;;  %v4850_v52 = vpack.c.bf16 %v9358_v38, %v4580_v23  ;;  %v7540_v38 = vld [vmem:[%s10890_s1 + $0x38] sm:$0xff] }
 0x8e0   : > { %v4849_v23 = vpack.c.bf16 %v4578_v36, %v9364_v62 }
 0x8e1   : > { %7164 = vmatmul.msk.bf16.vlgmr.msra.gmra.mxu3 %vm1189_vm2, %v9384_v3  ;;  %3524 = vrot.lane.b32.xlu1 %v9387_v4, %s10833_s16 }
 0x8e2   : > { %v4788_v55 = vpop.f32.mrf.mxu2 }
 0x8e3   : > { %v4853_v59 = vpack.c.bf16 %v4788_v55, %v4788_v55  ;;  %v4851_v55 = vpack.c.bf16 %v4684_v43, %v4682_v16 }
 0x8e5   : > { %v4855_v39 = vsel %vm1196_vm1, %v4853_v59, 0  ;;  %v4689_v16 = vpop.f32.mrf.mxu1 }
 0x8e6   : > { %4860 = vmatpush.bf16.msrb.mxu0 %v4855_v39  ;;  %v9406_v39 = vpack.c.b16 %v4819_v34, %v4819_v34 }
 0x8e8   : > { %v4195_v13 = vpop.f32.mrf.mxu3 }
 0x8e9   : > { %v4226_v26 = vmul.f32 %v9395_v33, %v4195_v13  ;;  %v10892_v13 = vmax.f32 %v9199_v57, 0.0 }
 0x8ea   : > { %v4791_v2 = vpop.f32.mrf.mxu2  ;;  %4861 = vmatpush.bf16.msrb.mxu0 %v4852_v10 }
 0x8eb   : > { %v4239_v58 = vadd.f32 %v9402_v50, %v4226_v26  ;;  %v10891_v26 = vmax.f32 %v9193_v37, 0.0  ;;  %v7539_v37 = vld [vmem:[%s10890_s1 + $0x30] sm:$0xff] }
 0x8ec   : > { %v3487_v59 = vpop.permute.xlu0 %3486 }
 0x8ed   : > { %v9410_v40 = vmax.f32 %v9253_v53, %v3487_v59  ;;  %v9420_v53 = vadd.f32 %v4239_v58, %v10891_v26  ;;  %v4585_v59 = vpop.f32.mrf.mxu0  ;;  %v4692_v36 = vpop.f32.mrf.mxu1  ;;  %v7538_v26 = vld [vmem:[%s10890_s1 + $0x28] sm:$0xff] }
 0x8ee   : > { %4862 = vmatpush.bf16.msrb.mxu0 %v4851_v55 }
 0x8ef   : > { %3522 = vrot.lane.b32.xlu0 %v9410_v40, %s10833_s16  ;;  %v10829_v55 = vmax.f32 %v9420_v53, 0.0 }
 0x8f0   : > { %v4197_v1 = vpop.f32.mrf.mxu3 }
 0x8f1   : > { %v4227_v43 = vmul.f32 %v9395_v33, %v4197_v1  ;;  %7165 = vmatmul.msk.bf16.gmra.mxu3 %vm1189_vm2, %v9406_v39 }
 0x8f2   : > { %v4793_v9 = vpop.f32.mrf.mxu2  ;;  %4863 = vmatpush.bf16.msrb.mxu0 %v4850_v52 }
 0x8f3   : > { %v4240_v10 = vadd.f32 %v9402_v50, %v4227_v43 }
 0x8f5   : > { %v9427_v34 = vadd.f32 %v4240_v10, %v10892_v13  ;;  %v4588_v19 = vpop.f32.mrf.mxu0 }
 0x8f6   : > { %4864 = vmatpush.bf16.msrb.mxu0 %v4849_v23 }
 0x8f7   : > { %v10828_v52 = vmax.f32 %v9427_v34, 0.0  ;;  %4275 = vrot.lane.b32.xlu0 %v10829_v55, %s10835_s23 }
 0x8f8   : > { %v4200_v58 = vpop.f32.mrf.mxu3 }
 0x8f9   : > { %v4228_v62 = vmul.f32 %v9395_v33, %v4200_v58  ;;  %4277 = vrot.lane.b32.xlu1 %v10828_v52, %s10835_s23  ;;  %7166 = vmatmul.msk.bf16.vlgmr.msrb.gmra.mxu0 %vm1189_vm2, %v9384_v3  ;;  %v7537_v58 = vld [vmem:[%s10890_s1 + $0x20] sm:$0xff]  ;;  %v4878_v52 = vpack.c.bf16 %v4793_v9, %v4791_v2 }
 0x8fa   : > { %5452 = vmatpush.bf16.msra.mxu0 %v7540_v38  ;;  %v4796_v57 = vpop.f32.mrf.mxu2  ;;  %v10893_v38 = vmax.f32 %v9223_v28, 0.0  ;;  %v7536_v28 = vld [vmem:[%s10890_s1 + $0x18] sm:$0xff] }
 0x8fb   : > { %v4241_v1 = vadd.f32 %v9402_v50, %v4228_v62  ;;  %v4879_v43 = vpack.c.bf16 %v4796_v57, %v4796_v57  ;;  %v4877_v57 = vpack.c.bf16 %v4692_v36, %v4689_v16 }
 0x8fd   : > { %v4881_v10 = vsel %vm1196_vm1, %v4879_v43, 0  ;;  %v9446_v23 = vadd.f32 %v4241_v1, %v10893_v38  ;;  %v3497_v1 = vpop.permute.xlu2 %3496  ;;  %v9457_v43 = vpop.f32.mrf.mxu1 }
 0x8fe   : > { %5453 = vmatpush.bf16.msra.mxu0 %v7539_v37  ;;  %4886 = vmatpush.bf16.msrb.mxu1 %v4881_v10  ;;  %v4876_v10 = vpack.c.bf16 %v9398_v20, %v4588_v19  ;;  %v9479_v19 = vpop.f32.mrf.mxu0  ;;  %v7534_v20 = vld [vmem:[%s10890_s1 + $0x8] sm:$0xff] }
 0x8ff   : > { %v4265_v13 = vmax.f32 %v9446_v23, 0.0 }
 0x900   : > { %v4202_v55 = vpop.f32.mrf.mxu3 }
 0x901   : > { %4279 = vrot.lane.b32.xlu2 %v4265_v13, %s10835_s23  ;;  %v4229_v37 = vmul.f32 %v9395_v33, %v4202_v55  ;;  %v9464_v55 = vmax.f32 %v9280_v15, %v3497_v1  ;;  %v10894_v15 = vmax.f32 %v9229_v30, 0.0 }
 0x902   : > { %5454 = vmatpush.bf16.msra.mxu0 %v7538_v26  ;;  %v9454_v62 = vpop.f32.mrf.mxu2  ;;  %4887 = vmatpush.bf16.msrb.mxu1 %v4878_v52  ;;  %v7535_v52 = vld [vmem:[%s10890_s1 + $0x10] sm:$0xff] }
 0x903   : > { %v4242_v2 = vadd.f32 %v9402_v50, %v4229_v37  ;;  %v4875_v37 = vpack.c.bf16 %v4585_v59, %v9404_v47 }
 0x904   : > { %v3493_v26 = vpop.permute.xlu0 %3492 }
 0x905   : > { %v9461_v9 = vmax.f32 %v9294_v6, %v3493_v26  ;;  %v9477_v38 = vadd.f32 %v4242_v2, %v10894_v15  ;;  %v4697_v30 = vpop.f32.mrf.mxu1  ;;  %v7533_v2 = vld [vmem:[%s10890_s1] sm:$0xff] }
 0x906   : > { %5455 = vmatpush.bf16.msra.mxu0 %v7537_v58  ;;  %4888 = vmatpush.bf16.msrb.mxu1 %v4877_v57  ;;  %v7548_v58 = vld [vmem:[%s10890_s1 + $0x78] sm:$0xff] }
 0x907   : > { %3528 = vrot.lane.b32.xlu0 %v9461_v9, %s10833_s16  ;;  %v10832_v26 = vmax.f32 %v9477_v38, 0.0 }
 0x908   : > { %v4205_v16 = vpop.f32.mrf.mxu3 }
 0x909   : > { %7167 = vmatmul.msk.bf16.gmra.mxu0 %vm1189_vm2, %v9406_v39  ;;  %3532 = vrot.lane.b32.xlu2 %v9464_v55, %s10833_s16  ;;  %v4230_v6 = vmul.f32 %v9395_v33, %v4205_v16 }
 0x90a   : > { %5456 = vmatpush.bf16.msra.mxu0 %v7536_v28  ;;  %v4801_v36 = vpop.f32.mrf.mxu2  ;;  %4889 = vmatpush.bf16.msrb.mxu1 %v4876_v10  ;;  %v7547_v10 = vld [vmem:[%s10890_s1 + $0x70] sm:$0xff] }
 0x90b   : > { %v4243_v57 = vadd.f32 %v9402_v50, %v4230_v6 }
 0x90c   : > { %v3495_v28 = vpop.permute.xlu1 %3494 }
 0x90d   : > { %v9486_v1 = vmax.f32 %v9306_v45, %v3495_v28  ;;  %v10896_v28 = vmax.f32 %v9265_v31, 0.0 }
 0x90e   : > { %5457 = vmatpush.bf16.msra.mxu0 %v7535_v52  ;;  %4890 = vmatpush.bf16.msrb.mxu1 %v4875_v37  ;;  %v10895_v52 = vmax.f32 %v9261_v12, 0.0 }
 0x90f   : > { %3530 = vrot.lane.b32.xlu1 %v9486_v1, %s10833_s16  ;;  %4281 = vrot.lane.b32.xlu0 %v10832_v26, %s10835_s23 }
 0x910   : > { %v4207_v47 = vpop.f32.mrf.mxu3  ;;  %v9501_v16 = vadd.f32 %v4243_v57, %v10895_v52  ;;  %v7545_v57 = vld [vmem:[%s10890_s1 + $0x60] sm:$0xff] }
 0x911   : > { %v4231_v45 = vmul.f32 %v9395_v33, %v4207_v47  ;;  %7168 = vmatmul.msk.bf16.vlgmr.msrb.gmra.mxu1 %vm1189_vm2, %v9384_v3 }
 0x912   : > { %5458 = vmatpush.bf16.msra.mxu0 %v7534_v20  ;;  %5556 = vmatpush.bf16.msra.mxu1 %v7548_v58  ;;  %v4803_v59 = vpop.f32.mrf.mxu2  ;;  %v7546_v20 = vld [vmem:[%s10890_s1 + $0x68] sm:$0xff]  ;;  %v4593_v58 = vpop.f32.mrf.mxu0  ;;  %v4267_v26 = vmax.f32 %v9501_v16, 0.0 }
 0x913   : > { %v4244_v6 = vadd.f32 %v9402_v50, %v4231_v45  ;;  %v4905_v15 = vpack.c.bf16 %v4803_v59, %v4803_v59  ;;  %v4904_v45 = vpack.c.bf16 %v4801_v36, %v9454_v62  ;;  %v7544_v59 = vld [vmem:[%s10890_s1 + $0x58] sm:$0xff]  ;;  %v3503_v62 = vpop.permute.xlu2 %3502 }
 0x915   : > { %v4907_v37 = vsel %vm1196_vm1, %v4905_v15, 0  ;;  %v9508_v47 = vadd.f32 %v4244_v6, %v10896_v28  ;;  %v7543_v28 = vld [vmem:[%s10890_s1 + $0x50] sm:$0xff] }
 0x916   : > { %5459 = vmatpush.bf16.msra.mxu0 %v7533_v2  ;;  %5557 = vmatpush.bf16.msra.mxu1 %v7547_v10  ;;  %v4699_v10 = vpop.f32.mrf.mxu1 }
 0x917   : > { %4912 = vmatpush.bf16.msrb.mxu2 %v4907_v37  ;;  %v4268_v12 = vmax.f32 %v9508_v47, 0.0  ;;  %4283 = vrot.lane.b32.xlu1 %v4267_v26, %s10835_s23  ;;  %v4903_v52 = vpack.c.bf16 %v4699_v10, %v4697_v30  ;;  %v9528_v37 = vmax.f32 %v9322_v27, %v3503_v62  ;;  %v10897_v27 = vmax.f32 %v9288_v46, 0.0  ;;  %v7541_v46 = vld [vmem:[%s10890_s1 + $0x40] sm:$0xff] }
 0x918   : > { %v4210_v2 = vpop.f32.mrf.mxu3  ;;  %v4901_v10 = vpack.c.bf16 %v4593_v58, %v9479_v19  ;;  %v10898_v58 = vmax.f32 %v9283_v41, 0.0  ;;  %v7553_v41 = vld [vmem:[%s10890_s1 + $0xa0] sm:$0xff] }
 0x919   : > { %5460 = vmatmul.bf16.vlgmr.msra.gmra.mxu0 %v8698_v44  ;;  %4285 = vrot.lane.b32.xlu2 %v4268_v12, %s10835_s23  ;;  %v4232_v31 = vmul.f32 %v9395_v33, %v4210_v2  ;;  %v7556_v2 = vld [vmem:[%s10890_s1 + $0xb8] sm:$0xff] }
 0x91a   : > { %5558 = vmatpush.bf16.msra.mxu1 %v7546_v20  ;;  %v4595_v20 = vpop.f32.mrf.mxu0 }
 0x91b   : > { %4913 = vmatpush.bf16.msrb.mxu2 %v4904_v45  ;;  %v4245_v6 = vadd.f32 %v9402_v50, %v4232_v31 }
 0x91c   : > { %v3499_v36 = vpop.permute.xlu0 %3498 }
 0x91d   : > { %v9525_v15 = vmax.f32 %v9334_v0, %v3499_v36  ;;  %v9541_v45 = vadd.f32 %v4245_v6, %v10897_v27  ;;  %v7555_v36 = vld [vmem:[%s10890_s1 + $0xb0] sm:$0xff] }
 0x91e   : > { %5559 = vmatpush.bf16.msra.mxu1 %v7545_v57  ;;  %v4902_v57 = vpack.c.bf16 %v9457_v43, %v4595_v20  ;;  %v7542_v43 = vld [vmem:[%s10890_s1 + $0x48] sm:$0xff] }
 0x91f   : > { %4914 = vmatpush.bf16.msrb.mxu2 %v4903_v52  ;;  %3534 = vrot.lane.b32.xlu0 %v9525_v15, %s10833_s16  ;;  %v4269_v62 = vmax.f32 %v9541_v45, 0.0 }
 0x920   : > { %v4212_v30 = vpop.f32.mrf.mxu3 }
 0x921   : > { %7169 = vmatmul.msk.bf16.gmra.mxu1 %vm1189_vm2, %v9406_v39  ;;  %3538 = vrot.lane.b32.xlu2 %v9528_v37, %s10833_s16  ;;  %v4233_v0 = vmul.f32 %v9395_v33, %v4212_v30 }
 0x922   : > { %5560 = vmatpush.bf16.msra.mxu1 %v7544_v59 }
 0x923   : > { %4915 = vmatpush.bf16.msrb.mxu2 %v4902_v57  ;;  %v4246_v59 = vadd.f32 %v9402_v50, %v4233_v0  ;;  %v10899_v57 = vmax.f32 %v9312_v60, 0.0 }
 0x924   : > { %v3501_v31 = vpop.permute.xlu1 %3500 }
 0x925   : > { %v9548_v52 = vmax.f32 %v9349_v22, %v3501_v31  ;;  %v9564_v6 = vadd.f32 %v4246_v59, %v10898_v58  ;;  %v7550_v58 = vld [vmem:[%s10890_s1 + $0x88] sm:$0xff] }
 0x926   : > { %5561 = vmatpush.bf16.msra.mxu1 %v7543_v28  ;;  %v7554_v28 = vld [vmem:[%s10890_s1 + $0xa8] sm:$0xff] }
 0x927   : > { %4916 = vmatpush.bf16.msrb.mxu2 %v4901_v10  ;;  %3536 = vrot.lane.b32.xlu1 %v9548_v52, %s10833_s16  ;;  %v4270_v0 = vmax.f32 %v9564_v6, 0.0  ;;  %s10900_s16 = sld [smem:[#allocation15_spill]]  ;;  %v10901_v10 = vmax.f32 %v9316_v48, 0.0 }
 0x928   : > { %4287 = vrot.lane.b32.xlu0 %v4269_v62, %s10835_s23  ;;  %v4215_v19 = vpop.f32.mrf.mxu3 }
 0x929   : > { %v4234_v22 = vmul.f32 %v9395_v33, %v4215_v19  ;;  %5465 = vmatmul.bf16.gmra.mxu0 %v8717_v11 }
 0x92a   : > { %5562 = vmatpush.bf16.msra.mxu1 %v7542_v43  ;;  %7170 = vmatmul.msk.bf16.vlgmr.msrb.gmra.mxu2 %vm1189_vm2, %v9384_v3 }
 0x92b   : > { %5660 = vmatpush.bf16.msra.mxu2 %v7556_v2  ;;  %v4247_v20 = vadd.f32 %v9402_v50, %v4234_v22  ;;  %v7552_v2 = vld [vmem:[%s10890_s1 + $0x98] sm:$0xff] }
 0x92d   : > { %v9570_v30 = vadd.f32 %v4247_v20, %v10899_v57  ;;  %v7531_v20 = vld [vmem:[%s10900_s16 + $0x30] sm:$0xff] }
 0x92e   : > { %5563 = vmatpush.bf16.msra.mxu1 %v7541_v46  ;;  %v7551_v46 = vld [vmem:[%s10890_s1 + $0x90] sm:$0xff] }
 0x92f   : > { %5661 = vmatpush.bf16.msra.mxu2 %v7555_v36  ;;  %v4271_v3 = vmax.f32 %v9570_v30, 0.0  ;;  %4289 = vrot.lane.b32.xlu1 %v4270_v0, %s10835_s23  ;;  %v7532_v36 = vld [vmem:[%s10900_s16 + $0x38] sm:$0xff] }
 0x930   : > { %v4217_v27 = vpop.f32.mrf.mxu3  ;;  %5047 = vmatpush.bf16.msrb.mxu3 %v7532_v36  ;;  %v3521_v36 = vpop.permute.xlu2 %3520 }
 0x931   : > { %v4235_v43 = vmul.f32 %v9395_v33, %v4217_v27  ;;  %5564 = vmatmul.bf16.vlgmr.msra.gmra.mxu1 %v8698_v44  ;;  %4291 = vrot.lane.b32.xlu2 %v4271_v3, %s10835_s23  ;;  %v7549_v27 = vld [vmem:[%s10890_s1 + $0x80] sm:$0xff]  ;;  %s10905_s1 = smov 32  }
 0x933   : > { %5662 = vmatpush.bf16.msra.mxu2 %v7554_v28  ;;  %v4248_v60 = vadd.f32 %v9402_v50, %v4235_v43  ;;  %v10902_v28 = vmax.f32 %v9340_v49, 0.0 }
 0x934   : > { %5048 = vmatpush.bf16.msrb.mxu3 %v7531_v20 }
 0x935   : > { %v9587_v31 = vadd.f32 %v4248_v60, %v10901_v10  ;;  %v10903_v10 = vmax.f32 %v9344_v25, 0.0 }
 0x937   : > { %5663 = vmatpush.bf16.msra.mxu2 %v7553_v41  ;;  %v4272_v59 = vmax.f32 %v9587_v31, 0.0 }
 0x938   : > { %v4220_v19 = vpop.f32.mrf.mxu3 }
 0x939   : > { %v4236_v22 = vmul.f32 %v9395_v33, %v4220_v19  ;;  %4293 = vrot.lane.b32.xlu0 %v4272_v59, %s10835_s23  ;;  %5470 = vmatmul.bf16.gmra.mxu0 %v8736_v56  ;;  %v7528_v19 = vld [vmem:[%s10900_s16 + $0x18] sm:$0xff] }
 0x93a   : > { %7171 = vmatmul.msk.bf16.gmra.mxu2 %vm1189_vm2, %v9406_v39  ;;  %v7530_v39 = vld [vmem:[%s10900_s16 + $0x28] sm:$0xff] }
 0x93b   : > { %5664 = vmatpush.bf16.msra.mxu2 %v7552_v2  ;;  %v4249_v48 = vadd.f32 %v9402_v50, %v4236_v22  ;;  %5049 = vmatpush.bf16.msrb.mxu3 %v7530_v39  ;;  %v7529_v2 = vld [vmem:[%s10900_s16 + $0x20] sm:$0xff]  ;;  %v7526_v39 = vld [vmem:[%s10900_s16 + $0x8] sm:$0xff] }
 0x93d   : > { %v9604_v57 = vadd.f32 %v4249_v48, %v10902_v28  ;;  %v7527_v48 = vld [vmem:[%s10900_s16 + $0x10] sm:$0xff] }
 0x93f   : > { %5665 = vmatpush.bf16.msra.mxu2 %v7551_v46  ;;  %v4273_v41 = vmax.f32 %v9604_v57, 0.0  ;;  %5050 = vmatpush.bf16.msrb.mxu3 %v7529_v2 }
 0x940   : > { %v4222_v43 = vpop.f32.mrf.mxu3 }
 0x941   : > { %v4237_v60 = vmul.f32 %v9395_v33, %v4222_v43  ;;  %4295 = vrot.lane.b32.xlu1 %v4273_v41, %s10835_s23  ;;  %5569 = vmatmul.bf16.gmra.mxu1 %v8717_v11 }
 0x943   : > { %5666 = vmatpush.bf16.msra.mxu2 %v7550_v58  ;;  %v4250_v49 = vadd.f32 %v9402_v50, %v4237_v60  ;;  %v3517_v22 = vpop.permute.xlu0 %3516  ;;  %5051 = vmatpush.bf16.msrb.mxu3 %v7528_v19  ;;  %v3542_v50 = vmax.f32 %v9362_v18, %v3521_v36 }
 0x944   : > { %v3540_v25 = vmax.f32 %v9367_v42, %v3517_v22  ;;  %v3527_v42 = vpop.permute.xlu2 %3526 }
 0x945   : > { %v9618_v46 = vadd.f32 %v4250_v49, %v10903_v10  ;;  %v3593_v20 = vsel %vm3592_vm4, %v3542_v50, -inf  ;;  %v7525_v10 = vld [vmem:[%s10900_s16] sm:$0xff] }
 0x946   : > { %v3553_v28 = vsel %vm3552_vm5, %v3540_v25, -inf }
 0x947   : > { %5667 = vmatpush.bf16.msra.mxu2 %v7549_v27  ;;  %v4274_v33 = vmax.f32 %v9618_v46, 0.0  ;;  %5052 = vmatpush.bf16.msrb.mxu3 %v7527_v48 }
 0x949   : > { %4297 = vrot.lane.b32.xlu2 %v4274_v33, %s10835_s23  ;;  %5475 = vmatmul.bf16.gmra.mxu0 %v8759_v35  ;;  %s10904_s23 = sld [smem:[#allocation14_spill]] }
 0x94a   : > { %5668 = vmatmul.bf16.vlgmr.msra.gmra.mxu2 %v8698_v44 }
 0x94b   : > { %v3519_v58 = vpop.permute.xlu1 %3518  ;;  %5053 = vmatpush.bf16.msrb.mxu3 %v7526_v39 }
 0x94c   : > { %v3541_v44 = vmax.f32 %v9377_v24, %v3519_v58  ;;  %v3545_v24 = vmax.f32 %v9374_v7, %v3527_v42 }
 0x94e   : > { %v3555_v27 = vsel %vm3554_vm6, %v3541_v44, -inf  ;;  %v3591_v18 = vsel %vm3590_vm7, %v3541_v44, -inf  ;;  %v3602_v58 = vsel %vm3592_vm4, %v3545_v24, -inf }
 0x94f   : > { %v3556_v43 = vmax.f32 %v3553_v28, %v3555_v27  ;;  %v3594_v60 = vmax.f32 %v3591_v18, %v3593_v20  ;;  %5054 = vmatpush.bf16.msrb.mxu3 %v7525_v10 }
 0x951   : > { %5574 = vmatmul.bf16.gmra.mxu1 %v8736_v56  ;;  %v3557_v49 = vrot.slane %v3556_v43, 4  ;;  %v3595_v2 = vrot.slane %v3594_v60, 4 }
 0x953   : > { %v3558_v36 = vmax.f32 %v3556_v43, %v3557_v49  ;;  %v3596_v19 = vmax.f32 %v3594_v60, %v3595_v2  ;;  %v3525_v22 = vpop.permute.xlu1 %3524 }
 0x954   : > { %v3544_v50 = vmax.f32 %v9387_v4, %v3525_v22 }
 0x955   : > { %v3559_v25 = vrot.slane %v3558_v36, 2  ;;  %v3597_v48 = vrot.slane %v3596_v19, 2 }
 0x956   : > { %v3601_v44 = vsel %vm3590_vm7, %v3544_v50, -inf }
 0x957   : > { %v3560_v20 = vmax.f32 %v3558_v36, %v3559_v25  ;;  %v3598_v28 = vmax.f32 %v3596_v19, %v3597_v48  ;;  %v3603_v27 = vmax.f32 %v3601_v44, %v3602_v58 }
 0x959   : > { %v3561_v7 = vrot.slane %v3560_v20, 1  ;;  %v3599_v18 = vrot.slane %v3598_v28, 1  ;;  %5480 = vmatmul.bf16.gmra.mxu0 %v8782_v14  ;;  %v3604_v49 = vrot.slane %v3603_v27, 4 }
 0x95a   : > { %5673 = vmatmul.bf16.gmra.mxu2 %v8717_v11  ;;  %v9654_v11 = vld [vmem:[%s10904_s23] sm:$0xff]  ;;  %s10910_s23 = smov 16  }
 0x95b   : > { %v4280_v39 = vpop.permute.xlu2 %4279  ;;  %v3562_v4 = vmax.f32 %v3560_v20, %v3561_v7  ;;  %v3600_v42 = vmax.f32 %v3598_v28, %v3599_v18  ;;  %v3605_v2 = vmax.f32 %v3603_v27, %v3604_v49  ;;  %v9659_v36 = vperm.slane %v9654_v11, 0 }
 0x95c   : > { %v9646_v43 = vmax.f32 %v4265_v13, %v4280_v39  ;;  %v3564_v13 = vsel %vm3554_vm6, %v3544_v50, -inf  ;;  %v9665_v58 = vperm.slane %v9654_v11, 1  ;;  %v10906_v7 = vmax.f32 %v9420_v53, 0.0 }
 0x95d   : > { %v9649_v60 = vsel %vm3628_vm8, %v3562_v4, %v3600_v42  ;;  %v3606_v22 = vrot.slane %v3605_v2, 2  ;;  %v10907_v42 = vmax.f32 %v9427_v34, 0.0 }
 0x95e   : > { %4315 = vrot.lane.b32.xlu2 %v9646_v43, %s10905_s1 }
 0x95f   : > { %v3607_v20 = vmax.f32 %v3605_v2, %v3606_v22 }
 0x961   : > { %5579 = vmatmul.bf16.gmra.mxu1 %v8759_v35  ;;  %v3523_v24 = vpop.permute.xlu0 %3522  ;;  %v3608_v2 = vrot.slane %v3607_v20, 1 }
 0x962   : > { %v3543_v10 = vmax.f32 %v9410_v40, %v3523_v24 }
 0x963   : > { %v3533_v27 = vpop.permute.xlu2 %3532 }
 0x964   : > { %v4840_v23 = vpop.f32.mrf.mxu3  ;;  %v3563_v19 = vsel %vm3552_vm5, %v3543_v10, -inf }
 0x965   : > { %v3565_v25 = vmax.f32 %v3563_v19, %v3564_v13  ;;  %v4928_v48 = vmul.f32 %v9659_v36, %v4840_v23  ;;  %v3609_v19 = vmax.f32 %v3607_v20, %v3608_v2 }
 0x967   : > { %v3566_v44 = vrot.slane %v3565_v25, 4  ;;  %v4941_v50 = vadd.f32 %v9665_v58, %v4928_v48 }
 0x969   : > { %v3567_v40 = vmax.f32 %v3565_v25, %v3566_v44  ;;  %5485 = vmatmul.bf16.gmra.mxu0 %v8801_v17  ;;  %v4276_v28 = vpop.permute.xlu0 %4275  ;;  %v9684_v53 = vadd.f32 %v4941_v50, %v8692_v61 }
 0x96a   : > { %5678 = vmatmul.bf16.gmra.mxu2 %v8736_v56  ;;  %v9672_v18 = vmax.f32 %v10906_v7, %v4276_v28 }
 0x96b   : > { %v4278_v39 = vpop.permute.xlu1 %4277  ;;  %v3568_v4 = vrot.slane %v3567_v40, 2  ;;  %v4965_v25 = vmax.f32 %v9684_v53, 0.0 }
 0x96c   : > { %v9676_v49 = vmax.f32 %v10907_v42, %v4278_v39  ;;  %v4842_v24 = vpop.f32.mrf.mxu3  ;;  %4311 = vrot.lane.b32.xlu0 %v9672_v18, %s10905_s1 }
 0x96d   : > { %v4929_v56 = vmul.f32 %v9659_v36, %v4842_v24  ;;  %v3569_v10 = vmax.f32 %v3567_v40, %v3568_v4 }
 0x96e   : > { %4313 = vrot.lane.b32.xlu1 %v9676_v49, %s10905_s1 }
 0x96f   : > { %v4942_v23 = vadd.f32 %v9665_v58, %v4929_v56  ;;  %v3570_v13 = vrot.slane %v3569_v10, 1 }
 0x971   : > { %v9688_v34 = vadd.f32 %v4942_v23, %v8694_v21  ;;  %5584 = vmatmul.bf16.gmra.mxu1 %v8782_v14  ;;  %v3571_v22 = vmax.f32 %v3569_v10, %v3570_v13  ;;  %v3548_v23 = vmax.f32 %v9464_v55, %v3533_v27 }
 0x973   : > { %v10838_v48 = vmax.f32 %v9688_v34, 0.0  ;;  %v4286_v44 = vpop.permute.xlu2 %4285  ;;  %v9694_v40 = vsel %vm3628_vm8, %v3571_v22, %v3609_v19 }
 0x974   : > { %v9698_v28 = vmax.f32 %v4268_v12, %v4286_v44  ;;  %v4845_v50 = vpop.f32.mrf.mxu3 }
 0x975   : > { %v4977_v7 = vpack.c.bf16 %v10838_v48, %v4965_v25  ;;  %v4930_v39 = vmul.f32 %v9659_v36, %v4845_v50 }
 0x976   : > { %v4866_v20 = vpop.f32.mrf.mxu0  ;;  %4321 = vrot.lane.b32.xlu2 %v9698_v28, %s10905_s1 }
 0x977   : > { %v4931_v4 = vmul.f32 %v9659_v36, %v4866_v20  ;;  %5055 = vmatmul.bf16.vlgmr.msrb.gmra.mxu3 %v4977_v7  ;;  %v4943_v12 = vadd.f32 %v9665_v58, %v4930_v39  ;;  %v10908_v20 = vmax.f32 %v9477_v38, 0.0 }
 0x979   : > { %v4944_v42 = vadd.f32 %v9665_v58, %v4931_v4  ;;  %v3529_v47 = vpop.permute.xlu0 %3528  ;;  %v9715_v10 = vadd.f32 %v4943_v12, %v8711_v51  ;;  %v3611_v4 = vsel %vm3592_vm4, %v3548_v23, -inf }
 0x97a   : > { %5683 = vmatmul.bf16.gmra.mxu2 %v8759_v35  ;;  %v3546_v19 = vmax.f32 %v9461_v9, %v3529_v47 }
 0x97b   : > { %v9712_v56 = vadd.f32 %v4944_v42, %v8713_v5  ;;  %v10848_v44 = vmax.f32 %v9715_v10, 0.0  ;;  %v3539_v50 = vpop.permute.xlu2 %3538 }
 0x97c   : > { %v4847_v24 = vpop.f32.mrf.mxu3  ;;  %v3572_v55 = vsel %vm3552_vm5, %v3546_v19, -inf }
 0x97d   : > { %v10847_v13 = vmax.f32 %v9712_v56, 0.0 }
 0x97e   : > { %v4868_v2 = vpop.f32.mrf.mxu0 }
 0x97f   : > { %v4932_v12 = vmul.f32 %v9659_v36, %v4868_v2 }
 0x981   : > { %5589 = vmatmul.bf16.gmra.mxu1 %v8801_v17  ;;  %v3531_v35 = vpop.permute.xlu1 %3530  ;;  %v4282_v22 = vpop.permute.xlu0 %4281  ;;  %v4945_v48 = vadd.f32 %v9665_v58, %v4932_v12 }
 0x982   : > { %v3547_v7 = vmax.f32 %v9486_v1, %v3531_v35  ;;  %v9725_v39 = vmax.f32 %v10908_v20, %v4282_v22  ;;  %v4978_v1 = vpack.c.bf16 %v10847_v13, %v10848_v44 }
 0x984   : > { %v3573_v27 = vsel %vm3554_vm6, %v3547_v7, -inf  ;;  %v3610_v9 = vsel %vm3590_vm7, %v3547_v7, -inf  ;;  %4317 = vrot.lane.b32.xlu0 %v9725_v39, %s10905_s1 }
 0x985   : > { %v3574_v42 = vmax.f32 %v3572_v55, %v3573_v27  ;;  %v3612_v38 = vmax.f32 %v3610_v9, %v3611_v4 }
 0x986   : > { %v4871_v47 = vpop.f32.mrf.mxu0 }
 0x987   : > { %v4933_v24 = vmul.f32 %v9659_v36, %v4871_v47  ;;  %5060 = vmatmul.bf16.gmra.mxu3 %v4978_v1  ;;  %v3575_v23 = vrot.slane %v3574_v42, 4  ;;  %v3613_v19 = vrot.slane %v3612_v38, 4 }
 0x989   : > { %v4946_v35 = vadd.f32 %v9665_v58, %v4933_v24  ;;  %v3576_v22 = vmax.f32 %v3574_v42, %v3575_v23  ;;  %v3614_v7 = vmax.f32 %v3612_v38, %v3613_v19  ;;  %v4284_v20 = vpop.permute.xlu1 %4283 }
 0x98a   : > { %5688 = vmatmul.bf16.gmra.mxu2 %v8782_v14  ;;  %v9744_v4 = vmax.f32 %v4267_v26, %v4284_v20  ;;  %v9758_v26 = vadd.f32 %v4945_v48, %v8730_v32 }
 0x98b   : > { %v4292_v55 = vpop.permute.xlu2 %4291  ;;  %v3577_v2 = vrot.slane %v3576_v22, 2  ;;  %v3615_v27 = vrot.slane %v3614_v7, 2  ;;  %v9751_v1 = vadd.f32 %v4946_v35, %v8732_v54 }
 0x98c   : > { %v9748_v9 = vmax.f32 %v4271_v3, %v4292_v55  ;;  %4319 = vrot.lane.b32.xlu1 %v9744_v4, %s10905_s1  ;;  %v10846_v19 = vmax.f32 %v9758_v26, 0.0  ;;  %v3551_v55 = vmax.f32 %v9528_v37, %v3539_v50 }
 0x98d   : > { %v3578_v14 = vmax.f32 %v3576_v22, %v3577_v2  ;;  %v3616_v42 = vmax.f32 %v3614_v7, %v3615_v27  ;;  %v10845_v3 = vmax.f32 %v9751_v1, 0.0 }
 0x98e   : > { %v4873_v38 = vpop.f32.mrf.mxu0  ;;  %v4892_v47 = vpop.f32.mrf.mxu1  ;;  %4327 = vrot.lane.b32.xlu2 %v9748_v9, %s10905_s1 }
 0x98f   : > { %v3579_v16 = vrot.slane %v3578_v14, 1  ;;  %v3617_v30 = vrot.slane %v3616_v42, 1  ;;  %v4979_v22 = vpack.c.bf16 %v10845_v3, %v10846_v19  ;;  %v4934_v48 = vmul.f32 %v9659_v36, %v4892_v47 }
 0x991   : > { %v3580_v12 = vmax.f32 %v3578_v14, %v3579_v16  ;;  %v3618_v24 = vmax.f32 %v3616_v42, %v3617_v30  ;;  %v3535_v23 = vpop.permute.xlu0 %3534  ;;  %v4947_v38 = vadd.f32 %v9665_v58, %v4934_v48  ;;  %v3620_v30 = vsel %vm3592_vm4, %v3551_v55, -inf }
 0x992   : > { %v3549_v2 = vmax.f32 %v9525_v15, %v3535_v23 }
 0x993   : > { %v9763_v35 = vsel %vm3628_vm8, %v3580_v12, %v3618_v24  ;;  %v9791_v45 = vadd.f32 %v4947_v38, %v8752_v63 }
 0x994   : > { %v3581_v37 = vsel %vm3552_vm5, %v3549_v2, -inf }
 0x995   : > { %v10844_v55 = vmax.f32 %v9791_v45, 0.0 }
 0x996   : > { %v4894_v7 = vpop.f32.mrf.mxu1 }
 0x997   : > { %v4935_v20 = vmul.f32 %v9659_v36, %v4894_v7  ;;  %5065 = vmatmul.bf16.gmra.mxu3 %v4979_v22 }
 0x999   : > { %v4948_v27 = vadd.f32 %v9665_v58, %v4935_v20  ;;  %v3537_v14 = vpop.permute.xlu1 %3536 }
 0x99a   : > { %5693 = vmatmul.bf16.gmra.mxu2 %v8801_v17  ;;  %v4288_v42 = vpop.permute.xlu0 %4287  ;;  %v3550_v16 = vmax.f32 %v9548_v52, %v3537_v14 }
 0x99b   : > { %v9779_v47 = vmax.f32 %v4269_v62, %v4288_v42  ;;  %v9784_v15 = vadd.f32 %v4948_v27, %v8754_v8 }
 0x99c   : > { %v3582_v50 = vsel %vm3554_vm6, %v3550_v16, -inf  ;;  %v3619_v17 = vsel %vm3590_vm7, %v3550_v16, -inf }
 0x99d   : > { %4323 = vrot.lane.b32.xlu0 %v9779_v47, %s10905_s1  ;;  %v3583_v12 = vmax.f32 %v3581_v37, %v3582_v50  ;;  %v3621_v52 = vmax.f32 %v3619_v17, %v3620_v30  ;;  %v10841_v22 = vmax.f32 %v9784_v15, 0.0 }
 0x99e   : > { %v4897_v24 = vpop.f32.mrf.mxu1 }
 0x99f   : > { %v3584_v62 = vrot.slane %v3583_v12, 4  ;;  %v3622_v23 = vrot.slane %v3621_v52, 4  ;;  %v4980_v16 = vpack.c.bf16 %v10841_v22, %v10844_v55 }
 0x9a1   : > { %v3585_v7 = vmax.f32 %v3583_v12, %v3584_v62  ;;  %v3623_v48 = vmax.f32 %v3621_v52, %v3622_v23  ;;  %v4290_v20 = vpop.permute.xlu1 %4289 }
 0x9a2   : > { %v9797_v2 = vmax.f32 %v4270_v0, %v4290_v20  ;;  %v4936_v0 = vmul.f32 %v9659_v36, %v4897_v24 }
 0x9a3   : > { %v4298_v27 = vpop.permute.xlu2 %4297  ;;  %v3586_v14 = vrot.slane %v3585_v7, 2  ;;  %v3624_v42 = vrot.slane %v3623_v48, 2 }
 0x9a4   : > { %v9801_v38 = vmax.f32 %v4274_v33, %v4298_v27  ;;  %4325 = vrot.lane.b32.xlu1 %v9797_v2, %s10905_s1  ;;  %v4949_v12 = vadd.f32 %v9665_v58, %v4936_v0  ;;  %v10909_v27 = vld [vmem:[#allocation17_spill] sm:$0xff] }
 0x9a5   : > { %v3587_v30 = vmax.f32 %v3585_v7, %v3586_v14  ;;  %v3625_v37 = vmax.f32 %v3623_v48, %v3624_v42 }
 0x9a6   : > { %v4899_v6 = vpop.f32.mrf.mxu1  ;;  %4333 = vrot.lane.b32.xlu2 %v9801_v38, %s10905_s1  ;;  %v9824_v24 = vadd.f32 %v4949_v12, %v8776_v29 }
 0x9a7   : > { %5070 = vmatmul.bf16.gmra.mxu3 %v4980_v16  ;;  %v3588_v46 = vrot.slane %v3587_v30, 1  ;;  %v3626_v33 = vrot.slane %v3625_v37, 1 }
 0x9a8   : > { %v10840_v42 = vmax.f32 %v9824_v24, 0.0 }
 0x9a9   : > { %v3589_v50 = vmax.f32 %v3587_v30, %v3588_v46  ;;  %v3627_v17 = vmax.f32 %v3625_v37, %v3626_v33 }
 0x9ab   : > { %v4294_v52 = vpop.permute.xlu0 %4293  ;;  %v9814_v62 = vsel %vm3628_vm8, %v3589_v50, %v3627_v17  ;;  %v10911_v17 = vld [vmem:[#allocation18_spill] sm:$0xff] }
 0x9ac   : > { %v9818_v23 = vmax.f32 %v4272_v59, %v4294_v52 }
 0x9ad   : > { %v4918_v7 = vpop.f32.mrf.mxu2 }
 0x9ae   : > { %v4937_v48 = vmul.f32 %v9659_v36, %v4918_v7  ;;  %4329 = vrot.lane.b32.xlu0 %v9818_v23, %s10905_s1  ;;  %v5565_v33 = vpop.f32.mrf.mxu1  ;;  %v10912_v7 = vld [vmem:[#allocation19_spill] sm:$0xff] }
 0x9b0   : > { %v4950_v20 = vadd.f32 %v9665_v58, %v4937_v48 }
 0x9b2   : > { %v9828_v14 = vadd.f32 %v4950_v20, %v10909_v27  ;;  %v5461_v20 = vpop.f32.mrf.mxu0 }
 0x9b3   : > { %v4296_v59 = vpop.permute.xlu1 %4295 }
 0x9b4   : > { %v10839_v31 = vmax.f32 %v9828_v14, 0.0  ;;  %v9834_v16 = vmax.f32 %v4273_v41, %v4296_v59 }
 0x9b5   : > { %v4920_v30 = vpop.f32.mrf.mxu2 }
 0x9b6   : > { %v4981_v37 = vpack.c.bf16 %v10839_v31, %v10840_v42  ;;  %4331 = vrot.lane.b32.xlu1 %v9834_v16, %s10905_s1  ;;  %v4938_v6 = vmul.f32 %v9659_v36, %v4920_v30 }
 0x9b8   : > { %5075 = vmatmul.bf16.gmra.mxu3 %v4981_v37  ;;  %v4316_v0 = vpop.permute.xlu2 %4315  ;;  %v4951_v57 = vadd.f32 %v9665_v58, %v4938_v6 }
 0x9b9   : > { %v9844_v46 = vmax.f32 %v9646_v43, %v4316_v0 }
 0x9ba   : > { %v9851_v12 = vadd.f32 %v4951_v57, %v10911_v17  ;;  %v5463_v0 = vpop.f32.mrf.mxu0 }
 0x9bb   : > { %4351 = vrot.lane.b32.xlu2 %v9844_v46, %s10910_s23  ;;  %v5702_v19 = vpack.c.bf16 %v5463_v0, %v5461_v20  ;;  %v5701_v20 = vld [vmem:[%s7809_s27 + $0x8] sm:$0xf] }
 0x9bc   : > { %v10843_v43 = vmax.f32 %v9851_v12, 0.0 }
 0x9bd   : > { %v4923_v41 = vpop.f32.mrf.mxu2 }
 0x9be   : > { %v4939_v50 = vmul.f32 %v9659_v36, %v4923_v41  ;;  %v5567_v36 = vpop.f32.mrf.mxu1 }
 0x9c0   : > { %v4952_v52 = vadd.f32 %v9665_v58, %v4939_v50 }
 0x9c2   : > { %v9855_v48 = vadd.f32 %v4952_v52, %v10912_v7  ;;  %v5466_v52 = vpop.f32.mrf.mxu0 }
 0x9c4   : > { %v10842_v59 = vmax.f32 %v9855_v48, 0.0 }
 0x9c5   : > { %v4925_v30 = vpop.f32.mrf.mxu2 }
 0x9c6   : > { %v4982_v37 = vpack.c.bf16 %v10842_v59, %v10843_v43  ;;  %v5570_v58 = vpop.f32.mrf.mxu1 }
 0x9c7   : > { %v5704_v3 = vpack.c.bf16 %v5570_v58, %v5567_v36 }
 0x9c8   : > { %5080 = vmatmul.bf16.gmra.mxu3 %v4982_v37 }
 0x9ca   : > { %v5468_v55 = vpop.f32.mrf.mxu0 }
 0x9cd   : > { %v5669_v6 = vpop.f32.mrf.mxu2 }
 0x9ce   : > { %v5572_v30 = vpop.f32.mrf.mxu1 }
 0x9d0   : > { %v4322_v57 = vpop.permute.xlu2 %4321 }
 0x9d1   : > { %v9864_v41 = vmax.f32 %v9698_v28, %v4322_v57 }
 0x9d3   : > { %4357 = vrot.lane.b32.xlu2 %v9864_v41, %s10910_s23 }
 0x9d5   : > { %v5671_v50 = vpop.f32.mrf.mxu2 }
 0x9d6   : > { %v5705_v57 = vpack.c.bf16 %v5671_v50, %v5669_v6 }
 0x9dd   : > { %v5674_v31 = vpop.f32.mrf.mxu2 }
 0x9de   : > { %v5706_v42 = vpack.c.bf16 %v5674_v31, %v5674_v31  ;;  %v4312_v59 = vpop.permute.xlu0 %4311 }
 0x9df   : > { %v9870_v37 = vmax.f32 %v9672_v18, %v4312_v59  ;;  %v5703_v18 = vpack.c.bf16 %v5565_v33, %v5466_v52  ;;  %v5471_v59 = vpop.f32.mrf.mxu0 }
 0x9e0   : > { %v5722_v22 = vsel %vm1196_vm1, %v5706_v42, 0  ;;  %v4314_v43 = vpop.permute.xlu1 %4313  ;;  %v5575_v42 = vpop.f32.mrf.mxu1 }
 0x9e1   : > { %5727 = vmatpush.bf16.msra.mxu3 %v5722_v22  ;;  %v9873_v28 = vmax.f32 %v9676_v49, %v4314_v43  ;;  %4347 = vrot.lane.b32.xlu0 %v9870_v37, %s10910_s23  ;;  %v9880_v43 = vld [vmem:[%s7809_s27] sm:$0xff] }
 0x9e3   : > { %4349 = vrot.lane.b32.xlu1 %v9873_v28, %s10910_s23 }
 0x9e5   : > { %v5676_v31 = vpop.f32.mrf.mxu2  ;;  %5728 = vmatpush.bf16.msra.mxu3 %v5705_v57 }
 0x9e7   : > { %v5473_v50 = vpop.f32.mrf.mxu0 }
 0x9e8   : > { %v5577_v49 = vpop.f32.mrf.mxu1 }
 0x9e9   : > { %5729 = vmatpush.bf16.msra.mxu3 %v5704_v3  ;;  %v9886_v3 = vperm.slane %v9654_v11, 2 }
 0x9ed   : > { %v5679_v22 = vpop.f32.mrf.mxu2  ;;  %5730 = vmatpush.bf16.msra.mxu3 %v5703_v18  ;;  %v5712_v18 = vunpack.c.l.b16 %v5701_v20 }
 0x9ee   : > { %v5745_v58 = vpack.c.bf16 %v5679_v22, %v5676_v31 }
 0x9ef   : > { %v9907_v31 = vpack.c.b16 %v5712_v18, %v5712_v18 }
 0x9f0   : > { %v9892_v0 = vpop.f32.mrf.mxu1 }
 0x9f1   : > { %5731 = vmatpush.bf16.msra.mxu3 %v5702_v19  ;;  %v9895_v19 = vperm.slane %v9654_v11, 3 }
 0x9f4   : > { %7336 = vmatmul.msk.bf16.vlgmr.msra.gmra.mxu3 %vm1189_vm2, %v9880_v43 }
 0x9f5   : > { %v5681_v6 = vpop.f32.mrf.mxu2 }
 0x9f6   : > { %v5746_v13 = vpack.c.bf16 %v5681_v6, %v5681_v6  ;;  %v4318_v36 = vpop.permute.xlu0 %4317 }
 0x9f7   : > { %v9889_v33 = vmax.f32 %v9725_v39, %v4318_v36  ;;  %v5744_v36 = vpack.c.bf16 %v5577_v49, %v5575_v42 }
 0x9f8   : > { %v5748_v57 = vsel %vm1196_vm1, %v5746_v13, 0  ;;  %v5582_v49 = vpop.f32.mrf.mxu1 }
 0x9f9   : > { %5753 = vmatpush.bf16.msrb.mxu0 %v5748_v57  ;;  %4353 = vrot.lane.b32.xlu0 %v9889_v33, %s10910_s23  ;;  %v9901_v57 = vpop.f32.mrf.mxu0 }
 0x9fa   : > { %v5056_v52 = vpop.f32.mrf.mxu3 }
 0x9fb   : > { %v5087_v13 = vmul.f32 %v9886_v3, %v5056_v52  ;;  %v5743_v52 = vpack.c.bf16 %v5572_v30, %v5473_v50 }
 0x9fd   : > { %v5684_v6 = vpop.f32.mrf.mxu2  ;;  %5754 = vmatpush.bf16.msrb.mxu0 %v5745_v58  ;;  %v5100_v39 = vadd.f32 %v9895_v19, %v5087_v13 }
 0x9fe   : > { %v4320_v44 = vpop.permute.xlu1 %4319 }
 0x9ff   : > { %v9905_v11 = vadd.f32 %v5100_v39, %v4965_v25  ;;  %v9910_v22 = vmax.f32 %v9744_v4, %v4320_v44  ;;  %v5742_v44 = vpack.c.bf16 %v5471_v59, %v5468_v55  ;;  %v10914_v4 = vmax.f32 %v9688_v34, 0.0 }
 0xa00   : > { %v5585_v55 = vpop.f32.mrf.mxu1 }
 0xa01   : > { %5755 = vmatpush.bf16.msrb.mxu0 %v5744_v36  ;;  %v10851_v20 = vmax.f32 %v9905_v11, 0.0  ;;  %4355 = vrot.lane.b32.xlu1 %v9910_v22, %s10910_s23  ;;  %v5478_v50 = vpop.f32.mrf.mxu0 }
 0xa02   : > { %v5058_v42 = vpop.f32.mrf.mxu3 }
 0xa03   : > { %v5088_v58 = vmul.f32 %v9886_v3, %v5058_v42  ;;  %5136 = vrot.lane.b32.xlu0 %v10851_v20, %s10913_s2 }
 0xa04   : > { %7337 = vmatmul.msk.bf16.gmra.mxu3 %vm1189_vm2, %v9907_v31 }
 0xa05   : > { %v5686_v53 = vpop.f32.mrf.mxu2  ;;  %5756 = vmatpush.bf16.msrb.mxu0 %v5743_v52  ;;  %v5101_v25 = vadd.f32 %v9895_v19, %v5088_v58  ;;  %v10915_v58 = vmax.f32 %v9715_v10, 0.0 }
 0xa07   : > { %v9924_v30 = vadd.f32 %v5101_v25, %v10914_v4 }
 0xa09   : > { %5757 = vmatpush.bf16.msrb.mxu0 %v5742_v44  ;;  %v10850_v13 = vmax.f32 %v9924_v30, 0.0 }
 0xa0a   : > { %v5061_v18 = vpop.f32.mrf.mxu3 }
 0xa0b   : > { %v5089_v39 = vmul.f32 %v9886_v3, %v5061_v18  ;;  %5138 = vrot.lane.b32.xlu1 %v10850_v13, %s10913_s2  ;;  %v5771_v18 = vpack.c.bf16 %v5686_v53, %v5684_v6  ;;  %v10916_v6 = vmax.f32 %v9712_v56, 0.0 }
 0xa0c   : > { %7338 = vmatmul.msk.bf16.vlgmr.msrb.gmra.mxu0 %vm1189_vm2, %v9880_v43 }
 0xa0d   : > { %v5689_v36 = vpop.f32.mrf.mxu2  ;;  %v5102_v34 = vadd.f32 %v9895_v19, %v5089_v39  ;;  %v5481_v39 = vpop.f32.mrf.mxu0 }
 0xa0e   : > { %v5772_v59 = vpack.c.bf16 %v5689_v36, %v5689_v36  ;;  %v5769_v20 = vpack.c.bf16 %v9892_v0, %v5481_v39  ;;  %v5768_v0 = vpack.c.bf16 %v5478_v50, %v9901_v57  ;;  %v10917_v39 = vmax.f32 %v9758_v26, 0.0 }
 0xa0f   : > { %v4324_v42 = vpop.permute.xlu0 %4323  ;;  %v9937_v25 = vadd.f32 %v5102_v34, %v10915_v58  ;;  %v4328_v34 = vpop.permute.xlu2 %4327 }
 0xa10   : > { %v5774_v52 = vsel %vm1196_vm1, %v5772_v59, 0  ;;  %v9940_v44 = vmax.f32 %v9779_v47, %v4324_v42  ;;  %v5770_v59 = vpack.c.bf16 %v5585_v55, %v5582_v49 }
 0xa11   : > { %5779 = vmatpush.bf16.msrb.mxu1 %v5774_v52  ;;  %v5126_v4 = vmax.f32 %v9937_v25, 0.0  ;;  %v5587_v52 = vpop.f32.mrf.mxu1  ;;  %v10925_v25 = vmax.f32 %v9905_v11, 0.0 }
 0xa12   : > { %4359 = vrot.lane.b32.xlu0 %v9940_v44, %s10910_s23  ;;  %v5063_v13 = vpop.f32.mrf.mxu3 }
 0xa13   : > { %v5090_v36 = vmul.f32 %v9886_v3, %v5063_v13  ;;  %5140 = vrot.lane.b32.xlu2 %v5126_v4, %s10913_s2 }
 0xa15   : > { %v5691_v10 = vpop.f32.mrf.mxu2  ;;  %5780 = vmatpush.bf16.msrb.mxu1 %v5771_v18  ;;  %v5103_v47 = vadd.f32 %v9895_v19, %v5090_v36  ;;  %v9960_v18 = vmax.f32 %v9748_v9, %v4328_v34  ;;  %v5483_v9 = vpop.f32.mrf.mxu0 }
 0xa16   : > { %v4326_v42 = vpop.permute.xlu1 %4325 }
 0xa17   : > { %v9952_v53 = vadd.f32 %v5103_v47, %v10916_v6  ;;  %v9955_v58 = vmax.f32 %v9797_v2, %v4326_v42 }
 0xa19   : > { %5781 = vmatpush.bf16.msrb.mxu1 %v5770_v59  ;;  %v10853_v13 = vmax.f32 %v9952_v53, 0.0  ;;  %4361 = vrot.lane.b32.xlu1 %v9955_v58, %s10910_s23  ;;  %v5590_v34 = vpop.f32.mrf.mxu1 }
 0xa1a   : > { %v5066_v49 = vpop.f32.mrf.mxu3 }
 0xa1b   : > { %v5091_v55 = vmul.f32 %v9886_v3, %v5066_v49  ;;  %5142 = vrot.lane.b32.xlu0 %v10853_v13, %s10913_s2  ;;  %4363 = vrot.lane.b32.xlu2 %v9960_v18, %s10910_s23 }
 0xa1c   : > { %7339 = vmatmul.msk.bf16.gmra.mxu0 %vm1189_vm2, %v9907_v31 }
 0xa1d   : > { %v5694_v56 = vpop.f32.mrf.mxu2  ;;  %5782 = vmatpush.bf16.msrb.mxu1 %v5769_v20  ;;  %v5104_v2 = vadd.f32 %v9895_v19, %v5091_v55  ;;  %v5486_v50 = vpop.f32.mrf.mxu0  ;;  %v10918_v55 = vmax.f32 %v9751_v1, 0.0 }
 0xa1f   : > { %v9976_v36 = vadd.f32 %v5104_v2, %v10917_v39 }
 0xa20   : > { %v4330_v47 = vpop.permute.xlu0 %4329 }
 0xa21   : > { %5783 = vmatpush.bf16.msrb.mxu1 %v5768_v0  ;;  %v9979_v59 = vmax.f32 %v9818_v23, %v4330_v47  ;;  %v10852_v42 = vmax.f32 %v9976_v36, 0.0  ;;  %v5592_v13 = vpop.f32.mrf.mxu1 }
 0xa22   : > { %v5068_v6 = vpop.f32.mrf.mxu3 }
 0xa23   : > { %v5092_v20 = vmul.f32 %v9886_v3, %v5068_v6  ;;  %4365 = vrot.lane.b32.xlu0 %v9979_v59, %s10910_s23  ;;  %5144 = vrot.lane.b32.xlu1 %v10852_v42, %s10913_s2  ;;  %v5797_v6 = vpack.c.bf16 %v5694_v56, %v5691_v10 }
 0xa24   : > { %7340 = vmatmul.msk.bf16.vlgmr.msrb.gmra.mxu1 %vm1189_vm2, %v9880_v43 }
 0xa25   : > { %v5696_v26 = vpop.f32.mrf.mxu2  ;;  %v5105_v57 = vadd.f32 %v9895_v19, %v5092_v20  ;;  %v5488_v10 = vpop.f32.mrf.mxu0 }
 0xa26   : > { %v5798_v23 = vpack.c.bf16 %v5696_v26, %v5696_v26  ;;  %v4334_v26 = vpop.permute.xlu2 %4333 }
 0xa27   : > { %v9994_v2 = vadd.f32 %v5105_v57, %v10918_v55  ;;  %v10919_v57 = vmax.f32 %v9791_v45, 0.0  ;;  %v10012_v56 = vmax.f32 %v9801_v38, %v4334_v26  ;;  %v5794_v38 = vpack.c.bf16 %v5486_v50, %v5483_v9 }
 0xa28   : > { %v5800_v49 = vsel %vm1196_vm1, %v5798_v23, 0  ;;  %v4332_v0 = vpop.permute.xlu1 %4331 }
 0xa29   : > { %5805 = vmatpush.bf16.msrb.mxu2 %v5800_v49  ;;  %v9997_v39 = vmax.f32 %v9834_v16, %v4332_v0  ;;  %v5129_v47 = vmax.f32 %v9994_v2, 0.0  ;;  %v5796_v16 = vpack.c.bf16 %v5592_v13, %v5590_v34  ;;  %v5795_v49 = vpack.c.bf16 %v5587_v52, %v5488_v10 }
 0xa2a   : > { %v5071_v42 = vpop.f32.mrf.mxu3  ;;  %v10920_v13 = vmax.f32 %v9784_v15, 0.0  ;;  %v10921_v15 = vmax.f32 %v9824_v24, 0.0 }
 0xa2b   : > { %v5093_v20 = vmul.f32 %v9886_v3, %v5071_v42  ;;  %4367 = vrot.lane.b32.xlu1 %v9997_v39, %s10910_s23  ;;  %5146 = vrot.lane.b32.xlu2 %v5129_v47, %s10913_s2 }
 0xa2d   : > { %5806 = vmatpush.bf16.msrb.mxu2 %v5797_v6  ;;  %v5106_v1 = vadd.f32 %v9895_v19, %v5093_v20 }
 0xa2f   : > { %v10009_v23 = vadd.f32 %v5106_v1, %v10919_v57 }
 0xa31   : > { %5807 = vmatpush.bf16.msrb.mxu2 %v5796_v16  ;;  %v5130_v42 = vmax.f32 %v10009_v23, 0.0 }
 0xa32   : > { %v5073_v55 = vpop.f32.mrf.mxu3 }
 0xa33   : > { %v5094_v0 = vmul.f32 %v9886_v3, %v5073_v55  ;;  %5148 = vrot.lane.b32.xlu0 %v5130_v42, %s10913_s2  ;;  %4369 = vrot.lane.b32.xlu2 %v10012_v56, %s10910_s23 }
 0xa34   : > { %7341 = vmatmul.msk.bf16.gmra.mxu1 %vm1189_vm2, %v9907_v31 }
 0xa35   : > { %5808 = vmatpush.bf16.msrb.mxu2 %v5795_v49  ;;  %v5107_v45 = vadd.f32 %v9895_v19, %v5094_v0  ;;  %v7565_v49 = vld [vmem:[%s7819_s30 + $0x38] sm:$0xff] }
 0xa36   : > { %5940 = vmatpush.bf16.msrb.mxu3 %v7565_v49  ;;  %v7562_v49 = vld [vmem:[%s7819_s30 + $0x20] sm:$0xff] }
 0xa37   : > { %v10026_v52 = vadd.f32 %v5107_v45, %v10920_v13 }
 0xa39   : > { %5809 = vmatpush.bf16.msrb.mxu2 %v5794_v38  ;;  %v5131_v34 = vmax.f32 %v10026_v52, 0.0  ;;  %v7564_v38 = vld [vmem:[%s7819_s30 + $0x30] sm:$0xff] }
 0xa3a   : > { %5941 = vmatpush.bf16.msrb.mxu3 %v7564_v38 }
 0xa3b   : > { %v5076_v6 = vpop.f32.mrf.mxu3  ;;  %5150 = vrot.lane.b32.xlu1 %v5131_v34, %s10913_s2 }
 0xa3c   : > { %v5095_v20 = vmul.f32 %v9886_v3, %v5076_v6  ;;  %7342 = vmatmul.msk.bf16.vlgmr.msrb.gmra.mxu2 %vm1189_vm2, %v9880_v43  ;;  %v10922_v43 = vmax.f32 %v9828_v14, 0.0  ;;  %v10923_v14 = vmax.f32 %v9851_v12, 0.0  ;;  %v4352_v6 = vpop.permute.xlu2 %4351 }
 0xa3e   : > { %v5108_v9 = vadd.f32 %v9895_v19, %v5095_v20 }
 0xa40   : > { %v10038_v50 = vadd.f32 %v5108_v9, %v10921_v15  ;;  %v7563_v9 = vld [vmem:[%s7819_s30 + $0x28] sm:$0xff] }
 0xa41   : > { %5942 = vmatpush.bf16.msrb.mxu3 %v7563_v9 }
 0xa42   : > { %v5132_v1 = vmax.f32 %v10038_v50, 0.0 }
 0xa43   : > { %v5078_v26 = vpop.f32.mrf.mxu3 }
 0xa44   : > { %v5096_v16 = vmul.f32 %v9886_v3, %v5078_v26  ;;  %5152 = vrot.lane.b32.xlu2 %v5132_v1, %s10913_s2 }
 0xa45   : > { %5943 = vmatpush.bf16.msrb.mxu3 %v7562_v49 }
 0xa46   : > { %v5109_v57 = vadd.f32 %v9895_v19, %v5096_v16 }
 0xa48   : > { %v10048_v10 = vadd.f32 %v5109_v57, %v10922_v43 }
 0xa4a   : > { %v10855_v24 = vmax.f32 %v10048_v10, 0.0 }
 0xa4b   : > { %v5081_v55 = vpop.f32.mrf.mxu3 }
 0xa4c   : > { %v5097_v0 = vmul.f32 %v9886_v3, %v5081_v55  ;;  %5154 = vrot.lane.b32.xlu0 %v10855_v24, %s10913_s2  ;;  %7343 = vmatmul.msk.bf16.gmra.mxu2 %vm1189_vm2, %v9907_v31  ;;  %v4373_v31 = vmax.f32 %v9844_v46, %v4352_v6 }
 0xa4e   : > { %v5110_v45 = vadd.f32 %v9895_v19, %v5097_v0  ;;  %v4450_v38 = vsel %vm3592_vm4, %v4373_v31, -inf }
 0xa50   : > { %v10062_v13 = vadd.f32 %v5110_v45, %v10923_v14  ;;  %v10924_v45 = vmax.f32 %v9855_v48, 0.0 }
 0xa52   : > { %v10854_v20 = vmax.f32 %v10062_v13, 0.0 }
 0xa53   : > { %v5083_v15 = vpop.f32.mrf.mxu3  ;;  %v4348_v12 = vpop.permute.xlu0 %4347 }
 0xa54   : > { %v5098_v26 = vmul.f32 %v9886_v3, %v5083_v15  ;;  %5156 = vrot.lane.b32.xlu1 %v10854_v20, %s10913_s2  ;;  %v4371_v57 = vmax.f32 %v9870_v37, %v4348_v12  ;;  %v7561_v15 = vld [vmem:[%s7819_s30 + $0x18] sm:$0xff]  ;;  %v4358_v20 = vpop.permute.xlu2 %4357 }
 0xa55   : > { %v4350_v43 = vpop.permute.xlu1 %4349  ;;  %5944 = vmatpush.bf16.msrb.mxu3 %v7561_v15 }
 0xa56   : > { %v5111_v16 = vadd.f32 %v9895_v19, %v5098_v26  ;;  %v4372_v55 = vmax.f32 %v9873_v28, %v4350_v43  ;;  %v4384_v3 = vsel %vm4383_vm9, %v4371_v57, -inf  ;;  %v4413_v0 = vsel %vm4412_vm10, %v4371_v57, -inf  ;;  %v7560_v43 = vld [vmem:[%s7819_s30 + $0x10] sm:$0xff] }
 0xa57   : > { %v4385_v14 = vrot.slane %v4384_v3, 4 }
 0xa58   : > { %v10079_v46 = vadd.f32 %v5111_v16, %v10924_v45  ;;  %v4414_v19 = vsel %vm3554_vm6, %v4372_v55, -inf  ;;  %v4449_v37 = vsel %vm3590_vm7, %v4372_v55, -inf }
 0xa59   : > { %v4415_v6 = vmax.f32 %v4413_v0, %v4414_v19  ;;  %v4451_v9 = vmax.f32 %v4449_v37, %v4450_v38  ;;  %v4386_v26 = vmax.f32 %v4384_v3, %v4385_v14  ;;  %5945 = vmatpush.bf16.msrb.mxu3 %v7560_v43  ;;  %v7559_v14 = vld [vmem:[%s7819_s30 + $0x8] sm:$0xff] }
 0xa5a   : > { %v5135_v28 = vmax.f32 %v10079_v46, 0.0 }
 0xa5b   : > { %v4416_v12 = vrot.slane %v4415_v6, 4  ;;  %v4452_v48 = vrot.slane %v4451_v9, 4  ;;  %v4387_v31 = vrot.slane %v4386_v26, 2 }
 0xa5c   : > { %5158 = vrot.lane.b32.xlu2 %v5135_v28, %s10913_s2 }
 0xa5d   : > { %v4417_v16 = vmax.f32 %v4415_v6, %v4416_v12  ;;  %v4453_v57 = vmax.f32 %v4451_v9, %v4452_v48  ;;  %v4388_v55 = vmax.f32 %v4386_v26, %v4387_v31  ;;  %5946 = vmatpush.bf16.msrb.mxu3 %v7559_v14  ;;  %v7558_v9 = vld [vmem:[%s7819_s30] sm:$0xff] }
 0xa5f   : > { %v4418_v49 = vrot.slane %v4417_v16, 2  ;;  %v4454_v0 = vrot.slane %v4453_v57, 2  ;;  %v4389_v45 = vrot.slane %v4388_v55, 1 }
 0xa61   : > { %v4419_v38 = vmax.f32 %v4417_v16, %v4418_v49  ;;  %v4455_v3 = vmax.f32 %v4453_v57, %v4454_v0  ;;  %v4390_v24 = vmax.f32 %v4388_v55, %v4389_v45  ;;  %5947 = vmatpush.bf16.msrb.mxu3 %v7558_v9  ;;  %v4376_v45 = vmax.f32 %v9864_v41, %v4358_v20 }
 0xa63   : > { %v4420_v19 = vrot.slane %v4419_v38, 1  ;;  %v4456_v37 = vrot.slane %v4455_v3, 1 }
 0xa65   : > { %v4421_v15 = vmax.f32 %v4419_v38, %v4420_v19  ;;  %v4457_v6 = vmax.f32 %v4455_v3, %v4456_v37  ;;  %v4459_v37 = vsel %vm3592_vm4, %v4376_v45, -inf }
 0xa67   : > { %v4485_v26 = vsel %vm3628_vm8, %v4390_v24, %v4421_v15  ;;  %v10107_v24 = vld [vmem:[%s7814_s4] sm:$0xff] }
 0xa68   : > { %v4490_v12 = vsel %vm4489_vm11, %v4485_v26, %v4457_v6  ;;  %v10112_v14 = vperm.slane %v10107_v24, 0  ;;  %v10126_v11 = vperm.slane %v10107_v24, 1 }
 0xa69   : > { %v6185_v48 = vrot.slane %v4490_v12, 6 }
 0xa6b   : > { %v10096_v31 = vsel %vm4489_vm11, %v9649_v60, %v6185_v48  ;;  %v4354_v16 = vpop.permute.xlu0 %4353 }
 0xa6c   : > { %v4374_v57 = vmax.f32 %v9889_v33, %v4354_v16 }
 0xa6d   : > { %v5141_v43 = vpop.permute.xlu2 %5140 }
 0xa6e   : > { %v10101_v55 = vmax.f32 %v5126_v4, %v5141_v43  ;;  %v4391_v49 = vsel %vm4383_vm9, %v4374_v57, -inf  ;;  %v4422_v15 = vsel %vm4412_vm10, %v4374_v57, -inf }
 0xa6f   : > { %v4392_v0 = vrot.slane %v4391_v49, 4 }
 0xa70   : > { %5176 = vrot.lane.b32.xlu2 %v10101_v55, %s10905_s1 }
 0xa71   : > { %v4393_v60 = vmax.f32 %v4391_v49, %v4392_v0 }
 0xa73   : > { %v4356_v38 = vpop.permute.xlu1 %4355  ;;  %v4394_v20 = vrot.slane %v4393_v60, 2 }
 0xa74   : > { %v4375_v3 = vmax.f32 %v9910_v22, %v4356_v38 }
 0xa75   : > { %v5137_v33 = vpop.permute.xlu0 %5136  ;;  %v4395_v16 = vmax.f32 %v4393_v60, %v4394_v20  ;;  %v4364_v49 = vpop.permute.xlu2 %4363 }
 0xa76   : > { %v10116_v4 = vmax.f32 %v10925_v25, %v5137_v33  ;;  %v4423_v6 = vsel %vm3554_vm6, %v4375_v3, -inf  ;;  %v4458_v41 = vsel %vm3590_vm7, %v4375_v3, -inf  ;;  %v10926_v33 = vmax.f32 %v9924_v30, 0.0 }
 0xa77   : > { %v5733_v19 = vpop.f32.mrf.mxu3  ;;  %v4424_v9 = vmax.f32 %v4422_v15, %v4423_v6  ;;  %v4460_v22 = vmax.f32 %v4458_v41, %v4459_v37  ;;  %v4396_v15 = vrot.slane %v4395_v16, 1 }
 0xa78   : > { %5172 = vrot.lane.b32.xlu0 %v10116_v4, %s10905_s1  ;;  %v5821_v26 = vmul.f32 %v10112_v14, %v5733_v19 }
 0xa79   : > { %v4425_v12 = vrot.slane %v4424_v9, 4  ;;  %v4461_v48 = vrot.slane %v4460_v22, 4 }
 0xa7a   : > { %v5834_v0 = vadd.f32 %v10126_v11, %v5821_v26  ;;  %v4397_v26 = vmax.f32 %v4395_v16, %v4396_v15 }
 0xa7b   : > { %v4426_v43 = vmax.f32 %v4424_v9, %v4425_v12  ;;  %v4462_v57 = vmax.f32 %v4460_v22, %v4461_v48 }
 0xa7c   : > { %v10137_v60 = vadd.f32 %v5834_v0, %v8692_v61 }
 0xa7d   : > { %v5139_v45 = vpop.permute.xlu1 %5138  ;;  %v4427_v38 = vrot.slane %v4426_v43, 2  ;;  %v4463_v3 = vrot.slane %v4462_v57, 2 }
 0xa7e   : > { %v10131_v25 = vmax.f32 %v10926_v33, %v5139_v45 }
 0xa7f   : > { %v5735_v37 = vpop.f32.mrf.mxu3  ;;  %v4428_v6 = vmax.f32 %v4426_v43, %v4427_v38  ;;  %v4464_v41 = vmax.f32 %v4462_v57, %v4463_v3  ;;  %v5858_v43 = vmax.f32 %v10137_v60, 0.0 }
 0xa80   : > { %v5822_v19 = vmul.f32 %v10112_v14, %v5735_v37  ;;  %5174 = vrot.lane.b32.xlu1 %v10131_v25, %s10905_s1 }
 0xa81   : > { %v4429_v9 = vrot.slane %v4428_v6, 1  ;;  %v4465_v22 = vrot.slane %v4464_v41, 1 }
 0xa82   : > { %v5835_v20 = vadd.f32 %v10126_v11, %v5822_v19 }
 0xa83   : > { %v4430_v12 = vmax.f32 %v4428_v6, %v4429_v9  ;;  %v4466_v48 = vmax.f32 %v4464_v41, %v4465_v22  ;;  %v4379_v41 = vmax.f32 %v9960_v18, %v4364_v49 }
 0xa84   : > { %v10141_v30 = vadd.f32 %v5835_v20, %v8694_v21  ;;  %v4360_v45 = vpop.permute.xlu0 %4359 }
 0xa85   : > { %v4377_v38 = vmax.f32 %v9940_v44, %v4360_v45  ;;  %v5147_v3 = vpop.permute.xlu2 %5146  ;;  %v4486_v61 = vsel %vm3628_vm8, %v4397_v26, %v4430_v12  ;;  %v4468_v45 = vsel %vm3592_vm4, %v4379_v41, -inf }
 0xa86   : > { %v5859_v57 = vmax.f32 %v10141_v30, 0.0  ;;  %v10149_v0 = vmax.f32 %v5129_v47, %v5147_v3  ;;  %v4491_v21 = vsel %vm4489_vm11, %v4486_v61, %v4466_v48  ;;  %v10927_v3 = vmax.f32 %v9952_v53, 0.0 }
 0xa87   : > { %v5738_v33 = vpop.f32.mrf.mxu3  ;;  %v4398_v37 = vsel %vm4383_vm9, %v4377_v38, -inf  ;;  %v6186_v19 = vrot.slane %v4491_v21, 6 }
 0xa88   : > { %v5870_v16 = vpack.c.bf16 %v5859_v57, %v5858_v43  ;;  %v4399_v15 = vrot.slane %v4398_v37, 4  ;;  %5182 = vrot.lane.b32.xlu2 %v10149_v0, %s10905_s1  ;;  %v5823_v2 = vmul.f32 %v10112_v14, %v5738_v33 }
 0xa89   : > { %v5759_v44 = vpop.f32.mrf.mxu0  ;;  %v10163_v6 = vsel %vm4489_vm11, %v9694_v40, %v6186_v19  ;;  %v4431_v40 = vsel %vm4412_vm10, %v4377_v38, -inf }
 0xa8a   : > { %v5824_v47 = vmul.f32 %v10112_v14, %v5759_v44  ;;  %5948 = vmatmul.bf16.vlgmr.msrb.gmra.mxu3 %v5870_v16  ;;  %v4400_v9 = vmax.f32 %v4398_v37, %v4399_v15  ;;  %v5836_v26 = vadd.f32 %v10126_v11, %v5823_v2 }
 0xa8b   : > { %v4362_v22 = vpop.permute.xlu1 %4361 }
 0xa8c   : > { %v5837_v20 = vadd.f32 %v10126_v11, %v5824_v47  ;;  %v4378_v12 = vmax.f32 %v9955_v58, %v4362_v22  ;;  %v4401_v16 = vrot.slane %v4400_v9, 2  ;;  %v10183_v53 = vadd.f32 %v5836_v26, %v8711_v51 }
 0xa8d   : > { %v5143_v48 = vpop.permute.xlu0 %5142  ;;  %v4370_v41 = vpop.permute.xlu2 %4369 }
 0xa8e   : > { %v10172_v61 = vmax.f32 %v10927_v3, %v5143_v48  ;;  %v10176_v18 = vadd.f32 %v5837_v20, %v8713_v5  ;;  %v4432_v49 = vsel %vm3554_vm6, %v4378_v12, -inf  ;;  %v4467_v21 = vsel %vm3590_vm7, %v4378_v12, -inf }
 0xa8f   : > { %v5740_v33 = vpop.f32.mrf.mxu3  ;;  %v4433_v37 = vmax.f32 %v4431_v40, %v4432_v49  ;;  %v4469_v58 = vmax.f32 %v4467_v21, %v4468_v45  ;;  %v4402_v5 = vmax.f32 %v4400_v9, %v4401_v16  ;;  %v10857_v20 = vmax.f32 %v10183_v53, 0.0 }
 0xa90   : > { %5178 = vrot.lane.b32.xlu0 %v10172_v61, %s10905_s1  ;;  %v10856_v38 = vmax.f32 %v10176_v18, 0.0  ;;  %v10928_v33 = vmax.f32 %v9976_v36, 0.0 }
 0xa91   : > { %v5761_v19 = vpop.f32.mrf.mxu0  ;;  %v4434_v15 = vrot.slane %v4433_v37, 4  ;;  %v4470_v44 = vrot.slane %v4469_v58, 4  ;;  %v4403_v26 = vrot.slane %v4402_v5, 1 }
 0xa92   : > { %v5871_v9 = vpack.c.bf16 %v10856_v38, %v10857_v20 }
 0xa93   : > { %v4435_v2 = vmax.f32 %v4433_v37, %v4434_v15  ;;  %v4471_v47 = vmax.f32 %v4469_v58, %v4470_v44  ;;  %v4382_v44 = vmax.f32 %v10012_v56, %v4370_v41 }
 0xa95   : > { %v4366_v22 = vpop.permute.xlu0 %4365  ;;  %v5145_v12 = vpop.permute.xlu1 %5144  ;;  %v4436_v48 = vrot.slane %v4435_v2, 2  ;;  %v4472_v45 = vrot.slane %v4471_v47, 2  ;;  %v4477_v41 = vsel %vm3592_vm4, %v4382_v44, -inf }
 0xa96   : > { %v4380_v3 = vmax.f32 %v9979_v59, %v4366_v22  ;;  %v10190_v51 = vmax.f32 %v10928_v33, %v5145_v12  ;;  %v5825_v59 = vmul.f32 %v10112_v14, %v5761_v19 }
 0xa97   : > { %v4437_v40 = vmax.f32 %v4435_v2, %v4436_v48  ;;  %v4473_v49 = vmax.f32 %v4471_v47, %v4472_v45  ;;  %v4404_v2 = vmax.f32 %v4402_v5, %v4403_v26 }
 0xa98   : > { %v4405_v21 = vsel %vm4383_vm9, %v4380_v3, -inf  ;;  %5180 = vrot.lane.b32.xlu1 %v10190_v51, %s10905_s1  ;;  %v5838_v48 = vadd.f32 %v10126_v11, %v5825_v59 }
 0xa99   : > { %v5764_v16 = vpop.f32.mrf.mxu0  ;;  %v4406_v37 = vrot.slane %v4405_v21, 4  ;;  %v4438_v58 = vrot.slane %v4437_v40, 1  ;;  %v4474_v15 = vrot.slane %v4473_v49, 1 }
 0xa9a   : > { %v5826_v36 = vmul.f32 %v10112_v14, %v5764_v16  ;;  %5953 = vmatmul.bf16.gmra.mxu3 %v5871_v9  ;;  %v10221_v50 = vadd.f32 %v5838_v48, %v8730_v32 }
 0xa9b   : > { %v4439_v47 = vmax.f32 %v4437_v40, %v4438_v58  ;;  %v4475_v12 = vmax.f32 %v4473_v49, %v4474_v15  ;;  %v4407_v45 = vmax.f32 %v4405_v21, %v4406_v37  ;;  %v4440_v40 = vsel %vm4412_vm10, %v4380_v3, -inf }
 0xa9c   : > { %v5839_v22 = vadd.f32 %v10126_v11, %v5826_v36 }
 0xa9d   : > { %v4368_v33 = vpop.permute.xlu1 %4367  ;;  %v4487_v19 = vsel %vm3628_vm8, %v4404_v2, %v4439_v47 }
 0xa9e   : > { %v5153_v38 = vpop.permute.xlu2 %5152  ;;  %v4381_v20 = vmax.f32 %v9997_v39, %v4368_v33  ;;  %v4492_v56 = vsel %vm4489_vm11, %v4487_v19, %v4475_v12  ;;  %v10213_v5 = vadd.f32 %v5839_v22, %v8732_v54 }
 0xa9f   : > { %v10208_v9 = vmax.f32 %v5132_v1, %v5153_v38  ;;  %v6187_v26 = vrot.slane %v4492_v56, 6  ;;  %v4408_v1 = vrot.slane %v4407_v45, 2 }
 0xaa0   : > { %v4441_v49 = vsel %vm3554_vm6, %v4381_v20, -inf  ;;  %v4476_v21 = vsel %vm3590_vm7, %v4381_v20, -inf  ;;  %v5863_v3 = vmax.f32 %v10213_v5, 0.0  ;;  %v5862_v20 = vmax.f32 %v10221_v50, 0.0 }
 0xaa1   : > { %5188 = vrot.lane.b32.xlu2 %v10208_v9, %s10905_s1  ;;  %v5766_v39 = vpop.f32.mrf.mxu0  ;;  %v4442_v38 = vmax.f32 %v4440_v40, %v4441_v49  ;;  %v4478_v16 = vmax.f32 %v4476_v21, %v4477_v41  ;;  %v5785_v59 = vpop.f32.mrf.mxu1  ;;  %v10225_v54 = vsel %vm4489_vm11, %v9763_v35, %v6187_v26  ;;  %v4409_v58 = vmax.f32 %v4407_v45, %v4408_v1 }
 0xaa2   : > { %v5872_v35 = vpack.c.bf16 %v5863_v3, %v5862_v20  ;;  %v5827_v33 = vmul.f32 %v10112_v14, %v5785_v59 }
 0xaa3   : > { %v4443_v37 = vrot.slane %v4442_v38, 4  ;;  %v4479_v36 = vrot.slane %v4478_v16, 4  ;;  %v4410_v12 = vrot.slane %v4409_v58, 1 }
 0xaa4   : > { %v5840_v21 = vadd.f32 %v10126_v11, %v5827_v33 }
 0xaa5   : > { %v4444_v15 = vmax.f32 %v4442_v38, %v4443_v37  ;;  %v4480_v44 = vmax.f32 %v4478_v16, %v4479_v36  ;;  %v5149_v22 = vpop.permute.xlu0 %5148  ;;  %v4411_v26 = vmax.f32 %v4409_v58, %v4410_v12 }
 0xaa6   : > { %v10231_v32 = vmax.f32 %v5130_v42, %v5149_v22  ;;  %v10255_v36 = vadd.f32 %v5840_v21, %v8752_v63 }
 0xaa7   : > { %v4445_v2 = vrot.slane %v4444_v15, 2  ;;  %v4481_v47 = vrot.slane %v4480_v44, 2 }
 0xaa8   : > { %5184 = vrot.lane.b32.xlu0 %v10231_v32, %s10905_s1 }
 0xaa9   : > { %v4446_v48 = vmax.f32 %v4444_v15, %v4445_v2  ;;  %v4482_v45 = vmax.f32 %v4480_v44, %v4481_v47  ;;  %v5787_v19 = vpop.f32.mrf.mxu1  ;;  %v5864_v15 = vmax.f32 %v10255_v36, 0.0 }
 0xaaa   : > { %5958 = vmatmul.bf16.gmra.mxu3 %v5872_v35  ;;  %v5828_v23 = vmul.f32 %v10112_v14, %v5787_v19  ;;  %v10929_v35 = vmax.f32 %v10048_v10, 0.0 }
 0xaab   : > { %v4447_v42 = vrot.slane %v4446_v48, 1  ;;  %v4483_v56 = vrot.slane %v4482_v45, 1 }
 0xaac   : > { %v5841_v41 = vadd.f32 %v10126_v11, %v5828_v23 }
 0xaad   : > { %v4448_v40 = vmax.f32 %v4446_v48, %v4447_v42  ;;  %v4484_v49 = vmax.f32 %v4482_v45, %v4483_v56  ;;  %v5151_v39 = vpop.permute.xlu1 %5150  ;;  %v10930_v42 = vmax.f32 %v10062_v13, 0.0 }
 0xaae   : > { %v10245_v1 = vmax.f32 %v5131_v34, %v5151_v39  ;;  %v10249_v16 = vadd.f32 %v5841_v41, %v8754_v8 }
 0xaaf   : > { %v4488_v38 = vsel %vm3628_vm8, %v4411_v26, %v4448_v40 }
 0xab0   : > { %v4493_v59 = vsel %vm4489_vm11, %v4488_v38, %v4484_v49  ;;  %5186 = vrot.lane.b32.xlu1 %v10245_v1, %s10905_s1  ;;  %v5865_v34 = vmax.f32 %v10249_v16, 0.0 }
 0xab1   : > { %v6188_v37 = vrot.slane %v4493_v59, 6  ;;  %v5790_v58 = vpop.f32.mrf.mxu1 }
 0xab2   : > { %v5873_v63 = vpack.c.bf16 %v5865_v34, %v5864_v15 }
 0xab3   : > { %v10259_v52 = vsel %vm4489_vm11, %v9814_v62, %v6188_v37  ;;  %v5829_v62 = vmul.f32 %v10112_v14, %v5790_v58 }
 0xab5   : > { %v5842_v2 = vadd.f32 %v10126_v11, %v5829_v62  ;;  %v10336_v62 = vperm.slane %v10107_v24, 3 }
 0xab6   : > { %v5159_v8 = vpop.permute.xlu2 %5158 }
 0xab7   : > { %v10265_v44 = vmax.f32 %v5135_v28, %v5159_v8  ;;  %v10283_v48 = vadd.f32 %v5842_v2, %v8776_v29 }
 0xab9   : > { %5194 = vrot.lane.b32.xlu2 %v10265_v44, %s10905_s1  ;;  %v5792_v22 = vpop.f32.mrf.mxu1  ;;  %v5866_v19 = vmax.f32 %v10283_v48, 0.0 }
 0xaba   : > { %5963 = vmatmul.bf16.gmra.mxu3 %v5873_v63  ;;  %v10333_v63 = vperm.slane %v10107_v24, 2 }
 0xabe   : > { %v5155_v47 = vpop.permute.xlu0 %5154 }
 0xabf   : > { %v10277_v46 = vmax.f32 %v10929_v35, %v5155_v47  ;;  %v5811_v28 = vpop.f32.mrf.mxu2 }
 0xac0   : > { %v5830_v12 = vmul.f32 %v10112_v14, %v5811_v28 }
 0xac1   : > { %5190 = vrot.lane.b32.xlu0 %v10277_v46, %s10905_s1 }
 0xac2   : > { %v5843_v45 = vadd.f32 %v10126_v11, %v5830_v12 }
 0xac4   : > { %v10287_v33 = vadd.f32 %v5843_v45, %v10909_v27 }
 0xac6   : > { %v5867_v10 = vmax.f32 %v10287_v33, 0.0  ;;  %v5157_v23 = vpop.permute.xlu1 %5156 }
 0xac7   : > { %v10293_v56 = vmax.f32 %v10930_v42, %v5157_v23  ;;  %v5813_v41 = vpop.f32.mrf.mxu2  ;;  %v10931_v42 = vmax.f32 %v10183_v53, 0.0 }
 0xac8   : > { %v5874_v29 = vpack.c.bf16 %v5867_v10, %v5866_v19  ;;  %v5831_v27 = vmul.f32 %v10112_v14, %v5813_v41 }
 0xac9   : > { %5192 = vrot.lane.b32.xlu1 %v10293_v56, %s10905_s1 }
 0xaca   : > { %5968 = vmatmul.bf16.gmra.mxu3 %v5874_v29  ;;  %v5177_v26 = vpop.permute.xlu2 %5176  ;;  %v5844_v13 = vadd.f32 %v10126_v11, %v5831_v27 }
 0xacb   : > { %v10303_v40 = vmax.f32 %v10101_v55, %v5177_v26  ;;  %v10932_v26 = vmax.f32 %v10176_v18, 0.0 }
 0xacc   : > { %v10310_v39 = vadd.f32 %v5844_v13, %v10911_v17 }
 0xacd   : > { %5212 = vrot.lane.b32.xlu2 %v10303_v40, %s10910_s23 }
 0xace   : > { %v5868_v37 = vmax.f32 %v10310_v39, 0.0 }
 0xacf   : > { %v5816_v49 = vpop.f32.mrf.mxu2 }
 0xad0   : > { %v5832_v21 = vmul.f32 %v10112_v14, %v5816_v49 }
 0xad2   : > { %v5845_v38 = vadd.f32 %v10126_v11, %v5832_v21 }
 0xad4   : > { %v10314_v59 = vadd.f32 %v5845_v38, %v10912_v7 }
 0xad6   : > { %v5869_v55 = vmax.f32 %v10314_v59, 0.0 }
 0xad7   : > { %v5818_v58 = vpop.f32.mrf.mxu2 }
 0xad8   : > { %v5875_v8 = vpack.c.bf16 %v5869_v55, %v5868_v37 }
 0xada   : > { %5973 = vmatmul.bf16.gmra.mxu3 %v5875_v8 }
 0xae2   : > { %v10416_v36 = vpop.permute.xlu2 %5182 }
 0xaea   : > { %v5173_v14 = vpop.permute.xlu0 %5172 }
 0xaeb   : > { %v10323_v17 = vmax.f32 %v10116_v4, %v5173_v14 }
 0xaed   : > { %5208 = vrot.lane.b32.xlu0 %v10323_v17, %s10910_s23 }
 0xaf2   : > { %v5175_v7 = vpop.permute.xlu1 %5174 }
 0xaf3   : > { %v10328_v11 = vmax.f32 %v10131_v25, %v5175_v7 }
 0xaf5   : > { %5210 = vrot.lane.b32.xlu1 %v10328_v11, %s10910_s23 }
 0xb0d   : > { %v5949_v22 = vpop.f32.mrf.mxu3 }
 0xb0e   : > { %v5980_v4 = vmul.f32 %v10333_v63, %v5949_v22 }
 0xb10   : > { %v5993_v2 = vadd.f32 %v10336_v62, %v5980_v4 }
 0xb12   : > { %v10342_v47 = vadd.f32 %v5993_v2, %v5858_v43 }
 0xb14   : > { %v6017_v25 = vmax.f32 %v10342_v47, 0.0 }
 0xb15   : > { %v5951_v35 = vpop.f32.mrf.mxu3 }
 0xb16   : > { %v5981_v28 = vmul.f32 %v10333_v63, %v5951_v35  ;;  %6029 = vrot.lane.b32.xlu1 %v6017_v25, %s10913_s2 }
 0xb18   : > { %v5994_v24 = vadd.f32 %v10336_v62, %v5981_v28 }
 0xb1a   : > { %v10352_v12 = vadd.f32 %v5994_v24, %v5859_v57  ;;  %v10409_v24 = vpop.permute.xlu0 %5178 }
 0xb1c   : > { %v6018_v45 = vmax.f32 %v10352_v12, 0.0 }
 0xb1d   : > { %v5954_v60 = vpop.f32.mrf.mxu3 }
 0xb1e   : > { %v5982_v43 = vmul.f32 %v10333_v63, %v5954_v60  ;;  %6031 = vrot.lane.b32.xlu2 %v6018_v45, %s10913_s2 }
 0xb20   : > { %v5995_v23 = vadd.f32 %v10336_v62, %v5982_v43 }
 0xb22   : > { %v10362_v41 = vadd.f32 %v5995_v23, %v10931_v42 }
 0xb24   : > { %v6019_v29 = vmax.f32 %v10362_v41, 0.0 }
 0xb25   : > { %v5956_v30 = vpop.f32.mrf.mxu3 }
 0xb26   : > { %v5983_v57 = vmul.f32 %v10333_v63, %v5956_v30  ;;  %6033 = vrot.lane.b32.xlu0 %v6019_v29, %s10913_s2  ;;  %v5181_v30 = vpop.permute.xlu1 %5180 }
 0xb28   : > { %v5996_v27 = vadd.f32 %v10336_v62, %v5983_v57  ;;  %v5185_v57 = vpop.permute.xlu0 %5184 }
 0xb2a   : > { %v10372_v13 = vadd.f32 %v5996_v27, %v10932_v26 }
 0xb2c   : > { %v6020_v49 = vmax.f32 %v10372_v13, 0.0 }
 0xb2d   : > { %v5959_v53 = vpop.f32.mrf.mxu3 }
 0xb2e   : > { %v5984_v21 = vmul.f32 %v10333_v63, %v5959_v53  ;;  %6035 = vrot.lane.b32.xlu0 %v6020_v49, %s10913_s2 }
 0xb30   : > { %v5997_v38 = vadd.f32 %v10336_v62, %v5984_v21 }
 0xb32   : > { %v10382_v58 = vadd.f32 %v5997_v38, %v5862_v20  ;;  %v10435_v38 = vpop.permute.xlu1 %5186 }
 0xb34   : > { %v6021_v8 = vmax.f32 %v10382_v58, 0.0 }
 0xb35   : > { %v5961_v18 = vpop.f32.mrf.mxu3 }
 0xb36   : > { %v5985_v14 = vmul.f32 %v10333_v63, %v5961_v18  ;;  %6037 = vrot.lane.b32.xlu1 %v6021_v8, %s10913_s2  ;;  %v10437_v18 = vpop.permute.xlu0 %5190 }
 0xb38   : > { %v5998_v7 = vadd.f32 %v10336_v62, %v5985_v14 }
 0xb3a   : > { %v10392_v22 = vadd.f32 %v5998_v7, %v5863_v3 }
 0xb3c   : > { %v6022_v4 = vmax.f32 %v10392_v22, 0.0 }
 0xb3d   : > { %v5964_v50 = vpop.f32.mrf.mxu3 }
 0xb3e   : > { %v5986_v20 = vmul.f32 %v10333_v63, %v5964_v50  ;;  %6039 = vrot.lane.b32.xlu1 %v6022_v4, %s10913_s2 }
 0xb40   : > { %v5999_v2 = vadd.f32 %v10336_v62, %v5986_v20 }
 0xb42   : > { %v10402_v35 = vadd.f32 %v5999_v2, %v5864_v15  ;;  %v10451_v2 = vpop.permute.xlu1 %5192 }
 0xb44   : > { %v6023_v28 = vmax.f32 %v10402_v35, 0.0 }
 0xb45   : > { %v5966_v5 = vpop.f32.mrf.mxu3 }
 0xb46   : > { %v5987_v3 = vmul.f32 %v10333_v63, %v5966_v5  ;;  %6041 = vrot.lane.b32.xlu2 %v6023_v28, %s10913_s2 }
 0xb48   : > { %v6000_v60 = vadd.f32 %v10336_v62, %v5987_v3 }
 0xb4a   : > { %v10414_v43 = vadd.f32 %v6000_v60, %v5865_v34  ;;  %v10428_v34 = vpop.permute.xlu2 %5188 }
 0xb4c   : > { %v6024_v15 = vmax.f32 %v10414_v43, 0.0 }
 0xb4d   : > { %v5969_v23 = vpop.f32.mrf.mxu3 }
 0xb4e   : > { %v5988_v42 = vmul.f32 %v10333_v63, %v5969_v23  ;;  %6043 = vrot.lane.b32.xlu0 %v6024_v15, %s10913_s2 }
 0xb50   : > { %v6001_v27 = vadd.f32 %v10336_v62, %v5988_v42  ;;  %v10461_v42 = vmax.f32 %v10190_v51, %v5181_v30  ;;  %v10474_v30 = vmax.f32 %v10231_v32, %v5185_v57 }
 0xb52   : > { %v10426_v16 = vadd.f32 %v6001_v27, %v5866_v19  ;;  %v10444_v19 = vpop.permute.xlu2 %5194 }
 0xb54   : > { %v6025_v26 = vmax.f32 %v10426_v16, 0.0 }
 0xb55   : > { %v5971_v53 = vpop.f32.mrf.mxu3 }
 0xb56   : > { %v5989_v21 = vmul.f32 %v10333_v63, %v5971_v53  ;;  %6045 = vrot.lane.b32.xlu2 %v6025_v26, %s10913_s2 }
 0xb58   : > { %v6002_v14 = vadd.f32 %v10336_v62, %v5989_v21 }
 0xb5a   : > { %v10442_v48 = vadd.f32 %v6002_v14, %v5867_v10  ;;  %v5213_v60 = vpop.permute.xlu2 %5212 }
 0xb5b   : > { %v5234_v14 = vmax.f32 %v10303_v40, %v5213_v60 }
 0xb5c   : > { %v10858_v7 = vmax.f32 %v10442_v48, 0.0  ;;  %v10933_v16 = vmax.f32 %v10442_v48, 0.0 }
 0xb5d   : > { %v5974_v50 = vpop.f32.mrf.mxu3  ;;  %v5339_v40 = vsel %vm3592_vm4, %v5234_v14, -inf }
 0xb5e   : > { %v5990_v20 = vmul.f32 %v10333_v63, %v5974_v50  ;;  %6047 = vrot.lane.b32.xlu1 %v10858_v7, %s10913_s2 }
 0xb5f   : > { %v5209_v3 = vpop.permute.xlu0 %5208 }
 0xb60   : > { %v6003_v5 = vadd.f32 %v10336_v62, %v5990_v20  ;;  %v5232_v33 = vmax.f32 %v10323_v17, %v5209_v3 }
 0xb62   : > { %v10457_v10 = vadd.f32 %v6003_v5, %v5868_v37  ;;  %v5244_v23 = vsel %vm4383_vm9, %v5232_v33, -inf  ;;  %v5272_v20 = vsel %vm4412_vm10, %v5232_v33, -inf }
 0xb63   : > { %v5245_v27 = vrot.slane %v5244_v23, 4 }
 0xb64   : > { %v6027_v53 = vmax.f32 %v10457_v10, 0.0 }
 0xb65   : > { %v5976_v21 = vpop.f32.mrf.mxu3  ;;  %v5246_v39 = vmax.f32 %v5244_v23, %v5245_v27 }
 0xb66   : > { %v5991_v50 = vmul.f32 %v10333_v63, %v5976_v21  ;;  %5216 = vrot.lane.b32.xlu1 %v10461_v42, %s10910_s23  ;;  %6049 = vrot.lane.b32.xlu2 %v6027_v53, %s10913_s2 }
 0xb67   : > { %v5211_v51 = vpop.permute.xlu1 %5210  ;;  %v5247_v60 = vrot.slane %v5246_v39, 2 }
 0xb68   : > { %v6004_v37 = vadd.f32 %v10336_v62, %v5991_v50  ;;  %v5233_v17 = vmax.f32 %v10328_v11, %v5211_v51 }
 0xb69   : > { %v5248_v59 = vmax.f32 %v5246_v39, %v5247_v60 }
 0xb6a   : > { %v10479_v63 = vadd.f32 %v6004_v37, %v5869_v55  ;;  %v5273_v5 = vsel %vm3554_vm6, %v5233_v17, -inf  ;;  %v5309_v62 = vsel %vm5308_vm12, %v5233_v17, -inf  ;;  %v5338_v3 = vsel %vm5337_vm13, %v5233_v17, -inf }
 0xb6b   : > { %v5274_v23 = vmax.f32 %v5272_v20, %v5273_v5  ;;  %v5310_v11 = vrot.slane %v5309_v62, 4  ;;  %v5340_v27 = vmax.f32 %v5338_v3, %v5339_v40  ;;  %v5249_v40 = vrot.slane %v5248_v59, 1 }
 0xb6c   : > { %v6028_v32 = vmax.f32 %v10479_v63, 0.0 }
 0xb6d   : > { %v5275_v57 = vrot.slane %v5274_v23, 4  ;;  %v5311_v21 = vmax.f32 %v5309_v62, %v5310_v11  ;;  %v5341_v14 = vrot.slane %v5340_v27, 4  ;;  %v10493_v62 = vmax.f32 %v10172_v61, %v10409_v24 }
 0xb6e   : > { %5220 = vrot.lane.b32.xlu2 %v10474_v30, %s10910_s23  ;;  %6051 = vrot.lane.b32.xlu0 %v6028_v32, %s10913_s2  ;;  %v5250_v39 = vmax.f32 %v5248_v59, %v5249_v40  ;;  %s7378_s2 = sshll.u32 %s10935_s0, 4 }
 0xb6f   : > { %v5276_v55 = vmax.f32 %v5274_v23, %v5275_v57  ;;  %v5312_v33 = vrot.slane %v5311_v21, 2  ;;  %v5342_v50 = vmax.f32 %v5340_v27, %v5341_v14  ;;  %s10510_s3 = scalar_lea.vmem %s7824_s20, %s7378_s2 }
 0xb71   : > { %v5277_v37 = vrot.slane %v5276_v55, 2  ;;  %v5313_v51 = vmax.f32 %v5311_v21, %v5312_v33  ;;  %v5343_v17 = vrot.slane %v5342_v50, 2 }
 0xb73   : > { %v5278_v20 = vmax.f32 %v5276_v55, %v5277_v37  ;;  %v5344_v5 = vmax.f32 %v5342_v50, %v5343_v17  ;;  %v5314_v3 = vrot.slane %v5313_v51, 1 }
 0xb75   : > { %v5279_v11 = vrot.slane %v5278_v20, 1  ;;  %v5345_v7 = vrot.slane %v5344_v5, 1  ;;  %v5315_v27 = vmax.f32 %v5313_v51, %v5314_v3 }
 0xb76   : > { %5214 = vrot.lane.b32.xlu0 %v10493_v62, %s10910_s23 }
 0xb77   : > { %v5280_v60 = vmax.f32 %v5278_v20, %v5279_v11  ;;  %v5346_v21 = vmax.f32 %v5344_v5, %v5345_v7 }
 0xb78   : > { %v6032_v23 = vpop.permute.xlu2 %6031 }
 0xb79   : > { %v10499_v57 = vmax.f32 %v6018_v45, %v6032_v23  ;;  %v5374_v61 = vsel %vm3628_vm8, %v5250_v39, %v5280_v60  ;;  %v10632_v60 = vmax.f32 %v10265_v44, %v10444_v19 }
 0xb7a   : > { %v5378_v24 = vsel %vm4489_vm11, %v5374_v61, %v5315_v27 }
 0xb7b   : > { %6067 = vrot.lane.b32.xlu1 %v10499_v57, %s10905_s1  ;;  %v10507_v14 = vsel %vm5382_vm14, %v5378_v24, %v5346_v21 }
 0xb7c   : > { %v6197_v12 = vrot.slane %v10507_v14, 3 }
 0xb7e   : > { %v6210_v45 = vsel %vm6209_vm15, %v10096_v31, %v6197_v12 }
 0xb7f   : > { %6218 = vst.msk [vmem:[%s10510_s3] sm:$0xff] %vm3552_vm5, %v6210_v45 }
 0xb88   : > { %v6030_v7 = vpop.permute.xlu1 %6029 }
 0xb89   : > { %v10521_v59 = vmax.f32 %v6017_v25, %v6030_v7 }
 0xb8b   : > { %6065 = vrot.lane.b32.xlu0 %v10521_v59, %s10905_s1 }
 0xb98   : > { %v6034_v55 = vpop.permute.xlu0 %6033 }
 0xb99   : > { %v10527_v33 = vmax.f32 %v6019_v29, %v6034_v55 }
 0xb9b   : > { %6069 = vrot.lane.b32.xlu2 %v10527_v33, %s10905_s1 }
 0xba0   : > { %v6036_v50 = vpop.permute.xlu0 %6035  ;;  %v6042_v31 = vpop.permute.xlu2 %6041 }
 0xba1   : > { %v10533_v37 = vmax.f32 %v6020_v49, %v6036_v50  ;;  %v10537_v47 = vmax.f32 %v6023_v28, %v6042_v31 }
 0xba3   : > { %6071 = vrot.lane.b32.xlu2 %v10533_v37, %s10905_s1  ;;  %6077 = vrot.lane.b32.xlu1 %v10537_v47, %s10905_s1 }
 0xba8   : > { %v6038_v25 = vpop.permute.xlu1 %6037 }
 0xba9   : > { %v10545_v41 = vmax.f32 %v6021_v8, %v6038_v25 }
 0xbab   : > { %6073 = vrot.lane.b32.xlu0 %v10545_v41, %s10905_s1 }
 0xbb0   : > { %v6040_v29 = vpop.permute.xlu1 %6039  ;;  %v6046_v13 = vpop.permute.xlu2 %6045 }
 0xbb1   : > { %v10551_v49 = vmax.f32 %v6022_v4, %v6040_v29  ;;  %v10555_v35 = vmax.f32 %v6025_v26, %v6046_v13  ;;  %v10575_v4 = vmax.f32 %v10277_v46, %v10437_v18  ;;  %v10593_v46 = vmax.f32 %v10245_v1, %v10435_v38 }
 0xbb3   : > { %6075 = vrot.lane.b32.xlu0 %v10551_v49, %s10905_s1  ;;  %6081 = vrot.lane.b32.xlu1 %v10555_v35, %s10905_s1 }
 0xbc0   : > { %v6044_v58 = vpop.permute.xlu0 %6043  ;;  %v6050_v8 = vpop.permute.xlu2 %6049 }
 0xbc1   : > { %v10563_v28 = vmax.f32 %v6024_v15, %v6044_v58  ;;  %v10567_v22 = vmax.f32 %v6027_v53, %v6050_v8  ;;  %v10581_v15 = vmax.f32 %v10208_v9, %v10428_v34  ;;  %v10602_v34 = vmax.f32 %v10149_v0, %v10416_v36 }
 0xbc2   : > { %v10616_v0 = vmax.f32 %v10293_v56, %v10451_v2 }
 0xbc3   : > { %6079 = vrot.lane.b32.xlu2 %v10563_v28, %s10905_s1  ;;  %6085 = vrot.lane.b32.xlu1 %v10567_v22, %s10905_s1 }
 0xbc8   : > { %v5221_v17 = vpop.permute.xlu2 %5220 }
 0xbcb   : > { %5226 = vrot.lane.b32.xlu1 %v10575_v4, %s10910_s23 }
 0xbd0   : > { %v6048_v43 = vpop.permute.xlu1 %6047 }
 0xbd1   : > { %v10585_v26 = vmax.f32 %v10933_v16, %v6048_v43 }
 0xbd3   : > { %6083 = vrot.lane.b32.xlu0 %v10585_v26, %s10905_s1  ;;  %5224 = vrot.lane.b32.xlu1 %v10581_v15, %s10910_s23 }
 0xbd8   : > { %v5217_v18 = vpop.permute.xlu1 %5216 }
 0xbd9   : > { %v10598_v9 = vmax.f32 %v10461_v42, %v5217_v18 }
 0xbdb   : > { %5222 = vrot.lane.b32.xlu0 %v10593_v46, %s10910_s23  ;;  %v5316_v1 = vsel %vm5308_vm12, %v10598_v9, -inf  ;;  %v5282_v63 = vsel %vm3554_vm6, %v10598_v9, -inf }
 0xbdc   : > { %v5317_v38 = vrot.slane %v5316_v1, 4 }
 0xbde   : > { %v5318_v36 = vmax.f32 %v5316_v1, %v5317_v38 }
 0xbe0   : > { %v6052_v48 = vpop.permute.xlu0 %6051  ;;  %v5319_v3 = vrot.slane %v5318_v36, 2 }
 0xbe1   : > { %v10606_v10 = vmax.f32 %v6028_v32, %v6052_v48 }
 0xbe2   : > { %v5320_v23 = vmax.f32 %v5318_v36, %v5319_v3 }
 0xbe3   : > { %5218 = vrot.lane.b32.xlu0 %v10602_v34, %s10910_s23  ;;  %6087 = vrot.lane.b32.xlu2 %v10606_v10, %s10905_s1 }
 0xbe4   : > { %v5321_v45 = vrot.slane %v5320_v23, 1 }
 0xbe6   : > { %v5322_v31 = vmax.f32 %v5320_v23, %v5321_v45 }
 0xbe8   : > { %v5215_v42 = vpop.permute.xlu0 %5214 }
 0xbe9   : > { %v5235_v53 = vmax.f32 %v10493_v62, %v5215_v42 }
 0xbeb   : > { %v5251_v32 = vsel %vm4383_vm9, %v5235_v53, -inf  ;;  %v5281_v51 = vsel %vm4412_vm10, %v5235_v53, -inf  ;;  %5228 = vrot.lane.b32.xlu2 %v10616_v0, %s10910_s23 }
 0xbec   : > { %v5252_v40 = vrot.slane %v5251_v32, 4  ;;  %v5283_v20 = vmax.f32 %v5281_v51, %v5282_v63  ;;  %v5238_v63 = vmax.f32 %v10474_v30, %v5221_v17 }
 0xbed   : > { %v6068_v5 = vpop.permute.xlu1 %6067 }
 0xbee   : > { %v10626_v56 = vmax.f32 %v10499_v57, %v6068_v5  ;;  %v5253_v2 = vmax.f32 %v5251_v32, %v5252_v40  ;;  %v5284_v62 = vrot.slane %v5283_v20, 4  ;;  %v5258_v32 = vsel %vm4383_vm9, %v5238_v63, -inf }
 0xbf0   : > { %6103 = vrot.lane.b32.xlu1 %v10626_v56, %s10910_s23  ;;  %v5254_v11 = vrot.slane %v5253_v2, 2  ;;  %v5285_v39 = vmax.f32 %v5283_v20, %v5284_v62 }
 0xbf2   : > { %v5255_v27 = vmax.f32 %v5253_v2, %v5254_v11  ;;  %v5286_v21 = vrot.slane %v5285_v39, 2 }
 0xbf3   : > { %5230 = vrot.lane.b32.xlu2 %v10632_v60, %s10910_s23 }
 0xbf4   : > { %v5256_v61 = vrot.slane %v5255_v27, 1  ;;  %v5287_v57 = vmax.f32 %v5285_v39, %v5286_v21 }
 0xbf5   : > { %v6070_v24 = vpop.permute.xlu2 %6069 }
 0xbf6   : > { %v5288_v7 = vrot.slane %v5287_v57, 1  ;;  %v5257_v55 = vmax.f32 %v5255_v27, %v5256_v61  ;;  %v10637_v25 = vmax.f32 %v10527_v33, %v6070_v24 }
 0xbf8   : > { %v5289_v50 = vmax.f32 %v5287_v57, %v5288_v7 }
 0xbfa   : > { %v5375_v44 = vsel %vm3628_vm8, %v5257_v55, %v5289_v50 }
 0xbfb   : > { %v10641_v19 = vsel %vm4489_vm11, %v5375_v44, %v5322_v31  ;;  %6105 = vrot.lane.b32.xlu2 %v10637_v25, %s10910_s23 }
 0xbfd   : > { %v6066_v29 = vpop.permute.xlu0 %6065  ;;  %v6072_v58 = vpop.permute.xlu2 %6071 }
 0xbfe   : > { %v10646_v13 = vmax.f32 %v10521_v59, %v6066_v29  ;;  %v10651_v8 = vmax.f32 %v10533_v37, %v6072_v58 }
 0xc00   : > { %6101 = vrot.lane.b32.xlu0 %v10646_v13, %s10910_s23 }
 0xc03   : > { %6107 = vrot.lane.b32.xlu2 %v10651_v8, %s10910_s23 }
 0xc15   : > { %v6078_v33 = vpop.permute.xlu1 %6077 }
 0xc16   : > { %v10656_v43 = vmax.f32 %v10537_v47, %v6078_v33 }
 0xc18   : > { %6113 = vrot.lane.b32.xlu1 %v10656_v43, %s10910_s23 }
 0xc1d   : > { %v6074_v16 = vpop.permute.xlu0 %6073  ;;  %v6080_v59 = vpop.permute.xlu2 %6079 }
 0xc1e   : > { %v10661_v18 = vmax.f32 %v10545_v41, %v6074_v16  ;;  %v10664_v48 = vmax.f32 %v10563_v28, %v6080_v59 }
 0xc20   : > { %6109 = vrot.lane.b32.xlu0 %v10661_v18, %s10910_s23  ;;  %6115 = vrot.lane.b32.xlu2 %v10664_v48, %s10910_s23 }
 0xc25   : > { %v6082_v37 = vpop.permute.xlu1 %6081  ;;  %v6076_v38 = vpop.permute.xlu0 %6075 }
 0xc26   : > { %v10676_v42 = vmax.f32 %v10555_v35, %v6082_v37  ;;  %v10701_v61 = vmax.f32 %v10551_v49, %v6076_v38 }
 0xc35   : > { %v6086_v47 = vpop.permute.xlu1 %6085 }
 0xc36   : > { %v10671_v1 = vmax.f32 %v10567_v22, %v6086_v47 }
 0xc38   : > { %6121 = vrot.lane.b32.xlu1 %v10671_v1, %s10910_s23 }
 0xc3d   : > { %v5227_v41 = vpop.permute.xlu1 %5226  ;;  %v6088_v28 = vpop.permute.xlu2 %6087 }
 0xc3e   : > { %v5241_v36 = vmax.f32 %v10575_v4, %v5227_v41  ;;  %v10680_v53 = vmax.f32 %v10606_v10, %v6088_v28  ;;  %v5259_v10 = vrot.slane %v5258_v32, 4 }
 0xc40   : > { %6117 = vrot.lane.b32.xlu1 %v10676_v42, %s10910_s23  ;;  %6123 = vrot.lane.b32.xlu2 %v10680_v53, %s10910_s23  ;;  %v5265_v22 = vsel %vm4383_vm9, %v5241_v36, -inf  ;;  %v5299_v17 = vsel %vm4412_vm10, %v5241_v36, -inf  ;;  %v5260_v39 = vmax.f32 %v5258_v32, %v5259_v10 }
 0xc41   : > { %v5266_v51 = vrot.slane %v5265_v22, 4 }
 0xc42   : > { %v5261_v55 = vrot.slane %v5260_v39, 2 }
 0xc43   : > { %v5267_v2 = vmax.f32 %v5265_v22, %v5266_v51 }
 0xc44   : > { %v5262_v32 = vmax.f32 %v5260_v39, %v5261_v55 }
 0xc45   : > { %v6084_v35 = vpop.permute.xlu0 %6083  ;;  %v5229_v4 = vpop.permute.xlu2 %5228  ;;  %v5268_v57 = vrot.slane %v5267_v2, 2 }
 0xc46   : > { %v10690_v40 = vmax.f32 %v10585_v26, %v6084_v35  ;;  %v5242_v20 = vmax.f32 %v10616_v0, %v5229_v4  ;;  %v5225_v30 = vpop.permute.xlu1 %5224  ;;  %v5290_v0 = vsel %vm4412_vm10, %v5238_v63, -inf  ;;  %v5263_v39 = vrot.slane %v5262_v32, 1 }
 0xc47   : > { %v5240_v26 = vmax.f32 %v10581_v15, %v5225_v30  ;;  %v5269_v37 = vmax.f32 %v5267_v2, %v5268_v57 }
 0xc48   : > { %6119 = vrot.lane.b32.xlu0 %v10690_v40, %s10910_s23  ;;  %v5300_v5 = vsel %vm3554_vm6, %v5242_v20, -inf  ;;  %v5330_v3 = vsel %vm5308_vm12, %v5242_v20, -inf  ;;  %v5365_v31 = vsel %vm5337_vm13, %v5242_v20, -inf }
 0xc49   : > { %v5301_v62 = vmax.f32 %v5299_v17, %v5300_v5  ;;  %v5331_v11 = vrot.slane %v5330_v3, 4  ;;  %v5357_v50 = vsel %vm3592_vm4, %v5240_v26, -inf  ;;  %v5270_v20 = vrot.slane %v5269_v37, 1 }
 0xc4b   : > { %v5302_v23 = vrot.slane %v5301_v62, 4  ;;  %v5332_v27 = vmax.f32 %v5330_v3, %v5331_v11 }
 0xc4d   : > { %v5223_v21 = vpop.permute.xlu0 %5222  ;;  %v5303_v24 = vmax.f32 %v5301_v62, %v5302_v23  ;;  %v5231_v7 = vpop.permute.xlu2 %5230  ;;  %v5333_v29 = vrot.slane %v5332_v27, 2  ;;  %v5347_v62 = vsel %vm5337_vm13, %v10598_v9, -inf  ;;  %v5264_v9 = vmax.f32 %v5262_v32, %v5263_v39 }
 0xc4e   : > { %v5239_v45 = vmax.f32 %v10593_v46, %v5223_v21  ;;  %v5243_v15 = vmax.f32 %v10632_v60, %v5231_v7 }
 0xc4f   : > { %v5304_v44 = vrot.slane %v5303_v24, 2  ;;  %v5334_v35 = vmax.f32 %v5332_v27, %v5333_v29 }
 0xc50   : > { %v5291_v58 = vsel %vm3554_vm6, %v5239_v45, -inf  ;;  %v5323_v33 = vsel %vm5308_vm12, %v5239_v45, -inf  ;;  %6111 = vrot.lane.b32.xlu0 %v10701_v61, %s10910_s23  ;;  %v5356_v46 = vsel %vm5337_vm13, %v5239_v45, -inf  ;;  %v5366_v59 = vsel %vm3592_vm4, %v5243_v15, -inf }
 0xc51   : > { %v5292_v49 = vmax.f32 %v5290_v0, %v5291_v58  ;;  %v5324_v16 = vrot.slane %v5323_v33, 4  ;;  %v5305_v47 = vmax.f32 %v5303_v24, %v5304_v44  ;;  %v5358_v38 = vmax.f32 %v5356_v46, %v5357_v50 }
 0xc52   : > { %v5367_v41 = vmax.f32 %v5365_v31, %v5366_v59  ;;  %v5335_v27 = vrot.slane %v5334_v35, 1  ;;  %v5271_v24 = vmax.f32 %v5269_v37, %v5270_v20 }
 0xc53   : > { %v5293_v60 = vrot.slane %v5292_v49, 4  ;;  %v5325_v28 = vmax.f32 %v5323_v33, %v5324_v16  ;;  %v5306_v36 = vrot.slane %v5305_v47, 1  ;;  %v5359_v63 = vrot.slane %v5358_v38, 4 }
 0xc54   : > { %v5368_v22 = vrot.slane %v5367_v41, 4  ;;  %v5336_v29 = vmax.f32 %v5334_v35, %v5335_v27 }
 0xc55   : > { %v5294_v51 = vmax.f32 %v5292_v49, %v5293_v60  ;;  %v5326_v4 = vrot.slane %v5325_v28, 2  ;;  %v5219_v10 = vpop.permute.xlu0 %5218  ;;  %v5360_v30 = vmax.f32 %v5358_v38, %v5359_v63  ;;  %v5307_v11 = vmax.f32 %v5305_v47, %v5306_v36 }
 0xc56   : > { %v5369_v17 = vmax.f32 %v5367_v41, %v5368_v22  ;;  %v5237_v5 = vmax.f32 %v10602_v34, %v5219_v10 }
 0xc57   : > { %v5295_v3 = vrot.slane %v5294_v51, 2  ;;  %v5327_v2 = vmax.f32 %v5325_v28, %v5326_v4  ;;  %v5361_v26 = vrot.slane %v5360_v30, 2  ;;  %v5377_v31 = vsel %vm3628_vm8, %v5271_v24, %v5307_v11 }
 0xc58   : > { %v5370_v23 = vrot.slane %v5369_v17, 2  ;;  %v5348_v0 = vsel %vm3592_vm4, %v5237_v5, -inf  ;;  %v5381_v46 = vsel %vm4489_vm11, %v5377_v31, %v5336_v29 }
 0xc59   : > { %v5296_v21 = vmax.f32 %v5294_v51, %v5295_v3  ;;  %v5349_v57 = vmax.f32 %v5347_v62, %v5348_v0  ;;  %v5328_v45 = vrot.slane %v5327_v2, 1  ;;  %v5362_v7 = vmax.f32 %v5360_v30, %v5361_v26 }
 0xc5a   : > { %v5371_v55 = vmax.f32 %v5369_v17, %v5370_v23 }
 0xc5b   : > { %v5297_v50 = vrot.slane %v5296_v21, 1  ;;  %v5350_v34 = vrot.slane %v5349_v57, 4  ;;  %v5363_v15 = vrot.slane %v5362_v7, 1  ;;  %v5329_v49 = vmax.f32 %v5327_v2, %v5328_v45 }
 0xc5c   : > { %v5372_v44 = vrot.slane %v5371_v55, 1 }
 0xc5d   : > { %v5298_v58 = vmax.f32 %v5296_v21, %v5297_v50  ;;  %v5351_v33 = vmax.f32 %v5349_v57, %v5350_v34  ;;  %v5364_v59 = vmax.f32 %v5362_v7, %v5363_v15 }
 0xc5e   : > { %v5373_v16 = vmax.f32 %v5371_v55, %v5372_v44 }
 0xc5f   : > { %v5376_v37 = vsel %vm3628_vm8, %v5264_v9, %v5298_v58  ;;  %v5352_v47 = vrot.slane %v5351_v33, 2 }
 0xc60   : > { %v5380_v38 = vsel %vm4489_vm11, %v5376_v37, %v5329_v49  ;;  %v10722_v41 = vsel %vm5382_vm14, %v5381_v46, %v5373_v16 }
 0xc61   : > { %v10725_v60 = vsel %vm5382_vm14, %v5380_v38, %v5364_v59  ;;  %v6200_v28 = vrot.slane %v10722_v41, 3  ;;  %v5353_v36 = vmax.f32 %v5351_v33, %v5352_v47 }
 0xc62   : > { %v6199_v63 = vrot.slane %v10725_v60, 3  ;;  %v6104_v20 = vpop.permute.xlu1 %6103 }
 0xc63   : > { %v6213_v22 = vsel %vm6209_vm15, %v10259_v52, %v6200_v28  ;;  %v5354_v32 = vrot.slane %v5353_v36, 1  ;;  %v6126_v30 = vmax.f32 %v10626_v56, %v6104_v20 }
 0xc64   : > { %v6212_v35 = vsel %vm6209_vm15, %v10225_v54, %v6199_v63  ;;  %6225 = vst.msk [vmem:[%s10510_s3 + $0x30] sm:$0xff] %vm3552_vm5, %v6213_v22  ;;  %v6106_v54 = vpop.permute.xlu2 %6105 }
 0xc65   : > { %6223 = vst.msk [vmem:[%s10510_s3 + $0x20] sm:$0xff] %vm3552_vm5, %v6212_v35  ;;  %v5355_v51 = vmax.f32 %v5353_v36, %v5354_v32  ;;  %v6127_v5 = vmax.f32 %v10637_v25, %v6106_v54  ;;  %v6138_v3 = vsel %vm3552_vm5, %v6126_v30, -inf }
 0xc67   : > { %v10743_v4 = vsel %vm5382_vm14, %v10641_v19, %v5355_v51  ;;  %v6140_v11 = vsel %vm3592_vm4, %v6127_v5, -inf }
 0xc68   : > { %v6198_v10 = vrot.slane %v10743_v4, 3 }
 0xc6a   : > { %v6211_v52 = vsel %vm6209_vm15, %v10163_v6, %v6198_v10 }
 0xc6b   : > { %6221 = vst.msk [vmem:[%s10510_s3 + $0x10] sm:$0xff] %vm3552_vm5, %v6211_v52 }
 0xc6c   : > { %v6108_v21 = vpop.permute.xlu2 %6107 }
 0xc6d   : > { %v6128_v38 = vmax.f32 %v10651_v8, %v6108_v21 }
 0xc72   : > { %v6102_v17 = vpop.permute.xlu0 %6101 }
 0xc73   : > { %v6125_v19 = vmax.f32 %v10646_v13, %v6102_v17 }
 0xc75   : > { %v6137_v2 = vsel %vm3552_vm5, %v6125_v19, -inf }
 0xc76   : > { %v6139_v62 = vmax.f32 %v6137_v2, %v6138_v3 }
 0xc78   : > { %v6141_v6 = vmax.f32 %v6139_v62, %v6140_v11 }
 0xc7a   : > { %v6142_v26 = vrot.slane %v6141_v6, 4  ;;  %v6116_v24 = vpop.permute.xlu2 %6115 }
 0xc7b   : > { %v6132_v7 = vmax.f32 %v10664_v48, %v6116_v24 }
 0xc7c   : > { %v6143_v23 = vmax.f32 %v6141_v6, %v6142_v26 }
 0xc7d   : > { %v6160_v31 = vsel %vm3552_vm5, %v6132_v7, -inf }
 0xc7e   : > { %v6144_v0 = vrot.slane %v6143_v23, 2 }
 0xc80   : > { %v6145_v39 = vmax.f32 %v6143_v23, %v6144_v0 }
 0xc82   : > { %v6146_v27 = vrot.slane %v6145_v39, 1 }
 0xc84   : > { %v6147_v56 = vmax.f32 %v6145_v39, %v6146_v27 }
 0xc86   : > { %v6214_v25 = vsel %vm3628_vm8, %v6197_v12, %v6147_v56 }
 0xc87   : > { %6220 = vst.msk [vmem:[%s10510_s3 + $0x8] sm:$0x3] %vm6219_vm0, %v6214_v25 }
 0xc8a   : > { %v6114_v13 = vpop.permute.xlu1 %6113 }
 0xc8b   : > { %v6131_v45 = vmax.f32 %v10656_v43, %v6114_v13 }
 0xc8d   : > { %v6159_v55 = vsel %vm3552_vm5, %v6131_v45, -inf }
 0xc8e   : > { %v6161_v15 = vmax.f32 %v6159_v55, %v6160_v31 }
 0xc92   : > { %v6110_v50 = vpop.permute.xlu0 %6109 }
 0xc93   : > { %v6129_v46 = vmax.f32 %v10661_v18, %v6110_v50  ;;  %v6148_v18 = vsel %vm3552_vm5, %v6128_v38, -inf }
 0xc9a   : > { %v6124_v9 = vpop.permute.xlu2 %6123 }
 0xc9b   : > { %v6136_v48 = vmax.f32 %v10680_v53, %v6124_v9  ;;  %v6149_v53 = vsel %vm3552_vm5, %v6129_v46, -inf }
 0xc9c   : > { %v6150_v52 = vmax.f32 %v6148_v18, %v6149_v53 }
 0xcaa   : > { %v6122_v57 = vpop.permute.xlu1 %6121 }
 0xcab   : > { %v6135_v58 = vmax.f32 %v10671_v1, %v6122_v57  ;;  %v6173_v1 = vsel %vm3592_vm4, %v6136_v48, -inf }
 0xcad   : > { %v6171_v59 = vsel %vm3552_vm5, %v6135_v58, -inf }
 0xcb2   : > { %v6118_v34 = vpop.permute.xlu1 %6117 }
 0xcb3   : > { %v6133_v14 = vmax.f32 %v10676_v42, %v6118_v34 }
 0xcb5   : > { %v6162_v12 = vsel %vm3592_vm4, %v6133_v14, -inf }
 0xcb6   : > { %v6163_v44 = vmax.f32 %v6161_v15, %v6162_v12 }
 0xcb8   : > { %v6164_v29 = vrot.slane %v6163_v44, 4 }
 0xcba   : > { %v6165_v33 = vmax.f32 %v6163_v44, %v6164_v29  ;;  %v6120_v43 = vpop.permute.xlu0 %6119 }
 0xcbb   : > { %v6134_v49 = vmax.f32 %v10690_v40, %v6120_v43 }
 0xcbc   : > { %v6166_v16 = vrot.slane %v6165_v33, 2 }
 0xcbd   : > { %v6170_v42 = vsel %vm3552_vm5, %v6134_v49, -inf }
 0xcbe   : > { %v6167_v37 = vmax.f32 %v6165_v33, %v6166_v16  ;;  %v6172_v47 = vmax.f32 %v6170_v42, %v6171_v59 }
 0xcc0   : > { %v6168_v36 = vrot.slane %v6167_v37, 1  ;;  %v6174_v22 = vmax.f32 %v6172_v47, %v6173_v1 }
 0xcc2   : > { %v6169_v32 = vmax.f32 %v6167_v37, %v6168_v36  ;;  %v6175_v40 = vrot.slane %v6174_v22, 4  ;;  %v6112_v35 = vpop.permute.xlu0 %6111 }
 0xcc3   : > { %v6130_v51 = vmax.f32 %v10701_v61, %v6112_v35 }
 0xcc4   : > { %v6216_v20 = vsel %vm3628_vm8, %v6199_v63, %v6169_v32  ;;  %v6176_v8 = vmax.f32 %v6174_v22, %v6175_v40 }
 0xcc5   : > { %6224 = vst.msk [vmem:[%s10510_s3 + $0x28] sm:$0x3] %vm6219_vm0, %v6216_v20  ;;  %v6151_v54 = vsel %vm3592_vm4, %v6130_v51, -inf }
 0xcc6   : > { %v6177_v30 = vrot.slane %v6176_v8, 2  ;;  %v6152_v17 = vmax.f32 %v6150_v52, %v6151_v54 }
 0xcc8   : > { %v6178_v5 = vmax.f32 %v6176_v8, %v6177_v30  ;;  %v6153_v19 = vrot.slane %v6152_v17, 4 }
 0xcca   : > { %v6179_v3 = vrot.slane %v6178_v5, 1  ;;  %v6154_v2 = vmax.f32 %v6152_v17, %v6153_v19 }
 0xccc   : > { %v6180_v62 = vmax.f32 %v6178_v5, %v6179_v3  ;;  %v6155_v61 = vrot.slane %v6154_v2, 2 }
 0xcce   : > { %v6217_v60 = vsel %vm3628_vm8, %v6200_v28, %v6180_v62  ;;  %v6156_v11 = vmax.f32 %v6154_v2, %v6155_v61 }
 0xccf   : > { %6226 = vst.msk [vmem:[%s10510_s3 + $0x38] sm:$0x3] %vm6219_vm0, %v6217_v60 }
 0xcd0   : > { %v6157_v63 = vrot.slane %v6156_v11, 1 }
 0xcd2   : > { %v6158_v6 = vmax.f32 %v6156_v11, %v6157_v63 }
 0xcd4   : > { %v6215_v26 = vsel %vm3628_vm8, %v6198_v10, %v6158_v6 }
 0xcd5   : > { %6222 = vst.msk [vmem:[%s10510_s3 + $0x18] sm:$0x3] %vm6219_vm0, %v6215_v26 }
 0xcd6 PF: > { %s73_s22 = sadd.s32 1, %s7625_s22  }
 0xcd7   : > { %p70_p4 = scmp.ge.s32.totalorder %s73_s22, 4  }
 0xcd9   :  { %72 = sbr.rel (!%p70_p4) target bundleno = 51 (0x33), region = 219 }

</bundles_post_ra>
